<compile_context>
chip_gen: v7x
topology: tpu7x:2x2x1
jax: 0.10.0
libtpu: 0.0.40
codegen_flags: <defaults>
</compile_context>

<pallas_src>
import jax
import jax.numpy as jnp
from jax import lax
from jax.experimental import pallas as pl
from jax.experimental.pallas import tpu as pltpu

IN_FEATURES = 3 * 224 * 224   # 150528
HIDDEN = 128
OUT_FEATURES = 10

TK = 37632                            # 150528 = 4 * 37632 (one contiguous ~9 MiB bf16 slab)
KSTEPS_TOTAL = IN_FEATURES // TK      # 4 grid steps total
assert KSTEPS_TOTAL * TK == IN_FEATURES

VMEM_LIMIT = 32 * 1024 * 1024         # <= physical VMEM on every generation (v7x: 64 MiB)


def prepare_weights(w1):
    """One-time weight prep: transpose W1 to K-major [IN_FEATURES, HIDDEN], cast to bf16."""
    return jnp.asarray(w1).T.astype(jnp.bfloat16)


def _num_k_slices():
    """2-way K split only on dual-TensorCore chips (v7x); 1 elsewhere / on failure."""
    try:
        kind = jax.devices()[0].device_kind.lower()
    except Exception:
        return 1
    return 2 if ("v7" in kind or "7x" in kind) else 1


# ---------------------------------------------------------------------------
# Single-TC path (v5e / v6e): fc1 + bias + relu + fc2 fully fused, one call.
# ---------------------------------------------------------------------------
def _fused_kernel(x_ref, w1_ref, b1_ref, w2_ref, b2_ref, out_ref, acc_ref):
    k = pl.program_id(0)

    @pl.when(k == 0)
    def _():
        acc_ref[...] = jnp.zeros_like(acc_ref)

    # fc1 partial: x tile (B, TK) f32 -> bf16 on the VPU; W1^T tile (TK, 128)
    # bf16, contiguous, K-major; f32 accumulation on the MXU.
    acc_ref[...] += jnp.dot(
        x_ref[...].astype(jnp.bfloat16),
        w1_ref[...],
        preferred_element_type=jnp.float32,
    )

    # Fused epilogue on the final K step: +b1, relu, fc2 (h @ W2^T), +b2.
    @pl.when(k == pl.num_programs(0) - 1)
    def _():
        h = jnp.maximum(acc_ref[...] + b1_ref[...], 0.0)
        logits = lax.dot_general(
            h, w2_ref[...],                                   # (B,128) @ (10,128)^T
            dimension_numbers=(((1,), (1,)), ((), ())),
            preferred_element_type=jnp.float32,
        ) + b2_ref[...]
        out_ref[...] = logits


def _forward_fused(x_flat, w1t_bf16, b1, w2, b2):
    B = x_flat.shape[0]
    cost = pl.CostEstimate(
        flops=2 * B * IN_FEATURES * HIDDEN + 2 * B * HIDDEN * OUT_FEATURES,
        transcendentals=0,
        bytes_accessed=(IN_FEATURES * HIDDEN * 2        # bf16 W1 stream
                        + B * IN_FEATURES * 4           # f32 x stream
                        + B * OUT_FEATURES * 4),        # f32 logits
    )
    return pl.pallas_call(
        _fused_kernel,
        out_shape=jax.ShapeDtypeStruct((B, OUT_FEATURES), jnp.float32),
        grid_spec=pltpu.PrefetchScalarGridSpec(
            num_scalar_prefetch=0,
            grid=(KSTEPS_TOTAL,),
            in_specs=[
                pl.BlockSpec((B, TK), lambda k: (0, k)),                # x tile
                pl.BlockSpec((TK, HIDDEN), lambda k: (k, 0)),           # W1^T tile
                pl.BlockSpec((1, HIDDEN), lambda k: (0, 0)),            # b1 (resident)
                pl.BlockSpec((OUT_FEATURES, HIDDEN), lambda k: (0, 0)), # W2 (torch layout)
                pl.BlockSpec((1, OUT_FEATURES), lambda k: (0, 0)),      # b2 (resident)
            ],
            out_specs=pl.BlockSpec((B, OUT_FEATURES), lambda k: (0, 0)),
            scratch_shapes=[pltpu.VMEM((B, HIDDEN), jnp.float32)],      # fc1 accumulator
        ),
        compiler_params=pltpu.CompilerParams(
            dimension_semantics=("arbitrary",),
            vmem_limit_bytes=VMEM_LIMIT,
        ),
        cost_estimate=cost,
    )(x_flat, w1t_bf16, b1.reshape(1, HIDDEN), w2, b2.reshape(1, OUT_FEATURES))


# ---------------------------------------------------------------------------
# Dual-TC path (v7x): K reduction split across a CORE_PARALLEL axis of 2,
# per-slice (B, 128) f32 partials; tiny combine + epilogue in plain JAX.
# ---------------------------------------------------------------------------
def _fc1_partial_kernel(x_ref, w1_ref, out_ref):
    k = pl.program_id(1)

    @pl.when(k == 0)
    def _():
        out_ref[...] = jnp.zeros_like(out_ref)

    out_ref[...] += jnp.dot(
        x_ref[...].astype(jnp.bfloat16),
        w1_ref[...],
        preferred_element_type=jnp.float32,
    )


def _forward_two_slice(x_flat, w1t_bf16, b1, w2, b2, num_slices):
    B = x_flat.shape[0]
    ksteps = KSTEPS_TOTAL // num_slices
    cost = pl.CostEstimate(
        flops=2 * B * IN_FEATURES * HIDDEN,
        transcendentals=0,
        bytes_accessed=(IN_FEATURES * HIDDEN * 2
                        + B * IN_FEATURES * 4
                        + num_slices * B * HIDDEN * 4),
    )
    partials = pl.pallas_call(
        _fc1_partial_kernel,
        out_shape=jax.ShapeDtypeStruct((num_slices, B, HIDDEN), jnp.float32),
        grid_spec=pltpu.PrefetchScalarGridSpec(
            num_scalar_prefetch=0,
            grid=(num_slices, ksteps),
            in_specs=[
                pl.BlockSpec((B, TK), lambda c, k: (0, c * ksteps + k)),
                pl.BlockSpec((TK, HIDDEN), lambda c, k: (c * ksteps + k, 0)),
            ],
            out_specs=pl.BlockSpec((None, B, HIDDEN), lambda c, k: (c, 0, 0)),
        ),
        compiler_params=pltpu.CompilerParams(
            dimension_semantics=(pltpu.CORE_PARALLEL, pltpu.ARBITRARY),
            vmem_limit_bytes=VMEM_LIMIT,
        ),
        cost_estimate=cost,
    )(x_flat, w1t_bf16)

    h = jnp.maximum(partials.sum(axis=0) + b1[None, :], 0.0)
    return jnp.dot(h, w2.T, preferred_element_type=jnp.float32) + b2[None, :]


def simple_nn_forward(x, w1t_bf16, b1, w2, b2, *, num_k_slices=None):
    """x: [B, 3, 224, 224] f32.  w1t_bf16: [150528, 128] bf16 (pre-transposed).
    b1: [128] f32, w2: [10, 128] f32 (torch layout), b2: [10] f32."""
    B = x.shape[0]
    x_flat = x.reshape(B, -1)            # nn.Flatten on NCHW (row-major C,H,W)
    if num_k_slices is None:
        num_k_slices = _num_k_slices()
    if num_k_slices <= 1:
        return _forward_fused(x_flat, w1t_bf16, b1, w2, b2)
    return _forward_two_slice(x_flat, w1t_bf16, b1, w2, b2, num_k_slices)


# ---------------------------------------------------------------------------
# References
# ---------------------------------------------------------------------------
def reference_forward_f32(x, w1, b1, w2, b2):
    x_flat = x.reshape(x.shape[0], -1)
    h = jnp.maximum(x_flat @ w1.T + b1, 0.0)
    return h @ w2.T + b2


def reference_forward_bf16(x, w1t_bf16, b1, w2, b2):
    """Same bf16-input / f32-accumulate semantics as the kernel path."""
    x_flat = x.reshape(x.shape[0], -1).astype(jnp.bfloat16)
    h = jnp.dot(x_flat, w1t_bf16, preferred_element_type=jnp.float32) + b1
    h = jnp.maximum(h, 0.0)
    return jnp.dot(h, w2.T, preferred_element_type=jnp.float32) + b2


if __name__ == "__main__":
    key = jax.random.PRNGKey(0)
    kx, kw1, kb1, kw2, kb2 = jax.random.split(key, 5)

    B = 2
    x = jax.random.normal(kx, (B, 3, 224, 224), dtype=jnp.float32)

    # Deterministic parameter init (shapes match nn.Linear: [out, in]).
    bound1 = 1.0 / (IN_FEATURES ** 0.5)
    w1 = jax.random.uniform(kw1, (HIDDEN, IN_FEATURES), jnp.float32,
                            minval=-bound1, maxval=bound1)
    b1 = jax.random.uniform(kb1, (HIDDEN,), jnp.float32,
                            minval=-bound1, maxval=bound1)
    bound2 = 1.0 / (HIDDEN ** 0.5)
    w2 = jax.random.uniform(kw2, (OUT_FEATURES, HIDDEN), jnp.float32,
                            minval=-bound2, maxval=bound2)
    b2 = jax.random.uniform(kb2, (OUT_FEATURES,), jnp.float32,
                            minval=-bound2, maxval=bound2)

    # One-time weight prep (done at model-load time in real use).
    w1t_bf16 = prepare_weights(w1)

    out = jax.block_until_ready(simple_nn_forward(x, w1t_bf16, b1, w2, b2))
    assert out.shape == (B, OUT_FEATURES)

    # Primary check: same bf16-input semantics as the kernel.
    ref_bf16 = reference_forward_bf16(x, w1t_bf16, b1, w2, b2)
    assert jnp.allclose(out, ref_bf16, atol=2e-2, rtol=2e-2), \
        "mismatch vs bf16 reference"

    # Sanity check vs pure-f32 torch semantics (loose: bf16 weight rounding).
    ref_f32 = reference_forward_f32(x, w1, b1, w2, b2)
    assert jnp.allclose(out, ref_f32, atol=5e-2, rtol=5e-2), \
        "mismatch vs f32 reference"

    print("KERNEL_OK")
</pallas_src>

<mosaic_0001>
module attributes {stable_mosaic.version = 11 : i64} {
  func.func @_fused_kernel(%arg0: i32, %arg1: memref<2x37632xf32, #tpu.memory_space<vmem>>, %arg2: memref<37632x128xbf16, #tpu.memory_space<vmem>>, %arg3: memref<1x128xf32, #tpu.memory_space<vmem>>, %arg4: memref<10x128xf32, #tpu.memory_space<vmem>>, %arg5: memref<1x10xf32, #tpu.memory_space<vmem>>, %arg6: memref<2x10xf32, #tpu.memory_space<vmem>>, %arg7: memref<2x128xf32, #tpu.memory_space<vmem>>) attributes {dimension_semantics = [#tpu.dimension_semantics<arbitrary>], iteration_bounds = array<i64: 4>, scalar_prefetch = 0 : i64, scratch_operands = 1 : i64, tpu.core_type = #tpu.core_type<tc>, window_params = [{transform_indices = @transform_0, window_bounds = array<i64: 2, 37632>}, {transform_indices = @transform_1, window_bounds = array<i64: 37632, 128>}, {pipeline_mode = #tpu.pipeline_mode<synchronous>, transform_indices = @transform_2, window_bounds = array<i64: 1, 128>}, {pipeline_mode = #tpu.pipeline_mode<synchronous>, transform_indices = @transform_3, window_bounds = array<i64: 10, 128>}, {pipeline_mode = #tpu.pipeline_mode<synchronous>, transform_indices = @transform_4, window_bounds = array<i64: 1, 10>}, {pipeline_mode = #tpu.pipeline_mode<synchronous>, transform_indices = @transform_5, window_bounds = array<i64: 2, 10>}]} {
    %c0_i32 = arith.constant 0 : i32
    %0 = arith.cmpi eq, %arg0, %c0_i32 : i32
    %1 = arith.extui %0 : i1 to i32
    %c0_i32_0 = arith.constant 0 : i32
    %2 = arith.cmpi ne, %1, %c0_i32_0 : i32
    scf.if %2 {
      %cst_9 = arith.constant 0.000000e+00 : f32
      %13 = vector.broadcast %cst_9 : f32 to vector<2x128xf32>
      %c0_10 = arith.constant 0 : index
      %c0_11 = arith.constant 0 : index
      %14 = vector.load %arg7[%c0_10, %c0_11] : memref<2x128xf32, #tpu.memory_space<vmem>>, vector<2x128xf32>
      tpu.vector_store %arg7[%c0_10, %c0_11], %13 {strides = array<i32>} : memref<2x128xf32, #tpu.memory_space<vmem>>, vector<2x128xf32>,
    } else {
    }
    %c0 = arith.constant 0 : index
    %c0_1 = arith.constant 0 : index
    %3 = vector.load %arg7[%c0, %c0_1] : memref<2x128xf32, #tpu.memory_space<vmem>>, vector<2x128xf32>
    %c0_2 = arith.constant 0 : index
    %c0_3 = arith.constant 0 : index
    %4 = vector.load %arg1[%c0_2, %c0_3] : memref<2x37632xf32, #tpu.memory_space<vmem>>, vector<2x37632xf32>
    %5 = arith.truncf %4 : vector<2x37632xf32> to vector<2x37632xbf16>
    %c0_4 = arith.constant 0 : index
    %c0_5 = arith.constant 0 : index
    %6 = vector.load %arg2[%c0_4, %c0_5] : memref<37632x128xbf16, #tpu.memory_space<vmem>>, vector<37632x128xbf16>
    %cst = arith.constant dense<0.000000e+00> : vector<2x128xf32>
    %7 = tpu.matmul %5, %6, %cst {dimension_numbers = #tpu.dot_dimension_numbers<[1], [0], [0], [1], [0, 0, 1, 1], [], []>} : vector<2x37632xbf16>, vector<37632x128xbf16>, vector<2x128xf32> -> vector<2x128xf32>
    %8 = arith.addf %3, %7 : vector<2x128xf32>
    %c0_6 = arith.constant 0 : index
    %c0_7 = arith.constant 0 : index
    %9 = vector.load %arg7[%c0_6, %c0_7] : memref<2x128xf32, #tpu.memory_space<vmem>>, vector<2x128xf32>
    tpu.vector_store %arg7[%c0_6, %c0_7], %8 {strides = array<i32>} : memref<2x128xf32, #tpu.memory_space<vmem>>, vector<2x128xf32>,
    %c3_i32 = arith.constant 3 : i32
    %10 = arith.cmpi eq, %arg0, %c3_i32 : i32
    %11 = arith.extui %10 : i1 to i32
    %c0_i32_8 = arith.constant 0 : i32
    %12 = arith.cmpi ne, %11, %c0_i32_8 : i32
    scf.if %12 {
      %c0_9 = arith.constant 0 : index
      %c0_10 = arith.constant 0 : index
      %13 = vector.load %arg7[%c0_9, %c0_10] : memref<2x128xf32, #tpu.memory_space<vmem>>, vector<2x128xf32>
      %c0_11 = arith.constant 0 : index
      %c0_12 = arith.constant 0 : index
      %14 = vector.load %arg3[%c0_11, %c0_12] : memref<1x128xf32, #tpu.memory_space<vmem>>, vector<1x128xf32>
      %15 = vector.broadcast %14 : vector<1x128xf32> to vector<2x128xf32>
      %16 = arith.addf %13, %15 : vector<2x128xf32>
      %cst_13 = arith.constant 0.000000e+00 : f32
      %17 = vector.broadcast %cst_13 : f32 to vector<2x128xf32>
      %18 = arith.maximumf %16, %17 : vector<2x128xf32>
      %c0_14 = arith.constant 0 : index
      %c0_15 = arith.constant 0 : index
      %19 = vector.load %arg4[%c0_14, %c0_15] : memref<10x128xf32, #tpu.memory_space<vmem>>, vector<10x128xf32>
      %cst_16 = arith.constant dense<0.000000e+00> : vector<2x10xf32>
      %20 = tpu.matmul %18, %19, %cst_16 {dimension_numbers = #tpu.dot_dimension_numbers<[1], [1], [0], [0], [0, 0, 1, 0], [], []>} : vector<2x128xf32>, vector<10x128xf32>, vector<2x10xf32> -> vector<2x10xf32>
      %c0_17 = arith.constant 0 : index
      %c0_18 = arith.constant 0 : index
      %21 = vector.load %arg5[%c0_17, %c0_18] : memref<1x10xf32, #tpu.memory_space<vmem>>, vector<1x10xf32>
      %22 = vector.broadcast %21 : vector<1x10xf32> to vector<2x10xf32>
      %23 = arith.addf %20, %22 : vector<2x10xf32>
      %c0_19 = arith.constant 0 : index
      %c0_20 = arith.constant 0 : index
      %24 = vector.load %arg6[%c0_19, %c0_20] : memref<2x10xf32, #tpu.memory_space<vmem>>, vector<2x10xf32>
      tpu.vector_store %arg6[%c0_19, %c0_20], %23 {strides = array<i32>} : memref<2x10xf32, #tpu.memory_space<vmem>>, vector<2x10xf32>,
    } else {
    }
    return
  }
  func.func @transform_0(%arg0: i32) -> (i32, i32) {
    %c0_i32 = arith.constant 0 : i32
    %c0_i32_0 = arith.constant 0 : i32
    return %c0_i32, %arg0 : i32, i32
  }
  func.func @transform_1(%arg0: i32) -> (i32, i32) {
    %c0_i32 = arith.constant 0 : i32
    %c0_i32_0 = arith.constant 0 : i32
    return %arg0, %c0_i32 : i32, i32
  }
  func.func @transform_2(%arg0: i32) -> (i32, i32) {
    %c0_i32 = arith.constant 0 : i32
    %c0_i32_0 = arith.constant 0 : i32
    %c0_i32_1 = arith.constant 0 : i32
    return %c0_i32, %c0_i32_0 : i32, i32
  }
  func.func @transform_3(%arg0: i32) -> (i32, i32) {
    %c0_i32 = arith.constant 0 : i32
    %c0_i32_0 = arith.constant 0 : i32
    %c0_i32_1 = arith.constant 0 : i32
    return %c0_i32, %c0_i32_0 : i32, i32
  }
  func.func @transform_4(%arg0: i32) -> (i32, i32) {
    %c0_i32 = arith.constant 0 : i32
    %c0_i32_0 = arith.constant 0 : i32
    %c0_i32_1 = arith.constant 0 : i32
    return %c0_i32, %c0_i32_0 : i32, i32
  }
  func.func @transform_5(%arg0: i32) -> (i32, i32) {
    %c0_i32 = arith.constant 0 : i32
    %c0_i32_0 = arith.constant 0 : i32
    %c0_i32_1 = arith.constant 0 : i32
    return %c0_i32, %c0_i32_0 : i32, i32
  }
}

</mosaic_0001>

<bundles_post_ra>
// kernel: tpu_custom_call.1
= control target key start
LH: loop header
LB: loop body
LE: loop exit
PB: predicated region body
PF: predicated region fallthrough
CT: control target
= control target key end

     0   :  { %10 = vsyncpa [#allocation4], 0  ;;  %s38654_s0 = inlined_call_operand.hbm [shape: f32[2,150528], index: 0, kind: input, shape index: {}]   ;;  %s38655_s1 = inlined_call_operand.hbm [shape: bf16[150528,128], index: 1, kind: input, shape index: {}]   ;;  %s38656_s2 = inlined_call_operand.hbm [shape: f32[1,128], index: 2, kind: input, shape index: {}]   ;;  %s38657_s3 = inlined_call_operand.hbm [shape: f32[10,128], index: 3, kind: input, shape index: {}]   ;;  %s38658_s4 = inlined_call_operand.hbm [shape: f32[1,10], index: 4, kind: input, shape index: {}]   ;;  %s38659_s5 = inlined_call_operand.hbm [shape: f32[2,10], index: 5, kind: output, shape index: {}]  }
   0x1   :  { %12 = vsyncpa [#allocation4 + $0x1], 0 }
   0x2   :  { %13 = vsyncpa [#allocation7], 0 }
   0x3   :  { %15 = vsyncpa [#allocation7 + $0x1], 0 }
   0x4   :  { %16 = vsyncpa [#allocation10], 0 }
   0x5   :  { %17 = vsyncpa [#allocation5], 0  ;;  %s35612_s18 = smov 0   ;;  %s35614_s19 = smov 0  }
   0x6   :  { %s35616_s20 = smov 0   ;;  %s35618_s21 = smov 0  }
   0x7 LB: > { %s35631_s22 = sadd.s32 4294967295, %s35565_s21   ;;  %p43_p0 = scmp.ne.s32.totalorder %s35557_s19, %s35553_s18  ;;  %s35565_s21 = sphi %s35618_s21, %s38678_s21   ;;  %s35561_s20 = sphi %s35616_s20, %s38677_s20   ;;  %s35557_s19 = sphi %s35614_s19, %s38676_s19   ;;  %s35553_s18 = sphi %s35612_s18, %s38675_s18  }
   0x8   : > { %p38660_p1 = scmp.eq.s32.totalorder %s35631_s22, 0  ;;  %p27204_p2 = scmp.ge.s32.totalorder %s35565_s21, 1 }
   0x9   : > { %p164_p3 = scmp.lt.s32.totalorder %s35565_s21, 5  ;;  %s35567_s25 = smov [#allocation8]  }
   0xa   : > { %p35640_p5 = por %p38660_p1, %p43_p0  ;;  %s177_s26 = sshll.u32 %s35567_s25, 4  ;;  %s178_s26 = int_to_ptr.vmem [resolvable:$true] %s177_s26 }
   0xb   : > { %p35644_p6 = pnand %p27204_p2, %p164_p3  ;;  %s35568_s27 = smov [#allocation9]  }
   0xc   : > { %s38663_s23 = scalar_select %p35640_p5, 1, 0 }
   0xd   : > { %s38664_s24 = scalar_select %p35644_p6, 1, 0 }
   0xe   : > { %p32849_p7 = pneg %p35644_p6  ;;  %s187_s28 = sshll.u32 %s35568_s27, 4  ;;  %s35656_s28 = int_to_ptr.vmem [resolvable:$true] %s187_s28 }
   0xf   : > { %s35569_s30 = smov [#allocation11]   ;;  %s35345_s9 = scalar_lea.hbm %s38656_s2, 16 }
  0x10   : > { %p35652_p8 = pnand %p32849_p7, %p38660_p1  ;;  %s35658_s6 = sshll.u32 %s35569_s30, 4  ;;  %s202_s6 = int_to_ptr.vmem [resolvable:$true] %s35658_s6 }
  0x11   : > { %p35346_p9 = scmp.ne.s32.totalorder %s38656_s2, %s35345_s9  ;;  %p35352_p13 = scmp.lt.u32.totalorder %s35345_s9, %s38656_s2 }
  0x12   : > { %p35668_p10 = pneg %p35652_p8 }
  0x14   : > { %p35348_p11 = pnand %p35668_p10, %p35346_p9 }
  0x16   : > { %p35349_p12 = pneg %p35348_p11 }
  0x18   : > { %p35354_p0 = pnand %p35352_p13, %p35349_p12 }
  0x1a   : > { %35357 = shalt.err (!%p35354_p0)
}
  0x1b   : > { %s35358_s15 = scalar_lea.vmem %s178_s26, 16  ;;  %s35365_s16 = scalar_lea.vmem %s178_s26, 32 }
  0x1c   : > { %p35359_p2 = scmp.ne.s32.totalorder %s178_s26, %s35358_s15  ;;  %p35366_p4 = scmp.lt.s32.totalorder %s178_s26, %s178_s26 }
  0x1d   : > { %p35367_p1 = scmp.lt.s32.totalorder %s35365_s16, %s35358_s15 }
  0x1e   : > { %p35361_p3 = pnand %p35359_p2, %p35668_p10 }
  0x1f   : > { %p35368_p5 = por %p35367_p1, %p35366_p4 }
  0x20   : > { %p35362_p7 = pneg %p35361_p3 }
  0x22   : > { %p35369_p6 = pnand %p35368_p5, %p35362_p7 }
  0x24   : > { %35372 = shalt.err (!%p35369_p6)
}
  0x25   : > { %32852 = dma.hbm_to_vmem [thread:$0]  (!%p35652_p8), %s38656_s2, 16, %s178_s26, [#allocation7]  }
  0x26   : > { %s35373_s30 = scalar_lea.hbm %s38657_s3, 256 }
  0x27   : > { %p35374_p9 = scmp.ne.s32.totalorder %s38657_s3, %s35373_s30  ;;  %p35380_p4 = scmp.lt.u32.totalorder %s35373_s30, %s38657_s3 }
  0x29   : > { %p35376_p11 = pnand %p35374_p9, %p35668_p10 }
  0x2b   : > { %p35377_p1 = pneg %p35376_p11 }
  0x2d   : > { %p35382_p5 = pnand %p35380_p4, %p35377_p1 }
  0x2f   : > { %35385 = shalt.err (!%p35382_p5)
}
  0x30   : > { %s35386_s26 = scalar_lea.vmem %s35656_s28, 256  ;;  %p35394_p0 = scmp.lt.s32.totalorder %s35656_s28, %s35656_s28 }
  0x31   : > { %p35387_p6 = scmp.ne.s32.totalorder %s35656_s28, %s35386_s26  ;;  %p35395_p2 = scmp.lt.s32.totalorder %s35386_s26, %s35386_s26 }
  0x33   : > { %p35389_p12 = pnand %p35387_p6, %p35668_p10  ;;  %p35396_p3 = por %p35395_p2, %p35394_p0 }
  0x35   : > { %p35390_p13 = pneg %p35389_p12 }
  0x37   : > { %p35397_p7 = pnand %p35396_p3, %p35390_p13 }
  0x39   : > { %35400 = shalt.err (!%p35397_p7)
}
  0x3a   : > { %s35570_s11 = smov 128   ;;  %s35571_s13 = smov 8  }
  0x3b   : > { %32855 = dma.hbm_to_vmem [thread:$0]  (!%p35652_p8), %s38657_s3, 256, %s35656_s28, [#allocation10], %s35570_s11, %s35570_s11, %s35571_s13  }
  0x3c   : > { %s35401_s18 = scalar_lea.hbm %s38658_s4, 16 }
  0x3d   : > { %p35402_p9 = scmp.ne.s32.totalorder %s38658_s4, %s35401_s18  ;;  %p35408_p4 = scmp.lt.u32.totalorder %s35401_s18, %s38658_s4 }
  0x3f   : > { %p35404_p11 = pnand %p35402_p9, %p35668_p10 }
  0x41   : > { %p35405_p1 = pneg %p35404_p11 }
  0x43   : > { %p35410_p5 = pnand %p35408_p4, %p35405_p1 }
  0x45   : > { %35413 = shalt.err (!%p35410_p5)
}
  0x46   : > { %s35414_s8 = scalar_lea.vmem %s202_s6, 16  ;;  %s35421_s28 = scalar_lea.vmem %s202_s6, 32 }
  0x47   : > { %p35415_p6 = scmp.ne.s32.totalorder %s202_s6, %s35414_s8  ;;  %p35422_p0 = scmp.lt.s32.totalorder %s202_s6, %s202_s6 }
  0x48   : > { %p35423_p2 = scmp.lt.s32.totalorder %s35421_s28, %s35414_s8 }
  0x49   : > { %p35417_p12 = pnand %p35415_p6, %p35668_p10 }
  0x4a   : > { %p35424_p3 = por %p35423_p2, %p35422_p0 }
  0x4b   : > { %p35418_p13 = pneg %p35417_p12 }
  0x4d   : > { %p35425_p7 = pnand %p35424_p3, %p35418_p13 }
  0x4f   : > { %35428 = shalt.err (!%p35425_p7)
}
  0x50   : > { %32858 = dma.hbm_to_vmem [thread:$0]  (!%p35652_p8), %s38658_s4, 16, %s202_s6, [#allocation10]  }
  0x51   : > { %s35727_s12 = sadd.s32 1, %s35565_s21   ;;  %s30_s11 = sadd.s32 1, %s35561_s20 }
  0x52   : > { %s27_s26 = ssub.s32 %s35565_s21, %s35727_s12  ;;  %p37_p9 = scmp.ne.s32.totalorder %s35561_s20, %s35557_s19 }
  0x53   : > { %p28_p10 = scmp.eq.s32.totalorder %s27_s26, 0  ;;  %p38_p11 = scmp.eq.s32.totalorder %s35565_s21, 0 }
  0x54   : > { %p32869_p1 = scmp.lt.s32.totalorder %s35565_s21, 4  ;;  %s35740_s13 = sand.u32 1, %s35561_s20  }
  0x55   : > { %s35737_s29 = scalar_select %p28_p10, %s35561_s20, %s30_s11  }
  0x56   : > { %p39_p4 = por %p38_p11, %p37_p9  ;;  %s32825_s14 = smul.u32 588, %s35740_s13 }
  0x57   : > { %s29576_s15 = smul.u32 9408, %s35565_s21  ;;  %s213_s7 = scalar_lea.sflag [#allocation4], %s35740_s13 }
  0x58   : > { %p35744_p8 = pnand %p32869_p1, %p39_p4  ;;  %s32826_s16 = smul.u32 18816, %s35740_s13 }
  0x59   : > { %s35752_s25 = scalar_lea.hbm %s38654_s0, %s29576_s15  ;;  %s216_s27 = scalar_lea.vmem [#allocation3], %s32825_s14 }
  0x5a   : > { %s224_s30 = sshll.u32 %s216_s27, 4  ;;  %s35429_s8 = scalar_lea.hbm %s35752_s25, 9408  ;;  %s35754_s30 = int_to_ptr.vmem [resolvable:$true] %s224_s30 }
  0x5b   : > { %p35430_p5 = scmp.ne.s32.totalorder %s35752_s25, %s35429_s8  ;;  %p35431_p6 = pneg %p35744_p8 }
  0x5c   : > { %s35434_s10 = scalar_lea.hbm %s38654_s0, 37632  ;;  %p35435_p0 = scmp.lt.u32.totalorder %s35752_s25, %s38654_s0 }
  0x5d   : > { %p35432_p12 = pnand %p35431_p6, %p35430_p5  ;;  %p35436_p2 = scmp.lt.u32.totalorder %s35434_s10, %s35429_s8 }
  0x5e   : > { %p35438_p7 = scmp.lt.u32.totalorder %s35429_s8, %s35752_s25 }
  0x5f   : > { %p35433_p13 = pneg %p35432_p12  ;;  %p35437_p3 = por %p35436_p2, %p35435_p0 }
  0x61   : > { %p35439_p10 = por %p35438_p7, %p35437_p3 }
  0x63   : > { %p35440_p9 = pnand %p35439_p10, %p35433_p13 }
  0x65   : > { %35443 = shalt.err (!%p35440_p9)
}
  0x66   : > { %s35444_s14 = scalar_lea.vmem %s35754_s30, 9408  ;;  %s35572_s15 = smov [#allocation3]  }
  0x67   : > { %p35445_p11 = scmp.ne.s32.totalorder %s35754_s30, %s35444_s14  ;;  %s35449_s17 = sshll.u32 %s35572_s15, 4  ;;  %s35450_s17 = int_to_ptr.vmem [resolvable:$false] %s35449_s17 }
  0x68   : > { %s35451_s18 = scalar_lea.vmem %s35450_s17, 18816  ;;  %p35452_p5 = scmp.lt.s32.totalorder %s35754_s30, %s35450_s17 }
  0x69   : > { %p35447_p1 = pnand %p35445_p11, %p35431_p6  ;;  %p35453_p12 = scmp.lt.s32.totalorder %s35451_s18, %s35444_s14 }
  0x6b   : > { %p35448_p4 = pneg %p35447_p1  ;;  %p35454_p0 = por %p35453_p12, %p35452_p5 }
  0x6d   : > { %p35455_p2 = pnand %p35454_p0, %p35448_p4 }
  0x6f   : > { %35458 = shalt.err (!%p35455_p2)
}
  0x70   : > { %32862 = dma.hbm_to_vmem [thread:$0]  (!%p35744_p8), %s35752_s25, 9408, %s35754_s30, %s213_s7  }
  0x71   : > { %s231_s27 = sand.u32 1, %s35565_s21   ;;  %s235_s8 = scalar_lea.vmem [#allocation6], %s32826_s16 }
  0x72   : > { %s242_s28 = sshll.u32 %s235_s8, 4  ;;  %s29577_s9 = smul.u32 301056, %s35565_s21  ;;  %s35785_s28 = int_to_ptr.vmem [resolvable:$true] %s242_s28 }
  0x73   : > { %s35793_s14 = scalar_lea.sflag [#allocation7], %s231_s27  ;;  %s35464_s21 = scalar_lea.hbm %s38655_s1, 1204224 }
  0x74   : > { %s35791_s11 = scalar_lea.hbm %s38655_s1, %s29577_s9 }
  0x75   : > { %s35459_s15 = scalar_lea.hbm %s35791_s11, 301056  ;;  %p35465_p10 = scmp.lt.u32.totalorder %s35791_s11, %s38655_s1 }
  0x76   : > { %p35460_p13 = scmp.ne.s32.totalorder %s35791_s11, %s35459_s15  ;;  %p35466_p9 = scmp.lt.u32.totalorder %s35464_s21, %s35459_s15 }
  0x77   : > { %p35468_p1 = scmp.lt.u32.totalorder %s35459_s15, %s35791_s11 }
  0x78   : > { %p35462_p3 = pnand %p35460_p13, %p35431_p6  ;;  %p35467_p11 = por %p35466_p9, %p35465_p10 }
  0x7a   : > { %p35463_p7 = pneg %p35462_p3  ;;  %p35469_p4 = por %p35468_p1, %p35467_p11 }
  0x7c   : > { %p35470_p5 = pnand %p35469_p4, %p35463_p7 }
  0x7e   : > { %35473 = shalt.err (!%p35470_p5)
}
  0x7f   : > { %s35474_s7 = scalar_lea.vmem %s35785_s28, 301056  ;;  %s35573_s17 = smov [#allocation6]  }
  0x80   : > { %p35475_p12 = scmp.ne.s32.totalorder %s35785_s28, %s35474_s7  ;;  %s35479_s18 = sshll.u32 %s35573_s17, 4  ;;  %s35480_s18 = int_to_ptr.vmem [resolvable:$false] %s35479_s18 }
  0x81   : > { %s35481_s27 = scalar_lea.vmem %s35480_s18, 602112  ;;  %p35482_p13 = scmp.lt.s32.totalorder %s35785_s28, %s35480_s18 }
  0x82   : > { %p35477_p0 = pnand %p35475_p12, %p35431_p6  ;;  %p35483_p3 = scmp.lt.s32.totalorder %s35481_s27, %s35474_s7 }
  0x84   : > { %p35478_p2 = pneg %p35477_p0  ;;  %p35484_p10 = por %p35483_p3, %p35482_p13 }
  0x86   : > { %p35485_p9 = pnand %p35484_p10, %p35478_p2 }
  0x88   : > { %35488 = shalt.err (!%p35485_p9)
}
  0x89   : > { %s35574_s8 = smov 64   ;;  %s35575_s9 = smov 4  }
  0x8a   : > { %32865 = dma.hbm_to_vmem [thread:$0]  (!%p35744_p8), %s35791_s11, 301056, %s35785_s28, %s35793_s14, %s35574_s8, %s35574_s8, %s35575_s9  }
  0x8b   : > { %p38668_p6 = scmp.ne.s32.totalorder %s38664_s24, 0 }
  0x8c   : > { %s256_s10 = sand.u32 (!%p38668_p6), 1, %s35557_s19   ;;  %p38669_p7 = scmp.ne.s32.totalorder (!%p38668_p6), %s38663_s23, 0 }
  0x8d   : > { %254 = sbr.rel (%p38668_p6) target bundleno = 3009 (0xbc1), region = 40  ;;  %s257_s15 = scalar_lea.sflag (!%p38668_p6), [#allocation4], %s256_s10 }
  0x8e   : > { %s32827_s26 = smul.u32 (!%p38668_p6), 588, %s256_s10 }
  0x90   : > { %s35822_s13 = scalar_lea.vmem (!%p38668_p6), [#allocation3], %s32827_s26 }
  0x94   : > { %35532 = dma.done.wait (%p38669_p7), %s257_s15, 9408  }
  0x95   : > { %35534 = vsyncadd (%p38669_p7), %s257_s15, 4294957888  ;;  %s265_s16 = sand.u32 1, %s35631_s22   ;;  %s32828_s6 = smul.u32 18816, %s256_s10 }
  0x96   : > { %s266_s28 = scalar_lea.sflag [#allocation7], %s265_s16 }
  0x97   : > { %s35829_s11 = scalar_lea.vmem [#allocation6], %s32828_s6 }
  0x98   : > { %35536 = dma.done.wait (%p38669_p7), %s266_s28, 301056  }
  0x99   : > { %35538 = vsyncadd (%p38669_p7), %s266_s28, 4294666240  ;;  %p38670_p8 = scmp.eq.s32.totalorder %s35631_s22, 0 }
  0x9b   : > { %35540 = dma.done.wait (%p38670_p8), [#allocation7], 16   ;;  %p38671_p11 = pmov %p38670_p8 }
  0x9c   : > { %p38672_p1 = pmov %p38670_p8 }
  0x9d   : > { %35542 = vsyncadd (%p38671_p11), [#allocation7], 4294967280 }
  0x9e   : > { %35544 = dma.done.wait (%p38672_p1), [#allocation10], 272   ;;  %p38673_p4 = pmov %p38672_p1 }
  0x9f   : > { %p38674_p5 = scmp.ne.s32.totalorder %s35631_s22, 0 }
  0xa0   : > { %35546 = vsyncadd (%p38673_p4), [#allocation10], 4294967024  ;;  %v35576_v0 = vmov (!%p38674_p5), 0.0  }
  0xa1   : > { %314 = sbr.rel (%p38674_p5) target bundleno = 168 (0xa8), region = 64  ;;  %315 = vst [vmem:[#allocation2] sm:$0x3] (!%p38674_p5), %v35576_v0 }
  0xa8 PF: > { %v32920_v1 = vld [vmem:[%s35829_s11 + $0x40] sm:$0xff]   ;;  %v32924_v5 = vld [vmem:[%s35829_s11 + $0x48] sm:$0xff]   ;;  %v32928_v9 = vld [vmem:[%s35829_s11 + $0x50] sm:$0xff]   ;;  %v469_v29 = vlaneseq  ;;  %v35577_v37 = vmov 1983009808   ;;  %p29569_p12 = scmp.ne.s32.totalorder %s35631_s22, 3 }
  0xa9   : > { %v32921_v2 = vld [vmem:[%s35829_s11 + $0xc0] sm:$0xff]   ;;  %29578 = vmatprep.subr.bf16.mxu0 %v32920_v1  ;;  %v32925_v6 = vld [vmem:[%s35829_s11 + $0xc8] sm:$0xff]   ;;  %v32929_v10 = vld [vmem:[%s35829_s11 + $0xd0] sm:$0xff]   ;;  %v467_v38 = vunpack.c.l.s4 %v35577_v37  ;;  %vm35579_vm0 = vmmov (!%p29569_p12), 0   ;;  %vm27093_vm1 = vcmask (!%p29569_p12), 74752  }
  0xaa   : > { %v32922_v3 = vld [vmem:[%s35829_s11] sm:$0xff]   ;;  %29600 = vmatprep.subr.bf16.mxu1 %v32921_v2  ;;  %v32926_v7 = vld [vmem:[%s35829_s11 + $0x8] sm:$0xff]   ;;  %v32930_v11 = vld [vmem:[%s35829_s11 + $0x10] sm:$0xff]   ;;  %v470_v34 = vshrl.u32 %v469_v29, 7 }
  0xab   : > { %v32923_v4 = vld [vmem:[%s35829_s11 + $0x80] sm:$0xff]   ;;  %29579 = vmatpush3.bf16.msra.mxu0 %v32922_v3  ;;  %v32927_v8 = vld [vmem:[%s35829_s11 + $0x88] sm:$0xff]   ;;  %v32931_v12 = vld [vmem:[%s35829_s11 + $0x90] sm:$0xff]   ;;  %v468_v39 = vunpack.c.0.s8 %v467_v38 }
  0xac   : > { %29601 = vmatpush3.bf16.msra.mxu1 %v32923_v4  ;;  %29580 = vmatprep.subr.bf16.mxu0 %v32924_v5  ;;  %v32932_v13 = vld [vmem:[%s35829_s11 + $0x58] sm:$0xff]   ;;  %v32936_v17 = vld [vmem:[%s35829_s11 + $0x60] sm:$0xff]   ;;  %v32940_v21 = vld [vmem:[%s35829_s11 + $0x68] sm:$0xff]  }
  0xad   : > { %29602 = vmatprep.subr.bf16.mxu1 %v32925_v6  ;;  %v32933_v14 = vld [vmem:[%s35829_s11 + $0xd8] sm:$0xff]   ;;  %v32937_v18 = vld [vmem:[%s35829_s11 + $0xe0] sm:$0xff]   ;;  %v32941_v22 = vld [vmem:[%s35829_s11 + $0xe8] sm:$0xff]   ;;  %v35880_v42 = vsub.s32 %v468_v39, %v470_v34 }
  0xae   : > { %v32934_v15 = vld [vmem:[%s35829_s11 + $0x18] sm:$0xff]   ;;  %v32938_v19 = vld [vmem:[%s35829_s11 + $0x20] sm:$0xff]   ;;  %v32942_v23 = vld [vmem:[%s35829_s11 + $0x28] sm:$0xff]  }
  0xaf   : > { %29581 = vmatpush3.bf16.msra.mxu0 %v32926_v7  ;;  %v32935_v16 = vld [vmem:[%s35829_s11 + $0x98] sm:$0xff]   ;;  %v32939_v20 = vld [vmem:[%s35829_s11 + $0xa0] sm:$0xff]   ;;  %v32943_v24 = vld [vmem:[%s35829_s11 + $0xa8] sm:$0xff]  }
  0xb0   : > { %29603 = vmatpush3.bf16.msra.mxu1 %v32927_v8  ;;  %29582 = vmatprep.subr.bf16.mxu0 %v32928_v9  ;;  %v32944_v25 = vld [vmem:[%s35829_s11 + $0x70] sm:$0xff]   ;;  %v32948_v30 = vld [vmem:[%s35829_s11 + $0x78] sm:$0xff]   ;;  %v32953_v36 = vld [vmem:[%s35829_s11 + $0x140] sm:$0xff]  }
  0xb1   : > { %29604 = vmatprep.subr.bf16.mxu1 %v32929_v10  ;;  %v32945_v26 = vld [vmem:[%s35829_s11 + $0xf0] sm:$0xff]   ;;  %v32949_v31 = vld [vmem:[%s35829_s11 + $0xf8] sm:$0xff]   ;;  %v32955_v41 = vld [vmem:[%s35829_s11 + $0x1c0] sm:$0xff]  }
  0xb2   : > { %v32946_v27 = vld [vmem:[%s35829_s11 + $0x30] sm:$0xff]   ;;  %v32950_v32 = vld [vmem:[%s35829_s11 + $0x38] sm:$0xff]   ;;  %v32954_v47 = vld [vmem:[%s35829_s11 + $0x100] sm:$0xff]  }
  0xb3   : > { %29583 = vmatpush3.bf16.msra.mxu0 %v32930_v11  ;;  %v32947_v28 = vld [vmem:[%s35829_s11 + $0xb0] sm:$0xff]   ;;  %v32951_v33 = vld [vmem:[%s35829_s11 + $0xb8] sm:$0xff]   ;;  %v32956_v50 = vld [vmem:[%s35829_s11 + $0x180] sm:$0xff]  }
  0xb4   : > { %29605 = vmatpush3.bf16.msra.mxu1 %v32931_v12  ;;  %29584 = vmatprep.subr.bf16.mxu0 %v32932_v13  ;;  %v317_v35 = vld [vmem:[%s35822_s13] sm:$0xff]  ;;  %v32969_v1 = vld [vmem:[%s35829_s11 + $0x160] sm:$0xff]  }
  0xb5   : > { %29606 = vmatprep.subr.bf16.mxu1 %v32933_v14  ;;  %v465_v40 = vcombine.high %v317_v35, %v317_v35  ;;  %v472_v43 = vrot.slane %v317_v35, %v35880_v42  ;;  %v32957_v53 = vld [vmem:[%s35829_s11 + $0x148] sm:$0xff]   ;;  %v32961_v57 = vld [vmem:[%s35829_s11 + $0x150] sm:$0xff]   ;;  %v32965_v61 = vld [vmem:[%s35829_s11 + $0x158] sm:$0xff]  }
  0xb6   : > { %v32959_v54 = vld [vmem:[%s35829_s11 + $0x1c8] sm:$0xff]   ;;  %v32963_v58 = vld [vmem:[%s35829_s11 + $0x1d0] sm:$0xff]   ;;  %v32967_v62 = vld [vmem:[%s35829_s11 + $0x1d8] sm:$0xff]  }
  0xb7   : > { %29585 = vmatpush3.bf16.msra.mxu0 %v32934_v15  ;;  %v479_v44 = vrot.slane %v465_v40, %v35880_v42  ;;  %v480_v45 = vcombine.high %v472_v43, %v472_v43  ;;  %v2008_v48 = vpack.c.bf16 %v472_v43, %v472_v43  ;;  %v32958_v55 = vld [vmem:[%s35829_s11 + $0x108] sm:$0xff]   ;;  %v32962_v59 = vld [vmem:[%s35829_s11 + $0x110] sm:$0xff]   ;;  %v32966_v63 = vld [vmem:[%s35829_s11 + $0x118] sm:$0xff]  }
  0xb8   : > { %29607 = vmatpush3.bf16.msra.mxu1 %v32935_v16  ;;  %29586 = vmatprep.subr.bf16.mxu0 %v32936_v17  ;;  %v32960_v56 = vld [vmem:[%s35829_s11 + $0x188] sm:$0xff]   ;;  %v32964_v60 = vld [vmem:[%s35829_s11 + $0x190] sm:$0xff]   ;;  %v32968_v0 = vld [vmem:[%s35829_s11 + $0x198] sm:$0xff]  }
  0xb9   : > { %29608 = vmatprep.subr.bf16.mxu1 %v32937_v18  ;;  %v481_v46 = vcombine.high %v479_v44, %v479_v44  ;;  %v2010_v49 = vpack.c.bf16 %v479_v44, %v479_v44  ;;  %v2009_v51 = vpack.c.bf16 %v480_v45, %v480_v45  ;;  %v32971_v2 = vld [vmem:[%s35829_s11 + $0x1e0] sm:$0xff]   ;;  %v32973_v5 = vld [vmem:[%s35829_s11 + $0x168] sm:$0xff]   ;;  %v32977_v9 = vld [vmem:[%s35829_s11 + $0x170] sm:$0xff]  }
  0xba   : > { %v32970_v3 = vld [vmem:[%s35829_s11 + $0x120] sm:$0xff]   ;;  %v32975_v6 = vld [vmem:[%s35829_s11 + $0x1e8] sm:$0xff]   ;;  %v32979_v11 = vld [vmem:[%s35829_s11 + $0x1f0] sm:$0xff]  }
  0xbb   : > { %29587 = vmatpush3.bf16.msra.mxu0 %v32938_v19  ;;  %v2011_v52 = vpack.c.bf16 %v481_v46, %v481_v46  ;;  %21150 = vmatprep.mubr.bf16.mxu0 %v2009_v51  ;;  %v32972_v4 = vld [vmem:[%s35829_s11 + $0x1a0] sm:$0xff]   ;;  %v32974_v7 = vld [vmem:[%s35829_s11 + $0x128] sm:$0xff]   ;;  %v32978_v14 = vld [vmem:[%s35829_s11 + $0x130] sm:$0xff]  }
  0xbc   : > { %29609 = vmatpush3.bf16.msra.mxu1 %v32939_v20  ;;  %29588 = vmatprep.subr.bf16.mxu0 %v32940_v21  ;;  %v32976_v8 = vld [vmem:[%s35829_s11 + $0x1a8] sm:$0xff]   ;;  %v318_v10 = vld [vmem:[%s35822_s13 + $0x8] sm:$0xff] }
  0xbd   : > { %29610 = vmatprep.subr.bf16.mxu1 %v32941_v22  ;;  %21190 = vmatprep.mubr.bf16.mxu1 %v2011_v52  ;;  %v489_v12 = vrot.slane %v318_v10, %v35880_v42  ;;  %v482_v13 = vcombine.high %v318_v10, %v318_v10  ;;  %v32980_v15 = vld [vmem:[%s35829_s11 + $0x1b0] sm:$0xff]   ;;  %v32981_v18 = vld [vmem:[%s35829_s11 + $0x178] sm:$0xff]   ;;  %v32993_v34 = vld [vmem:[%s35829_s11 + $0x288] sm:$0xff]  }
  0xbe   : > { %v32983_v19 = vld [vmem:[%s35829_s11 + $0x1f8] sm:$0xff]   ;;  %v32994_v35 = vld [vmem:[%s35829_s11 + $0x250] sm:$0xff]   ;;  %v33002_v44 = vld [vmem:[%s35829_s11 + $0x260] sm:$0xff]  }
  0xbf   : > { %29589 = vmatpush3.bf16.msra.mxu0 %v32942_v23  ;;  %v497_v16 = vcombine.high %v489_v12, %v489_v12  ;;  %v496_v17 = vrot.slane %v482_v13, %v35880_v42  ;;  %v32982_v22 = vld [vmem:[%s35829_s11 + $0x138] sm:$0xff]   ;;  %v32995_v37 = vld [vmem:[%s35829_s11 + $0x210] sm:$0xff]   ;;  %v33004_v45 = vld [vmem:[%s35829_s11 + $0x2e0] sm:$0xff]  }
  0xc0   : > { %29611 = vmatpush3.bf16.msra.mxu1 %v32943_v24  ;;  %29590 = vmatprep.subr.bf16.mxu0 %v32944_v25  ;;  %v32984_v23 = vld [vmem:[%s35829_s11 + $0x1b8] sm:$0xff]   ;;  %v32985_v25 = vld [vmem:[%s35829_s11 + $0x240] sm:$0xff]   ;;  %v32997_v38 = vld [vmem:[%s35829_s11 + $0x290] sm:$0xff]  }
  0xc1   : > { %29612 = vmatprep.subr.bf16.mxu1 %v32945_v26  ;;  %v2013_v20 = vpack.c.bf16 %v497_v16, %v497_v16  ;;  %v498_v21 = vcombine.high %v496_v17, %v496_v17  ;;  %v32988_v26 = vld [vmem:[%s35829_s11 + $0x2c0] sm:$0xff]   ;;  %v2014_v29 = vpack.c.bf16 %v496_v17, %v496_v17  ;;  %v32998_v39 = vld [vmem:[%s35829_s11 + $0x258] sm:$0xff]   ;;  %v33009_v51 = vld [vmem:[%s35829_s11 + $0x2a8] sm:$0xff]  }
  0xc2   : > { %v33000_v40 = vld [vmem:[%s35829_s11 + $0x2d8] sm:$0xff]   ;;  %v33003_v46 = vld [vmem:[%s35829_s11 + $0x220] sm:$0xff]   ;;  %v33010_v52 = vld [vmem:[%s35829_s11 + $0x270] sm:$0xff]  }
  0xc3   : > { %29591 = vmatpush3.bf16.msra.mxu0 %v32946_v27  ;;  %v2015_v24 = vpack.c.bf16 %v498_v21, %v498_v21  ;;  %v32987_v27 = vld [vmem:[%s35829_s11 + $0x200] sm:$0xff]   ;;  %v33001_v43 = vld [vmem:[%s35829_s11 + $0x298] sm:$0xff]   ;;  %v33023_v10 = vld [vmem:[%s35829_s11 + $0x348] sm:$0xff]  }
  0xc4   : > { %29613 = vmatpush3.bf16.msra.mxu1 %v32947_v28  ;;  %29592 = vmatprep.subr.bf16.mxu0 %v32948_v30  ;;  %v2012_v28 = vpack.c.bf16 %v489_v12, %v489_v12  ;;  %v32989_v30 = vld [vmem:[%s35829_s11 + $0x280] sm:$0xff]   ;;  %v33024_v12 = vld [vmem:[%s35829_s11 + $0x308] sm:$0xff]   ;;  %v33028_v16 = vld [vmem:[%s35829_s11 + $0x310] sm:$0xff]  }
  0xc5   : > { %29614 = vmatprep.subr.bf16.mxu1 %v32949_v31  ;;  %v32990_v31 = vld [vmem:[%s35829_s11 + $0x248] sm:$0xff]   ;;  %v33030_v17 = vld [vmem:[%s35829_s11 + $0x390] sm:$0xff]   ;;  %v33034_v21 = vld [vmem:[%s35829_s11 + $0x398] sm:$0xff]  }
  0xc6   : > { %v33026_v13 = vld [vmem:[%s35829_s11 + $0x388] sm:$0xff]  }
  0xc7   : > { %29593 = vmatpush3.bf16.msra.mxu0 %v32950_v32  ;;  %v32992_v32 = vld [vmem:[%s35829_s11 + $0x2c8] sm:$0xff]  }
  0xc8   : > { %29615 = vmatpush3.bf16.msra.mxu1 %v32951_v33  ;;  %29622 = vmatprep.subr.bf16.mxu0 %v32953_v36  ;;  %v32991_v33 = vld [vmem:[%s35829_s11 + $0x208] sm:$0xff]   ;;  %v32996_v36 = vld [vmem:[%s35829_s11 + $0x2d0] sm:$0xff]  }
  0xc9   : > { %29644 = vmatprep.subr.bf16.mxu1 %v32955_v41  ;;  %v32999_v41 = vld [vmem:[%s35829_s11 + $0x218] sm:$0xff]  }
  0xca   : > { %21151 = vmatmul.mubr.bf16.vlgmr.msra.gmra.mrb[0].mxu0 %v2008_v48  ;;  %v33006_v48 = vld [vmem:[%s35829_s11 + $0x268] sm:$0xff]  }
  0xcb   : > { %21191 = vmatmul.mubr.bf16.vlgmr.msra.gmra.mrb[0].mxu1 %v2010_v49  ;;  %29623 = vmatpush3.bf16.msra.mxu0 %v32954_v47  ;;  %v33005_v47 = vld [vmem:[%s35829_s11 + $0x2a0] sm:$0xff]   ;;  %v33008_v49 = vld [vmem:[%s35829_s11 + $0x2e8] sm:$0xff]  }
  0xcc   : > { %29645 = vmatpush3.bf16.msra.mxu1 %v32956_v50  ;;  %29624 = vmatprep.subr.bf16.mxu0 %v32957_v53  ;;  %v33007_v50 = vld [vmem:[%s35829_s11 + $0x228] sm:$0xff]  }
  0xcd   : > { %29646 = vmatprep.subr.bf16.mxu1 %v32959_v54  ;;  %21230 = vmatprep.mubr.bf16.mxu0 %v2013_v20  ;;  %v319_v53 = vld [vmem:[%s35822_s13 + $0x10] sm:$0xff]  ;;  %v33012_v54 = vld [vmem:[%s35829_s11 + $0x2f0] sm:$0xff]  }
  0xce   : > { %21270 = vmatprep.mubr.bf16.mxu1 %v2015_v24  ;;  %v33032_v20 = vld [vmem:[%s35829_s11 + $0x318] sm:$0xff]   ;;  %v33036_v24 = vld [vmem:[%s35829_s11 + $0x320] sm:$0xff]  }
  0xcf   : > { %29625 = vmatpush3.bf16.msra.mxu0 %v32958_v55  ;;  %v506_v55 = vrot.slane %v319_v53, %v35880_v42 }
  0xd0   : > { %29647 = vmatpush3.bf16.msra.mxu1 %v32960_v56  ;;  %29626 = vmatprep.subr.bf16.mxu0 %v32961_v57  ;;  %v499_v56 = vcombine.high %v319_v53, %v319_v53  ;;  %v33011_v57 = vld [vmem:[%s35829_s11 + $0x230] sm:$0xff]   ;;  %v33056_v53 = vld [vmem:[%s35829_s11 + $0x448] sm:$0xff]  }
  0xd1   : > { %29648 = vmatprep.subr.bf16.mxu1 %v32963_v58  ;;  %v33013_v58 = vld [vmem:[%s35829_s11 + $0x2b0] sm:$0xff]  }
  0xd3   : > { %29627 = vmatpush3.bf16.msra.mxu0 %v32962_v59  ;;  %v514_v59 = vcombine.high %v506_v55, %v506_v55 }
  0xd4   : > { %29649 = vmatpush3.bf16.msra.mxu1 %v32964_v60  ;;  %29628 = vmatprep.subr.bf16.mxu0 %v32965_v61  ;;  %v513_v60 = vrot.slane %v499_v56, %v35880_v42  ;;  %v33014_v61 = vld [vmem:[%s35829_s11 + $0x278] sm:$0xff]   ;;  %v33059_v56 = vld [vmem:[%s35829_s11 + $0x488] sm:$0xff]  }
  0xd5   : > { %29650 = vmatprep.subr.bf16.mxu1 %v32967_v62  ;;  %v33016_v62 = vld [vmem:[%s35829_s11 + $0x2f8] sm:$0xff]  }
  0xd7   : > { %29629 = vmatpush3.bf16.msra.mxu0 %v32966_v63  ;;  %v2017_v63 = vpack.c.bf16 %v514_v59, %v514_v59  ;;  %v33061_v59 = vld [vmem:[%s35829_s11 + $0x410] sm:$0xff]  }
  0xd8   : > { %29651 = vmatpush3.bf16.msra.mxu1 %v32968_v0  ;;  %29630 = vmatprep.subr.bf16.mxu0 %v32969_v1  ;;  %v515_v0 = vcombine.high %v513_v60, %v513_v60  ;;  %v33015_v1 = vld [vmem:[%s35829_s11 + $0x238] sm:$0xff]  }
  0xd9   : > { %29652 = vmatprep.subr.bf16.mxu1 %v32971_v2  ;;  %v33017_v2 = vld [vmem:[%s35829_s11 + $0x2b8] sm:$0xff]  }
  0xdb   : > { %29631 = vmatpush3.bf16.msra.mxu0 %v32970_v3  ;;  %v2019_v3 = vpack.c.bf16 %v515_v0, %v515_v0  ;;  %v33067_v0 = vld [vmem:[%s35829_s11 + $0x498] sm:$0xff]  }
  0xdc   : > { %29653 = vmatpush3.bf16.msra.mxu1 %v32972_v4  ;;  %29632 = vmatprep.subr.bf16.mxu0 %v32973_v5  ;;  %v33018_v4 = vld [vmem:[%s35829_s11 + $0x340] sm:$0xff]  }
  0xdd   : > { %29654 = vmatprep.subr.bf16.mxu1 %v32975_v6  ;;  %v33021_v5 = vld [vmem:[%s35829_s11 + $0x3c0] sm:$0xff]  }
  0xde   : > { %v33020_v6 = vld [vmem:[%s35829_s11 + $0x300] sm:$0xff]  }
  0xdf   : > { %29633 = vmatpush3.bf16.msra.mxu0 %v32974_v7  ;;  %v2016_v7 = vpack.c.bf16 %v506_v55, %v506_v55  ;;  %v33057_v55 = vld [vmem:[%s35829_s11 + $0x408] sm:$0xff]  }
  0xe0   : > { %29655 = vmatpush3.bf16.msra.mxu1 %v32976_v8  ;;  %29634 = vmatprep.subr.bf16.mxu0 %v32977_v9  ;;  %v2018_v8 = vpack.c.bf16 %v513_v60, %v513_v60  ;;  %v33022_v9 = vld [vmem:[%s35829_s11 + $0x380] sm:$0xff]   ;;  %v33063_v60 = vld [vmem:[%s35829_s11 + $0x490] sm:$0xff]  }
  0xe1   : > { %29656 = vmatprep.subr.bf16.mxu1 %v32979_v11  ;;  %v33025_v11 = vld [vmem:[%s35829_s11 + $0x3c8] sm:$0xff]  }
  0xe3   : > { %29635 = vmatpush3.bf16.msra.mxu0 %v32978_v14  ;;  %v33027_v14 = vld [vmem:[%s35829_s11 + $0x350] sm:$0xff]  }
  0xe4   : > { %29657 = vmatpush3.bf16.msra.mxu1 %v32980_v15  ;;  %29636 = vmatprep.subr.bf16.mxu0 %v32981_v18  ;;  %v33029_v15 = vld [vmem:[%s35829_s11 + $0x3d0] sm:$0xff]   ;;  %v33031_v18 = vld [vmem:[%s35829_s11 + $0x358] sm:$0xff]  }
  0xe5   : > { %29658 = vmatprep.subr.bf16.mxu1 %v32983_v19  ;;  %v33033_v19 = vld [vmem:[%s35829_s11 + $0x3d8] sm:$0xff]  }
  0xe7   : > { %29637 = vmatpush3.bf16.msra.mxu0 %v32982_v22  ;;  %v33035_v22 = vld [vmem:[%s35829_s11 + $0x360] sm:$0xff]  }
  0xe8   : > { %29659 = vmatpush3.bf16.msra.mxu1 %v32984_v23  ;;  %29666 = vmatprep.subr.bf16.mxu0 %v32985_v25  ;;  %v33037_v23 = vld [vmem:[%s35829_s11 + $0x3e0] sm:$0xff]  }
  0xe9   : > { %29688 = vmatprep.subr.bf16.mxu1 %v32988_v26  ;;  %v33038_v25 = vld [vmem:[%s35829_s11 + $0x3a0] sm:$0xff]   ;;  %v33039_v26 = vld [vmem:[%s35829_s11 + $0x368] sm:$0xff]  }
  0xea   : > { %21231 = vmatmul.mubr.bf16.vlgmr.msra.gmra.mrb[4].mxu0 %v2012_v28  ;;  %v33040_v28 = vld [vmem:[%s35829_s11 + $0x328] sm:$0xff]  }
  0xeb   : > { %21271 = vmatmul.mubr.bf16.vlgmr.msra.gmra.mrb[4].mxu1 %v2014_v29  ;;  %29667 = vmatpush3.bf16.msra.mxu0 %v32987_v27  ;;  %v33041_v27 = vld [vmem:[%s35829_s11 + $0x3e8] sm:$0xff]  }
  0xec   : > { %29689 = vmatpush3.bf16.msra.mxu1 %v32989_v30  ;;  %29668 = vmatprep.subr.bf16.mxu0 %v32990_v31  ;;  %v33042_v29 = vld [vmem:[%s35829_s11 + $0x3a8] sm:$0xff]   ;;  %v33043_v30 = vld [vmem:[%s35829_s11 + $0x370] sm:$0xff]  }
  0xed   : > { %29690 = vmatprep.subr.bf16.mxu1 %v32992_v32  ;;  %21310 = vmatprep.mubr.bf16.mxu0 %v2017_v63  ;;  %v33045_v31 = vld [vmem:[%s35829_s11 + $0x3f0] sm:$0xff]   ;;  %v33065_v63 = vld [vmem:[%s35829_s11 + $0x418] sm:$0xff]  }
  0xee   : > { %21350 = vmatprep.mubr.bf16.mxu1 %v2019_v3  ;;  %v320_v32 = vld [vmem:[%s35822_s13 + $0x18] sm:$0xff] }
  0xef   : > { %29669 = vmatpush3.bf16.msra.mxu0 %v32991_v33  ;;  %v33044_v33 = vld [vmem:[%s35829_s11 + $0x330] sm:$0xff]   ;;  %v33069_v3 = vld [vmem:[%s35829_s11 + $0x420] sm:$0xff]  }
  0xf0   : > { %29691 = vmatpush3.bf16.msra.mxu1 %v32993_v34  ;;  %29670 = vmatprep.subr.bf16.mxu0 %v32994_v35  ;;  %v523_v34 = vrot.slane %v320_v32, %v35880_v42  ;;  %v516_v35 = vcombine.high %v320_v32, %v320_v32  ;;  %v33091_v32 = vld [vmem:[%s35829_s11 + $0x5c8] sm:$0xff]  }
  0xf1   : > { %29692 = vmatprep.subr.bf16.mxu1 %v32996_v36  ;;  %v33046_v36 = vld [vmem:[%s35829_s11 + $0x3b0] sm:$0xff]  }
  0xf3   : > { %29671 = vmatpush3.bf16.msra.mxu0 %v32995_v37  ;;  %v33047_v37 = vld [vmem:[%s35829_s11 + $0x378] sm:$0xff]  }
  0xf4   : > { %29693 = vmatpush3.bf16.msra.mxu1 %v32997_v38  ;;  %29672 = vmatprep.subr.bf16.mxu0 %v32998_v39  ;;  %v531_v38 = vcombine.high %v523_v34, %v523_v34  ;;  %v530_v39 = vrot.slane %v516_v35, %v35880_v42  ;;  %v33093_v35 = vld [vmem:[%s35829_s11 + $0x550] sm:$0xff]  }
  0xf5   : > { %29694 = vmatprep.subr.bf16.mxu1 %v33000_v40  ;;  %v33049_v40 = vld [vmem:[%s35829_s11 + $0x3f8] sm:$0xff]  }
  0xf7   : > { %29673 = vmatpush3.bf16.msra.mxu0 %v32999_v41  ;;  %v33048_v41 = vld [vmem:[%s35829_s11 + $0x338] sm:$0xff]  }
  0xf8   : > { %29695 = vmatpush3.bf16.msra.mxu1 %v33001_v43  ;;  %29674 = vmatprep.subr.bf16.mxu0 %v33002_v44  ;;  %v2021_v43 = vpack.c.bf16 %v531_v38, %v531_v38  ;;  %v532_v44 = vcombine.high %v530_v39, %v530_v39  ;;  %v33096_v38 = vld [vmem:[%s35829_s11 + $0x590] sm:$0xff]  }
  0xf9   : > { %29696 = vmatprep.subr.bf16.mxu1 %v33004_v45  ;;  %v33050_v45 = vld [vmem:[%s35829_s11 + $0x3b8] sm:$0xff]  }
  0xfb   : > { %29675 = vmatpush3.bf16.msra.mxu0 %v33003_v46  ;;  %v33051_v46 = vld [vmem:[%s35829_s11 + $0x440] sm:$0xff]  }
  0xfc   : > { %29697 = vmatpush3.bf16.msra.mxu1 %v33005_v47  ;;  %29676 = vmatprep.subr.bf16.mxu0 %v33006_v48  ;;  %v2023_v47 = vpack.c.bf16 %v532_v44, %v532_v44  ;;  %v33054_v48 = vld [vmem:[%s35829_s11 + $0x4c0] sm:$0xff]  }
  0xfd   : > { %29698 = vmatprep.subr.bf16.mxu1 %v33008_v49  ;;  %v33053_v49 = vld [vmem:[%s35829_s11 + $0x400] sm:$0xff]  }
  0xfe   : > { %v33101_v44 = vld [vmem:[%s35829_s11 + $0x560] sm:$0xff]  }
  0xff   : > { %29677 = vmatpush3.bf16.msra.mxu0 %v33007_v50  ;;  %v2020_v50 = vpack.c.bf16 %v523_v34, %v523_v34  ;;  %v33092_v34 = vld [vmem:[%s35829_s11 + $0x588] sm:$0xff]  }
 0x100   : > { %29699 = vmatpush3.bf16.msra.mxu1 %v33009_v51  ;;  %29678 = vmatprep.subr.bf16.mxu0 %v33010_v52  ;;  %v2022_v51 = vpack.c.bf16 %v530_v39, %v530_v39  ;;  %v33055_v52 = vld [vmem:[%s35829_s11 + $0x480] sm:$0xff]   ;;  %v33097_v39 = vld [vmem:[%s35829_s11 + $0x558] sm:$0xff]  }
 0x101   : > { %29700 = vmatprep.subr.bf16.mxu1 %v33012_v54  ;;  %v33058_v54 = vld [vmem:[%s35829_s11 + $0x4c8] sm:$0xff]  }
 0x103   : > { %29679 = vmatpush3.bf16.msra.mxu0 %v33011_v57  ;;  %v33060_v57 = vld [vmem:[%s35829_s11 + $0x450] sm:$0xff]  }
 0x104   : > { %29701 = vmatpush3.bf16.msra.mxu1 %v33013_v58  ;;  %29680 = vmatprep.subr.bf16.mxu0 %v33014_v61  ;;  %v33062_v58 = vld [vmem:[%s35829_s11 + $0x4d0] sm:$0xff]   ;;  %v33064_v61 = vld [vmem:[%s35829_s11 + $0x458] sm:$0xff]  }
 0x105   : > { %29702 = vmatprep.subr.bf16.mxu1 %v33016_v62  ;;  %v33066_v62 = vld [vmem:[%s35829_s11 + $0x4d8] sm:$0xff]  }
 0x107   : > { %29681 = vmatpush3.bf16.msra.mxu0 %v33015_v1  ;;  %v33068_v1 = vld [vmem:[%s35829_s11 + $0x460] sm:$0xff]  }
 0x108   : > { %29703 = vmatpush3.bf16.msra.mxu1 %v33017_v2  ;;  %29710 = vmatprep.subr.bf16.mxu0 %v33018_v4  ;;  %v33070_v2 = vld [vmem:[%s35829_s11 + $0x4e0] sm:$0xff]  }
 0x109   : > { %29732 = vmatprep.subr.bf16.mxu1 %v33021_v5  ;;  %v33071_v4 = vld [vmem:[%s35829_s11 + $0x4a0] sm:$0xff]   ;;  %v33072_v5 = vld [vmem:[%s35829_s11 + $0x468] sm:$0xff]  }
 0x10a   : > { %21311 = vmatmul.mubr.bf16.vlgmr.msra.gmra.mrb[8].mxu0 %v2016_v7  ;;  %v33073_v7 = vld [vmem:[%s35829_s11 + $0x428] sm:$0xff]  }
 0x10b   : > { %21351 = vmatmul.mubr.bf16.vlgmr.msra.gmra.mrb[8].mxu1 %v2018_v8  ;;  %29711 = vmatpush3.bf16.msra.mxu0 %v33020_v6  ;;  %v33074_v6 = vld [vmem:[%s35829_s11 + $0x4e8] sm:$0xff]  }
 0x10c   : > { %29733 = vmatpush3.bf16.msra.mxu1 %v33022_v9  ;;  %29712 = vmatprep.subr.bf16.mxu0 %v33023_v10  ;;  %v33075_v8 = vld [vmem:[%s35829_s11 + $0x4a8] sm:$0xff]   ;;  %v33076_v9 = vld [vmem:[%s35829_s11 + $0x470] sm:$0xff]  }
 0x10d   : > { %29734 = vmatprep.subr.bf16.mxu1 %v33025_v11  ;;  %21390 = vmatprep.mubr.bf16.mxu0 %v2021_v43  ;;  %v33078_v10 = vld [vmem:[%s35829_s11 + $0x4f0] sm:$0xff]   ;;  %v33100_v43 = vld [vmem:[%s35829_s11 + $0x598] sm:$0xff]  }
 0x10e   : > { %21430 = vmatprep.mubr.bf16.mxu1 %v2023_v47  ;;  %v321_v11 = vld [vmem:[%s35822_s13 + $0x20] sm:$0xff]  ;;  %v33104_v47 = vld [vmem:[%s35829_s11 + $0x5a0] sm:$0xff]  }
 0x10f   : > { %29713 = vmatpush3.bf16.msra.mxu0 %v33024_v12  ;;  %v33077_v12 = vld [vmem:[%s35829_s11 + $0x430] sm:$0xff]  }
 0x110   : > { %29735 = vmatpush3.bf16.msra.mxu1 %v33026_v13  ;;  %29714 = vmatprep.subr.bf16.mxu0 %v33027_v14  ;;  %v540_v13 = vrot.slane %v321_v11, %v35880_v42  ;;  %v533_v14 = vcombine.high %v321_v11, %v321_v11  ;;  %v33124_v11 = vld [vmem:[%s35829_s11 + $0x6c8] sm:$0xff]  }
 0x111   : > { %29736 = vmatprep.subr.bf16.mxu1 %v33029_v15  ;;  %v33079_v15 = vld [vmem:[%s35829_s11 + $0x4b0] sm:$0xff]  }
 0x113   : > { %29715 = vmatpush3.bf16.msra.mxu0 %v33028_v16  ;;  %v33080_v16 = vld [vmem:[%s35829_s11 + $0x478] sm:$0xff]  }
 0x114   : > { %29737 = vmatpush3.bf16.msra.mxu1 %v33030_v17  ;;  %29716 = vmatprep.subr.bf16.mxu0 %v33031_v18  ;;  %v548_v17 = vcombine.high %v540_v13, %v540_v13  ;;  %v547_v18 = vrot.slane %v533_v14, %v35880_v42  ;;  %v33126_v14 = vld [vmem:[%s35829_s11 + $0x650] sm:$0xff]  }
 0x115   : > { %29738 = vmatprep.subr.bf16.mxu1 %v33033_v19  ;;  %v33082_v19 = vld [vmem:[%s35829_s11 + $0x4f8] sm:$0xff]  }
 0x117   : > { %29717 = vmatpush3.bf16.msra.mxu0 %v33032_v20  ;;  %v33081_v20 = vld [vmem:[%s35829_s11 + $0x438] sm:$0xff]  }
 0x118   : > { %29739 = vmatpush3.bf16.msra.mxu1 %v33034_v21  ;;  %29718 = vmatprep.subr.bf16.mxu0 %v33035_v22  ;;  %v2025_v21 = vpack.c.bf16 %v548_v17, %v548_v17  ;;  %v549_v22 = vcombine.high %v547_v18, %v547_v18  ;;  %v33129_v17 = vld [vmem:[%s35829_s11 + $0x690] sm:$0xff]  }
 0x119   : > { %29740 = vmatprep.subr.bf16.mxu1 %v33037_v23  ;;  %v33083_v23 = vld [vmem:[%s35829_s11 + $0x4b8] sm:$0xff]  }
 0x11b   : > { %29719 = vmatpush3.bf16.msra.mxu0 %v33036_v24  ;;  %v33084_v24 = vld [vmem:[%s35829_s11 + $0x540] sm:$0xff]  }
 0x11c   : > { %29741 = vmatpush3.bf16.msra.mxu1 %v33038_v25  ;;  %29720 = vmatprep.subr.bf16.mxu0 %v33039_v26  ;;  %v2027_v25 = vpack.c.bf16 %v549_v22, %v549_v22  ;;  %v33087_v26 = vld [vmem:[%s35829_s11 + $0x5c0] sm:$0xff]  }
 0x11d   : > { %29742 = vmatprep.subr.bf16.mxu1 %v33041_v27  ;;  %v33086_v27 = vld [vmem:[%s35829_s11 + $0x500] sm:$0xff]  }
 0x11e   : > { %v33134_v22 = vld [vmem:[%s35829_s11 + $0x660] sm:$0xff]  }
 0x11f   : > { %29721 = vmatpush3.bf16.msra.mxu0 %v33040_v28  ;;  %v2024_v28 = vpack.c.bf16 %v540_v13, %v540_v13  ;;  %v33125_v13 = vld [vmem:[%s35829_s11 + $0x688] sm:$0xff]  }
 0x120   : > { %29743 = vmatpush3.bf16.msra.mxu1 %v33042_v29  ;;  %29722 = vmatprep.subr.bf16.mxu0 %v33043_v30  ;;  %v2026_v29 = vpack.c.bf16 %v547_v18, %v547_v18  ;;  %v33088_v30 = vld [vmem:[%s35829_s11 + $0x580] sm:$0xff]   ;;  %v33130_v18 = vld [vmem:[%s35829_s11 + $0x658] sm:$0xff]  }
 0x121   : > { %29744 = vmatprep.subr.bf16.mxu1 %v33045_v31  ;;  %v33089_v31 = vld [vmem:[%s35829_s11 + $0x548] sm:$0xff]  }
 0x123   : > { %29723 = vmatpush3.bf16.msra.mxu0 %v33044_v33  ;;  %v33090_v33 = vld [vmem:[%s35829_s11 + $0x508] sm:$0xff]  }
 0x124   : > { %29745 = vmatpush3.bf16.msra.mxu1 %v33046_v36  ;;  %29724 = vmatprep.subr.bf16.mxu0 %v33047_v37  ;;  %v33095_v36 = vld [vmem:[%s35829_s11 + $0x5d0] sm:$0xff]  }
 0x125   : > { %29746 = vmatprep.subr.bf16.mxu1 %v33049_v40  ;;  %v33094_v37 = vld [vmem:[%s35829_s11 + $0x510] sm:$0xff]   ;;  %v33099_v40 = vld [vmem:[%s35829_s11 + $0x5d8] sm:$0xff]  }
 0x127   : > { %29725 = vmatpush3.bf16.msra.mxu0 %v33048_v41  ;;  %v33098_v41 = vld [vmem:[%s35829_s11 + $0x518] sm:$0xff]  }
 0x128   : > { %29747 = vmatpush3.bf16.msra.mxu1 %v33050_v45  ;;  %29754 = vmatprep.subr.bf16.mxu0 %v33051_v46  ;;  %v33103_v45 = vld [vmem:[%s35829_s11 + $0x5e0] sm:$0xff]  }
 0x129   : > { %29776 = vmatprep.subr.bf16.mxu1 %v33054_v48  ;;  %v33102_v46 = vld [vmem:[%s35829_s11 + $0x520] sm:$0xff]   ;;  %v33105_v48 = vld [vmem:[%s35829_s11 + $0x568] sm:$0xff]  }
 0x12a   : > { %21391 = vmatmul.mubr.bf16.vlgmr.msra.gmra.mrb[12].mxu0 %v2020_v50  ;;  %v33106_v50 = vld [vmem:[%s35829_s11 + $0x528] sm:$0xff]  }
 0x12b   : > { %21431 = vmatmul.mubr.bf16.vlgmr.msra.gmra.mrb[12].mxu1 %v2022_v51  ;;  %29755 = vmatpush3.bf16.msra.mxu0 %v33053_v49  ;;  %v33107_v49 = vld [vmem:[%s35829_s11 + $0x5e8] sm:$0xff]  }
 0x12c   : > { %29777 = vmatpush3.bf16.msra.mxu1 %v33055_v52  ;;  %29756 = vmatprep.subr.bf16.mxu0 %v33056_v53  ;;  %v33108_v51 = vld [vmem:[%s35829_s11 + $0x5a8] sm:$0xff]   ;;  %v33109_v52 = vld [vmem:[%s35829_s11 + $0x570] sm:$0xff]  }
 0x12d   : > { %29778 = vmatprep.subr.bf16.mxu1 %v33058_v54  ;;  %21470 = vmatprep.mubr.bf16.mxu0 %v2025_v21  ;;  %v33111_v53 = vld [vmem:[%s35829_s11 + $0x5f0] sm:$0xff]   ;;  %v33133_v21 = vld [vmem:[%s35829_s11 + $0x698] sm:$0xff]  }
 0x12e   : > { %21510 = vmatprep.mubr.bf16.mxu1 %v2027_v25  ;;  %v322_v54 = vld [vmem:[%s35822_s13 + $0x28] sm:$0xff] }
 0x12f   : > { %29757 = vmatpush3.bf16.msra.mxu0 %v33057_v55  ;;  %v33110_v55 = vld [vmem:[%s35829_s11 + $0x530] sm:$0xff]   ;;  %v33137_v25 = vld [vmem:[%s35829_s11 + $0x6a0] sm:$0xff]  }
 0x130   : > { %29779 = vmatpush3.bf16.msra.mxu1 %v33059_v56  ;;  %29758 = vmatprep.subr.bf16.mxu0 %v33060_v57  ;;  %v557_v56 = vrot.slane %v322_v54, %v35880_v42  ;;  %v550_v57 = vcombine.high %v322_v54, %v322_v54  ;;  %v33157_v54 = vld [vmem:[%s35829_s11 + $0x7c8] sm:$0xff]  }
 0x131   : > { %29780 = vmatprep.subr.bf16.mxu1 %v33062_v58  ;;  %v33112_v58 = vld [vmem:[%s35829_s11 + $0x5b0] sm:$0xff]  }
 0x133   : > { %29759 = vmatpush3.bf16.msra.mxu0 %v33061_v59  ;;  %v33113_v59 = vld [vmem:[%s35829_s11 + $0x578] sm:$0xff]  }
 0x134   : > { %29781 = vmatpush3.bf16.msra.mxu1 %v33063_v60  ;;  %29760 = vmatprep.subr.bf16.mxu0 %v33064_v61  ;;  %v565_v60 = vcombine.high %v557_v56, %v557_v56  ;;  %v564_v61 = vrot.slane %v550_v57, %v35880_v42  ;;  %v33159_v57 = vld [vmem:[%s35829_s11 + $0x750] sm:$0xff]  }
 0x135   : > { %29782 = vmatprep.subr.bf16.mxu1 %v33066_v62  ;;  %v33115_v62 = vld [vmem:[%s35829_s11 + $0x5f8] sm:$0xff]  }
 0x137   : > { %29761 = vmatpush3.bf16.msra.mxu0 %v33065_v63  ;;  %v33114_v63 = vld [vmem:[%s35829_s11 + $0x538] sm:$0xff]  }
 0x138   : > { %29783 = vmatpush3.bf16.msra.mxu1 %v33067_v0  ;;  %29762 = vmatprep.subr.bf16.mxu0 %v33068_v1  ;;  %v2029_v0 = vpack.c.bf16 %v565_v60, %v565_v60  ;;  %v566_v1 = vcombine.high %v564_v61, %v564_v61  ;;  %v33162_v60 = vld [vmem:[%s35829_s11 + $0x790] sm:$0xff]  }
 0x139   : > { %29784 = vmatprep.subr.bf16.mxu1 %v33070_v2  ;;  %v33116_v2 = vld [vmem:[%s35829_s11 + $0x5b8] sm:$0xff]  }
 0x13b   : > { %29763 = vmatpush3.bf16.msra.mxu0 %v33069_v3  ;;  %v33117_v3 = vld [vmem:[%s35829_s11 + $0x640] sm:$0xff]  }
 0x13c   : > { %29785 = vmatpush3.bf16.msra.mxu1 %v33071_v4  ;;  %29764 = vmatprep.subr.bf16.mxu0 %v33072_v5  ;;  %v2031_v4 = vpack.c.bf16 %v566_v1, %v566_v1  ;;  %v33120_v5 = vld [vmem:[%s35829_s11 + $0x6c0] sm:$0xff]  }
 0x13d   : > { %29786 = vmatprep.subr.bf16.mxu1 %v33074_v6  ;;  %v33119_v6 = vld [vmem:[%s35829_s11 + $0x600] sm:$0xff]  }
 0x13e   : > { %v33167_v1 = vld [vmem:[%s35829_s11 + $0x760] sm:$0xff]  }
 0x13f   : > { %29765 = vmatpush3.bf16.msra.mxu0 %v33073_v7  ;;  %v2028_v7 = vpack.c.bf16 %v557_v56, %v557_v56  ;;  %v33158_v56 = vld [vmem:[%s35829_s11 + $0x788] sm:$0xff]  }
 0x140   : > { %29787 = vmatpush3.bf16.msra.mxu1 %v33075_v8  ;;  %29766 = vmatprep.subr.bf16.mxu0 %v33076_v9  ;;  %v2030_v8 = vpack.c.bf16 %v564_v61, %v564_v61  ;;  %v33121_v9 = vld [vmem:[%s35829_s11 + $0x680] sm:$0xff]   ;;  %v33163_v61 = vld [vmem:[%s35829_s11 + $0x758] sm:$0xff]  }
 0x141   : > { %29788 = vmatprep.subr.bf16.mxu1 %v33078_v10  ;;  %v33122_v10 = vld [vmem:[%s35829_s11 + $0x648] sm:$0xff]  }
 0x143   : > { %29767 = vmatpush3.bf16.msra.mxu0 %v33077_v12  ;;  %v33123_v12 = vld [vmem:[%s35829_s11 + $0x608] sm:$0xff]  }
 0x144   : > { %29789 = vmatpush3.bf16.msra.mxu1 %v33079_v15  ;;  %29768 = vmatprep.subr.bf16.mxu0 %v33080_v16  ;;  %v33128_v15 = vld [vmem:[%s35829_s11 + $0x6d0] sm:$0xff]  }
 0x145   : > { %29790 = vmatprep.subr.bf16.mxu1 %v33082_v19  ;;  %v33127_v16 = vld [vmem:[%s35829_s11 + $0x610] sm:$0xff]   ;;  %v33132_v19 = vld [vmem:[%s35829_s11 + $0x6d8] sm:$0xff]  }
 0x147   : > { %29769 = vmatpush3.bf16.msra.mxu0 %v33081_v20  ;;  %v33131_v20 = vld [vmem:[%s35829_s11 + $0x618] sm:$0xff]  }
 0x148   : > { %29791 = vmatpush3.bf16.msra.mxu1 %v33083_v23  ;;  %29798 = vmatprep.subr.bf16.mxu0 %v33084_v24  ;;  %v33136_v23 = vld [vmem:[%s35829_s11 + $0x6e0] sm:$0xff]  }
 0x149   : > { %29820 = vmatprep.subr.bf16.mxu1 %v33087_v26  ;;  %v33135_v24 = vld [vmem:[%s35829_s11 + $0x620] sm:$0xff]   ;;  %v33138_v26 = vld [vmem:[%s35829_s11 + $0x668] sm:$0xff]  }
 0x14a   : > { %21471 = vmatmul.mubr.bf16.vlgmr.msra.gmra.mrb[16].mxu0 %v2024_v28  ;;  %v33139_v28 = vld [vmem:[%s35829_s11 + $0x628] sm:$0xff]  }
 0x14b   : > { %21511 = vmatmul.mubr.bf16.vlgmr.msra.gmra.mrb[16].mxu1 %v2026_v29  ;;  %29799 = vmatpush3.bf16.msra.mxu0 %v33086_v27  ;;  %v33140_v27 = vld [vmem:[%s35829_s11 + $0x6e8] sm:$0xff]  }
 0x14c   : > { %29821 = vmatpush3.bf16.msra.mxu1 %v33088_v30  ;;  %29800 = vmatprep.subr.bf16.mxu0 %v33089_v31  ;;  %v33141_v29 = vld [vmem:[%s35829_s11 + $0x6a8] sm:$0xff]   ;;  %v33142_v30 = vld [vmem:[%s35829_s11 + $0x670] sm:$0xff]  }
 0x14d   : > { %29822 = vmatprep.subr.bf16.mxu1 %v33091_v32  ;;  %21550 = vmatprep.mubr.bf16.mxu0 %v2029_v0  ;;  %v33144_v31 = vld [vmem:[%s35829_s11 + $0x6f0] sm:$0xff]   ;;  %v33166_v0 = vld [vmem:[%s35829_s11 + $0x798] sm:$0xff]  }
 0x14e   : > { %21590 = vmatprep.mubr.bf16.mxu1 %v2031_v4  ;;  %v33143_v32 = vld [vmem:[%s35829_s11 + $0x630] sm:$0xff]   ;;  %v33170_v4 = vld [vmem:[%s35829_s11 + $0x7a0] sm:$0xff]  }
 0x14f   : > { %29801 = vmatpush3.bf16.msra.mxu0 %v33090_v33  ;;  %v323_v33 = vld [vmem:[%s35822_s13 + $0x30] sm:$0xff] }
 0x150   : > { %29823 = vmatpush3.bf16.msra.mxu1 %v33092_v34  ;;  %29802 = vmatprep.subr.bf16.mxu0 %v33093_v35  ;;  %v33145_v34 = vld [vmem:[%s35829_s11 + $0x6b0] sm:$0xff]   ;;  %v574_v35 = vrot.slane %v323_v33, %v35880_v42 }
 0x151   : > { %29824 = vmatprep.subr.bf16.mxu1 %v33095_v36  ;;  %v567_v36 = vcombine.high %v323_v33, %v323_v33 }
 0x153   : > { %29803 = vmatpush3.bf16.msra.mxu0 %v33094_v37  ;;  %v33146_v37 = vld [vmem:[%s35829_s11 + $0x678] sm:$0xff]  }
 0x154   : > { %29825 = vmatpush3.bf16.msra.mxu1 %v33096_v38  ;;  %29804 = vmatprep.subr.bf16.mxu0 %v33097_v39  ;;  %v33148_v38 = vld [vmem:[%s35829_s11 + $0x6f8] sm:$0xff]   ;;  %v582_v39 = vcombine.high %v574_v35, %v574_v35 }
 0x155   : > { %29826 = vmatprep.subr.bf16.mxu1 %v33099_v40  ;;  %v581_v40 = vrot.slane %v567_v36, %v35880_v42 }
 0x157   : > { %29805 = vmatpush3.bf16.msra.mxu0 %v33098_v41  ;;  %v33147_v41 = vld [vmem:[%s35829_s11 + $0x638] sm:$0xff]  }
 0x158   : > { %29827 = vmatpush3.bf16.msra.mxu1 %v33100_v43  ;;  %29806 = vmatprep.subr.bf16.mxu0 %v33101_v44  ;;  %v2033_v43 = vpack.c.bf16 %v582_v39, %v582_v39  ;;  %v33149_v44 = vld [vmem:[%s35829_s11 + $0x6b8] sm:$0xff]  }
 0x159   : > { %29828 = vmatprep.subr.bf16.mxu1 %v33103_v45  ;;  %v583_v45 = vcombine.high %v581_v40, %v581_v40 }
 0x15b   : > { %29807 = vmatpush3.bf16.msra.mxu0 %v33102_v46  ;;  %v33150_v46 = vld [vmem:[%s35829_s11 + $0x740] sm:$0xff]  }
 0x15c   : > { %29829 = vmatpush3.bf16.msra.mxu1 %v33104_v47  ;;  %29808 = vmatprep.subr.bf16.mxu0 %v33105_v48  ;;  %v2035_v47 = vpack.c.bf16 %v583_v45, %v583_v45  ;;  %v33153_v48 = vld [vmem:[%s35829_s11 + $0x7c0] sm:$0xff]   ;;  %v33189_v45 = vld [vmem:[%s35829_s11 + $0x808] sm:$0xff]  }
 0x15d   : > { %29830 = vmatprep.subr.bf16.mxu1 %v33107_v49  ;;  %v33152_v49 = vld [vmem:[%s35829_s11 + $0x700] sm:$0xff]  }
 0x15f   : > { %29809 = vmatpush3.bf16.msra.mxu0 %v33106_v50  ;;  %v2032_v50 = vpack.c.bf16 %v574_v35, %v574_v35 }
 0x160   : > { %29831 = vmatpush3.bf16.msra.mxu1 %v33108_v51  ;;  %29810 = vmatprep.subr.bf16.mxu0 %v33109_v52  ;;  %v2034_v51 = vpack.c.bf16 %v581_v40, %v581_v40  ;;  %v33154_v52 = vld [vmem:[%s35829_s11 + $0x780] sm:$0xff]  }
 0x161   : > { %29832 = vmatprep.subr.bf16.mxu1 %v33111_v53  ;;  %v33155_v53 = vld [vmem:[%s35829_s11 + $0x748] sm:$0xff]  }
 0x163   : > { %29811 = vmatpush3.bf16.msra.mxu0 %v33110_v55  ;;  %v33156_v55 = vld [vmem:[%s35829_s11 + $0x708] sm:$0xff]  }
 0x164   : > { %29833 = vmatpush3.bf16.msra.mxu1 %v33112_v58  ;;  %29812 = vmatprep.subr.bf16.mxu0 %v33113_v59  ;;  %v33161_v58 = vld [vmem:[%s35829_s11 + $0x7d0] sm:$0xff]  }
 0x165   : > { %29834 = vmatprep.subr.bf16.mxu1 %v33115_v62  ;;  %v33160_v59 = vld [vmem:[%s35829_s11 + $0x710] sm:$0xff]   ;;  %v33165_v62 = vld [vmem:[%s35829_s11 + $0x7d8] sm:$0xff]  }
 0x167   : > { %29813 = vmatpush3.bf16.msra.mxu0 %v33114_v63  ;;  %v33164_v63 = vld [vmem:[%s35829_s11 + $0x718] sm:$0xff]  }
 0x168   : > { %29835 = vmatpush3.bf16.msra.mxu1 %v33116_v2  ;;  %29842 = vmatprep.subr.bf16.mxu0 %v33117_v3  ;;  %v33169_v2 = vld [vmem:[%s35829_s11 + $0x7e0] sm:$0xff]  }
 0x169   : > { %29864 = vmatprep.subr.bf16.mxu1 %v33120_v5  ;;  %v33168_v3 = vld [vmem:[%s35829_s11 + $0x720] sm:$0xff]   ;;  %v33171_v5 = vld [vmem:[%s35829_s11 + $0x768] sm:$0xff]  }
 0x16a   : > { %21551 = vmatmul.mubr.bf16.vlgmr.msra.gmra.mrb[20].mxu0 %v2028_v7  ;;  %v33172_v7 = vld [vmem:[%s35829_s11 + $0x728] sm:$0xff]  }
 0x16b   : > { %21591 = vmatmul.mubr.bf16.vlgmr.msra.gmra.mrb[20].mxu1 %v2030_v8  ;;  %29843 = vmatpush3.bf16.msra.mxu0 %v33119_v6  ;;  %v33173_v6 = vld [vmem:[%s35829_s11 + $0x7e8] sm:$0xff]  }
 0x16c   : > { %29865 = vmatpush3.bf16.msra.mxu1 %v33121_v9  ;;  %29844 = vmatprep.subr.bf16.mxu0 %v33122_v10  ;;  %v33174_v8 = vld [vmem:[%s35829_s11 + $0x7a8] sm:$0xff]   ;;  %v33175_v9 = vld [vmem:[%s35829_s11 + $0x770] sm:$0xff]  }
 0x16d   : > { %29866 = vmatprep.subr.bf16.mxu1 %v33124_v11  ;;  %21630 = vmatprep.mubr.bf16.mxu0 %v2033_v43  ;;  %v33177_v10 = vld [vmem:[%s35829_s11 + $0x7f0] sm:$0xff]   ;;  %v33188_v43 = vld [vmem:[%s35829_s11 + $0x848] sm:$0xff]  }
 0x16e   : > { %21670 = vmatprep.mubr.bf16.mxu1 %v2035_v47  ;;  %v33192_v47 = vld [vmem:[%s35829_s11 + $0x850] sm:$0xff]  }
 0x16f   : > { %29845 = vmatpush3.bf16.msra.mxu0 %v33123_v12 }
 0x170   : > { %29867 = vmatpush3.bf16.msra.mxu1 %v33125_v13  ;;  %29846 = vmatprep.subr.bf16.mxu0 %v33126_v14  ;;  %v324_v13 = vld [vmem:[%s35822_s13 + $0x38] sm:$0xff] }
 0x171   : > { %29868 = vmatprep.subr.bf16.mxu1 %v33128_v15 }
 0x173   : > { %29847 = vmatpush3.bf16.msra.mxu0 %v33127_v16  ;;  %v33176_v16 = vld [vmem:[%s35829_s11 + $0x730] sm:$0xff]  }
 0x174   : > { %29869 = vmatpush3.bf16.msra.mxu1 %v33129_v17  ;;  %29848 = vmatprep.subr.bf16.mxu0 %v33130_v18  ;;  %v33178_v17 = vld [vmem:[%s35829_s11 + $0x7b0] sm:$0xff]   ;;  %v591_v18 = vrot.slane %v324_v13, %v35880_v42 }
 0x175   : > { %29870 = vmatprep.subr.bf16.mxu1 %v33132_v19  ;;  %v584_v19 = vcombine.high %v324_v13, %v324_v13  ;;  %v33212_v13 = vld [vmem:[%s35829_s11 + $0x878] sm:$0xff]  }
 0x176   : > { %v2036_v39 = vpack.c.bf16 %v591_v18, %v591_v18 }
 0x177   : > { %29849 = vmatpush3.bf16.msra.mxu0 %v33131_v20 }
 0x178   : > { %29871 = vmatpush3.bf16.msra.mxu1 %v33133_v21  ;;  %29850 = vmatprep.subr.bf16.mxu0 %v33134_v22 }
 0x179   : > { %29872 = vmatprep.subr.bf16.mxu1 %v33136_v23  ;;  %v33179_v23 = vld [vmem:[%s35829_s11 + $0x778] sm:$0xff]  }
 0x17b   : > { %29851 = vmatpush3.bf16.msra.mxu0 %v33135_v24 }
 0x17c   : > { %29873 = vmatpush3.bf16.msra.mxu1 %v33137_v25  ;;  %29852 = vmatprep.subr.bf16.mxu0 %v33138_v26  ;;  %v33181_v25 = vld [vmem:[%s35829_s11 + $0x7f8] sm:$0xff]   ;;  %v599_v26 = vcombine.high %v591_v18, %v591_v18 }
 0x17d   : > { %29874 = vmatprep.subr.bf16.mxu1 %v33140_v27  ;;  %v598_v27 = vrot.slane %v584_v19, %v35880_v42  ;;  %v33213_v19 = vld [vmem:[%s35829_s11 + $0x838] sm:$0xff]  }
 0x17f   : > { %29853 = vmatpush3.bf16.msra.mxu0 %v33139_v28  ;;  %v2038_v40 = vpack.c.bf16 %v598_v27, %v598_v27 }
 0x180   : > { %29875 = vmatpush3.bf16.msra.mxu1 %v33141_v29  ;;  %29854 = vmatprep.subr.bf16.mxu0 %v33142_v30  ;;  %v33180_v29 = vld [vmem:[%s35829_s11 + $0x738] sm:$0xff]   ;;  %v2037_v30 = vpack.c.bf16 %v599_v26, %v599_v26  ;;  %v33216_v26 = vld [vmem:[%s35829_s11 + $0x940] sm:$0xff]  }
 0x181   : > { %29876 = vmatprep.subr.bf16.mxu1 %v33144_v31  ;;  %v33182_v31 = vld [vmem:[%s35829_s11 + $0x7b8] sm:$0xff]  }
 0x183   : > { %29855 = vmatpush3.bf16.msra.mxu0 %v33143_v32  ;;  %v600_v32 = vcombine.high %v598_v27, %v598_v27 }
 0x184   : > { %29877 = vmatpush3.bf16.msra.mxu1 %v33145_v34  ;;  %29856 = vmatprep.subr.bf16.mxu0 %v33146_v37  ;;  %v33183_v34 = vld [vmem:[%s35829_s11 + $0x840] sm:$0xff]  }
 0x185   : > { %29878 = vmatprep.subr.bf16.mxu1 %v33148_v38  ;;  %v2039_v36 = vpack.c.bf16 %v600_v32, %v600_v32  ;;  %v33186_v37 = vld [vmem:[%s35829_s11 + $0x8c0] sm:$0xff]  }
 0x186   : > { %v33185_v38 = vld [vmem:[%s35829_s11 + $0x800] sm:$0xff]  }
 0x187   : > { %29857 = vmatpush3.bf16.msra.mxu0 %v33147_v41  ;;  %v33187_v41 = vld [vmem:[%s35829_s11 + $0x880] sm:$0xff]  }
 0x188   : > { %29879 = vmatpush3.bf16.msra.mxu1 %v33149_v44  ;;  %29886 = vmatprep.subr.bf16.mxu0 %v33150_v46  ;;  %v33190_v44 = vld [vmem:[%s35829_s11 + $0x8c8] sm:$0xff]   ;;  %v33220_v32 = vld [vmem:[%s35829_s11 + $0x980] sm:$0xff]  }
 0x189   : > { %29908 = vmatprep.subr.bf16.mxu1 %v33153_v48  ;;  %v33191_v46 = vld [vmem:[%s35829_s11 + $0x888] sm:$0xff]   ;;  %v33194_v48 = vld [vmem:[%s35829_s11 + $0x8d0] sm:$0xff]  }
 0x18a   : > { %21631 = vmatmul.mubr.bf16.vlgmr.msra.gmra.mrb[24].mxu0 %v2032_v50  ;;  %v33195_v50 = vld [vmem:[%s35829_s11 + $0x890] sm:$0xff]  }
 0x18b   : > { %21671 = vmatmul.mubr.bf16.vlgmr.msra.gmra.mrb[24].mxu1 %v2034_v51  ;;  %29887 = vmatpush3.bf16.msra.mxu0 %v33152_v49  ;;  %v33193_v49 = vld [vmem:[%s35829_s11 + $0x810] sm:$0xff]   ;;  %v33196_v51 = vld [vmem:[%s35829_s11 + $0x858] sm:$0xff]  }
 0x18c   : > { %29909 = vmatpush3.bf16.msra.mxu1 %v33154_v52  ;;  %29888 = vmatprep.subr.bf16.mxu0 %v33155_v53  ;;  %v33198_v52 = vld [vmem:[%s35829_s11 + $0x8d8] sm:$0xff]  }
 0x18d   : > { %29910 = vmatprep.subr.bf16.mxu1 %v33157_v54  ;;  %21710 = vmatprep.mubr.bf16.mxu0 %v2037_v30  ;;  %v33197_v53 = vld [vmem:[%s35829_s11 + $0x818] sm:$0xff]  }
 0x18e   : > { %21750 = vmatprep.mubr.bf16.mxu1 %v2039_v36  ;;  %v33199_v54 = vld [vmem:[%s35829_s11 + $0x898] sm:$0xff]   ;;  %v33224_v36 = vld [vmem:[%s35829_s11 + $0x988] sm:$0xff]  }
 0x18f   : > { %29889 = vmatpush3.bf16.msra.mxu0 %v33156_v55  ;;  %v33200_v55 = vld [vmem:[%s35829_s11 + $0x860] sm:$0xff]  }
 0x190   : > { %29911 = vmatpush3.bf16.msra.mxu1 %v33158_v56  ;;  %29890 = vmatprep.subr.bf16.mxu0 %v33159_v57  ;;  %v33202_v56 = vld [vmem:[%s35829_s11 + $0x8e0] sm:$0xff]  }
 0x191   : > { %29912 = vmatprep.subr.bf16.mxu1 %v33161_v58  ;;  %v33201_v57 = vld [vmem:[%s35829_s11 + $0x820] sm:$0xff]  }
 0x192   : > { %v33203_v58 = vld [vmem:[%s35829_s11 + $0x8a0] sm:$0xff]  }
 0x193   : > { %29891 = vmatpush3.bf16.msra.mxu0 %v33160_v59  ;;  %v33204_v59 = vld [vmem:[%s35829_s11 + $0x868] sm:$0xff]  }
 0x194   : > { %29913 = vmatpush3.bf16.msra.mxu1 %v33162_v60  ;;  %29892 = vmatprep.subr.bf16.mxu0 %v33163_v61  ;;  %v33206_v60 = vld [vmem:[%s35829_s11 + $0x8e8] sm:$0xff]  }
 0x195   : > { %29914 = vmatprep.subr.bf16.mxu1 %v33165_v62  ;;  %v33205_v61 = vld [vmem:[%s35829_s11 + $0x828] sm:$0xff]  }
 0x196   : > { %v33207_v62 = vld [vmem:[%s35829_s11 + $0x8a8] sm:$0xff]  }
 0x197   : > { %29893 = vmatpush3.bf16.msra.mxu0 %v33164_v63  ;;  %v33208_v63 = vld [vmem:[%s35829_s11 + $0x870] sm:$0xff]  }
 0x198   : > { %29915 = vmatpush3.bf16.msra.mxu1 %v33166_v0  ;;  %29894 = vmatprep.subr.bf16.mxu0 %v33167_v1  ;;  %v33210_v0 = vld [vmem:[%s35829_s11 + $0x8f0] sm:$0xff]  }
 0x199   : > { %29916 = vmatprep.subr.bf16.mxu1 %v33169_v2 }
 0x19b   : > { %29895 = vmatpush3.bf16.msra.mxu0 %v33168_v3  ;;  %v33209_v3 = vld [vmem:[%s35829_s11 + $0x830] sm:$0xff]  }
 0x19c   : > { %29917 = vmatpush3.bf16.msra.mxu1 %v33170_v4  ;;  %29896 = vmatprep.subr.bf16.mxu0 %v33171_v5  ;;  %v33211_v4 = vld [vmem:[%s35829_s11 + $0x8b0] sm:$0xff]  }
 0x19d   : > { %29918 = vmatprep.subr.bf16.mxu1 %v33173_v6  ;;  %v29594_v11 = vpop.f32.mrb[0].mxu0  ;;  %v325_v5 = vld [vmem:[%s35822_s13 + $0x40] sm:$0xff] }
 0x19e   : > { %v29616_v12 = vpop.f32.mrb[0].mxu1  ;;  %v29595_v14 = vpop.f32.mrb[1].mxu0 }
 0x19f   : > { %v29617_v15 = vpop.f32.mrb[1].mxu1  ;;  %v29596_v20 = vadd.f32 %v29595_v14, %v29594_v11  ;;  %v29597_v22 = vpop.f32.mrb[2].mxu0  ;;  %29897 = vmatpush3.bf16.msra.mxu0 %v33172_v7 }
 0x1a0   : > { %v29618_v21 = vadd.f32 %v29617_v15, %v29616_v12  ;;  %29919 = vmatpush3.bf16.msra.mxu1 %v33174_v8  ;;  %v29598_v24 = vpop.f32.mrb[3].mxu0  ;;  %29898 = vmatprep.subr.bf16.mxu0 %v33175_v9  ;;  %v29619_v33 = vpop.f32.mrb[2].mxu1  ;;  %v608_v8 = vrot.slane %v325_v5, %v35880_v42  ;;  %v601_v9 = vcombine.high %v325_v5, %v325_v5  ;;  %v33214_v15 = vld [vmem:[%s35829_s11 + $0x8f8] sm:$0xff]  }
 0x1a1   : > { %29920 = vmatprep.subr.bf16.mxu1 %v33177_v10  ;;  %v29620_v35 = vpop.f32.mrb[3].mxu1  ;;  %v33215_v22 = vld [vmem:[%s35829_s11 + $0x8b8] sm:$0xff]   ;;  %v33221_v33 = vld [vmem:[%s35829_s11 + $0x948] sm:$0xff]  }
 0x1a2   : > { %v36125_v28 = vadd.f32 %v29618_v21, %v29596_v20  ;;  %v2040_v30 = vpack.c.bf16 %v608_v8, %v608_v8  ;;  %v33222_v35 = vld [vmem:[%s35829_s11 + $0x908] sm:$0xff]   ;;  %v33247_v5 = vld [vmem:[%s35829_s11 + $0x9f8] sm:$0xff]  }
 0x1a3   : > { %29899 = vmatpush3.bf16.msra.mxu0 %v33176_v16  ;;  %v616_v16 = vcombine.high %v608_v8, %v608_v8 }
 0x1a4   : > { %29921 = vmatpush3.bf16.msra.mxu1 %v33178_v17  ;;  %29900 = vmatprep.subr.bf16.mxu0 %v33179_v23  ;;  %v615_v17 = vrot.slane %v601_v9, %v35880_v42  ;;  %v33246_v9 = vld [vmem:[%s35829_s11 + $0x938] sm:$0xff]  }
 0x1a5   : > { %29922 = vmatprep.subr.bf16.mxu1 %v33181_v25  ;;  %v2041_v21 = vpack.c.bf16 %v616_v16, %v616_v16  ;;  %v33249_v16 = vld [vmem:[%s35829_s11 + $0xa40] sm:$0xff]  }
 0x1a6   : > { %v617_v23 = vcombine.high %v615_v17, %v615_v17 }
 0x1a7   : > { %29901 = vmatpush3.bf16.msra.mxu0 %v33180_v29  ;;  %v33218_v29 = vld [vmem:[%s35829_s11 + $0x900] sm:$0xff]  }
 0x1a8   : > { %29923 = vmatpush3.bf16.msra.mxu1 %v33182_v31  ;;  %29930 = vmatprep.subr.bf16.mxu0 %v33183_v34  ;;  %v2043_v27 = vpack.c.bf16 %v617_v23, %v617_v23  ;;  %v2042_v31 = vpack.c.bf16 %v615_v17, %v615_v17  ;;  %v33223_v34 = vld [vmem:[%s35829_s11 + $0x9c8] sm:$0xff]   ;;  %v33253_v23 = vld [vmem:[%s35829_s11 + $0xa80] sm:$0xff]  }
 0x1a9   : > { %29952 = vmatprep.subr.bf16.mxu1 %v33186_v37  ;;  %v33225_v37 = vld [vmem:[%s35829_s11 + $0x950] sm:$0xff]  }
 0x1aa   : > { %21711 = vmatmul.mubr.bf16.vlgmr.msra.gmra.mrb[28].mxu0 %v2036_v39  ;;  %v33226_v39 = vld [vmem:[%s35829_s11 + $0x910] sm:$0xff]  }
 0x1ab   : > { %21751 = vmatmul.mubr.bf16.vlgmr.msra.gmra.mrb[28].mxu1 %v2038_v40  ;;  %29931 = vmatpush3.bf16.msra.mxu0 %v33185_v38  ;;  %v33227_v38 = vld [vmem:[%s35829_s11 + $0x9d0] sm:$0xff]  }
 0x1ac   : > { %29953 = vmatpush3.bf16.msra.mxu1 %v33187_v41  ;;  %29932 = vmatprep.subr.bf16.mxu0 %v33188_v43  ;;  %v33228_v40 = vld [vmem:[%s35829_s11 + $0x990] sm:$0xff]   ;;  %v33229_v41 = vld [vmem:[%s35829_s11 + $0x958] sm:$0xff]  }
 0x1ad   : > { %29954 = vmatprep.subr.bf16.mxu1 %v33190_v44  ;;  %21790 = vmatprep.mubr.bf16.mxu0 %v2041_v21  ;;  %v33231_v43 = vld [vmem:[%s35829_s11 + $0x9d8] sm:$0xff]  }
 0x1ae   : > { %21830 = vmatprep.mubr.bf16.mxu1 %v2043_v27  ;;  %v33230_v44 = vld [vmem:[%s35829_s11 + $0x918] sm:$0xff]   ;;  %v33257_v27 = vld [vmem:[%s35829_s11 + $0xa88] sm:$0xff]  }
 0x1af   : > { %29933 = vmatpush3.bf16.msra.mxu0 %v33189_v45  ;;  %v33232_v45 = vld [vmem:[%s35829_s11 + $0x998] sm:$0xff]  }
 0x1b0   : > { %29955 = vmatpush3.bf16.msra.mxu1 %v33191_v46  ;;  %29934 = vmatprep.subr.bf16.mxu0 %v33192_v47  ;;  %v33233_v46 = vld [vmem:[%s35829_s11 + $0x960] sm:$0xff]  }
 0x1b1   : > { %29956 = vmatprep.subr.bf16.mxu1 %v33194_v48  ;;  %v33235_v47 = vld [vmem:[%s35829_s11 + $0x9e0] sm:$0xff]  }
 0x1b2   : > { %v33234_v48 = vld [vmem:[%s35829_s11 + $0x920] sm:$0xff]  }
 0x1b3   : > { %29935 = vmatpush3.bf16.msra.mxu0 %v33193_v49  ;;  %v33236_v49 = vld [vmem:[%s35829_s11 + $0x9a0] sm:$0xff]  }
 0x1b4   : > { %29957 = vmatpush3.bf16.msra.mxu1 %v33195_v50  ;;  %29936 = vmatprep.subr.bf16.mxu0 %v33196_v51  ;;  %v33237_v50 = vld [vmem:[%s35829_s11 + $0x968] sm:$0xff]  }
 0x1b5   : > { %29958 = vmatprep.subr.bf16.mxu1 %v33198_v52  ;;  %v33239_v51 = vld [vmem:[%s35829_s11 + $0x9e8] sm:$0xff]  }
 0x1b6   : > { %v33238_v52 = vld [vmem:[%s35829_s11 + $0x928] sm:$0xff]  }
 0x1b7   : > { %29937 = vmatpush3.bf16.msra.mxu0 %v33197_v53  ;;  %v33240_v53 = vld [vmem:[%s35829_s11 + $0x9a8] sm:$0xff]  }
 0x1b8   : > { %29959 = vmatpush3.bf16.msra.mxu1 %v33199_v54  ;;  %29938 = vmatprep.subr.bf16.mxu0 %v33200_v55  ;;  %v33241_v54 = vld [vmem:[%s35829_s11 + $0x970] sm:$0xff]  }
 0x1b9   : > { %29960 = vmatprep.subr.bf16.mxu1 %v33202_v56  ;;  %v33243_v55 = vld [vmem:[%s35829_s11 + $0x9f0] sm:$0xff]  }
 0x1bb   : > { %29939 = vmatpush3.bf16.msra.mxu0 %v33201_v57 }
 0x1bc   : > { %29961 = vmatpush3.bf16.msra.mxu1 %v33203_v58  ;;  %29940 = vmatprep.subr.bf16.mxu0 %v33204_v59  ;;  %v33242_v58 = vld [vmem:[%s35829_s11 + $0x930] sm:$0xff]  }
 0x1bd   : > { %29962 = vmatprep.subr.bf16.mxu1 %v33206_v60  ;;  %v29638_v1 = vpop.f32.mrb[4].mxu0 }
 0x1be   : > { %v29660_v2 = vpop.f32.mrb[4].mxu1  ;;  %v29639_v6 = vpop.f32.mrb[5].mxu0 }
 0x1bf   : > { %v29661_v7 = vpop.f32.mrb[5].mxu1  ;;  %v29640_v10 = vadd.f32 %v29639_v6, %v29638_v1  ;;  %v29641_v11 = vpop.f32.mrb[6].mxu0  ;;  %29941 = vmatpush3.bf16.msra.mxu0 %v33205_v61  ;;  %v33244_v61 = vld [vmem:[%s35829_s11 + $0x9b0] sm:$0xff]  }
 0x1c0   : > { %v29662_v12 = vadd.f32 %v29661_v7, %v29660_v2  ;;  %29963 = vmatpush3.bf16.msra.mxu1 %v33207_v62  ;;  %v29642_v14 = vpop.f32.mrb[7].mxu0  ;;  %29942 = vmatprep.subr.bf16.mxu0 %v33208_v63  ;;  %v29663_v20 = vpop.f32.mrb[6].mxu1  ;;  %v326_v62 = vld [vmem:[%s35822_s13 + $0x48] sm:$0xff] }
 0x1c1   : > { %29964 = vmatprep.subr.bf16.mxu1 %v33210_v0  ;;  %v21233_v18 = vadd.f32 %v29640_v10, %v36125_v28  ;;  %v29664_v24 = vpop.f32.mrb[7].mxu1  ;;  %v33219_v28 = vld [vmem:[%s35829_s11 + $0x9c0] sm:$0xff]   ;;  %v33245_v2 = vld [vmem:[%s35829_s11 + $0x978] sm:$0xff]   ;;  %v618_v6 = vcombine.high %v326_v62, %v326_v62 }
 0x1c2   : > { %v33248_v14 = vld [vmem:[%s35829_s11 + $0x9b8] sm:$0xff]   ;;  %v33254_v24 = vld [vmem:[%s35829_s11 + $0xa48] sm:$0xff]  }
 0x1c3   : > { %v36165_v25 = vadd.f32 %v29662_v12, %v21233_v18  ;;  %29943 = vmatpush3.bf16.msra.mxu0 %v33209_v3  ;;  %v625_v3 = vrot.slane %v326_v62, %v35880_v42  ;;  %v632_v10 = vrot.slane %v618_v6, %v35880_v42  ;;  %v33251_v18 = vld [vmem:[%s35829_s11 + $0xa00] sm:$0xff]  }
 0x1c4   : > { %29965 = vmatpush3.bf16.msra.mxu1 %v33211_v4  ;;  %29944 = vmatprep.subr.bf16.mxu0 %v33212_v13 }
 0x1c5   : > { %29966 = vmatprep.subr.bf16.mxu1 %v33214_v15  ;;  %v633_v8 = vcombine.high %v625_v3, %v625_v3  ;;  %v634_v17 = vcombine.high %v632_v10, %v632_v10  ;;  %v2044_v20 = vpack.c.bf16 %v625_v3, %v625_v3 }
 0x1c7   : > { %29945 = vmatpush3.bf16.msra.mxu0 %v33213_v19  ;;  %v2045_v13 = vpack.c.bf16 %v633_v8, %v633_v8  ;;  %v33252_v19 = vld [vmem:[%s35829_s11 + $0xac0] sm:$0xff]   ;;  %v2047_v21 = vpack.c.bf16 %v634_v17, %v634_v17  ;;  %v33288_v17 = vld [vmem:[%s35829_s11 + $0xb08] sm:$0xff]  }
 0x1c8   : > { %29967 = vmatpush3.bf16.msra.mxu1 %v33215_v22  ;;  %29974 = vmatprep.subr.bf16.mxu0 %v33216_v26  ;;  %v2046_v22 = vpack.c.bf16 %v632_v10, %v632_v10  ;;  %v33255_v26 = vld [vmem:[%s35829_s11 + $0xa08] sm:$0xff]   ;;  %v33285_v10 = vld [vmem:[%s35829_s11 + $0xbc0] sm:$0xff]  }
 0x1c9   : > { %29996 = vmatprep.subr.bf16.mxu1 %v33219_v28  ;;  %v33258_v28 = vld [vmem:[%s35829_s11 + $0xa50] sm:$0xff]  }
 0x1ca   : > { %21791 = vmatmul.mubr.bf16.vlgmr.msra.gmra.mrb[32].mxu0 %v2040_v30  ;;  %v33259_v30 = vld [vmem:[%s35829_s11 + $0xa10] sm:$0xff]  }
 0x1cb   : > { %21831 = vmatmul.mubr.bf16.vlgmr.msra.gmra.mrb[32].mxu1 %v2042_v31  ;;  %29975 = vmatpush3.bf16.msra.mxu0 %v33218_v29  ;;  %v33260_v29 = vld [vmem:[%s35829_s11 + $0xad0] sm:$0xff]  }
 0x1cc   : > { %29997 = vmatpush3.bf16.msra.mxu1 %v33220_v32  ;;  %29976 = vmatprep.subr.bf16.mxu0 %v33221_v33  ;;  %v33261_v31 = vld [vmem:[%s35829_s11 + $0xa90] sm:$0xff]   ;;  %v33262_v32 = vld [vmem:[%s35829_s11 + $0xa58] sm:$0xff]  }
 0x1cd   : > { %29998 = vmatprep.subr.bf16.mxu1 %v33223_v34  ;;  %21870 = vmatprep.mubr.bf16.mxu0 %v2045_v13  ;;  %v33264_v33 = vld [vmem:[%s35829_s11 + $0xad8] sm:$0xff]  }
 0x1ce   : > { %21910 = vmatprep.mubr.bf16.mxu1 %v2047_v21  ;;  %v33263_v34 = vld [vmem:[%s35829_s11 + $0xa18] sm:$0xff]   ;;  %v33292_v21 = vld [vmem:[%s35829_s11 + $0xb10] sm:$0xff]  }
 0x1cf   : > { %29977 = vmatpush3.bf16.msra.mxu0 %v33222_v35  ;;  %v33265_v35 = vld [vmem:[%s35829_s11 + $0xa98] sm:$0xff]  }
 0x1d0   : > { %29999 = vmatpush3.bf16.msra.mxu1 %v33224_v36  ;;  %29978 = vmatprep.subr.bf16.mxu0 %v33225_v37  ;;  %v33266_v36 = vld [vmem:[%s35829_s11 + $0xa60] sm:$0xff]  }
 0x1d1   : > { %30000 = vmatprep.subr.bf16.mxu1 %v33227_v38  ;;  %v33268_v37 = vld [vmem:[%s35829_s11 + $0xae0] sm:$0xff]  }
 0x1d2   : > { %v33267_v38 = vld [vmem:[%s35829_s11 + $0xa20] sm:$0xff]  }
 0x1d3   : > { %29979 = vmatpush3.bf16.msra.mxu0 %v33226_v39  ;;  %v33269_v39 = vld [vmem:[%s35829_s11 + $0xaa0] sm:$0xff]  }
 0x1d4   : > { %30001 = vmatpush3.bf16.msra.mxu1 %v33228_v40  ;;  %29980 = vmatprep.subr.bf16.mxu0 %v33229_v41  ;;  %v33270_v40 = vld [vmem:[%s35829_s11 + $0xa68] sm:$0xff]  }
 0x1d5   : > { %30002 = vmatprep.subr.bf16.mxu1 %v33231_v43  ;;  %v33272_v41 = vld [vmem:[%s35829_s11 + $0xae8] sm:$0xff]  }
 0x1d6   : > { %v33271_v43 = vld [vmem:[%s35829_s11 + $0xa28] sm:$0xff]  }
 0x1d7   : > { %29981 = vmatpush3.bf16.msra.mxu0 %v33230_v44  ;;  %v33273_v44 = vld [vmem:[%s35829_s11 + $0xaa8] sm:$0xff]  }
 0x1d8   : > { %30003 = vmatpush3.bf16.msra.mxu1 %v33232_v45  ;;  %29982 = vmatprep.subr.bf16.mxu0 %v33233_v46  ;;  %v33274_v45 = vld [vmem:[%s35829_s11 + $0xa70] sm:$0xff]  }
 0x1d9   : > { %30004 = vmatprep.subr.bf16.mxu1 %v33235_v47  ;;  %v33276_v46 = vld [vmem:[%s35829_s11 + $0xaf0] sm:$0xff]  }
 0x1db   : > { %29983 = vmatpush3.bf16.msra.mxu0 %v33234_v48 }
 0x1dc   : > { %30005 = vmatpush3.bf16.msra.mxu1 %v33236_v49  ;;  %29984 = vmatprep.subr.bf16.mxu0 %v33237_v50  ;;  %v33275_v49 = vld [vmem:[%s35829_s11 + $0xa30] sm:$0xff]  }
 0x1dd   : > { %30006 = vmatprep.subr.bf16.mxu1 %v33239_v51  ;;  %v29682_v56 = vpop.f32.mrb[8].mxu0  ;;  %v33277_v50 = vld [vmem:[%s35829_s11 + $0xab0] sm:$0xff]  }
 0x1de   : > { %v29704_v57 = vpop.f32.mrb[8].mxu1  ;;  %v29683_v59 = vpop.f32.mrb[9].mxu0 }
 0x1df   : > { %v29705_v60 = vpop.f32.mrb[9].mxu1  ;;  %v29684_v63 = vadd.f32 %v29683_v59, %v29682_v56  ;;  %v29685_v0 = vpop.f32.mrb[10].mxu0  ;;  %29985 = vmatpush3.bf16.msra.mxu0 %v33238_v52  ;;  %v33280_v59 = vld [vmem:[%s35829_s11 + $0xaf8] sm:$0xff]  }
 0x1e0   : > { %v29706_v1 = vadd.f32 %v29705_v60, %v29704_v57  ;;  %30007 = vmatpush3.bf16.msra.mxu1 %v33240_v53  ;;  %v29686_v4 = vpop.f32.mrb[11].mxu0  ;;  %29986 = vmatprep.subr.bf16.mxu0 %v33241_v54  ;;  %v29707_v11 = vpop.f32.mrb[10].mxu1  ;;  %v33278_v53 = vld [vmem:[%s35829_s11 + $0xa78] sm:$0xff]  }
 0x1e1   : > { %30008 = vmatprep.subr.bf16.mxu1 %v33243_v55  ;;  %v21313_v7 = vadd.f32 %v29684_v63, %v36165_v25  ;;  %v29708_v15 = vpop.f32.mrb[11].mxu1  ;;  %v33256_v25 = vld [vmem:[%s35829_s11 + $0xac8] sm:$0xff]   ;;  %v33279_v0 = vld [vmem:[%s35829_s11 + $0xa38] sm:$0xff]  }
 0x1e2   : > { %v327_v57 = vld [vmem:[%s35822_s13 + $0x50] sm:$0xff] }
 0x1e3   : > { %v36202_v12 = vadd.f32 %v29706_v1, %v21313_v7  ;;  %29987 = vmatpush3.bf16.msra.mxu0 %v33242_v58  ;;  %v642_v60 = vrot.slane %v327_v57, %v35880_v42  ;;  %v33282_v7 = vld [vmem:[%s35829_s11 + $0xb40] sm:$0xff]   ;;  %v33287_v15 = vld [vmem:[%s35829_s11 + $0xb48] sm:$0xff]  }
 0x1e4   : > { %30009 = vmatpush3.bf16.msra.mxu1 %v33244_v61  ;;  %29988 = vmatprep.subr.bf16.mxu0 %v33245_v2  ;;  %v635_v61 = vcombine.high %v327_v57, %v327_v57 }
 0x1e5   : > { %30010 = vmatprep.subr.bf16.mxu1 %v33247_v5  ;;  %v650_v1 = vcombine.high %v642_v60, %v642_v60  ;;  %v33281_v5 = vld [vmem:[%s35829_s11 + $0xab8] sm:$0xff]   ;;  %v2048_v11 = vpack.c.bf16 %v642_v60, %v642_v60 }
 0x1e6   : > { %v649_v2 = vrot.slane %v635_v61, %v35880_v42  ;;  %v33314_v60 = vld [vmem:[%s35829_s11 + $0xbb8] sm:$0xff]  }
 0x1e7   : > { %29989 = vmatpush3.bf16.msra.mxu0 %v33246_v9  ;;  %v2049_v6 = vpack.c.bf16 %v650_v1, %v650_v1  ;;  %v33284_v9 = vld [vmem:[%s35829_s11 + $0xb00] sm:$0xff]  }
 0x1e8   : > { %30011 = vmatpush3.bf16.msra.mxu1 %v33248_v14  ;;  %30018 = vmatprep.subr.bf16.mxu0 %v33249_v16  ;;  %v651_v8 = vcombine.high %v649_v2, %v649_v2  ;;  %v2050_v13 = vpack.c.bf16 %v649_v2, %v649_v2  ;;  %v33286_v14 = vld [vmem:[%s35829_s11 + $0xb80] sm:$0xff]   ;;  %v33289_v16 = vld [vmem:[%s35829_s11 + $0xbc8] sm:$0xff]  }
 0x1e9   : > { %30040 = vmatprep.subr.bf16.mxu1 %v33252_v19  ;;  %v33291_v19 = vld [vmem:[%s35829_s11 + $0xb50] sm:$0xff]   ;;  %v33318_v1 = vld [vmem:[%s35829_s11 + $0xcc0] sm:$0xff]  }
 0x1ea   : > { %21871 = vmatmul.mubr.bf16.vlgmr.msra.gmra.mrb[36].mxu0 %v2044_v20  ;;  %v33293_v20 = vld [vmem:[%s35829_s11 + $0xbd0] sm:$0xff]  }
 0x1eb   : > { %21911 = vmatmul.mubr.bf16.vlgmr.msra.gmra.mrb[36].mxu1 %v2046_v22  ;;  %30019 = vmatpush3.bf16.msra.mxu0 %v33251_v18  ;;  %v33290_v18 = vld [vmem:[%s35829_s11 + $0xb88] sm:$0xff]   ;;  %v33294_v22 = vld [vmem:[%s35829_s11 + $0xb90] sm:$0xff]  }
 0x1ec   : > { %30041 = vmatpush3.bf16.msra.mxu1 %v33253_v23  ;;  %30020 = vmatprep.subr.bf16.mxu0 %v33254_v24  ;;  %v33295_v23 = vld [vmem:[%s35829_s11 + $0xb58] sm:$0xff]  }
 0x1ed   : > { %30042 = vmatprep.subr.bf16.mxu1 %v33256_v25  ;;  %21950 = vmatprep.mubr.bf16.mxu0 %v2049_v6  ;;  %v33297_v24 = vld [vmem:[%s35829_s11 + $0xbd8] sm:$0xff]   ;;  %v33320_v6 = vld [vmem:[%s35829_s11 + $0xc48] sm:$0xff]  }
 0x1ee   : > { %v33296_v25 = vld [vmem:[%s35829_s11 + $0xb18] sm:$0xff]  }
 0x1ef   : > { %30021 = vmatpush3.bf16.msra.mxu0 %v33255_v26  ;;  %v33298_v26 = vld [vmem:[%s35829_s11 + $0xb98] sm:$0xff]  }
 0x1f0   : > { %30043 = vmatpush3.bf16.msra.mxu1 %v33257_v27  ;;  %30022 = vmatprep.subr.bf16.mxu0 %v33258_v28  ;;  %v33299_v27 = vld [vmem:[%s35829_s11 + $0xb60] sm:$0xff]  }
 0x1f1   : > { %30044 = vmatprep.subr.bf16.mxu1 %v33260_v29  ;;  %v33301_v28 = vld [vmem:[%s35829_s11 + $0xbe0] sm:$0xff]  }
 0x1f2   : > { %v33300_v29 = vld [vmem:[%s35829_s11 + $0xb20] sm:$0xff]  }
 0x1f3   : > { %30023 = vmatpush3.bf16.msra.mxu0 %v33259_v30  ;;  %v33302_v30 = vld [vmem:[%s35829_s11 + $0xba0] sm:$0xff]  }
 0x1f4   : > { %30045 = vmatpush3.bf16.msra.mxu1 %v33261_v31  ;;  %30024 = vmatprep.subr.bf16.mxu0 %v33262_v32  ;;  %v33303_v31 = vld [vmem:[%s35829_s11 + $0xb68] sm:$0xff]  }
 0x1f5   : > { %30046 = vmatprep.subr.bf16.mxu1 %v33264_v33  ;;  %v33305_v32 = vld [vmem:[%s35829_s11 + $0xbe8] sm:$0xff]  }
 0x1f6   : > { %v33304_v33 = vld [vmem:[%s35829_s11 + $0xb28] sm:$0xff]  }
 0x1f7   : > { %30025 = vmatpush3.bf16.msra.mxu0 %v33263_v34  ;;  %v33306_v34 = vld [vmem:[%s35829_s11 + $0xba8] sm:$0xff]  }
 0x1f8   : > { %30047 = vmatpush3.bf16.msra.mxu1 %v33265_v35  ;;  %30026 = vmatprep.subr.bf16.mxu0 %v33266_v36  ;;  %v33307_v35 = vld [vmem:[%s35829_s11 + $0xb70] sm:$0xff]  }
 0x1f9   : > { %30048 = vmatprep.subr.bf16.mxu1 %v33268_v37  ;;  %v33309_v36 = vld [vmem:[%s35829_s11 + $0xbf0] sm:$0xff]  }
 0x1fb   : > { %30027 = vmatpush3.bf16.msra.mxu0 %v33267_v38 }
 0x1fc   : > { %30049 = vmatpush3.bf16.msra.mxu1 %v33269_v39  ;;  %30028 = vmatprep.subr.bf16.mxu0 %v33270_v40  ;;  %v33308_v39 = vld [vmem:[%s35829_s11 + $0xb30] sm:$0xff]  }
 0x1fd   : > { %30050 = vmatprep.subr.bf16.mxu1 %v33272_v41  ;;  %v29726_v47 = vpop.f32.mrb[12].mxu0  ;;  %v33310_v40 = vld [vmem:[%s35829_s11 + $0xbb0] sm:$0xff]  }
 0x1fe   : > { %v29748_v48 = vpop.f32.mrb[12].mxu1  ;;  %v29727_v51 = vpop.f32.mrb[13].mxu0 }
 0x1ff   : > { %v29749_v52 = vpop.f32.mrb[13].mxu1  ;;  %v29728_v54 = vadd.f32 %v29727_v51, %v29726_v47  ;;  %v29729_v55 = vpop.f32.mrb[14].mxu0  ;;  %30029 = vmatpush3.bf16.msra.mxu0 %v33271_v43  ;;  %v33311_v47 = vld [vmem:[%s35829_s11 + $0xb78] sm:$0xff]  }
 0x200   : > { %v29750_v56 = vadd.f32 %v29749_v52, %v29748_v48  ;;  %30051 = vmatpush3.bf16.msra.mxu1 %v33273_v44  ;;  %v29730_v58 = vpop.f32.mrb[15].mxu0  ;;  %30030 = vmatprep.subr.bf16.mxu0 %v33274_v45  ;;  %v29751_v63 = vpop.f32.mrb[14].mxu1  ;;  %v328_v48 = vld [vmem:[%s35822_s13 + $0x58] sm:$0xff]  ;;  %v33313_v51 = vld [vmem:[%s35829_s11 + $0xbf8] sm:$0xff]  }
 0x201   : > { %30052 = vmatprep.subr.bf16.mxu1 %v33276_v46  ;;  %v21393_v62 = vadd.f32 %v29728_v54, %v36202_v12  ;;  %v29752_v3 = vpop.f32.mrb[15].mxu1  ;;  %v2051_v12 = vpack.c.bf16 %v651_v8, %v651_v8  ;;  %v659_v52 = vrot.slane %v328_v48, %v35880_v42  ;;  %v33321_v8 = vld [vmem:[%s35829_s11 + $0xc08] sm:$0xff]  }
 0x203   : > { %v36240_v4 = vadd.f32 %v29750_v56, %v21393_v62  ;;  %30031 = vmatpush3.bf16.msra.mxu0 %v33275_v49  ;;  %21990 = vmatprep.mubr.bf16.mxu1 %v2051_v12  ;;  %v33312_v56 = vld [vmem:[%s35829_s11 + $0xb38] sm:$0xff]   ;;  %v667_v57 = vcombine.high %v659_v52, %v659_v52  ;;  %v33315_v62 = vld [vmem:[%s35829_s11 + $0xc40] sm:$0xff]   ;;  %v2052_v2 = vpack.c.bf16 %v659_v52, %v659_v52  ;;  %v33325_v12 = vld [vmem:[%s35829_s11 + $0xc10] sm:$0xff]  }
 0x204   : > { %30053 = vmatpush3.bf16.msra.mxu1 %v33277_v50  ;;  %30032 = vmatprep.subr.bf16.mxu0 %v33278_v53  ;;  %v652_v53 = vcombine.high %v328_v48, %v328_v48 }
 0x205   : > { %30054 = vmatprep.subr.bf16.mxu1 %v33280_v59  ;;  %v2053_v61 = vpack.c.bf16 %v667_v57, %v667_v57  ;;  %v33350_v57 = vld [vmem:[%s35829_s11 + $0xd00] sm:$0xff]  }
 0x206   : > { %v666_v58 = vrot.slane %v652_v53, %v35880_v42 }
 0x207   : > { %30033 = vmatpush3.bf16.msra.mxu0 %v33279_v0  ;;  %v33317_v0 = vld [vmem:[%s35829_s11 + $0xc00] sm:$0xff]  }
 0x208   : > { %30055 = vmatpush3.bf16.msra.mxu1 %v33281_v5  ;;  %30062 = vmatprep.subr.bf16.mxu0 %v33282_v7  ;;  %v668_v63 = vcombine.high %v666_v58, %v666_v58  ;;  %v33319_v5 = vld [vmem:[%s35829_s11 + $0xc80] sm:$0xff]   ;;  %v33322_v7 = vld [vmem:[%s35829_s11 + $0xcc8] sm:$0xff]  }
 0x209   : > { %30084 = vmatprep.subr.bf16.mxu1 %v33285_v10  ;;  %v33324_v10 = vld [vmem:[%s35829_s11 + $0xc50] sm:$0xff]  }
 0x20a   : > { %21951 = vmatmul.mubr.bf16.vlgmr.msra.gmra.mrb[40].mxu0 %v2048_v11  ;;  %v2055_v3 = vpack.c.bf16 %v668_v63, %v668_v63  ;;  %v33326_v11 = vld [vmem:[%s35829_s11 + $0xcd0] sm:$0xff]   ;;  %v33354_v63 = vld [vmem:[%s35829_s11 + $0xd08] sm:$0xff]  }
 0x20b   : > { %21991 = vmatmul.mubr.bf16.vlgmr.msra.gmra.mrb[40].mxu1 %v2050_v13  ;;  %30063 = vmatpush3.bf16.msra.mxu0 %v33284_v9  ;;  %v33323_v9 = vld [vmem:[%s35829_s11 + $0xc88] sm:$0xff]   ;;  %v33327_v13 = vld [vmem:[%s35829_s11 + $0xc90] sm:$0xff]  }
 0x20c   : > { %30085 = vmatpush3.bf16.msra.mxu1 %v33286_v14  ;;  %30064 = vmatprep.subr.bf16.mxu0 %v33287_v15  ;;  %v33328_v14 = vld [vmem:[%s35829_s11 + $0xc58] sm:$0xff]  }
 0x20d   : > { %30086 = vmatprep.subr.bf16.mxu1 %v33289_v16  ;;  %22030 = vmatprep.mubr.bf16.mxu0 %v2053_v61  ;;  %v33330_v15 = vld [vmem:[%s35829_s11 + $0xcd8] sm:$0xff]   ;;  %v33353_v61 = vld [vmem:[%s35829_s11 + $0xd48] sm:$0xff]  }
 0x20e   : > { %22070 = vmatprep.mubr.bf16.mxu1 %v2055_v3  ;;  %v33329_v16 = vld [vmem:[%s35829_s11 + $0xc18] sm:$0xff]   ;;  %v33358_v3 = vld [vmem:[%s35829_s11 + $0xd10] sm:$0xff]  }
 0x20f   : > { %30065 = vmatpush3.bf16.msra.mxu0 %v33288_v17  ;;  %v33331_v17 = vld [vmem:[%s35829_s11 + $0xc98] sm:$0xff]  }
 0x210   : > { %30087 = vmatpush3.bf16.msra.mxu1 %v33290_v18  ;;  %30066 = vmatprep.subr.bf16.mxu0 %v33291_v19  ;;  %v33332_v18 = vld [vmem:[%s35829_s11 + $0xc60] sm:$0xff]  }
 0x211   : > { %30088 = vmatprep.subr.bf16.mxu1 %v33293_v20  ;;  %v33334_v19 = vld [vmem:[%s35829_s11 + $0xce0] sm:$0xff]  }
 0x212   : > { %v33333_v20 = vld [vmem:[%s35829_s11 + $0xc20] sm:$0xff]  }
 0x213   : > { %30067 = vmatpush3.bf16.msra.mxu0 %v33292_v21  ;;  %v33335_v21 = vld [vmem:[%s35829_s11 + $0xca0] sm:$0xff]  }
 0x214   : > { %30089 = vmatpush3.bf16.msra.mxu1 %v33294_v22  ;;  %30068 = vmatprep.subr.bf16.mxu0 %v33295_v23  ;;  %v33336_v22 = vld [vmem:[%s35829_s11 + $0xc68] sm:$0xff]  }
 0x215   : > { %30090 = vmatprep.subr.bf16.mxu1 %v33297_v24  ;;  %v33338_v23 = vld [vmem:[%s35829_s11 + $0xce8] sm:$0xff]  }
 0x216   : > { %v33337_v24 = vld [vmem:[%s35829_s11 + $0xc28] sm:$0xff]  }
 0x217   : > { %30069 = vmatpush3.bf16.msra.mxu0 %v33296_v25  ;;  %v33339_v25 = vld [vmem:[%s35829_s11 + $0xca8] sm:$0xff]  }
 0x218   : > { %30091 = vmatpush3.bf16.msra.mxu1 %v33298_v26  ;;  %30070 = vmatprep.subr.bf16.mxu0 %v33299_v27  ;;  %v33340_v26 = vld [vmem:[%s35829_s11 + $0xc70] sm:$0xff]  }
 0x219   : > { %30092 = vmatprep.subr.bf16.mxu1 %v33301_v28  ;;  %v33342_v27 = vld [vmem:[%s35829_s11 + $0xcf0] sm:$0xff]  }
 0x21b   : > { %30071 = vmatpush3.bf16.msra.mxu0 %v33300_v29 }
 0x21c   : > { %30093 = vmatpush3.bf16.msra.mxu1 %v33302_v30  ;;  %30072 = vmatprep.subr.bf16.mxu0 %v33303_v31  ;;  %v33341_v30 = vld [vmem:[%s35829_s11 + $0xc30] sm:$0xff]  }
 0x21d   : > { %30094 = vmatprep.subr.bf16.mxu1 %v33305_v32  ;;  %v29770_v37 = vpop.f32.mrb[16].mxu0 }
 0x21e   : > { %v29792_v38 = vpop.f32.mrb[16].mxu1  ;;  %v29771_v41 = vpop.f32.mrb[17].mxu0 }
 0x21f   : > { %v29793_v43 = vpop.f32.mrb[17].mxu1  ;;  %v29772_v44 = vadd.f32 %v29771_v41, %v29770_v37  ;;  %v29773_v45 = vpop.f32.mrb[18].mxu0  ;;  %30073 = vmatpush3.bf16.msra.mxu0 %v33304_v33  ;;  %v33343_v33 = vld [vmem:[%s35829_s11 + $0xcb0] sm:$0xff]  }
 0x220   : > { %v29794_v46 = vadd.f32 %v29793_v43, %v29792_v38  ;;  %30095 = vmatpush3.bf16.msra.mxu1 %v33306_v34  ;;  %v29795_v49 = vpop.f32.mrb[18].mxu1  ;;  %v29774_v50 = vpop.f32.mrb[19].mxu0  ;;  %30074 = vmatprep.subr.bf16.mxu0 %v33307_v35  ;;  %v33344_v34 = vld [vmem:[%s35829_s11 + $0xc78] sm:$0xff]  }
 0x221   : > { %30096 = vmatprep.subr.bf16.mxu1 %v33309_v36  ;;  %v21473_v54 = vadd.f32 %v29772_v44, %v36240_v4  ;;  %v29796_v55 = vpop.f32.mrb[19].mxu1  ;;  %v2054_v4 = vpack.c.bf16 %v666_v58, %v666_v58  ;;  %v33346_v38 = vld [vmem:[%s35829_s11 + $0xcf8] sm:$0xff]  }
 0x222   : > { %v33347_v50 = vld [vmem:[%s35829_s11 + $0xcb8] sm:$0xff]  }
 0x223   : > { %v36278_v59 = vadd.f32 %v29794_v46, %v21473_v54  ;;  %30075 = vmatpush3.bf16.msra.mxu0 %v33308_v39  ;;  %v33345_v46 = vld [vmem:[%s35829_s11 + $0xc38] sm:$0xff]   ;;  %v33351_v54 = vld [vmem:[%s35829_s11 + $0xdc0] sm:$0xff]  }
 0x224   : > { %30097 = vmatpush3.bf16.msra.mxu1 %v33310_v40  ;;  %30076 = vmatprep.subr.bf16.mxu0 %v33311_v47  ;;  %v329_v40 = vld [vmem:[%s35822_s13 + $0x60] sm:$0xff] }
 0x225   : > { %30098 = vmatprep.subr.bf16.mxu1 %v33313_v51  ;;  %v676_v43 = vrot.slane %v329_v40, %v35880_v42  ;;  %v669_v44 = vcombine.high %v329_v40, %v329_v40  ;;  %v33348_v51 = vld [vmem:[%s35829_s11 + $0xd40] sm:$0xff]  }
 0x227   : > { %30077 = vmatpush3.bf16.msra.mxu0 %v33312_v56  ;;  %v684_v49 = vcombine.high %v676_v43, %v676_v43  ;;  %v683_v52 = vrot.slane %v669_v44, %v35880_v42  ;;  %v2056_v55 = vpack.c.bf16 %v676_v43, %v676_v43  ;;  %v33384_v44 = vld [vmem:[%s35829_s11 + $0xec0] sm:$0xff]  }
 0x228   : > { %30099 = vmatpush3.bf16.msra.mxu1 %v33314_v60  ;;  %30106 = vmatprep.subr.bf16.mxu0 %v33315_v62  ;;  %v33355_v62 = vld [vmem:[%s35829_s11 + $0xdc8] sm:$0xff]  }
 0x229   : > { %30128 = vmatprep.subr.bf16.mxu1 %v33318_v1  ;;  %v2057_v53 = vpack.c.bf16 %v684_v49, %v684_v49  ;;  %v685_v56 = vcombine.high %v683_v52, %v683_v52  ;;  %v2058_v58 = vpack.c.bf16 %v683_v52, %v683_v52  ;;  %v33357_v1 = vld [vmem:[%s35829_s11 + $0xd50] sm:$0xff]   ;;  %v33386_v52 = vld [vmem:[%s35829_s11 + $0xe48] sm:$0xff]  }
 0x22a   : > { %22031 = vmatmul.mubr.bf16.vlgmr.msra.gmra.mrb[44].mxu0 %v2052_v2  ;;  %v33359_v2 = vld [vmem:[%s35829_s11 + $0xdd0] sm:$0xff]  }
 0x22b   : > { %22071 = vmatmul.mubr.bf16.vlgmr.msra.gmra.mrb[44].mxu1 %v2054_v4  ;;  %30107 = vmatpush3.bf16.msra.mxu0 %v33317_v0  ;;  %v2059_v60 = vpack.c.bf16 %v685_v56, %v685_v56  ;;  %v33356_v0 = vld [vmem:[%s35829_s11 + $0xd88] sm:$0xff]   ;;  %v33360_v4 = vld [vmem:[%s35829_s11 + $0xd90] sm:$0xff]  }
 0x22c   : > { %30129 = vmatpush3.bf16.msra.mxu1 %v33319_v5  ;;  %30108 = vmatprep.subr.bf16.mxu0 %v33320_v6  ;;  %v33361_v5 = vld [vmem:[%s35829_s11 + $0xd58] sm:$0xff]   ;;  %v33390_v56 = vld [vmem:[%s35829_s11 + $0xe50] sm:$0xff]  }
 0x22d   : > { %30130 = vmatprep.subr.bf16.mxu1 %v33322_v7  ;;  %22110 = vmatprep.mubr.bf16.mxu0 %v2057_v53  ;;  %v33363_v6 = vld [vmem:[%s35829_s11 + $0xdd8] sm:$0xff]   ;;  %v33388_v53 = vld [vmem:[%s35829_s11 + $0xec8] sm:$0xff]  }
 0x22e   : > { %22150 = vmatprep.mubr.bf16.mxu1 %v2059_v60  ;;  %v33362_v7 = vld [vmem:[%s35829_s11 + $0xd18] sm:$0xff]  }
 0x22f   : > { %30109 = vmatpush3.bf16.msra.mxu0 %v33321_v8  ;;  %v33364_v8 = vld [vmem:[%s35829_s11 + $0xd98] sm:$0xff]  }
 0x230   : > { %30131 = vmatpush3.bf16.msra.mxu1 %v33323_v9  ;;  %30110 = vmatprep.subr.bf16.mxu0 %v33324_v10  ;;  %v33365_v9 = vld [vmem:[%s35829_s11 + $0xd60] sm:$0xff]   ;;  %v33394_v60 = vld [vmem:[%s35829_s11 + $0xe58] sm:$0xff]  }
 0x231   : > { %30132 = vmatprep.subr.bf16.mxu1 %v33326_v11  ;;  %v33367_v10 = vld [vmem:[%s35829_s11 + $0xde0] sm:$0xff]  }
 0x232   : > { %v33366_v11 = vld [vmem:[%s35829_s11 + $0xd20] sm:$0xff]  }
 0x233   : > { %30111 = vmatpush3.bf16.msra.mxu0 %v33325_v12  ;;  %v33368_v12 = vld [vmem:[%s35829_s11 + $0xda0] sm:$0xff]  }
 0x234   : > { %30133 = vmatpush3.bf16.msra.mxu1 %v33327_v13  ;;  %30112 = vmatprep.subr.bf16.mxu0 %v33328_v14  ;;  %v33369_v13 = vld [vmem:[%s35829_s11 + $0xd68] sm:$0xff]  }
 0x235   : > { %30134 = vmatprep.subr.bf16.mxu1 %v33330_v15  ;;  %v33371_v14 = vld [vmem:[%s35829_s11 + $0xde8] sm:$0xff]  }
 0x236   : > { %v33370_v15 = vld [vmem:[%s35829_s11 + $0xd28] sm:$0xff]  }
 0x237   : > { %30113 = vmatpush3.bf16.msra.mxu0 %v33329_v16  ;;  %v33372_v16 = vld [vmem:[%s35829_s11 + $0xda8] sm:$0xff]  }
 0x238   : > { %30135 = vmatpush3.bf16.msra.mxu1 %v33331_v17  ;;  %30114 = vmatprep.subr.bf16.mxu0 %v33332_v18  ;;  %v33373_v17 = vld [vmem:[%s35829_s11 + $0xd70] sm:$0xff]  }
 0x239   : > { %30136 = vmatprep.subr.bf16.mxu1 %v33334_v19 }
 0x23b   : > { %30115 = vmatpush3.bf16.msra.mxu0 %v33333_v20  ;;  %v33374_v20 = vld [vmem:[%s35829_s11 + $0xd30] sm:$0xff]  }
 0x23c   : > { %30137 = vmatpush3.bf16.msra.mxu1 %v33335_v21  ;;  %30116 = vmatprep.subr.bf16.mxu0 %v33336_v22  ;;  %v33375_v21 = vld [vmem:[%s35829_s11 + $0xdf0] sm:$0xff]  }
 0x23d   : > { %30138 = vmatprep.subr.bf16.mxu1 %v33338_v23  ;;  %v29814_v28 = vpop.f32.mrb[20].mxu0 }
 0x23e   : > { %v29836_v29 = vpop.f32.mrb[20].mxu1  ;;  %v29815_v31 = vpop.f32.mrb[21].mxu0 }
 0x23f   : > { %v29837_v32 = vpop.f32.mrb[21].mxu1  ;;  %v29816_v35 = vadd.f32 %v29815_v31, %v29814_v28  ;;  %v29817_v36 = vpop.f32.mrb[22].mxu0  ;;  %30117 = vmatpush3.bf16.msra.mxu0 %v33337_v24  ;;  %v33376_v24 = vld [vmem:[%s35829_s11 + $0xdb0] sm:$0xff]   ;;  %v33377_v28 = vld [vmem:[%s35829_s11 + $0xd78] sm:$0xff]  }
 0x240   : > { %v29838_v37 = vadd.f32 %v29837_v32, %v29836_v29  ;;  %30139 = vmatpush3.bf16.msra.mxu1 %v33339_v25  ;;  %v29818_v39 = vpop.f32.mrb[23].mxu0  ;;  %30118 = vmatprep.subr.bf16.mxu0 %v33340_v26  ;;  %v29839_v45 = vpop.f32.mrb[22].mxu1  ;;  %v330_v32 = vld [vmem:[%s35822_s13 + $0x68] sm:$0xff] }
 0x241   : > { %30140 = vmatprep.subr.bf16.mxu1 %v33342_v27  ;;  %v21553_v41 = vadd.f32 %v29816_v35, %v36278_v59  ;;  %v29840_v47 = vpop.f32.mrb[23].mxu1  ;;  %v33352_v59 = vld [vmem:[%s35829_s11 + $0xd80] sm:$0xff]   ;;  %v693_v35 = vrot.slane %v330_v32, %v35880_v42  ;;  %v686_v36 = vcombine.high %v330_v32, %v330_v32  ;;  %v33380_v39 = vld [vmem:[%s35829_s11 + $0xdb8] sm:$0xff]  }
 0x242   : > { %v33414_v32 = vld [vmem:[%s35829_s11 + $0xf40] sm:$0xff]  }
 0x243   : > { %v36315_v48 = vadd.f32 %v29838_v37, %v21553_v41  ;;  %30119 = vmatpush3.bf16.msra.mxu0 %v33341_v30  ;;  %v33379_v30 = vld [vmem:[%s35829_s11 + $0xdf8] sm:$0xff]   ;;  %v701_v40 = vcombine.high %v693_v35, %v693_v35  ;;  %v33381_v41 = vld [vmem:[%s35829_s11 + $0xe40] sm:$0xff]   ;;  %v700_v43 = vrot.slane %v686_v36, %v35880_v42 }
 0x244   : > { %30141 = vmatpush3.bf16.msra.mxu1 %v33343_v33  ;;  %30120 = vmatprep.subr.bf16.mxu0 %v33344_v34  ;;  %v33378_v34 = vld [vmem:[%s35829_s11 + $0xd38] sm:$0xff]  }
 0x245   : > { %30142 = vmatprep.subr.bf16.mxu1 %v33346_v38  ;;  %v2061_v45 = vpack.c.bf16 %v701_v40, %v701_v40  ;;  %v702_v47 = vcombine.high %v700_v43, %v700_v43  ;;  %v2062_v49 = vpack.c.bf16 %v700_v43, %v700_v43  ;;  %v33418_v40 = vld [vmem:[%s35829_s11 + $0xf80] sm:$0xff]   ;;  %v33419_v43 = vld [vmem:[%s35829_s11 + $0xf48] sm:$0xff]  }
 0x247   : > { %30121 = vmatpush3.bf16.msra.mxu0 %v33345_v46  ;;  %v2060_v46 = vpack.c.bf16 %v693_v35, %v693_v35 }
 0x248   : > { %30143 = vmatpush3.bf16.msra.mxu1 %v33347_v50  ;;  %30150 = vmatprep.subr.bf16.mxu0 %v33348_v51  ;;  %v33385_v50 = vld [vmem:[%s35829_s11 + $0xe80] sm:$0xff]   ;;  %v2063_v51 = vpack.c.bf16 %v702_v47, %v702_v47  ;;  %v33423_v47 = vld [vmem:[%s35829_s11 + $0xf50] sm:$0xff]  }
 0x249   : > { %30172 = vmatprep.subr.bf16.mxu1 %v33351_v54  ;;  %v33387_v54 = vld [vmem:[%s35829_s11 + $0xe08] sm:$0xff]  }
 0x24a   : > { %22111 = vmatmul.mubr.bf16.vlgmr.msra.gmra.mrb[48].mxu0 %v2056_v55  ;;  %v33389_v55 = vld [vmem:[%s35829_s11 + $0xe88] sm:$0xff]  }
 0x24b   : > { %30151 = vmatpush3.bf16.msra.mxu0 %v33350_v57  ;;  %22151 = vmatmul.mubr.bf16.vlgmr.msra.gmra.mrb[48].mxu1 %v2058_v58  ;;  %v33392_v57 = vld [vmem:[%s35829_s11 + $0xed0] sm:$0xff]  }
 0x24c   : > { %30173 = vmatpush3.bf16.msra.mxu1 %v33352_v59  ;;  %30152 = vmatprep.subr.bf16.mxu0 %v33353_v61  ;;  %v33391_v58 = vld [vmem:[%s35829_s11 + $0xe10] sm:$0xff]   ;;  %v33396_v61 = vld [vmem:[%s35829_s11 + $0xed8] sm:$0xff]  }
 0x24d   : > { %30174 = vmatprep.subr.bf16.mxu1 %v33355_v62  ;;  %22190 = vmatprep.mubr.bf16.mxu0 %v2061_v45  ;;  %v33393_v59 = vld [vmem:[%s35829_s11 + $0xe90] sm:$0xff]   ;;  %v33395_v62 = vld [vmem:[%s35829_s11 + $0xe18] sm:$0xff]   ;;  %v33420_v45 = vld [vmem:[%s35829_s11 + $0xf08] sm:$0xff]  }
 0x24e   : > { %22230 = vmatprep.mubr.bf16.mxu1 %v2063_v51  ;;  %v33427_v51 = vld [vmem:[%s35829_s11 + $0xf58] sm:$0xff]  }
 0x24f   : > { %30153 = vmatpush3.bf16.msra.mxu0 %v33354_v63  ;;  %v33397_v63 = vld [vmem:[%s35829_s11 + $0xe98] sm:$0xff]  }
 0x250   : > { %30175 = vmatpush3.bf16.msra.mxu1 %v33356_v0  ;;  %30154 = vmatprep.subr.bf16.mxu0 %v33357_v1  ;;  %v33398_v0 = vld [vmem:[%s35829_s11 + $0xe60] sm:$0xff]  }
 0x251   : > { %30176 = vmatprep.subr.bf16.mxu1 %v33359_v2  ;;  %v33400_v1 = vld [vmem:[%s35829_s11 + $0xee0] sm:$0xff]  }
 0x252   : > { %v33399_v2 = vld [vmem:[%s35829_s11 + $0xe20] sm:$0xff]  }
 0x253   : > { %30155 = vmatpush3.bf16.msra.mxu0 %v33358_v3  ;;  %v33401_v3 = vld [vmem:[%s35829_s11 + $0xea0] sm:$0xff]  }
 0x254   : > { %30177 = vmatpush3.bf16.msra.mxu1 %v33360_v4  ;;  %30156 = vmatprep.subr.bf16.mxu0 %v33361_v5  ;;  %v33402_v4 = vld [vmem:[%s35829_s11 + $0xe68] sm:$0xff]  }
 0x255   : > { %30178 = vmatprep.subr.bf16.mxu1 %v33363_v6  ;;  %v33404_v5 = vld [vmem:[%s35829_s11 + $0xee8] sm:$0xff]  }
 0x256   : > { %v33403_v6 = vld [vmem:[%s35829_s11 + $0xe28] sm:$0xff]  }
 0x257   : > { %30157 = vmatpush3.bf16.msra.mxu0 %v33362_v7  ;;  %v33405_v7 = vld [vmem:[%s35829_s11 + $0xea8] sm:$0xff]  }
 0x258   : > { %30179 = vmatpush3.bf16.msra.mxu1 %v33364_v8  ;;  %30158 = vmatprep.subr.bf16.mxu0 %v33365_v9  ;;  %v33406_v8 = vld [vmem:[%s35829_s11 + $0xe70] sm:$0xff]  }
 0x259   : > { %30180 = vmatprep.subr.bf16.mxu1 %v33367_v10 }
 0x25b   : > { %30159 = vmatpush3.bf16.msra.mxu0 %v33366_v11  ;;  %v33407_v11 = vld [vmem:[%s35829_s11 + $0xe30] sm:$0xff]  }
 0x25c   : > { %30181 = vmatpush3.bf16.msra.mxu1 %v33368_v12  ;;  %30160 = vmatprep.subr.bf16.mxu0 %v33369_v13  ;;  %v33408_v12 = vld [vmem:[%s35829_s11 + $0xef0] sm:$0xff]  }
 0x25d   : > { %v29858_v18 = vpop.f32.mrb[24].mxu0  ;;  %30182 = vmatprep.subr.bf16.mxu1 %v33371_v14 }
 0x25e   : > { %v29880_v19 = vpop.f32.mrb[24].mxu1  ;;  %v29859_v22 = vpop.f32.mrb[25].mxu0 }
 0x25f   : > { %v29881_v23 = vpop.f32.mrb[25].mxu1  ;;  %v29860_v25 = vadd.f32 %v29859_v22, %v29858_v18  ;;  %v29861_v26 = vpop.f32.mrb[26].mxu0  ;;  %30161 = vmatpush3.bf16.msra.mxu0 %v33370_v15  ;;  %v33409_v18 = vld [vmem:[%s35829_s11 + $0xeb0] sm:$0xff]   ;;  %v33412_v22 = vld [vmem:[%s35829_s11 + $0xef8] sm:$0xff]  }
 0x260   : > { %v29882_v27 = vadd.f32 %v29881_v23, %v29880_v19  ;;  %v29862_v29 = vpop.f32.mrb[27].mxu0  ;;  %30183 = vmatpush3.bf16.msra.mxu1 %v33372_v16  ;;  %30162 = vmatprep.subr.bf16.mxu0 %v33373_v17  ;;  %v29883_v33 = vpop.f32.mrb[26].mxu1  ;;  %v331_v23 = vld [vmem:[%s35822_s13 + $0x70] sm:$0xff] }
 0x261   : > { %v21633_v31 = vadd.f32 %v29860_v25, %v36315_v48  ;;  %30184 = vmatprep.subr.bf16.mxu1 %v33375_v21  ;;  %v29884_v37 = vpop.f32.mrb[27].mxu1  ;;  %v33383_v48 = vld [vmem:[%s35829_s11 + $0xe00] sm:$0xff]   ;;  %v33411_v25 = vld [vmem:[%s35829_s11 + $0xe38] sm:$0xff]   ;;  %v710_v26 = vrot.slane %v331_v23, %v35880_v42 }
 0x263   : > { %v36353_v38 = vadd.f32 %v29882_v27, %v21633_v31  ;;  %30163 = vmatpush3.bf16.msra.mxu0 %v33374_v20  ;;  %v33410_v20 = vld [vmem:[%s35829_s11 + $0xe78] sm:$0xff]   ;;  %v703_v27 = vcombine.high %v331_v23, %v331_v23  ;;  %v718_v31 = vcombine.high %v710_v26, %v710_v26  ;;  %v2064_v36 = vpack.c.bf16 %v710_v26, %v710_v26 }
 0x264   : > { %30185 = vmatpush3.bf16.msra.mxu1 %v33376_v24  ;;  %30164 = vmatprep.subr.bf16.mxu0 %v33377_v28 }
 0x265   : > { %30186 = vmatprep.subr.bf16.mxu1 %v33379_v30  ;;  %v33413_v30 = vld [vmem:[%s35829_s11 + $0xeb8] sm:$0xff]   ;;  %v717_v33 = vrot.slane %v703_v27, %v35880_v42  ;;  %v2065_v35 = vpack.c.bf16 %v718_v31, %v718_v31  ;;  %v33450_v27 = vld [vmem:[%s35829_s11 + $0x10c0] sm:$0xff]  }
 0x267   : > { %30165 = vmatpush3.bf16.msra.mxu0 %v33378_v34  ;;  %v33417_v34 = vld [vmem:[%s35829_s11 + $0xfc0] sm:$0xff]   ;;  %v719_v37 = vcombine.high %v717_v33, %v717_v33 }
 0x268   : > { %30187 = vmatpush3.bf16.msra.mxu1 %v33380_v39  ;;  %30194 = vmatprep.subr.bf16.mxu0 %v33381_v41  ;;  %v2066_v39 = vpack.c.bf16 %v717_v33, %v717_v33 }
 0x269   : > { %30216 = vmatprep.subr.bf16.mxu1 %v33384_v44  ;;  %v2067_v41 = vpack.c.bf16 %v719_v37, %v719_v37  ;;  %v33421_v44 = vld [vmem:[%s35829_s11 + $0xfc8] sm:$0xff]   ;;  %v33456_v37 = vld [vmem:[%s35829_s11 + $0x1050] sm:$0xff]  }
 0x26a   : > { %22191 = vmatmul.mubr.bf16.vlgmr.msra.gmra.mrb[52].mxu0 %v2060_v46  ;;  %v33422_v46 = vld [vmem:[%s35829_s11 + $0xf88] sm:$0xff]  }
 0x26b   : > { %30195 = vmatpush3.bf16.msra.mxu0 %v33383_v48  ;;  %22231 = vmatmul.mubr.bf16.vlgmr.msra.gmra.mrb[52].mxu1 %v2062_v49  ;;  %v33425_v48 = vld [vmem:[%s35829_s11 + $0xfd0] sm:$0xff]  }
 0x26c   : > { %30217 = vmatpush3.bf16.msra.mxu1 %v33385_v50  ;;  %30196 = vmatprep.subr.bf16.mxu0 %v33386_v52  ;;  %v33424_v49 = vld [vmem:[%s35829_s11 + $0xf10] sm:$0xff]   ;;  %v33429_v52 = vld [vmem:[%s35829_s11 + $0xfd8] sm:$0xff]  }
 0x26d   : > { %30218 = vmatprep.subr.bf16.mxu1 %v33388_v53  ;;  %22270 = vmatprep.mubr.bf16.mxu0 %v2065_v35  ;;  %v33426_v50 = vld [vmem:[%s35829_s11 + $0xf90] sm:$0xff]   ;;  %v33428_v53 = vld [vmem:[%s35829_s11 + $0xf18] sm:$0xff]   ;;  %v33454_v35 = vld [vmem:[%s35829_s11 + $0x10c8] sm:$0xff]  }
 0x26e   : > { %22310 = vmatprep.mubr.bf16.mxu1 %v2067_v41  ;;  %v33460_v41 = vld [vmem:[%s35829_s11 + $0x1058] sm:$0xff]  }
 0x26f   : > { %30197 = vmatpush3.bf16.msra.mxu0 %v33387_v54  ;;  %v33430_v54 = vld [vmem:[%s35829_s11 + $0xf98] sm:$0xff]  }
 0x270   : > { %30219 = vmatpush3.bf16.msra.mxu1 %v33389_v55  ;;  %30198 = vmatprep.subr.bf16.mxu0 %v33390_v56  ;;  %v33431_v55 = vld [vmem:[%s35829_s11 + $0xf60] sm:$0xff]  }
 0x271   : > { %30220 = vmatprep.subr.bf16.mxu1 %v33392_v57  ;;  %v33433_v56 = vld [vmem:[%s35829_s11 + $0xfe0] sm:$0xff]  }
 0x272   : > { %v33432_v57 = vld [vmem:[%s35829_s11 + $0xf20] sm:$0xff]  }
 0x273   : > { %30199 = vmatpush3.bf16.msra.mxu0 %v33391_v58  ;;  %v33434_v58 = vld [vmem:[%s35829_s11 + $0xfa0] sm:$0xff]  }
 0x274   : > { %30221 = vmatpush3.bf16.msra.mxu1 %v33393_v59  ;;  %30200 = vmatprep.subr.bf16.mxu0 %v33394_v60  ;;  %v33435_v59 = vld [vmem:[%s35829_s11 + $0xf68] sm:$0xff]  }
 0x275   : > { %30222 = vmatprep.subr.bf16.mxu1 %v33396_v61  ;;  %v33437_v60 = vld [vmem:[%s35829_s11 + $0xfe8] sm:$0xff]  }
 0x276   : > { %v33436_v61 = vld [vmem:[%s35829_s11 + $0xf28] sm:$0xff]  }
 0x277   : > { %30201 = vmatpush3.bf16.msra.mxu0 %v33395_v62  ;;  %v33438_v62 = vld [vmem:[%s35829_s11 + $0xfa8] sm:$0xff]  }
 0x278   : > { %30223 = vmatpush3.bf16.msra.mxu1 %v33397_v63  ;;  %30202 = vmatprep.subr.bf16.mxu0 %v33398_v0  ;;  %v33439_v63 = vld [vmem:[%s35829_s11 + $0xf70] sm:$0xff]  }
 0x279   : > { %30224 = vmatprep.subr.bf16.mxu1 %v33400_v1 }
 0x27b   : > { %30203 = vmatpush3.bf16.msra.mxu0 %v33399_v2 }
 0x27c   : > { %30225 = vmatpush3.bf16.msra.mxu1 %v33401_v3  ;;  %30204 = vmatprep.subr.bf16.mxu0 %v33402_v4  ;;  %v33440_v4 = vld [vmem:[%s35829_s11 + $0xf30] sm:$0xff]  }
 0x27d   : > { %v29902_v9 = vpop.f32.mrb[28].mxu0  ;;  %30226 = vmatprep.subr.bf16.mxu1 %v33404_v5  ;;  %v33441_v5 = vld [vmem:[%s35829_s11 + $0xff0] sm:$0xff]  }
 0x27e   : > { %v29924_v10 = vpop.f32.mrb[28].mxu1  ;;  %v29903_v13 = vpop.f32.mrb[29].mxu0 }
 0x27f   : > { %v29925_v14 = vpop.f32.mrb[29].mxu1  ;;  %v29904_v15 = vadd.f32 %v29903_v13, %v29902_v9  ;;  %v29905_v16 = vpop.f32.mrb[30].mxu0  ;;  %30205 = vmatpush3.bf16.msra.mxu0 %v33403_v6  ;;  %v33442_v9 = vld [vmem:[%s35829_s11 + $0xfb0] sm:$0xff]   ;;  %v33444_v13 = vld [vmem:[%s35829_s11 + $0xf38] sm:$0xff]  }
 0x280   : > { %v29926_v17 = vadd.f32 %v29925_v14, %v29924_v10  ;;  %v29906_v19 = vpop.f32.mrb[31].mxu0  ;;  %30227 = vmatpush3.bf16.msra.mxu1 %v33405_v7  ;;  %30206 = vmatprep.subr.bf16.mxu0 %v33406_v8  ;;  %v29927_v24 = vpop.f32.mrb[30].mxu1  ;;  %v33445_v14 = vld [vmem:[%s35829_s11 + $0xff8] sm:$0xff]  }
 0x281   : > { %v21713_v21 = vadd.f32 %v29904_v15, %v36353_v38  ;;  %30228 = vmatprep.subr.bf16.mxu1 %v33408_v12  ;;  %v29928_v28 = vpop.f32.mrb[31].mxu1  ;;  %v33416_v38 = vld [vmem:[%s35829_s11 + $0xf00] sm:$0xff]   ;;  %v33446_v19 = vld [vmem:[%s35829_s11 + $0xfb8] sm:$0xff]  }
 0x282   : > { %v332_v15 = vld [vmem:[%s35822_s13 + $0x78] sm:$0xff] }
 0x283   : > { %v36391_v29 = vadd.f32 %v29926_v17, %v21713_v21  ;;  %30207 = vmatpush3.bf16.msra.mxu0 %v33407_v11  ;;  %v33443_v11 = vld [vmem:[%s35829_s11 + $0xf78] sm:$0xff]  }
 0x284   : > { %30229 = vmatpush3.bf16.msra.mxu1 %v33409_v18  ;;  %30208 = vmatprep.subr.bf16.mxu0 %v33410_v20  ;;  %v727_v18 = vrot.slane %v332_v15, %v35880_v42  ;;  %v720_v20 = vcombine.high %v332_v15, %v332_v15 }
 0x285   : > { %30230 = vmatprep.subr.bf16.mxu1 %v33412_v22  ;;  %v33447_v22 = vld [vmem:[%s35829_s11 + $0x1040] sm:$0xff]  }
 0x286   : > { %v735_v23 = vcombine.high %v727_v18, %v727_v18  ;;  %v734_v24 = vrot.slane %v720_v20, %v35880_v42  ;;  %v2068_v26 = vpack.c.bf16 %v727_v18, %v727_v18  ;;  %v33482_v20 = vld [vmem:[%s35829_s11 + $0x1100] sm:$0xff]  }
 0x287   : > { %30209 = vmatpush3.bf16.msra.mxu0 %v33411_v25  ;;  %v33449_v25 = vld [vmem:[%s35829_s11 + $0x1000] sm:$0xff]  }
 0x288   : > { %30231 = vmatpush3.bf16.msra.mxu1 %v33413_v30  ;;  %30238 = vmatprep.subr.bf16.mxu0 %v33414_v32  ;;  %v2069_v28 = vpack.c.bf16 %v735_v23, %v735_v23  ;;  %v33451_v30 = vld [vmem:[%s35829_s11 + $0x1080] sm:$0xff]   ;;  %v2070_v31 = vpack.c.bf16 %v734_v24, %v734_v24  ;;  %v33452_v32 = vld [vmem:[%s35829_s11 + $0x1048] sm:$0xff]  }
 0x289   : > { %30260 = vmatprep.subr.bf16.mxu1 %v33417_v34  ;;  %v33453_v34 = vld [vmem:[%s35829_s11 + $0x1008] sm:$0xff]  }
 0x28a   : > { %22271 = vmatmul.mubr.bf16.vlgmr.msra.gmra.mrb[56].mxu0 %v2064_v36  ;;  %v33455_v36 = vld [vmem:[%s35829_s11 + $0x1088] sm:$0xff]  }
 0x28b   : > { %30239 = vmatpush3.bf16.msra.mxu0 %v33416_v38  ;;  %22311 = vmatmul.mubr.bf16.vlgmr.msra.gmra.mrb[56].mxu1 %v2066_v39  ;;  %v33457_v38 = vld [vmem:[%s35829_s11 + $0x1010] sm:$0xff]  }
 0x28c   : > { %30261 = vmatpush3.bf16.msra.mxu1 %v33418_v40  ;;  %30240 = vmatprep.subr.bf16.mxu0 %v33419_v43  ;;  %v33458_v39 = vld [vmem:[%s35829_s11 + $0x10d0] sm:$0xff]   ;;  %v33461_v43 = vld [vmem:[%s35829_s11 + $0x1018] sm:$0xff]  }
 0x28d   : > { %30262 = vmatprep.subr.bf16.mxu1 %v33421_v44  ;;  %22350 = vmatprep.mubr.bf16.mxu0 %v2069_v28  ;;  %v33459_v40 = vld [vmem:[%s35829_s11 + $0x1090] sm:$0xff]   ;;  %v33462_v44 = vld [vmem:[%s35829_s11 + $0x10d8] sm:$0xff]   ;;  %v33488_v28 = vld [vmem:[%s35829_s11 + $0x1188] sm:$0xff]  }
 0x28f   : > { %30241 = vmatpush3.bf16.msra.mxu0 %v33420_v45  ;;  %v33463_v45 = vld [vmem:[%s35829_s11 + $0x1098] sm:$0xff]  }
 0x290   : > { %30263 = vmatpush3.bf16.msra.mxu1 %v33422_v46  ;;  %30242 = vmatprep.subr.bf16.mxu0 %v33423_v47  ;;  %v33464_v46 = vld [vmem:[%s35829_s11 + $0x1060] sm:$0xff]  }
 0x291   : > { %30264 = vmatprep.subr.bf16.mxu1 %v33425_v48  ;;  %v33465_v47 = vld [vmem:[%s35829_s11 + $0x1020] sm:$0xff]  }
 0x292   : > { %v33466_v48 = vld [vmem:[%s35829_s11 + $0x10e0] sm:$0xff]  }
 0x293   : > { %30243 = vmatpush3.bf16.msra.mxu0 %v33424_v49  ;;  %v33467_v49 = vld [vmem:[%s35829_s11 + $0x10a0] sm:$0xff]  }
 0x294   : > { %30265 = vmatpush3.bf16.msra.mxu1 %v33426_v50  ;;  %30244 = vmatprep.subr.bf16.mxu0 %v33427_v51  ;;  %v33468_v50 = vld [vmem:[%s35829_s11 + $0x1068] sm:$0xff]  }
 0x295   : > { %30266 = vmatprep.subr.bf16.mxu1 %v33429_v52  ;;  %v33469_v51 = vld [vmem:[%s35829_s11 + $0x1028] sm:$0xff]  }
 0x296   : > { %v33470_v52 = vld [vmem:[%s35829_s11 + $0x10e8] sm:$0xff]  }
 0x297   : > { %30245 = vmatpush3.bf16.msra.mxu0 %v33428_v53  ;;  %v33471_v53 = vld [vmem:[%s35829_s11 + $0x10a8] sm:$0xff]  }
 0x298   : > { %30267 = vmatpush3.bf16.msra.mxu1 %v33430_v54  ;;  %30246 = vmatprep.subr.bf16.mxu0 %v33431_v55  ;;  %v33472_v54 = vld [vmem:[%s35829_s11 + $0x1070] sm:$0xff]  }
 0x299   : > { %30268 = vmatprep.subr.bf16.mxu1 %v33433_v56 }
 0x29b   : > { %30247 = vmatpush3.bf16.msra.mxu0 %v33432_v57  ;;  %v33473_v57 = vld [vmem:[%s35829_s11 + $0x1030] sm:$0xff]  }
 0x29c   : > { %30269 = vmatpush3.bf16.msra.mxu1 %v33434_v58  ;;  %30248 = vmatprep.subr.bf16.mxu0 %v33435_v59  ;;  %v33474_v58 = vld [vmem:[%s35829_s11 + $0x10f0] sm:$0xff]  }
 0x29d   : > { %v29946_v0 = vpop.f32.mrb[32].mxu0  ;;  %30270 = vmatprep.subr.bf16.mxu1 %v33437_v60 }
 0x29e   : > { %v29968_v1 = vpop.f32.mrb[32].mxu1  ;;  %v29947_v2 = vpop.f32.mrb[33].mxu0 }
 0x29f   : > { %v29969_v3 = vpop.f32.mrb[33].mxu1  ;;  %v29948_v6 = vadd.f32 %v29947_v2, %v29946_v0  ;;  %v29949_v7 = vpop.f32.mrb[34].mxu0  ;;  %30249 = vmatpush3.bf16.msra.mxu0 %v33436_v61  ;;  %v33475_v0 = vld [vmem:[%s35829_s11 + $0x10b0] sm:$0xff]   ;;  %v33476_v2 = vld [vmem:[%s35829_s11 + $0x1078] sm:$0xff]  }
 0x2a0   : > { %v29970_v8 = vadd.f32 %v29969_v3, %v29968_v1  ;;  %v29950_v10 = vpop.f32.mrb[35].mxu0  ;;  %30271 = vmatpush3.bf16.msra.mxu1 %v33438_v62  ;;  %30250 = vmatprep.subr.bf16.mxu0 %v33439_v63  ;;  %v29971_v16 = vpop.f32.mrb[34].mxu1 }
 0x2a1   : > { %v21793_v12 = vadd.f32 %v29948_v6, %v36391_v29  ;;  %30272 = vmatprep.subr.bf16.mxu1 %v33441_v5  ;;  %v29972_v21 = vpop.f32.mrb[35].mxu1  ;;  %v736_v29 = vcombine.high %v734_v24, %v734_v24  ;;  %v33478_v6 = vld [vmem:[%s35829_s11 + $0x10f8] sm:$0xff]   ;;  %v33484_v24 = vld [vmem:[%s35829_s11 + $0x1180] sm:$0xff]  }
 0x2a3   : > { %v36428_v17 = vadd.f32 %v29970_v8, %v21793_v12  ;;  %30251 = vmatpush3.bf16.msra.mxu0 %v33440_v4  ;;  %v2071_v33 = vpack.c.bf16 %v736_v29, %v736_v29  ;;  %v33477_v4 = vld [vmem:[%s35829_s11 + $0x1038] sm:$0xff]   ;;  %v33491_v29 = vld [vmem:[%s35829_s11 + $0x11d0] sm:$0xff]  }
 0x2a4   : > { %30273 = vmatpush3.bf16.msra.mxu1 %v33442_v9  ;;  %30252 = vmatprep.subr.bf16.mxu0 %v33443_v11  ;;  %v333_v9 = vld [vmem:[%s35822_s13 + $0x80] sm:$0xff] }
 0x2a5   : > { %30274 = vmatprep.subr.bf16.mxu1 %v33445_v14  ;;  %22390 = vmatprep.mubr.bf16.mxu1 %v2071_v33  ;;  %v744_v10 = vrot.slane %v333_v9, %v35880_v42  ;;  %v33479_v11 = vld [vmem:[%s35829_s11 + $0x10b8] sm:$0xff]   ;;  %v737_v12 = vcombine.high %v333_v9, %v333_v9  ;;  %v33516_v9 = vld [vmem:[%s35829_s11 + $0x12c0] sm:$0xff]  }
 0x2a6   : > { %v33495_v33 = vld [vmem:[%s35829_s11 + $0x11d8] sm:$0xff]  }
 0x2a7   : > { %30253 = vmatpush3.bf16.msra.mxu0 %v33444_v13  ;;  %v33480_v13 = vld [vmem:[%s35829_s11 + $0x1140] sm:$0xff]   ;;  %v752_v14 = vcombine.high %v744_v10, %v744_v10  ;;  %v751_v15 = vrot.slane %v737_v12, %v35880_v42  ;;  %v2072_v16 = vpack.c.bf16 %v744_v10, %v744_v10 }
 0x2a8   : > { %30275 = vmatpush3.bf16.msra.mxu1 %v33446_v19  ;;  %30282 = vmatprep.subr.bf16.mxu0 %v33447_v22  ;;  %v33485_v22 = vld [vmem:[%s35829_s11 + $0x1148] sm:$0xff]   ;;  %v33517_v12 = vld [vmem:[%s35829_s11 + $0x1280] sm:$0xff]  }
 0x2a9   : > { %30304 = vmatprep.subr.bf16.mxu1 %v33450_v27  ;;  %v2073_v18 = vpack.c.bf16 %v752_v14, %v752_v14  ;;  %v753_v19 = vcombine.high %v751_v15, %v751_v15  ;;  %v2074_v21 = vpack.c.bf16 %v751_v15, %v751_v15  ;;  %v33489_v27 = vld [vmem:[%s35829_s11 + $0x1150] sm:$0xff]   ;;  %v33518_v14 = vld [vmem:[%s35829_s11 + $0x1248] sm:$0xff]  }
 0x2aa   : > { %22351 = vmatmul.mubr.bf16.vlgmr.msra.gmra.mrb[60].mxu0 %v2068_v26  ;;  %v33486_v26 = vld [vmem:[%s35829_s11 + $0x1108] sm:$0xff]  }
 0x2ab   : > { %30283 = vmatpush3.bf16.msra.mxu0 %v33449_v25  ;;  %22391 = vmatmul.mubr.bf16.vlgmr.msra.gmra.mrb[60].mxu1 %v2070_v31  ;;  %v2075_v23 = vpack.c.bf16 %v753_v19, %v753_v19  ;;  %v33487_v25 = vld [vmem:[%s35829_s11 + $0x11c8] sm:$0xff]   ;;  %v33493_v31 = vld [vmem:[%s35829_s11 + $0x1158] sm:$0xff]   ;;  %v33522_v19 = vld [vmem:[%s35829_s11 + $0x1250] sm:$0xff]  }
 0x2ac   : > { %30284 = vmatprep.subr.bf16.mxu0 %v33452_v32  ;;  %30305 = vmatpush3.bf16.msra.mxu1 %v33451_v30  ;;  %v33490_v30 = vld [vmem:[%s35829_s11 + $0x1110] sm:$0xff]  }
 0x2ad   : > { %30306 = vmatprep.subr.bf16.mxu1 %v33454_v35  ;;  %22430 = vmatprep.mubr.bf16.mxu0 %v2073_v18  ;;  %v33492_v32 = vld [vmem:[%s35829_s11 + $0x1190] sm:$0xff]   ;;  %v33497_v35 = vld [vmem:[%s35829_s11 + $0x1160] sm:$0xff]   ;;  %v33521_v18 = vld [vmem:[%s35829_s11 + $0x1288] sm:$0xff]  }
 0x2ae   : > { %22470 = vmatprep.mubr.bf16.mxu1 %v2075_v23  ;;  %v33526_v23 = vld [vmem:[%s35829_s11 + $0x1258] sm:$0xff]  }
 0x2af   : > { %30285 = vmatpush3.bf16.msra.mxu0 %v33453_v34  ;;  %v33494_v34 = vld [vmem:[%s35829_s11 + $0x1118] sm:$0xff]  }
 0x2b0   : > { %30286 = vmatprep.subr.bf16.mxu0 %v33456_v37  ;;  %30307 = vmatpush3.bf16.msra.mxu1 %v33455_v36  ;;  %v33496_v36 = vld [vmem:[%s35829_s11 + $0x1198] sm:$0xff]   ;;  %v33499_v37 = vld [vmem:[%s35829_s11 + $0x11e0] sm:$0xff]  }
 0x2b1   : > { %30308 = vmatprep.subr.bf16.mxu1 %v33458_v39  ;;  %v33501_v39 = vld [vmem:[%s35829_s11 + $0x1168] sm:$0xff]  }
 0x2b3   : > { %30287 = vmatpush3.bf16.msra.mxu0 %v33457_v38  ;;  %v33498_v38 = vld [vmem:[%s35829_s11 + $0x1120] sm:$0xff]  }
 0x2b4   : > { %30288 = vmatprep.subr.bf16.mxu0 %v33460_v41  ;;  %30309 = vmatpush3.bf16.msra.mxu1 %v33459_v40  ;;  %v33500_v40 = vld [vmem:[%s35829_s11 + $0x11a0] sm:$0xff]   ;;  %v33503_v41 = vld [vmem:[%s35829_s11 + $0x11e8] sm:$0xff]  }
 0x2b5   : > { %30310 = vmatprep.subr.bf16.mxu1 %v33462_v44 }
 0x2b7   : > { %30289 = vmatpush3.bf16.msra.mxu0 %v33461_v43  ;;  %v33502_v43 = vld [vmem:[%s35829_s11 + $0x1128] sm:$0xff]  }
 0x2b8   : > { %30290 = vmatprep.subr.bf16.mxu0 %v33464_v46  ;;  %30311 = vmatpush3.bf16.msra.mxu1 %v33463_v45  ;;  %v33504_v46 = vld [vmem:[%s35829_s11 + $0x11a8] sm:$0xff]  }
 0x2b9   : > { %30312 = vmatprep.subr.bf16.mxu1 %v33466_v48 }
 0x2bb   : > { %30291 = vmatpush3.bf16.msra.mxu0 %v33465_v47  ;;  %v33505_v47 = vld [vmem:[%s35829_s11 + $0x1170] sm:$0xff]  }
 0x2bc   : > { %30292 = vmatprep.subr.bf16.mxu0 %v33468_v50  ;;  %30313 = vmatpush3.bf16.msra.mxu1 %v33467_v49  ;;  %v33506_v50 = vld [vmem:[%s35829_s11 + $0x1130] sm:$0xff]  }
 0x2bd   : > { %v29990_v55 = vpop.f32.mrb[36].mxu0  ;;  %30314 = vmatprep.subr.bf16.mxu1 %v33470_v52 }
 0x2be   : > { %v30012_v56 = vpop.f32.mrb[36].mxu1  ;;  %v29991_v59 = vpop.f32.mrb[37].mxu0 }
 0x2bf   : > { %v30013_v60 = vpop.f32.mrb[37].mxu1  ;;  %v29992_v61 = vadd.f32 %v29991_v59, %v29990_v55  ;;  %v29993_v62 = vpop.f32.mrb[38].mxu0  ;;  %30293 = vmatpush3.bf16.msra.mxu0 %v33469_v51 }
 0x2c0   : > { %v30014_v63 = vadd.f32 %v30013_v60, %v30012_v56  ;;  %v29994_v1 = vpop.f32.mrb[39].mxu0  ;;  %30294 = vmatprep.subr.bf16.mxu0 %v33472_v54  ;;  %30315 = vmatpush3.bf16.msra.mxu1 %v33471_v53  ;;  %v30015_v5 = vpop.f32.mrb[38].mxu1  ;;  %v33507_v54 = vld [vmem:[%s35829_s11 + $0x11f0] sm:$0xff]   ;;  %v33510_v60 = vld [vmem:[%s35829_s11 + $0x1138] sm:$0xff]  }
 0x2c1   : > { %v21873_v3 = vadd.f32 %v29992_v61, %v36428_v17  ;;  %30316 = vmatprep.subr.bf16.mxu1 %v33474_v58  ;;  %v30016_v7 = vpop.f32.mrb[39].mxu1  ;;  %v33483_v17 = vld [vmem:[%s35829_s11 + $0x11c0] sm:$0xff]   ;;  %v33508_v56 = vld [vmem:[%s35829_s11 + $0x11b0] sm:$0xff]   ;;  %v33509_v58 = vld [vmem:[%s35829_s11 + $0x1178] sm:$0xff]  }
 0x2c2   : > { %v33515_v7 = vld [vmem:[%s35829_s11 + $0x1200] sm:$0xff]  }
 0x2c3   : > { %v36465_v8 = vadd.f32 %v30014_v63, %v21873_v3  ;;  %30295 = vmatpush3.bf16.msra.mxu0 %v33473_v57  ;;  %v33511_v63 = vld [vmem:[%s35829_s11 + $0x11f8] sm:$0xff]  }
 0x2c4   : > { %30296 = vmatprep.subr.bf16.mxu0 %v33476_v2  ;;  %30317 = vmatpush3.bf16.msra.mxu1 %v33475_v0  ;;  %v334_v0 = vld [vmem:[%s35822_s13 + $0x88] sm:$0xff] }
 0x2c5   : > { %30318 = vmatprep.subr.bf16.mxu1 %v33478_v6  ;;  %v761_v1 = vrot.slane %v334_v0, %v35880_v42  ;;  %v33512_v2 = vld [vmem:[%s35829_s11 + $0x11b8] sm:$0xff]   ;;  %v754_v3 = vcombine.high %v334_v0, %v334_v0 }
 0x2c7   : > { %30297 = vmatpush3.bf16.msra.mxu0 %v33477_v4  ;;  %v33513_v4 = vld [vmem:[%s35829_s11 + $0x1240] sm:$0xff]   ;;  %v769_v5 = vcombine.high %v761_v1, %v761_v1  ;;  %v768_v6 = vrot.slane %v754_v3, %v35880_v42 }
 0x2c8   : > { %30326 = vmatprep.subr.bf16.mxu0 %v33480_v13  ;;  %30319 = vmatpush3.bf16.msra.mxu1 %v33479_v11 }
 0x2c9   : > { %30348 = vmatprep.subr.bf16.mxu1 %v33483_v17  ;;  %v2077_v10 = vpack.c.bf16 %v769_v5, %v769_v5  ;;  %v770_v11 = vcombine.high %v768_v6, %v768_v6  ;;  %v2078_v13 = vpack.c.bf16 %v768_v6, %v768_v6  ;;  %v33520_v17 = vld [vmem:[%s35829_s11 + $0x12c8] sm:$0xff]   ;;  %v33550_v6 = vld [vmem:[%s35829_s11 + $0x1380] sm:$0xff]  }
 0x2ca   : > { %22431 = vmatmul.mubr.bf16.vlgmr.msra.gmra.mrb[64].mxu0 %v2072_v16  ;;  %v33519_v16 = vld [vmem:[%s35829_s11 + $0x1208] sm:$0xff]  }
 0x2cb   : > { %30327 = vmatpush3.bf16.msra.mxu0 %v33482_v20  ;;  %22471 = vmatmul.mubr.bf16.vlgmr.msra.gmra.mrb[64].mxu1 %v2074_v21  ;;  %v2079_v15 = vpack.c.bf16 %v770_v11, %v770_v11  ;;  %v33523_v20 = vld [vmem:[%s35829_s11 + $0x1210] sm:$0xff]  }
 0x2cc   : > { %30328 = vmatprep.subr.bf16.mxu0 %v33485_v22  ;;  %30349 = vmatpush3.bf16.msra.mxu1 %v33484_v24  ;;  %v33524_v21 = vld [vmem:[%s35829_s11 + $0x12d0] sm:$0xff]   ;;  %v33527_v24 = vld [vmem:[%s35829_s11 + $0x1218] sm:$0xff]  }
 0x2cd   : > { %30350 = vmatprep.subr.bf16.mxu1 %v33487_v25  ;;  %22510 = vmatprep.mubr.bf16.mxu0 %v2077_v10  ;;  %v33525_v22 = vld [vmem:[%s35829_s11 + $0x1290] sm:$0xff]   ;;  %v33528_v25 = vld [vmem:[%s35829_s11 + $0x12d8] sm:$0xff]   ;;  %v33554_v10 = vld [vmem:[%s35829_s11 + $0x1388] sm:$0xff]  }
 0x2ce   : > { %22550 = vmatprep.mubr.bf16.mxu1 %v2079_v15  ;;  %v33557_v11 = vld [vmem:[%s35829_s11 + $0x13d0] sm:$0xff]   ;;  %v33561_v15 = vld [vmem:[%s35829_s11 + $0x13d8] sm:$0xff]  }
 0x2cf   : > { %30329 = vmatpush3.bf16.msra.mxu0 %v33486_v26  ;;  %v33529_v26 = vld [vmem:[%s35829_s11 + $0x1298] sm:$0xff]  }
 0x2d0   : > { %30330 = vmatprep.subr.bf16.mxu0 %v33489_v27  ;;  %30351 = vmatpush3.bf16.msra.mxu1 %v33488_v28  ;;  %v33530_v27 = vld [vmem:[%s35829_s11 + $0x1260] sm:$0xff]  }
 0x2d1   : > { %30352 = vmatprep.subr.bf16.mxu1 %v33491_v29  ;;  %v33531_v28 = vld [vmem:[%s35829_s11 + $0x1220] sm:$0xff]  }
 0x2d2   : > { %v33532_v29 = vld [vmem:[%s35829_s11 + $0x12e0] sm:$0xff]  }
 0x2d3   : > { %30331 = vmatpush3.bf16.msra.mxu0 %v33490_v30  ;;  %v33533_v30 = vld [vmem:[%s35829_s11 + $0x12a0] sm:$0xff]  }
 0x2d4   : > { %30332 = vmatprep.subr.bf16.mxu0 %v33493_v31  ;;  %30353 = vmatpush3.bf16.msra.mxu1 %v33492_v32  ;;  %v33534_v31 = vld [vmem:[%s35829_s11 + $0x1268] sm:$0xff]  }
 0x2d5   : > { %30354 = vmatprep.subr.bf16.mxu1 %v33495_v33  ;;  %v33535_v32 = vld [vmem:[%s35829_s11 + $0x1228] sm:$0xff]  }
 0x2d6   : > { %v33536_v33 = vld [vmem:[%s35829_s11 + $0x12e8] sm:$0xff]  }
 0x2d7   : > { %30333 = vmatpush3.bf16.msra.mxu0 %v33494_v34  ;;  %v33537_v34 = vld [vmem:[%s35829_s11 + $0x12a8] sm:$0xff]  }
 0x2d8   : > { %30334 = vmatprep.subr.bf16.mxu0 %v33497_v35  ;;  %30355 = vmatpush3.bf16.msra.mxu1 %v33496_v36 }
 0x2d9   : > { %30356 = vmatprep.subr.bf16.mxu1 %v33499_v37 }
 0x2db   : > { %30335 = vmatpush3.bf16.msra.mxu0 %v33498_v38 }
 0x2dc   : > { %30336 = vmatprep.subr.bf16.mxu0 %v33501_v39  ;;  %30357 = vmatpush3.bf16.msra.mxu1 %v33500_v40  ;;  %v33538_v39 = vld [vmem:[%s35829_s11 + $0x1270] sm:$0xff]  }
 0x2dd   : > { %v30034_v44 = vpop.f32.mrb[40].mxu0  ;;  %30358 = vmatprep.subr.bf16.mxu1 %v33503_v41  ;;  %v33539_v40 = vld [vmem:[%s35829_s11 + $0x1230] sm:$0xff]  }
 0x2de   : > { %v30056_v45 = vpop.f32.mrb[40].mxu1  ;;  %v30035_v48 = vpop.f32.mrb[41].mxu0 }
 0x2df   : > { %v30057_v49 = vpop.f32.mrb[41].mxu1  ;;  %v30036_v51 = vadd.f32 %v30035_v48, %v30034_v44  ;;  %v30037_v52 = vpop.f32.mrb[42].mxu0  ;;  %30337 = vmatpush3.bf16.msra.mxu0 %v33502_v43 }
 0x2e0   : > { %v30058_v53 = vadd.f32 %v30057_v49, %v30056_v45  ;;  %v30038_v55 = vpop.f32.mrb[43].mxu0  ;;  %30338 = vmatprep.subr.bf16.mxu0 %v33505_v47  ;;  %v30059_v59 = vpop.f32.mrb[42].mxu1  ;;  %30359 = vmatpush3.bf16.msra.mxu1 %v33504_v46  ;;  %v33540_v45 = vld [vmem:[%s35829_s11 + $0x12f0] sm:$0xff]   ;;  %v33542_v49 = vld [vmem:[%s35829_s11 + $0x1278] sm:$0xff]  }
 0x2e1   : > { %v21953_v57 = vadd.f32 %v30036_v51, %v36465_v8  ;;  %v30060_v61 = vpop.f32.mrb[43].mxu1  ;;  %30360 = vmatprep.subr.bf16.mxu1 %v33507_v54  ;;  %v2076_v8 = vpack.c.bf16 %v761_v1, %v761_v1  ;;  %v33541_v47 = vld [vmem:[%s35829_s11 + $0x12b0] sm:$0xff]   ;;  %v33543_v52 = vld [vmem:[%s35829_s11 + $0x1238] sm:$0xff]   ;;  %v33546_v59 = vld [vmem:[%s35829_s11 + $0x1340] sm:$0xff]  }
 0x2e2   : > { %v33544_v54 = vld [vmem:[%s35829_s11 + $0x12f8] sm:$0xff]  }
 0x2e3   : > { %v36502_v62 = vadd.f32 %v30058_v53, %v21953_v57  ;;  %30339 = vmatpush3.bf16.msra.mxu0 %v33506_v50  ;;  %v335_v55 = vld [vmem:[%s35822_s13 + $0x90] sm:$0xff] }
 0x2e4   : > { %30340 = vmatprep.subr.bf16.mxu0 %v33509_v58  ;;  %30361 = vmatpush3.bf16.msra.mxu1 %v33508_v56  ;;  %v778_v56 = vrot.slane %v335_v55, %v35880_v42  ;;  %v33545_v57 = vld [vmem:[%s35829_s11 + $0x12b8] sm:$0xff]   ;;  %v771_v58 = vcombine.high %v335_v55, %v335_v55  ;;  %v33582_v55 = vld [vmem:[%s35829_s11 + $0x14c0] sm:$0xff]  }
 0x2e5   : > { %30362 = vmatprep.subr.bf16.mxu1 %v33511_v63  ;;  %v33549_v63 = vld [vmem:[%s35829_s11 + $0x13c0] sm:$0xff]  }
 0x2e6   : > { %v785_v61 = vrot.slane %v771_v58, %v35880_v42  ;;  %v33583_v58 = vld [vmem:[%s35829_s11 + $0x1480] sm:$0xff]  }
 0x2e7   : > { %30341 = vmatpush3.bf16.msra.mxu0 %v33510_v60  ;;  %v786_v60 = vcombine.high %v778_v56, %v778_v56 }
 0x2e8   : > { %30370 = vmatprep.subr.bf16.mxu0 %v33513_v4  ;;  %30363 = vmatpush3.bf16.msra.mxu1 %v33512_v2  ;;  %v787_v1 = vcombine.high %v785_v61, %v785_v61  ;;  %v33548_v2 = vld [vmem:[%s35829_s11 + $0x1300] sm:$0xff]   ;;  %v2082_v3 = vpack.c.bf16 %v785_v61, %v785_v61  ;;  %v33551_v4 = vld [vmem:[%s35829_s11 + $0x1348] sm:$0xff]  }
 0x2e9   : > { %30392 = vmatprep.subr.bf16.mxu1 %v33516_v9  ;;  %v2081_v0 = vpack.c.bf16 %v786_v60, %v786_v60  ;;  %v33555_v9 = vld [vmem:[%s35829_s11 + $0x1350] sm:$0xff]   ;;  %v33584_v60 = vld [vmem:[%s35829_s11 + $0x1448] sm:$0xff]  }
 0x2ea   : > { %22511 = vmatmul.mubr.bf16.vlgmr.msra.gmra.mrb[68].mxu0 %v2076_v8  ;;  %v2083_v5 = vpack.c.bf16 %v787_v1, %v787_v1  ;;  %v33552_v8 = vld [vmem:[%s35829_s11 + $0x1308] sm:$0xff]   ;;  %v33588_v1 = vld [vmem:[%s35829_s11 + $0x1450] sm:$0xff]  }
 0x2eb   : > { %30371 = vmatpush3.bf16.msra.mxu0 %v33515_v7  ;;  %22551 = vmatmul.mubr.bf16.vlgmr.msra.gmra.mrb[68].mxu1 %v2078_v13  ;;  %v33553_v7 = vld [vmem:[%s35829_s11 + $0x13c8] sm:$0xff]   ;;  %v33559_v13 = vld [vmem:[%s35829_s11 + $0x1358] sm:$0xff]  }
 0x2ec   : > { %30372 = vmatprep.subr.bf16.mxu0 %v33518_v14  ;;  %30393 = vmatpush3.bf16.msra.mxu1 %v33517_v12  ;;  %v33556_v12 = vld [vmem:[%s35829_s11 + $0x1310] sm:$0xff]  }
 0x2ed   : > { %30394 = vmatprep.subr.bf16.mxu1 %v33520_v17  ;;  %22590 = vmatprep.mubr.bf16.mxu0 %v2081_v0  ;;  %v33558_v14 = vld [vmem:[%s35829_s11 + $0x1390] sm:$0xff]   ;;  %v33563_v17 = vld [vmem:[%s35829_s11 + $0x1360] sm:$0xff]   ;;  %v33587_v0 = vld [vmem:[%s35829_s11 + $0x1488] sm:$0xff]  }
 0x2ee   : > { %22630 = vmatprep.mubr.bf16.mxu1 %v2083_v5  ;;  %v33592_v5 = vld [vmem:[%s35829_s11 + $0x1458] sm:$0xff]  }
 0x2ef   : > { %30373 = vmatpush3.bf16.msra.mxu0 %v33519_v16  ;;  %v33560_v16 = vld [vmem:[%s35829_s11 + $0x1318] sm:$0xff]  }
 0x2f0   : > { %30374 = vmatprep.subr.bf16.mxu0 %v33522_v19  ;;  %30395 = vmatpush3.bf16.msra.mxu1 %v33521_v18  ;;  %v33562_v18 = vld [vmem:[%s35829_s11 + $0x1398] sm:$0xff]   ;;  %v33565_v19 = vld [vmem:[%s35829_s11 + $0x13e0] sm:$0xff]  }
 0x2f1   : > { %30396 = vmatprep.subr.bf16.mxu1 %v33524_v21  ;;  %v33567_v21 = vld [vmem:[%s35829_s11 + $0x1368] sm:$0xff]  }
 0x2f3   : > { %30375 = vmatpush3.bf16.msra.mxu0 %v33523_v20  ;;  %v33564_v20 = vld [vmem:[%s35829_s11 + $0x1320] sm:$0xff]  }
 0x2f4   : > { %30376 = vmatprep.subr.bf16.mxu0 %v33526_v23  ;;  %30397 = vmatpush3.bf16.msra.mxu1 %v33525_v22  ;;  %v33566_v22 = vld [vmem:[%s35829_s11 + $0x13a0] sm:$0xff]   ;;  %v33569_v23 = vld [vmem:[%s35829_s11 + $0x13e8] sm:$0xff]  }
 0x2f5   : > { %30398 = vmatprep.subr.bf16.mxu1 %v33528_v25  ;;  %v33568_v25 = vld [vmem:[%s35829_s11 + $0x1328] sm:$0xff]  }
 0x2f7   : > { %30377 = vmatpush3.bf16.msra.mxu0 %v33527_v24 }
 0x2f8   : > { %30378 = vmatprep.subr.bf16.mxu0 %v33530_v27  ;;  %30399 = vmatpush3.bf16.msra.mxu1 %v33529_v26 }
 0x2f9   : > { %30400 = vmatprep.subr.bf16.mxu1 %v33532_v29  ;;  %v33571_v29 = vld [vmem:[%s35829_s11 + $0x1370] sm:$0xff]  }
 0x2fb   : > { %30379 = vmatpush3.bf16.msra.mxu0 %v33531_v28  ;;  %v33570_v28 = vld [vmem:[%s35829_s11 + $0x13a8] sm:$0xff]  }
 0x2fc   : > { %30380 = vmatprep.subr.bf16.mxu0 %v33534_v31  ;;  %30401 = vmatpush3.bf16.msra.mxu1 %v33533_v30 }
 0x2fd   : > { %v30078_v35 = vpop.f32.mrb[44].mxu0  ;;  %30402 = vmatprep.subr.bf16.mxu1 %v33536_v33  ;;  %v33572_v33 = vld [vmem:[%s35829_s11 + $0x1330] sm:$0xff]  }
 0x2fe   : > { %v30100_v36 = vpop.f32.mrb[44].mxu1  ;;  %v30079_v37 = vpop.f32.mrb[45].mxu0 }
 0x2ff   : > { %v30101_v38 = vpop.f32.mrb[45].mxu1  ;;  %v30080_v41 = vadd.f32 %v30079_v37, %v30078_v35  ;;  %v30081_v43 = vpop.f32.mrb[46].mxu0  ;;  %30381 = vmatpush3.bf16.msra.mxu0 %v33535_v32 }
 0x300   : > { %v30102_v44 = vadd.f32 %v30101_v38, %v30100_v36  ;;  %v30082_v46 = vpop.f32.mrb[47].mxu0  ;;  %30382 = vmatprep.subr.bf16.mxu0 %v33538_v39  ;;  %30403 = vmatpush3.bf16.msra.mxu1 %v33537_v34  ;;  %v30103_v50 = vpop.f32.mrb[46].mxu1  ;;  %v33573_v36 = vld [vmem:[%s35829_s11 + $0x13f0] sm:$0xff]  }
 0x301   : > { %v22033_v48 = vadd.f32 %v30080_v41, %v36502_v62  ;;  %30404 = vmatprep.subr.bf16.mxu1 %v33540_v45  ;;  %v30104_v53 = vpop.f32.mrb[47].mxu1  ;;  %v2080_v62 = vpack.c.bf16 %v778_v56, %v778_v56  ;;  %v33574_v38 = vld [vmem:[%s35829_s11 + $0x13b0] sm:$0xff]   ;;  %v33577_v45 = vld [vmem:[%s35829_s11 + $0x13f8] sm:$0xff]   ;;  %v33579_v50 = vld [vmem:[%s35829_s11 + $0x1440] sm:$0xff]  }
 0x302   : > { %v336_v46 = vld [vmem:[%s35822_s13 + $0x98] sm:$0xff] }
 0x303   : > { %v36539_v51 = vadd.f32 %v30102_v44, %v22033_v48  ;;  %30383 = vmatpush3.bf16.msra.mxu0 %v33539_v40  ;;  %v33575_v40 = vld [vmem:[%s35829_s11 + $0x1378] sm:$0xff]   ;;  %v33581_v53 = vld [vmem:[%s35829_s11 + $0x1400] sm:$0xff]  }
 0x304   : > { %30384 = vmatprep.subr.bf16.mxu0 %v33542_v49  ;;  %30405 = vmatpush3.bf16.msra.mxu1 %v33541_v47  ;;  %v33576_v44 = vld [vmem:[%s35829_s11 + $0x1338] sm:$0xff]   ;;  %v795_v47 = vrot.slane %v336_v46, %v35880_v42  ;;  %v788_v49 = vcombine.high %v336_v46, %v336_v46  ;;  %v33615_v46 = vld [vmem:[%s35829_s11 + $0x15c0] sm:$0xff]  }
 0x305   : > { %30406 = vmatprep.subr.bf16.mxu1 %v33544_v54  ;;  %v33578_v48 = vld [vmem:[%s35829_s11 + $0x13b8] sm:$0xff]  }
 0x306   : > { %v2084_v54 = vpack.c.bf16 %v795_v47, %v795_v47 }
 0x307   : > { %30385 = vmatpush3.bf16.msra.mxu0 %v33543_v52  ;;  %v802_v52 = vrot.slane %v788_v49, %v35880_v42  ;;  %v33616_v49 = vld [vmem:[%s35829_s11 + $0x1580] sm:$0xff]  }
 0x308   : > { %30414 = vmatprep.subr.bf16.mxu0 %v33546_v59  ;;  %30407 = vmatpush3.bf16.msra.mxu1 %v33545_v57 }
 0x309   : > { %30436 = vmatprep.subr.bf16.mxu1 %v33549_v63  ;;  %v804_v57 = vcombine.high %v802_v52, %v802_v52  ;;  %v2086_v59 = vpack.c.bf16 %v802_v52, %v802_v52  ;;  %v33586_v63 = vld [vmem:[%s35829_s11 + $0x14c8] sm:$0xff]  }
 0x30a   : > { %22591 = vmatmul.mubr.bf16.vlgmr.msra.gmra.mrb[72].mxu0 %v2080_v62  ;;  %v33585_v62 = vld [vmem:[%s35829_s11 + $0x1408] sm:$0xff]  }
 0x30b   : > { %30415 = vmatpush3.bf16.msra.mxu0 %v33548_v2  ;;  %22631 = vmatmul.mubr.bf16.vlgmr.msra.gmra.mrb[72].mxu1 %v2082_v3  ;;  %v2087_v61 = vpack.c.bf16 %v804_v57, %v804_v57  ;;  %v33589_v2 = vld [vmem:[%s35829_s11 + $0x1410] sm:$0xff]  }
 0x30c   : > { %30416 = vmatprep.subr.bf16.mxu0 %v33551_v4  ;;  %30437 = vmatpush3.bf16.msra.mxu1 %v33550_v6  ;;  %v33590_v3 = vld [vmem:[%s35829_s11 + $0x14d0] sm:$0xff]   ;;  %v33593_v6 = vld [vmem:[%s35829_s11 + $0x1418] sm:$0xff]  }
 0x30d   : > { %30438 = vmatprep.subr.bf16.mxu1 %v33553_v7  ;;  %22710 = vmatprep.mubr.bf16.mxu1 %v2087_v61  ;;  %v33591_v4 = vld [vmem:[%s35829_s11 + $0x1490] sm:$0xff]   ;;  %v33594_v7 = vld [vmem:[%s35829_s11 + $0x14d8] sm:$0xff]  }
 0x30e   : > { %v33622_v57 = vld [vmem:[%s35829_s11 + $0x1510] sm:$0xff]   ;;  %v33626_v61 = vld [vmem:[%s35829_s11 + $0x1518] sm:$0xff]  }
 0x30f   : > { %30417 = vmatpush3.bf16.msra.mxu0 %v33552_v8  ;;  %v33595_v8 = vld [vmem:[%s35829_s11 + $0x1498] sm:$0xff]  }
 0x310   : > { %30418 = vmatprep.subr.bf16.mxu0 %v33555_v9  ;;  %30439 = vmatpush3.bf16.msra.mxu1 %v33554_v10  ;;  %v33596_v9 = vld [vmem:[%s35829_s11 + $0x1460] sm:$0xff]  }
 0x311   : > { %30440 = vmatprep.subr.bf16.mxu1 %v33557_v11  ;;  %v33597_v10 = vld [vmem:[%s35829_s11 + $0x1420] sm:$0xff]  }
 0x312   : > { %v33598_v11 = vld [vmem:[%s35829_s11 + $0x14e0] sm:$0xff]  }
 0x313   : > { %30419 = vmatpush3.bf16.msra.mxu0 %v33556_v12  ;;  %v33599_v12 = vld [vmem:[%s35829_s11 + $0x14a0] sm:$0xff]  }
 0x314   : > { %30420 = vmatprep.subr.bf16.mxu0 %v33559_v13  ;;  %30441 = vmatpush3.bf16.msra.mxu1 %v33558_v14  ;;  %v33600_v13 = vld [vmem:[%s35829_s11 + $0x1468] sm:$0xff]  }
 0x315   : > { %30442 = vmatprep.subr.bf16.mxu1 %v33561_v15  ;;  %v33601_v14 = vld [vmem:[%s35829_s11 + $0x1428] sm:$0xff]  }
 0x317   : > { %30421 = vmatpush3.bf16.msra.mxu0 %v33560_v16  ;;  %v33602_v16 = vld [vmem:[%s35829_s11 + $0x14e8] sm:$0xff]  }
 0x318   : > { %30422 = vmatprep.subr.bf16.mxu0 %v33563_v17  ;;  %30443 = vmatpush3.bf16.msra.mxu1 %v33562_v18 }
 0x319   : > { %30444 = vmatprep.subr.bf16.mxu1 %v33565_v19  ;;  %v33603_v19 = vld [vmem:[%s35829_s11 + $0x14a8] sm:$0xff]  }
 0x31b   : > { %30423 = vmatpush3.bf16.msra.mxu0 %v33564_v20  ;;  %v33604_v20 = vld [vmem:[%s35829_s11 + $0x1470] sm:$0xff]  }
 0x31c   : > { %30424 = vmatprep.subr.bf16.mxu0 %v33567_v21  ;;  %30445 = vmatpush3.bf16.msra.mxu1 %v33566_v22 }
 0x31d   : > { %v30122_v24 = vpop.f32.mrb[48].mxu0  ;;  %30446 = vmatprep.subr.bf16.mxu1 %v33569_v23 }
 0x31e   : > { %v30123_v26 = vpop.f32.mrb[49].mxu0  ;;  %v30144_v27 = vpop.f32.mrb[48].mxu1 }
 0x31f   : > { %v30124_v30 = vadd.f32 %v30123_v26, %v30122_v24  ;;  %v30125_v31 = vpop.f32.mrb[50].mxu0  ;;  %v30145_v32 = vpop.f32.mrb[49].mxu1  ;;  %30425 = vmatpush3.bf16.msra.mxu0 %v33568_v25  ;;  %v33605_v26 = vld [vmem:[%s35829_s11 + $0x1430] sm:$0xff]  }
 0x320   : > { %v30126_v34 = vpop.f32.mrb[51].mxu0  ;;  %v30146_v35 = vadd.f32 %v30145_v32, %v30144_v27  ;;  %v30147_v39 = vpop.f32.mrb[50].mxu1  ;;  %30426 = vmatprep.subr.bf16.mxu0 %v33571_v29  ;;  %30447 = vmatpush3.bf16.msra.mxu1 %v33570_v28  ;;  %v33606_v28 = vld [vmem:[%s35829_s11 + $0x14f0] sm:$0xff]  }
 0x321   : > { %v22113_v37 = vadd.f32 %v30124_v30, %v36539_v51  ;;  %v30148_v41 = vpop.f32.mrb[51].mxu1  ;;  %30448 = vmatprep.subr.bf16.mxu1 %v33573_v36  ;;  %v803_v51 = vcombine.high %v795_v47, %v795_v47  ;;  %v33607_v30 = vld [vmem:[%s35829_s11 + $0x14b0] sm:$0xff]   ;;  %v33609_v34 = vld [vmem:[%s35829_s11 + $0x1438] sm:$0xff]  }
 0x322   : > { %v337_v36 = vld [vmem:[%s35822_s13 + $0xa0] sm:$0xff] }
 0x323   : > { %v36577_v43 = vadd.f32 %v30146_v35, %v22113_v37  ;;  %30427 = vmatpush3.bf16.msra.mxu0 %v33572_v33  ;;  %v2085_v56 = vpack.c.bf16 %v803_v51, %v803_v51  ;;  %v33608_v33 = vld [vmem:[%s35829_s11 + $0x1478] sm:$0xff]   ;;  %v812_v37 = vrot.slane %v337_v36, %v35880_v42  ;;  %v805_v39 = vcombine.high %v337_v36, %v337_v36  ;;  %v33617_v51 = vld [vmem:[%s35829_s11 + $0x1548] sm:$0xff]   ;;  %v33648_v36 = vld [vmem:[%s35829_s11 + $0x16c0] sm:$0xff]  }
 0x324   : > { %30428 = vmatprep.subr.bf16.mxu0 %v33575_v40  ;;  %30449 = vmatpush3.bf16.msra.mxu1 %v33574_v38  ;;  %v33610_v35 = vld [vmem:[%s35829_s11 + $0x14f8] sm:$0xff]   ;;  %v33612_v40 = vld [vmem:[%s35829_s11 + $0x1540] sm:$0xff]  }
 0x325   : > { %30450 = vmatprep.subr.bf16.mxu1 %v33577_v45  ;;  %22670 = vmatprep.mubr.bf16.mxu0 %v2085_v56  ;;  %v33611_v38 = vld [vmem:[%s35829_s11 + $0x14b8] sm:$0xff]   ;;  %v820_v41 = vcombine.high %v812_v37, %v812_v37  ;;  %v2088_v45 = vpack.c.bf16 %v812_v37, %v812_v37  ;;  %v33621_v56 = vld [vmem:[%s35829_s11 + $0x1550] sm:$0xff]  }
 0x327   : > { %30429 = vmatpush3.bf16.msra.mxu0 %v33576_v44  ;;  %v33614_v44 = vld [vmem:[%s35829_s11 + $0x1500] sm:$0xff]   ;;  %v2089_v47 = vpack.c.bf16 %v820_v41, %v820_v41  ;;  %v33650_v41 = vld [vmem:[%s35829_s11 + $0x1648] sm:$0xff]  }
 0x328   : > { %30458 = vmatprep.subr.bf16.mxu0 %v33579_v50  ;;  %30451 = vmatpush3.bf16.msra.mxu1 %v33578_v48 }
 0x329   : > { %30480 = vmatprep.subr.bf16.mxu1 %v33582_v55  ;;  %v33620_v55 = vld [vmem:[%s35829_s11 + $0x1588] sm:$0xff]  }
 0x32a   : > { %22671 = vmatmul.mubr.bf16.vlgmr.msra.gmra.mrb[76].mxu0 %v2084_v54  ;;  %v33619_v54 = vld [vmem:[%s35829_s11 + $0x15c8] sm:$0xff]  }
 0x32b   : > { %30459 = vmatpush3.bf16.msra.mxu0 %v33581_v53  ;;  %22711 = vmatmul.mubr.bf16.vlgmr.msra.gmra.mrb[76].mxu1 %v2086_v59  ;;  %v33618_v53 = vld [vmem:[%s35829_s11 + $0x1508] sm:$0xff]   ;;  %v33624_v59 = vld [vmem:[%s35829_s11 + $0x1590] sm:$0xff]  }
 0x32c   : > { %30460 = vmatprep.subr.bf16.mxu0 %v33584_v60  ;;  %30481 = vmatpush3.bf16.msra.mxu1 %v33583_v58  ;;  %v33623_v58 = vld [vmem:[%s35829_s11 + $0x15d0] sm:$0xff]   ;;  %v33625_v60 = vld [vmem:[%s35829_s11 + $0x1558] sm:$0xff]  }
 0x32d   : > { %30482 = vmatprep.subr.bf16.mxu1 %v33586_v63  ;;  %22750 = vmatprep.mubr.bf16.mxu0 %v2089_v47  ;;  %v33628_v63 = vld [vmem:[%s35829_s11 + $0x1598] sm:$0xff]   ;;  %v33654_v47 = vld [vmem:[%s35829_s11 + $0x1650] sm:$0xff]  }
 0x32f   : > { %30461 = vmatpush3.bf16.msra.mxu0 %v33585_v62  ;;  %v33627_v62 = vld [vmem:[%s35829_s11 + $0x15d8] sm:$0xff]  }
 0x330   : > { %30462 = vmatprep.subr.bf16.mxu0 %v33588_v1  ;;  %30483 = vmatpush3.bf16.msra.mxu1 %v33587_v0  ;;  %v33629_v0 = vld [vmem:[%s35829_s11 + $0x1560] sm:$0xff]  }
 0x331   : > { %30484 = vmatprep.subr.bf16.mxu1 %v33590_v3  ;;  %v33630_v1 = vld [vmem:[%s35829_s11 + $0x1520] sm:$0xff]  }
 0x332   : > { %v33632_v3 = vld [vmem:[%s35829_s11 + $0x15a0] sm:$0xff]  }
 0x333   : > { %30463 = vmatpush3.bf16.msra.mxu0 %v33589_v2  ;;  %v33631_v2 = vld [vmem:[%s35829_s11 + $0x15e0] sm:$0xff]  }
 0x334   : > { %30464 = vmatprep.subr.bf16.mxu0 %v33592_v5  ;;  %30485 = vmatpush3.bf16.msra.mxu1 %v33591_v4  ;;  %v33633_v4 = vld [vmem:[%s35829_s11 + $0x1568] sm:$0xff]  }
 0x335   : > { %30486 = vmatprep.subr.bf16.mxu1 %v33594_v7  ;;  %v33634_v5 = vld [vmem:[%s35829_s11 + $0x1528] sm:$0xff]  }
 0x336   : > { %v33635_v7 = vld [vmem:[%s35829_s11 + $0x15e8] sm:$0xff]  }
 0x337   : > { %30465 = vmatpush3.bf16.msra.mxu0 %v33593_v6 }
 0x338   : > { %30466 = vmatprep.subr.bf16.mxu0 %v33596_v9  ;;  %30487 = vmatpush3.bf16.msra.mxu1 %v33595_v8 }
 0x339   : > { %30488 = vmatprep.subr.bf16.mxu1 %v33598_v11 }
 0x33b   : > { %30467 = vmatpush3.bf16.msra.mxu0 %v33597_v10 }
 0x33c   : > { %30468 = vmatprep.subr.bf16.mxu0 %v33600_v13  ;;  %30489 = vmatpush3.bf16.msra.mxu1 %v33599_v12  ;;  %v33636_v13 = vld [vmem:[%s35829_s11 + $0x15a8] sm:$0xff]  }
 0x33d   : > { %v30166_v15 = vpop.f32.mrb[52].mxu0  ;;  %30490 = vmatprep.subr.bf16.mxu1 %v33602_v16 }
 0x33e   : > { %v30167_v17 = vpop.f32.mrb[53].mxu0  ;;  %v30188_v18 = vpop.f32.mrb[52].mxu1 }
 0x33f   : > { %v30168_v21 = vadd.f32 %v30167_v17, %v30166_v15  ;;  %v30169_v22 = vpop.f32.mrb[54].mxu0  ;;  %v30189_v23 = vpop.f32.mrb[53].mxu1  ;;  %30469 = vmatpush3.bf16.msra.mxu0 %v33601_v14  ;;  %v33637_v14 = vld [vmem:[%s35829_s11 + $0x1570] sm:$0xff]  }
 0x340   : > { %v30170_v24 = vpop.f32.mrb[55].mxu0  ;;  %v30190_v25 = vadd.f32 %v30189_v23, %v30188_v18  ;;  %v30191_v29 = vpop.f32.mrb[54].mxu1  ;;  %30470 = vmatprep.subr.bf16.mxu0 %v33604_v20  ;;  %30491 = vmatpush3.bf16.msra.mxu1 %v33603_v19  ;;  %v33638_v17 = vld [vmem:[%s35829_s11 + $0x1530] sm:$0xff]  }
 0x341   : > { %v22193_v27 = vadd.f32 %v30168_v21, %v36577_v43  ;;  %v30192_v31 = vpop.f32.mrb[55].mxu1  ;;  %30492 = vmatprep.subr.bf16.mxu1 %v33606_v28  ;;  %v819_v43 = vrot.slane %v805_v39, %v35880_v42  ;;  %v33639_v19 = vld [vmem:[%s35829_s11 + $0x15f0] sm:$0xff]   ;;  %v33641_v24 = vld [vmem:[%s35829_s11 + $0x1578] sm:$0xff]   ;;  %v33649_v39 = vld [vmem:[%s35829_s11 + $0x1680] sm:$0xff]  }
 0x342   : > { %v33640_v22 = vld [vmem:[%s35829_s11 + $0x15b0] sm:$0xff]   ;;  %v33644_v29 = vld [vmem:[%s35829_s11 + $0x15b8] sm:$0xff]   ;;  %v33645_v31 = vld [vmem:[%s35829_s11 + $0x1640] sm:$0xff]  }
 0x343   : > { %v36614_v32 = vadd.f32 %v30190_v25, %v22193_v27  ;;  %30471 = vmatpush3.bf16.msra.mxu0 %v33605_v26  ;;  %v821_v48 = vcombine.high %v819_v43, %v819_v43  ;;  %v2090_v50 = vpack.c.bf16 %v819_v43, %v819_v43  ;;  %v33642_v25 = vld [vmem:[%s35829_s11 + $0x1538] sm:$0xff]  }
 0x344   : > { %30472 = vmatprep.subr.bf16.mxu0 %v33608_v33  ;;  %30493 = vmatpush3.bf16.msra.mxu1 %v33607_v30  ;;  %v33643_v26 = vld [vmem:[%s35829_s11 + $0x15f8] sm:$0xff]  }
 0x345   : > { %30494 = vmatprep.subr.bf16.mxu1 %v33610_v35  ;;  %v2091_v52 = vpack.c.bf16 %v821_v48, %v821_v48  ;;  %v338_v27 = vld [vmem:[%s35822_s13 + $0xa8] sm:$0xff] }
 0x346   : > { %v829_v28 = vrot.slane %v338_v27, %v35880_v42  ;;  %v822_v30 = vcombine.high %v338_v27, %v338_v27  ;;  %v33655_v48 = vld [vmem:[%s35829_s11 + $0x1610] sm:$0xff]   ;;  %v33681_v27 = vld [vmem:[%s35829_s11 + $0x17c0] sm:$0xff]  }
 0x347   : > { %30473 = vmatpush3.bf16.msra.mxu0 %v33609_v34  ;;  %22790 = vmatprep.mubr.bf16.mxu1 %v2091_v52  ;;  %v33647_v34 = vld [vmem:[%s35829_s11 + $0x1600] sm:$0xff]   ;;  %v33659_v52 = vld [vmem:[%s35829_s11 + $0x1618] sm:$0xff]  }
 0x348   : > { %30502 = vmatprep.subr.bf16.mxu0 %v33612_v40  ;;  %30495 = vmatpush3.bf16.msra.mxu1 %v33611_v38  ;;  %v836_v33 = vrot.slane %v822_v30, %v35880_v42  ;;  %v2092_v35 = vpack.c.bf16 %v829_v28, %v829_v28  ;;  %v33682_v30 = vld [vmem:[%s35829_s11 + $0x1780] sm:$0xff]  }
 0x349   : > { %30524 = vmatprep.subr.bf16.mxu1 %v33615_v46  ;;  %v33653_v46 = vld [vmem:[%s35829_s11 + $0x1688] sm:$0xff]  }
 0x34a   : > { %22751 = vmatmul.mubr.bf16.vlgmr.msra.gmra.mrb[80].mxu0 %v2088_v45  ;;  %v838_v38 = vcombine.high %v836_v33, %v836_v33  ;;  %v2094_v40 = vpack.c.bf16 %v836_v33, %v836_v33  ;;  %v33652_v45 = vld [vmem:[%s35829_s11 + $0x16c8] sm:$0xff]  }
 0x34b   : > { %30503 = vmatpush3.bf16.msra.mxu0 %v33614_v44  ;;  %22791 = vmatmul.mubr.bf16.vlgmr.msra.gmra.mrb[80].mxu1 %v2090_v50  ;;  %v33651_v44 = vld [vmem:[%s35829_s11 + $0x1608] sm:$0xff]   ;;  %v33657_v50 = vld [vmem:[%s35829_s11 + $0x1690] sm:$0xff]  }
 0x34c   : > { %30504 = vmatprep.subr.bf16.mxu0 %v33617_v51  ;;  %30525 = vmatpush3.bf16.msra.mxu1 %v33616_v49  ;;  %v2095_v43 = vpack.c.bf16 %v838_v38, %v838_v38  ;;  %v33656_v49 = vld [vmem:[%s35829_s11 + $0x16d0] sm:$0xff]   ;;  %v33658_v51 = vld [vmem:[%s35829_s11 + $0x1658] sm:$0xff]  }
 0x34d   : > { %30526 = vmatprep.subr.bf16.mxu1 %v33619_v54  ;;  %v33661_v54 = vld [vmem:[%s35829_s11 + $0x1698] sm:$0xff]   ;;  %v33688_v38 = vld [vmem:[%s35829_s11 + $0x1710] sm:$0xff]  }
 0x34e   : > { %22870 = vmatprep.mubr.bf16.mxu1 %v2095_v43  ;;  %v33692_v43 = vld [vmem:[%s35829_s11 + $0x1718] sm:$0xff]  }
 0x34f   : > { %30505 = vmatpush3.bf16.msra.mxu0 %v33618_v53  ;;  %v33660_v53 = vld [vmem:[%s35829_s11 + $0x16d8] sm:$0xff]  }
 0x350   : > { %30506 = vmatprep.subr.bf16.mxu0 %v33621_v56  ;;  %30527 = vmatpush3.bf16.msra.mxu1 %v33620_v55  ;;  %v33662_v55 = vld [vmem:[%s35829_s11 + $0x1660] sm:$0xff]  }
 0x351   : > { %30528 = vmatprep.subr.bf16.mxu1 %v33623_v58  ;;  %v33663_v56 = vld [vmem:[%s35829_s11 + $0x1620] sm:$0xff]  }
 0x352   : > { %v33665_v58 = vld [vmem:[%s35829_s11 + $0x16a0] sm:$0xff]  }
 0x353   : > { %30507 = vmatpush3.bf16.msra.mxu0 %v33622_v57  ;;  %v33664_v57 = vld [vmem:[%s35829_s11 + $0x16e0] sm:$0xff]  }
 0x354   : > { %30508 = vmatprep.subr.bf16.mxu0 %v33625_v60  ;;  %30529 = vmatpush3.bf16.msra.mxu1 %v33624_v59  ;;  %v33666_v59 = vld [vmem:[%s35829_s11 + $0x1668] sm:$0xff]  }
 0x355   : > { %30530 = vmatprep.subr.bf16.mxu1 %v33627_v62 }
 0x357   : > { %30509 = vmatpush3.bf16.msra.mxu0 %v33626_v61  ;;  %v33667_v61 = vld [vmem:[%s35829_s11 + $0x1628] sm:$0xff]  }
 0x358   : > { %30510 = vmatprep.subr.bf16.mxu0 %v33629_v0  ;;  %30531 = vmatpush3.bf16.msra.mxu1 %v33628_v63  ;;  %v33668_v63 = vld [vmem:[%s35829_s11 + $0x16e8] sm:$0xff]  }
 0x359   : > { %30532 = vmatprep.subr.bf16.mxu1 %v33631_v2 }
 0x35b   : > { %30511 = vmatpush3.bf16.msra.mxu0 %v33630_v1 }
 0x35c   : > { %30512 = vmatprep.subr.bf16.mxu0 %v33633_v4  ;;  %30533 = vmatpush3.bf16.msra.mxu1 %v33632_v3  ;;  %v33669_v3 = vld [vmem:[%s35829_s11 + $0x16a8] sm:$0xff]   ;;  %v33670_v4 = vld [vmem:[%s35829_s11 + $0x1670] sm:$0xff]  }
 0x35d   : > { %v30210_v6 = vpop.f32.mrb[56].mxu0  ;;  %30534 = vmatprep.subr.bf16.mxu1 %v33635_v7 }
 0x35e   : > { %v30211_v8 = vpop.f32.mrb[57].mxu0  ;;  %v30232_v9 = vpop.f32.mrb[56].mxu1 }
 0x35f   : > { %v30212_v10 = vadd.f32 %v30211_v8, %v30210_v6  ;;  %v30213_v11 = vpop.f32.mrb[58].mxu0  ;;  %v30233_v12 = vpop.f32.mrb[57].mxu1  ;;  %30513 = vmatpush3.bf16.msra.mxu0 %v33634_v5 }
 0x360   : > { %v30214_v15 = vpop.f32.mrb[59].mxu0  ;;  %v30234_v16 = vadd.f32 %v30233_v12, %v30232_v9  ;;  %v30235_v20 = vpop.f32.mrb[58].mxu1  ;;  %30514 = vmatprep.subr.bf16.mxu0 %v33637_v14  ;;  %30535 = vmatpush3.bf16.msra.mxu1 %v33636_v13  ;;  %v33671_v9 = vld [vmem:[%s35829_s11 + $0x1630] sm:$0xff]  }
 0x361   : > { %v22273_v18 = vadd.f32 %v30212_v10, %v36614_v32  ;;  %v30236_v23 = vpop.f32.mrb[59].mxu1  ;;  %30536 = vmatprep.subr.bf16.mxu1 %v33639_v19  ;;  %v837_v32 = vcombine.high %v829_v28, %v829_v28  ;;  %v33672_v11 = vld [vmem:[%s35829_s11 + $0x16f0] sm:$0xff]   ;;  %v33674_v15 = vld [vmem:[%s35829_s11 + $0x1678] sm:$0xff]  }
 0x362   : > { %v33673_v14 = vld [vmem:[%s35829_s11 + $0x16b0] sm:$0xff]   ;;  %v33677_v20 = vld [vmem:[%s35829_s11 + $0x16b8] sm:$0xff]  }
 0x363   : > { %v36651_v21 = vadd.f32 %v30234_v16, %v22273_v18  ;;  %30515 = vmatpush3.bf16.msra.mxu0 %v33638_v17  ;;  %v2093_v37 = vpack.c.bf16 %v837_v32, %v837_v32  ;;  %v33675_v16 = vld [vmem:[%s35829_s11 + $0x1638] sm:$0xff]   ;;  %v33683_v32 = vld [vmem:[%s35829_s11 + $0x1748] sm:$0xff]  }
 0x364   : > { %30516 = vmatprep.subr.bf16.mxu0 %v33641_v24  ;;  %30537 = vmatpush3.bf16.msra.mxu1 %v33640_v22  ;;  %v33676_v17 = vld [vmem:[%s35829_s11 + $0x16f8] sm:$0xff]   ;;  %v33678_v22 = vld [vmem:[%s35829_s11 + $0x1740] sm:$0xff]  }
 0x365   : > { %30538 = vmatprep.subr.bf16.mxu1 %v33643_v26  ;;  %22830 = vmatprep.mubr.bf16.mxu0 %v2093_v37  ;;  %v339_v18 = vld [vmem:[%s35822_s13 + $0xb0] sm:$0xff]  ;;  %v33687_v37 = vld [vmem:[%s35829_s11 + $0x1750] sm:$0xff]  }
 0x366   : > { %v846_v19 = vrot.slane %v339_v18, %v35880_v42 }
 0x367   : > { %30517 = vmatpush3.bf16.msra.mxu0 %v33642_v25  ;;  %v33680_v25 = vld [vmem:[%s35829_s11 + $0x1700] sm:$0xff]  }
 0x368   : > { %30546 = vmatprep.subr.bf16.mxu0 %v33645_v31  ;;  %30539 = vmatpush3.bf16.msra.mxu1 %v33644_v29  ;;  %v854_v23 = vcombine.high %v846_v19, %v846_v19  ;;  %v2096_v26 = vpack.c.bf16 %v846_v19, %v846_v19 }
 0x369   : > { %30568 = vmatprep.subr.bf16.mxu1 %v33648_v36  ;;  %v33686_v36 = vld [vmem:[%s35829_s11 + $0x1788] sm:$0xff]  }
 0x36a   : > { %22831 = vmatmul.mubr.bf16.vlgmr.msra.gmra.mrb[84].mxu0 %v2092_v35  ;;  %v2097_v28 = vpack.c.bf16 %v854_v23, %v854_v23  ;;  %v33685_v35 = vld [vmem:[%s35829_s11 + $0x17c8] sm:$0xff]  }
 0x36b   : > { %30547 = vmatpush3.bf16.msra.mxu0 %v33647_v34  ;;  %22871 = vmatmul.mubr.bf16.vlgmr.msra.gmra.mrb[84].mxu1 %v2094_v40  ;;  %v33684_v34 = vld [vmem:[%s35829_s11 + $0x1708] sm:$0xff]   ;;  %v33690_v40 = vld [vmem:[%s35829_s11 + $0x1790] sm:$0xff]  }
 0x36c   : > { %30548 = vmatprep.subr.bf16.mxu0 %v33650_v41  ;;  %30569 = vmatpush3.bf16.msra.mxu1 %v33649_v39  ;;  %v33689_v39 = vld [vmem:[%s35829_s11 + $0x17d0] sm:$0xff]   ;;  %v33691_v41 = vld [vmem:[%s35829_s11 + $0x1758] sm:$0xff]   ;;  %v33716_v23 = vld [vmem:[%s35829_s11 + $0x1848] sm:$0xff]  }
 0x36d   : > { %30570 = vmatprep.subr.bf16.mxu1 %v33652_v45  ;;  %22910 = vmatprep.mubr.bf16.mxu0 %v2097_v28  ;;  %v33694_v45 = vld [vmem:[%s35829_s11 + $0x1798] sm:$0xff]   ;;  %v33720_v28 = vld [vmem:[%s35829_s11 + $0x1850] sm:$0xff]  }
 0x36f   : > { %30549 = vmatpush3.bf16.msra.mxu0 %v33651_v44  ;;  %v33693_v44 = vld [vmem:[%s35829_s11 + $0x17d8] sm:$0xff]  }
 0x370   : > { %30550 = vmatprep.subr.bf16.mxu0 %v33654_v47  ;;  %30571 = vmatpush3.bf16.msra.mxu1 %v33653_v46  ;;  %v33695_v46 = vld [vmem:[%s35829_s11 + $0x1760] sm:$0xff]  }
 0x371   : > { %30572 = vmatprep.subr.bf16.mxu1 %v33656_v49  ;;  %v33696_v47 = vld [vmem:[%s35829_s11 + $0x1720] sm:$0xff]  }
 0x372   : > { %v33698_v49 = vld [vmem:[%s35829_s11 + $0x17a0] sm:$0xff]  }
 0x373   : > { %30551 = vmatpush3.bf16.msra.mxu0 %v33655_v48  ;;  %v33697_v48 = vld [vmem:[%s35829_s11 + $0x17e0] sm:$0xff]  }
 0x374   : > { %30552 = vmatprep.subr.bf16.mxu0 %v33658_v51  ;;  %30573 = vmatpush3.bf16.msra.mxu1 %v33657_v50  ;;  %v33699_v50 = vld [vmem:[%s35829_s11 + $0x1768] sm:$0xff]  }
 0x375   : > { %30574 = vmatprep.subr.bf16.mxu1 %v33660_v53 }
 0x377   : > { %30553 = vmatpush3.bf16.msra.mxu0 %v33659_v52  ;;  %v33700_v52 = vld [vmem:[%s35829_s11 + $0x1728] sm:$0xff]  }
 0x378   : > { %30554 = vmatprep.subr.bf16.mxu0 %v33662_v55  ;;  %30575 = vmatpush3.bf16.msra.mxu1 %v33661_v54  ;;  %v33701_v54 = vld [vmem:[%s35829_s11 + $0x17e8] sm:$0xff]  }
 0x379   : > { %30576 = vmatprep.subr.bf16.mxu1 %v33664_v57 }
 0x37b   : > { %30555 = vmatpush3.bf16.msra.mxu0 %v33663_v56 }
 0x37c   : > { %30556 = vmatprep.subr.bf16.mxu0 %v33666_v59  ;;  %30577 = vmatpush3.bf16.msra.mxu1 %v33665_v58  ;;  %v33702_v58 = vld [vmem:[%s35829_s11 + $0x17a8] sm:$0xff]   ;;  %v33703_v59 = vld [vmem:[%s35829_s11 + $0x1770] sm:$0xff]  }
 0x37d   : > { %v30254_v60 = vpop.f32.mrb[60].mxu0  ;;  %30578 = vmatprep.subr.bf16.mxu1 %v33668_v63 }
 0x37e   : > { %v30255_v62 = vpop.f32.mrb[61].mxu0  ;;  %v30276_v2 = vpop.f32.mrb[60].mxu1 }
 0x37f   : > { %v30256_v0 = vadd.f32 %v30255_v62, %v30254_v60  ;;  %v30257_v1 = vpop.f32.mrb[62].mxu0  ;;  %v30277_v6 = vpop.f32.mrb[61].mxu1  ;;  %30557 = vmatpush3.bf16.msra.mxu0 %v33667_v61 }
 0x380   : > { %v30258_v5 = vpop.f32.mrb[63].mxu0  ;;  %v30278_v8 = vadd.f32 %v30277_v6, %v30276_v2  ;;  %v30279_v10 = vpop.f32.mrb[62].mxu1  ;;  %30558 = vmatprep.subr.bf16.mxu0 %v33670_v4  ;;  %30579 = vmatpush3.bf16.msra.mxu1 %v33669_v3  ;;  %v33705_v2 = vld [vmem:[%s35829_s11 + $0x17f0] sm:$0xff]   ;;  %v33707_v6 = vld [vmem:[%s35829_s11 + $0x1778] sm:$0xff]  }
 0x381   : > { %v22353_v7 = vadd.f32 %v30256_v0, %v36651_v21  ;;  %v30280_v12 = vpop.f32.mrb[63].mxu1  ;;  %30580 = vmatprep.subr.bf16.mxu1 %v33672_v11  ;;  %v839_v21 = vcombine.high %v339_v18, %v339_v18  ;;  %v33704_v0 = vld [vmem:[%s35829_s11 + $0x1730] sm:$0xff]   ;;  %v33710_v11 = vld [vmem:[%s35829_s11 + $0x17b8] sm:$0xff]   ;;  %v33714_v18 = vld [vmem:[%s35829_s11 + $0x18c0] sm:$0xff]  }
 0x382   : > { %v33706_v5 = vld [vmem:[%s35829_s11 + $0x17b0] sm:$0xff]  }
 0x383   : > { %v36689_v13 = vadd.f32 %v30278_v8, %v22353_v7  ;;  %30559 = vmatpush3.bf16.msra.mxu0 %v33671_v9  ;;  %v853_v24 = vrot.slane %v839_v21, %v35880_v42  ;;  %v33708_v7 = vld [vmem:[%s35829_s11 + $0x1738] sm:$0xff]   ;;  %v340_v9 = vld [vmem:[%s35822_s13 + $0xb8] sm:$0xff] }
 0x384   : > { %30560 = vmatprep.subr.bf16.mxu0 %v33674_v15  ;;  %30581 = vmatpush3.bf16.msra.mxu1 %v33673_v14  ;;  %v33709_v8 = vld [vmem:[%s35829_s11 + $0x17f8] sm:$0xff]   ;;  %v863_v10 = vrot.slane %v340_v9, %v35880_v42  ;;  %v856_v12 = vcombine.high %v340_v9, %v340_v9  ;;  %v33715_v21 = vld [vmem:[%s35829_s11 + $0x1880] sm:$0xff]  }
 0x385   : > { %30582 = vmatprep.subr.bf16.mxu1 %v33676_v17  ;;  %v855_v29 = vcombine.high %v853_v24, %v853_v24  ;;  %v2098_v31 = vpack.c.bf16 %v853_v24, %v853_v24  ;;  %v33747_v9 = vld [vmem:[%s35829_s11 + $0x19c0] sm:$0xff]  }
 0x386   : > { %v871_v14 = vcombine.high %v863_v10, %v863_v10  ;;  %v870_v15 = vrot.slane %v856_v12, %v35880_v42  ;;  %v2100_v17 = vpack.c.bf16 %v863_v10, %v863_v10  ;;  %v33748_v12 = vld [vmem:[%s35829_s11 + $0x1980] sm:$0xff]  }
 0x387   : > { %30561 = vmatpush3.bf16.msra.mxu0 %v33675_v16  ;;  %v2099_v33 = vpack.c.bf16 %v855_v29, %v855_v29  ;;  %v33713_v16 = vld [vmem:[%s35829_s11 + $0x1800] sm:$0xff]   ;;  %v33721_v29 = vld [vmem:[%s35829_s11 + $0x1810] sm:$0xff]  }
 0x388   : > { %30590 = vmatprep.subr.bf16.mxu0 %v33678_v22  ;;  %30583 = vmatpush3.bf16.msra.mxu1 %v33677_v20  ;;  %v2101_v19 = vpack.c.bf16 %v871_v14, %v871_v14  ;;  %v872_v20 = vcombine.high %v870_v15, %v870_v15  ;;  %v2102_v22 = vpack.c.bf16 %v870_v15, %v870_v15  ;;  %v33749_v14 = vld [vmem:[%s35829_s11 + $0x1948] sm:$0xff]  }
 0x389   : > { %30612 = vmatprep.subr.bf16.mxu1 %v33681_v27  ;;  %22950 = vmatprep.mubr.bf16.mxu1 %v2099_v33  ;;  %v33719_v27 = vld [vmem:[%s35829_s11 + $0x1888] sm:$0xff]   ;;  %v33725_v33 = vld [vmem:[%s35829_s11 + $0x1818] sm:$0xff]  }
 0x38a   : > { %22911 = vmatmul.mubr.bf16.vlgmr.msra.gmra.mrb[88].mxu0 %v2096_v26  ;;  %v2103_v24 = vpack.c.bf16 %v872_v20, %v872_v20  ;;  %v33718_v26 = vld [vmem:[%s35829_s11 + $0x18c8] sm:$0xff]   ;;  %v33754_v20 = vld [vmem:[%s35829_s11 + $0x1910] sm:$0xff]  }
 0x38b   : > { %30591 = vmatpush3.bf16.msra.mxu0 %v33680_v25  ;;  %22951 = vmatmul.mubr.bf16.vlgmr.msra.gmra.mrb[88].mxu1 %v2098_v31  ;;  %v33717_v25 = vld [vmem:[%s35829_s11 + $0x1808] sm:$0xff]   ;;  %v33723_v31 = vld [vmem:[%s35829_s11 + $0x1890] sm:$0xff]  }
 0x38c   : > { %30592 = vmatprep.subr.bf16.mxu0 %v33683_v32  ;;  %30613 = vmatpush3.bf16.msra.mxu1 %v33682_v30  ;;  %v33722_v30 = vld [vmem:[%s35829_s11 + $0x18d0] sm:$0xff]   ;;  %v33724_v32 = vld [vmem:[%s35829_s11 + $0x1858] sm:$0xff]  }
 0x38d   : > { %30614 = vmatprep.subr.bf16.mxu1 %v33685_v35  ;;  %22990 = vmatprep.mubr.bf16.mxu0 %v2101_v19  ;;  %v33727_v35 = vld [vmem:[%s35829_s11 + $0x1898] sm:$0xff]   ;;  %v33753_v19 = vld [vmem:[%s35829_s11 + $0x1950] sm:$0xff]  }
 0x38e   : > { %23030 = vmatprep.mubr.bf16.mxu1 %v2103_v24  ;;  %v33758_v24 = vld [vmem:[%s35829_s11 + $0x1918] sm:$0xff]  }
 0x38f   : > { %30593 = vmatpush3.bf16.msra.mxu0 %v33684_v34  ;;  %v33726_v34 = vld [vmem:[%s35829_s11 + $0x18d8] sm:$0xff]  }
 0x390   : > { %30594 = vmatprep.subr.bf16.mxu0 %v33687_v37  ;;  %30615 = vmatpush3.bf16.msra.mxu1 %v33686_v36  ;;  %v33728_v36 = vld [vmem:[%s35829_s11 + $0x1860] sm:$0xff]  }
 0x391   : > { %30616 = vmatprep.subr.bf16.mxu1 %v33689_v39  ;;  %v33729_v37 = vld [vmem:[%s35829_s11 + $0x1820] sm:$0xff]  }
 0x392   : > { %v33731_v39 = vld [vmem:[%s35829_s11 + $0x18a0] sm:$0xff]  }
 0x393   : > { %30595 = vmatpush3.bf16.msra.mxu0 %v33688_v38  ;;  %v33730_v38 = vld [vmem:[%s35829_s11 + $0x18e0] sm:$0xff]  }
 0x394   : > { %30596 = vmatprep.subr.bf16.mxu0 %v33691_v41  ;;  %30617 = vmatpush3.bf16.msra.mxu1 %v33690_v40  ;;  %v33732_v40 = vld [vmem:[%s35829_s11 + $0x1868] sm:$0xff]  }
 0x395   : > { %30618 = vmatprep.subr.bf16.mxu1 %v33693_v44 }
 0x397   : > { %30597 = vmatpush3.bf16.msra.mxu0 %v33692_v43  ;;  %v33733_v43 = vld [vmem:[%s35829_s11 + $0x1828] sm:$0xff]  }
 0x398   : > { %30598 = vmatprep.subr.bf16.mxu0 %v33695_v46  ;;  %30619 = vmatpush3.bf16.msra.mxu1 %v33694_v45  ;;  %v33734_v45 = vld [vmem:[%s35829_s11 + $0x18e8] sm:$0xff]  }
 0x399   : > { %30620 = vmatprep.subr.bf16.mxu1 %v33697_v48 }
 0x39b   : > { %30599 = vmatpush3.bf16.msra.mxu0 %v33696_v47 }
 0x39c   : > { %30600 = vmatprep.subr.bf16.mxu0 %v33699_v50  ;;  %30621 = vmatpush3.bf16.msra.mxu1 %v33698_v49 }
 0x39d   : > { %v30298_v51 = vpop.f32.mrb[64].mxu0  ;;  %30622 = vmatprep.subr.bf16.mxu1 %v33701_v54 }
 0x39e   : > { %v30299_v53 = vpop.f32.mrb[65].mxu0  ;;  %v30320_v57 = vpop.f32.mrb[64].mxu1 }
 0x39f   : > { %v30300_v55 = vadd.f32 %v30299_v53, %v30298_v51  ;;  %v30301_v56 = vpop.f32.mrb[66].mxu0  ;;  %v30321_v61 = vpop.f32.mrb[65].mxu1  ;;  %30601 = vmatpush3.bf16.msra.mxu0 %v33700_v52  ;;  %v33735_v51 = vld [vmem:[%s35829_s11 + $0x18a8] sm:$0xff]   ;;  %v33736_v52 = vld [vmem:[%s35829_s11 + $0x1870] sm:$0xff]  }
 0x3a0   : > { %v30302_v60 = vpop.f32.mrb[67].mxu0  ;;  %v30322_v63 = vadd.f32 %v30321_v61, %v30320_v57  ;;  %v30323_v1 = vpop.f32.mrb[66].mxu1  ;;  %30602 = vmatprep.subr.bf16.mxu0 %v33703_v59  ;;  %30623 = vmatpush3.bf16.msra.mxu1 %v33702_v58  ;;  %v33738_v58 = vld [vmem:[%s35829_s11 + $0x18f0] sm:$0xff]   ;;  %v33740_v61 = vld [vmem:[%s35829_s11 + $0x1878] sm:$0xff]  }
 0x3a1   : > { %v22433_v62 = vadd.f32 %v30300_v55, %v36689_v13  ;;  %v30324_v3 = vpop.f32.mrb[67].mxu1  ;;  %30624 = vmatprep.subr.bf16.mxu1 %v33705_v2  ;;  %v33711_v13 = vld [vmem:[%s35829_s11 + $0x1840] sm:$0xff]   ;;  %v33737_v55 = vld [vmem:[%s35829_s11 + $0x1830] sm:$0xff]   ;;  %v33743_v2 = vld [vmem:[%s35829_s11 + $0x18b8] sm:$0xff]  }
 0x3a2   : > { %v33739_v60 = vld [vmem:[%s35829_s11 + $0x18b0] sm:$0xff]  }
 0x3a3   : > { %v36727_v4 = vadd.f32 %v30322_v63, %v22433_v62  ;;  %30603 = vmatpush3.bf16.msra.mxu0 %v33704_v0  ;;  %v33741_v62 = vld [vmem:[%s35829_s11 + $0x1838] sm:$0xff]  }
 0x3a4   : > { %30604 = vmatprep.subr.bf16.mxu0 %v33707_v6  ;;  %30625 = vmatpush3.bf16.msra.mxu1 %v33706_v5  ;;  %v33742_v63 = vld [vmem:[%s35829_s11 + $0x18f8] sm:$0xff]  }
 0x3a5   : > { %30626 = vmatprep.subr.bf16.mxu1 %v33709_v8  ;;  %v341_v0 = vld [vmem:[%s35822_s13 + $0xc0] sm:$0xff] }
 0x3a6   : > { %v880_v1 = vrot.slane %v341_v0, %v35880_v42  ;;  %v873_v3 = vcombine.high %v341_v0, %v341_v0  ;;  %v33780_v0 = vld [vmem:[%s35829_s11 + $0x1ac0] sm:$0xff]  }
 0x3a7   : > { %30605 = vmatpush3.bf16.msra.mxu0 %v33708_v7  ;;  %v33746_v7 = vld [vmem:[%s35829_s11 + $0x1900] sm:$0xff]  }
 0x3a8   : > { %30634 = vmatprep.subr.bf16.mxu0 %v33711_v13  ;;  %30627 = vmatpush3.bf16.msra.mxu1 %v33710_v11  ;;  %v888_v5 = vcombine.high %v880_v1, %v880_v1  ;;  %v887_v6 = vrot.slane %v873_v3, %v35880_v42  ;;  %v2104_v8 = vpack.c.bf16 %v880_v1, %v880_v1  ;;  %v33781_v3 = vld [vmem:[%s35829_s11 + $0x1a80] sm:$0xff]  }
 0x3a9   : > { %30656 = vmatprep.subr.bf16.mxu1 %v33714_v18  ;;  %v33752_v18 = vld [vmem:[%s35829_s11 + $0x1988] sm:$0xff]  }
 0x3aa   : > { %22991 = vmatmul.mubr.bf16.vlgmr.msra.gmra.mrb[92].mxu0 %v2100_v17  ;;  %v2105_v10 = vpack.c.bf16 %v888_v5, %v888_v5  ;;  %v889_v11 = vcombine.high %v887_v6, %v887_v6  ;;  %v2106_v13 = vpack.c.bf16 %v887_v6, %v887_v6  ;;  %v33751_v17 = vld [vmem:[%s35829_s11 + $0x19c8] sm:$0xff]  }
 0x3ab   : > { %30635 = vmatpush3.bf16.msra.mxu0 %v33713_v16  ;;  %23031 = vmatmul.mubr.bf16.vlgmr.msra.gmra.mrb[92].mxu1 %v2102_v22  ;;  %v33750_v16 = vld [vmem:[%s35829_s11 + $0x1908] sm:$0xff]   ;;  %v33756_v22 = vld [vmem:[%s35829_s11 + $0x1990] sm:$0xff]  }
 0x3ac   : > { %30636 = vmatprep.subr.bf16.mxu0 %v33716_v23  ;;  %30657 = vmatpush3.bf16.msra.mxu1 %v33715_v21  ;;  %v2107_v15 = vpack.c.bf16 %v889_v11, %v889_v11  ;;  %v33755_v21 = vld [vmem:[%s35829_s11 + $0x19d0] sm:$0xff]   ;;  %v33757_v23 = vld [vmem:[%s35829_s11 + $0x1958] sm:$0xff]   ;;  %v33782_v5 = vld [vmem:[%s35829_s11 + $0x1a48] sm:$0xff]  }
 0x3ad   : > { %30658 = vmatprep.subr.bf16.mxu1 %v33718_v26  ;;  %23070 = vmatprep.mubr.bf16.mxu0 %v2105_v10  ;;  %v33760_v26 = vld [vmem:[%s35829_s11 + $0x1998] sm:$0xff]   ;;  %v33786_v10 = vld [vmem:[%s35829_s11 + $0x1a50] sm:$0xff]  }
 0x3ae   : > { %23110 = vmatprep.mubr.bf16.mxu1 %v2107_v15  ;;  %v33787_v11 = vld [vmem:[%s35829_s11 + $0x1a10] sm:$0xff]   ;;  %v33791_v15 = vld [vmem:[%s35829_s11 + $0x1a18] sm:$0xff]  }
 0x3af   : > { %30637 = vmatpush3.bf16.msra.mxu0 %v33717_v25  ;;  %v33759_v25 = vld [vmem:[%s35829_s11 + $0x19d8] sm:$0xff]  }
 0x3b0   : > { %30638 = vmatprep.subr.bf16.mxu0 %v33720_v28  ;;  %30659 = vmatpush3.bf16.msra.mxu1 %v33719_v27  ;;  %v33761_v27 = vld [vmem:[%s35829_s11 + $0x1960] sm:$0xff]  }
 0x3b1   : > { %30660 = vmatprep.subr.bf16.mxu1 %v33722_v30  ;;  %v33762_v28 = vld [vmem:[%s35829_s11 + $0x1920] sm:$0xff]  }
 0x3b2   : > { %v33764_v30 = vld [vmem:[%s35829_s11 + $0x19a0] sm:$0xff]  }
 0x3b3   : > { %30639 = vmatpush3.bf16.msra.mxu0 %v33721_v29  ;;  %v33763_v29 = vld [vmem:[%s35829_s11 + $0x19e0] sm:$0xff]  }
 0x3b4   : > { %30640 = vmatprep.subr.bf16.mxu0 %v33724_v32  ;;  %30661 = vmatpush3.bf16.msra.mxu1 %v33723_v31  ;;  %v33765_v31 = vld [vmem:[%s35829_s11 + $0x1968] sm:$0xff]  }
 0x3b5   : > { %30662 = vmatprep.subr.bf16.mxu1 %v33726_v34 }
 0x3b7   : > { %30641 = vmatpush3.bf16.msra.mxu0 %v33725_v33  ;;  %v33766_v33 = vld [vmem:[%s35829_s11 + $0x1928] sm:$0xff]  }
 0x3b8   : > { %30642 = vmatprep.subr.bf16.mxu0 %v33728_v36  ;;  %30663 = vmatpush3.bf16.msra.mxu1 %v33727_v35  ;;  %v33767_v35 = vld [vmem:[%s35829_s11 + $0x19e8] sm:$0xff]  }
 0x3b9   : > { %30664 = vmatprep.subr.bf16.mxu1 %v33730_v38 }
 0x3bb   : > { %30643 = vmatpush3.bf16.msra.mxu0 %v33729_v37 }
 0x3bc   : > { %30644 = vmatprep.subr.bf16.mxu0 %v33732_v40  ;;  %30665 = vmatpush3.bf16.msra.mxu1 %v33731_v39  ;;  %v33768_v39 = vld [vmem:[%s35829_s11 + $0x19a8] sm:$0xff]   ;;  %v33769_v40 = vld [vmem:[%s35829_s11 + $0x1970] sm:$0xff]  }
 0x3bd   : > { %v30342_v41 = vpop.f32.mrb[68].mxu0  ;;  %30666 = vmatprep.subr.bf16.mxu1 %v33734_v45 }
 0x3be   : > { %v30343_v44 = vpop.f32.mrb[69].mxu0  ;;  %v30364_v48 = vpop.f32.mrb[68].mxu1 }
 0x3bf   : > { %v30344_v46 = vadd.f32 %v30343_v44, %v30342_v41  ;;  %v30345_v47 = vpop.f32.mrb[70].mxu0  ;;  %v30365_v50 = vpop.f32.mrb[69].mxu1  ;;  %30645 = vmatpush3.bf16.msra.mxu0 %v33733_v43 }
 0x3c0   : > { %v30346_v49 = vpop.f32.mrb[71].mxu0  ;;  %v30366_v54 = vadd.f32 %v30365_v50, %v30364_v48  ;;  %v30367_v56 = vpop.f32.mrb[70].mxu1  ;;  %30646 = vmatprep.subr.bf16.mxu0 %v33736_v52  ;;  %30667 = vmatpush3.bf16.msra.mxu1 %v33735_v51  ;;  %v33771_v48 = vld [vmem:[%s35829_s11 + $0x19f0] sm:$0xff]   ;;  %v33773_v52 = vld [vmem:[%s35829_s11 + $0x1978] sm:$0xff]  }
 0x3c1   : > { %v22513_v53 = vadd.f32 %v30344_v46, %v36727_v4  ;;  %v30368_v59 = vpop.f32.mrb[71].mxu1  ;;  %30668 = vmatprep.subr.bf16.mxu1 %v33738_v58  ;;  %v33744_v4 = vld [vmem:[%s35829_s11 + $0x1940] sm:$0xff]   ;;  %v33770_v46 = vld [vmem:[%s35829_s11 + $0x1930] sm:$0xff]  }
 0x3c2   : > { %v33772_v51 = vld [vmem:[%s35829_s11 + $0x19b0] sm:$0xff]   ;;  %v33777_v59 = vld [vmem:[%s35829_s11 + $0x1a40] sm:$0xff]  }
 0x3c3   : > { %v36764_v57 = vadd.f32 %v30366_v54, %v22513_v53  ;;  %30647 = vmatpush3.bf16.msra.mxu0 %v33737_v55  ;;  %v33774_v53 = vld [vmem:[%s35829_s11 + $0x1938] sm:$0xff]  }
 0x3c4   : > { %30648 = vmatprep.subr.bf16.mxu0 %v33740_v61  ;;  %30669 = vmatpush3.bf16.msra.mxu1 %v33739_v60  ;;  %v33775_v54 = vld [vmem:[%s35829_s11 + $0x19f8] sm:$0xff]  }
 0x3c5   : > { %30670 = vmatprep.subr.bf16.mxu1 %v33742_v63  ;;  %v342_v55 = vld [vmem:[%s35822_s13 + $0xc8] sm:$0xff] }
 0x3c6   : > { %v897_v56 = vrot.slane %v342_v55, %v35880_v42  ;;  %v890_v58 = vcombine.high %v342_v55, %v342_v55  ;;  %v33813_v55 = vld [vmem:[%s35829_s11 + $0x1bc0] sm:$0xff]  }
 0x3c7   : > { %30649 = vmatpush3.bf16.msra.mxu0 %v33741_v62  ;;  %v33779_v62 = vld [vmem:[%s35829_s11 + $0x1a00] sm:$0xff]  }
 0x3c8   : > { %30678 = vmatprep.subr.bf16.mxu0 %v33744_v4  ;;  %30671 = vmatpush3.bf16.msra.mxu1 %v33743_v2  ;;  %v905_v60 = vcombine.high %v897_v56, %v897_v56  ;;  %v904_v61 = vrot.slane %v890_v58, %v35880_v42  ;;  %v2108_v63 = vpack.c.bf16 %v897_v56, %v897_v56  ;;  %v33814_v58 = vld [vmem:[%s35829_s11 + $0x1b80] sm:$0xff]  }
 0x3c9   : > { %30700 = vmatprep.subr.bf16.mxu1 %v33747_v9  ;;  %v33785_v9 = vld [vmem:[%s35829_s11 + $0x1a88] sm:$0xff]  }
 0x3ca   : > { %23071 = vmatmul.mubr.bf16.vlgmr.msra.gmra.mrb[96].mxu0 %v2104_v8  ;;  %v2109_v1 = vpack.c.bf16 %v905_v60, %v905_v60  ;;  %v906_v2 = vcombine.high %v904_v61, %v904_v61  ;;  %v2110_v4 = vpack.c.bf16 %v904_v61, %v904_v61  ;;  %v33784_v8 = vld [vmem:[%s35829_s11 + $0x1ac8] sm:$0xff]  }
 0x3cb   : > { %30679 = vmatpush3.bf16.msra.mxu0 %v33746_v7  ;;  %23111 = vmatmul.mubr.bf16.vlgmr.msra.gmra.mrb[96].mxu1 %v2106_v13  ;;  %v33783_v7 = vld [vmem:[%s35829_s11 + $0x1a08] sm:$0xff]   ;;  %v33789_v13 = vld [vmem:[%s35829_s11 + $0x1a90] sm:$0xff]  }
 0x3cc   : > { %30680 = vmatprep.subr.bf16.mxu0 %v33749_v14  ;;  %30701 = vmatpush3.bf16.msra.mxu1 %v33748_v12  ;;  %v2111_v6 = vpack.c.bf16 %v906_v2, %v906_v2  ;;  %v33788_v12 = vld [vmem:[%s35829_s11 + $0x1ad0] sm:$0xff]   ;;  %v33790_v14 = vld [vmem:[%s35829_s11 + $0x1a58] sm:$0xff]   ;;  %v33815_v60 = vld [vmem:[%s35829_s11 + $0x1b48] sm:$0xff]  }
 0x3cd   : > { %30702 = vmatprep.subr.bf16.mxu1 %v33751_v17  ;;  %23150 = vmatprep.mubr.bf16.mxu0 %v2109_v1  ;;  %v33793_v17 = vld [vmem:[%s35829_s11 + $0x1a98] sm:$0xff]   ;;  %v33819_v1 = vld [vmem:[%s35829_s11 + $0x1b50] sm:$0xff]  }
 0x3ce   : > { %23190 = vmatprep.mubr.bf16.mxu1 %v2111_v6  ;;  %v33820_v2 = vld [vmem:[%s35829_s11 + $0x1b10] sm:$0xff]   ;;  %v33824_v6 = vld [vmem:[%s35829_s11 + $0x1b18] sm:$0xff]  }
 0x3cf   : > { %30681 = vmatpush3.bf16.msra.mxu0 %v33750_v16  ;;  %v33792_v16 = vld [vmem:[%s35829_s11 + $0x1ad8] sm:$0xff]  }
 0x3d0   : > { %30682 = vmatprep.subr.bf16.mxu0 %v33753_v19  ;;  %30703 = vmatpush3.bf16.msra.mxu1 %v33752_v18  ;;  %v33794_v18 = vld [vmem:[%s35829_s11 + $0x1a60] sm:$0xff]  }
 0x3d1   : > { %30704 = vmatprep.subr.bf16.mxu1 %v33755_v21  ;;  %v33795_v19 = vld [vmem:[%s35829_s11 + $0x1a20] sm:$0xff]  }
 0x3d2   : > { %v33797_v21 = vld [vmem:[%s35829_s11 + $0x1aa0] sm:$0xff]  }
 0x3d3   : > { %30683 = vmatpush3.bf16.msra.mxu0 %v33754_v20  ;;  %v33796_v20 = vld [vmem:[%s35829_s11 + $0x1ae0] sm:$0xff]  }
 0x3d4   : > { %30684 = vmatprep.subr.bf16.mxu0 %v33757_v23  ;;  %30705 = vmatpush3.bf16.msra.mxu1 %v33756_v22  ;;  %v33798_v22 = vld [vmem:[%s35829_s11 + $0x1a68] sm:$0xff]  }
 0x3d5   : > { %30706 = vmatprep.subr.bf16.mxu1 %v33759_v25 }
 0x3d7   : > { %30685 = vmatpush3.bf16.msra.mxu0 %v33758_v24  ;;  %v33799_v24 = vld [vmem:[%s35829_s11 + $0x1a28] sm:$0xff]  }
 0x3d8   : > { %30686 = vmatprep.subr.bf16.mxu0 %v33761_v27  ;;  %30707 = vmatpush3.bf16.msra.mxu1 %v33760_v26  ;;  %v33800_v26 = vld [vmem:[%s35829_s11 + $0x1ae8] sm:$0xff]  }
 0x3d9   : > { %30708 = vmatprep.subr.bf16.mxu1 %v33763_v29 }
 0x3db   : > { %30687 = vmatpush3.bf16.msra.mxu0 %v33762_v28 }
 0x3dc   : > { %30688 = vmatprep.subr.bf16.mxu0 %v33765_v31  ;;  %30709 = vmatpush3.bf16.msra.mxu1 %v33764_v30  ;;  %v33801_v30 = vld [vmem:[%s35829_s11 + $0x1aa8] sm:$0xff]   ;;  %v33802_v31 = vld [vmem:[%s35829_s11 + $0x1a70] sm:$0xff]  }
 0x3dd   : > { %v30386_v32 = vpop.f32.mrb[72].mxu0  ;;  %30710 = vmatprep.subr.bf16.mxu1 %v33767_v35 }
 0x3de   : > { %v30387_v34 = vpop.f32.mrb[73].mxu0  ;;  %v30408_v38 = vpop.f32.mrb[72].mxu1 }
 0x3df   : > { %v30388_v36 = vadd.f32 %v30387_v34, %v30386_v32  ;;  %v30389_v37 = vpop.f32.mrb[74].mxu0  ;;  %v30409_v43 = vpop.f32.mrb[73].mxu1  ;;  %30689 = vmatpush3.bf16.msra.mxu0 %v33766_v33 }
 0x3e0   : > { %v30390_v41 = vpop.f32.mrb[75].mxu0  ;;  %v30410_v45 = vadd.f32 %v30409_v43, %v30408_v38  ;;  %v30411_v47 = vpop.f32.mrb[74].mxu1  ;;  %30690 = vmatprep.subr.bf16.mxu0 %v33769_v40  ;;  %30711 = vmatpush3.bf16.msra.mxu1 %v33768_v39  ;;  %v33804_v38 = vld [vmem:[%s35829_s11 + $0x1af0] sm:$0xff]   ;;  %v33806_v43 = vld [vmem:[%s35829_s11 + $0x1a78] sm:$0xff]  }
 0x3e1   : > { %v22593_v44 = vadd.f32 %v30388_v36, %v36764_v57  ;;  %v30412_v49 = vpop.f32.mrb[75].mxu1  ;;  %30712 = vmatprep.subr.bf16.mxu1 %v33771_v48  ;;  %v33776_v57 = vld [vmem:[%s35829_s11 + $0x19b8] sm:$0xff]   ;;  %v33803_v36 = vld [vmem:[%s35829_s11 + $0x1a30] sm:$0xff]  }
 0x3e2   : > { %v33805_v41 = vld [vmem:[%s35829_s11 + $0x1ab0] sm:$0xff]   ;;  %v33809_v48 = vld [vmem:[%s35829_s11 + $0x1ab8] sm:$0xff]  }
 0x3e3   : > { %v36803_v50 = vadd.f32 %v30410_v45, %v22593_v44  ;;  %30691 = vmatpush3.bf16.msra.mxu0 %v33770_v46  ;;  %v33807_v44 = vld [vmem:[%s35829_s11 + $0x1a38] sm:$0xff]  }
 0x3e4   : > { %30692 = vmatprep.subr.bf16.mxu0 %v33773_v52  ;;  %30713 = vmatpush3.bf16.msra.mxu1 %v33772_v51  ;;  %v33808_v45 = vld [vmem:[%s35829_s11 + $0x1af8] sm:$0xff]  }
 0x3e5   : > { %30714 = vmatprep.subr.bf16.mxu1 %v33775_v54  ;;  %v343_v46 = vld [vmem:[%s35822_s13 + $0xd0] sm:$0xff] }
 0x3e6   : > { %v914_v47 = vrot.slane %v343_v46, %v35880_v42  ;;  %v907_v49 = vcombine.high %v343_v46, %v343_v46  ;;  %v33846_v46 = vld [vmem:[%s35829_s11 + $0x1cc0] sm:$0xff]  }
 0x3e7   : > { %30693 = vmatpush3.bf16.msra.mxu0 %v33774_v53  ;;  %v33812_v53 = vld [vmem:[%s35829_s11 + $0x1b00] sm:$0xff]  }
 0x3e8   : > { %30722 = vmatprep.subr.bf16.mxu0 %v33777_v59  ;;  %30715 = vmatpush3.bf16.msra.mxu1 %v33776_v57  ;;  %v922_v51 = vcombine.high %v914_v47, %v914_v47  ;;  %v921_v52 = vrot.slane %v907_v49, %v35880_v42  ;;  %v2112_v54 = vpack.c.bf16 %v914_v47, %v914_v47  ;;  %v33847_v49 = vld [vmem:[%s35829_s11 + $0x1c80] sm:$0xff]  }
 0x3e9   : > { %30744 = vmatprep.subr.bf16.mxu1 %v33780_v0  ;;  %v33818_v0 = vld [vmem:[%s35829_s11 + $0x1b88] sm:$0xff]  }
 0x3ea   : > { %23151 = vmatmul.mubr.bf16.vlgmr.msra.gmra.mrb[100].mxu0 %v2108_v63  ;;  %v2113_v56 = vpack.c.bf16 %v922_v51, %v922_v51  ;;  %v923_v57 = vcombine.high %v921_v52, %v921_v52  ;;  %v2114_v59 = vpack.c.bf16 %v921_v52, %v921_v52  ;;  %v33817_v63 = vld [vmem:[%s35829_s11 + $0x1bc8] sm:$0xff]  }
 0x3eb   : > { %30723 = vmatpush3.bf16.msra.mxu0 %v33779_v62  ;;  %23191 = vmatmul.mubr.bf16.vlgmr.msra.gmra.mrb[100].mxu1 %v2110_v4  ;;  %v33816_v62 = vld [vmem:[%s35829_s11 + $0x1b08] sm:$0xff]   ;;  %v33822_v4 = vld [vmem:[%s35829_s11 + $0x1b90] sm:$0xff]  }
 0x3ec   : > { %30724 = vmatprep.subr.bf16.mxu0 %v33782_v5  ;;  %30745 = vmatpush3.bf16.msra.mxu1 %v33781_v3  ;;  %v2115_v61 = vpack.c.bf16 %v923_v57, %v923_v57  ;;  %v33821_v3 = vld [vmem:[%s35829_s11 + $0x1bd0] sm:$0xff]   ;;  %v33823_v5 = vld [vmem:[%s35829_s11 + $0x1b58] sm:$0xff]   ;;  %v33848_v51 = vld [vmem:[%s35829_s11 + $0x1c48] sm:$0xff]  }
 0x3ed   : > { %30746 = vmatprep.subr.bf16.mxu1 %v33784_v8  ;;  %23230 = vmatprep.mubr.bf16.mxu0 %v2113_v56  ;;  %v33826_v8 = vld [vmem:[%s35829_s11 + $0x1b98] sm:$0xff]   ;;  %v33852_v56 = vld [vmem:[%s35829_s11 + $0x1c50] sm:$0xff]  }
 0x3ee   : > { %23270 = vmatprep.mubr.bf16.mxu1 %v2115_v61  ;;  %v33853_v57 = vld [vmem:[%s35829_s11 + $0x1c10] sm:$0xff]   ;;  %v33857_v61 = vld [vmem:[%s35829_s11 + $0x1c18] sm:$0xff]  }
 0x3ef   : > { %30725 = vmatpush3.bf16.msra.mxu0 %v33783_v7  ;;  %v33825_v7 = vld [vmem:[%s35829_s11 + $0x1bd8] sm:$0xff]  }
 0x3f0   : > { %30726 = vmatprep.subr.bf16.mxu0 %v33786_v10  ;;  %30747 = vmatpush3.bf16.msra.mxu1 %v33785_v9  ;;  %v33827_v9 = vld [vmem:[%s35829_s11 + $0x1b60] sm:$0xff]  }
 0x3f1   : > { %30748 = vmatprep.subr.bf16.mxu1 %v33788_v12  ;;  %v33828_v10 = vld [vmem:[%s35829_s11 + $0x1b20] sm:$0xff]  }
 0x3f2   : > { %v33830_v12 = vld [vmem:[%s35829_s11 + $0x1ba0] sm:$0xff]  }
 0x3f3   : > { %30727 = vmatpush3.bf16.msra.mxu0 %v33787_v11  ;;  %v33829_v11 = vld [vmem:[%s35829_s11 + $0x1be0] sm:$0xff]  }
 0x3f4   : > { %30728 = vmatprep.subr.bf16.mxu0 %v33790_v14  ;;  %30749 = vmatpush3.bf16.msra.mxu1 %v33789_v13  ;;  %v33831_v13 = vld [vmem:[%s35829_s11 + $0x1b68] sm:$0xff]  }
 0x3f5   : > { %30750 = vmatprep.subr.bf16.mxu1 %v33792_v16 }
 0x3f7   : > { %30729 = vmatpush3.bf16.msra.mxu0 %v33791_v15  ;;  %v33832_v15 = vld [vmem:[%s35829_s11 + $0x1b28] sm:$0xff]  }
 0x3f8   : > { %30730 = vmatprep.subr.bf16.mxu0 %v33794_v18  ;;  %30751 = vmatpush3.bf16.msra.mxu1 %v33793_v17  ;;  %v33833_v17 = vld [vmem:[%s35829_s11 + $0x1be8] sm:$0xff]  }
 0x3f9   : > { %30752 = vmatprep.subr.bf16.mxu1 %v33796_v20 }
 0x3fb   : > { %30731 = vmatpush3.bf16.msra.mxu0 %v33795_v19 }
 0x3fc   : > { %30732 = vmatprep.subr.bf16.mxu0 %v33798_v22  ;;  %30753 = vmatpush3.bf16.msra.mxu1 %v33797_v21 }
 0x3fd   : > { %v30430_v23 = vpop.f32.mrb[76].mxu0  ;;  %30754 = vmatprep.subr.bf16.mxu1 %v33800_v26 }
 0x3fe   : > { %v30431_v25 = vpop.f32.mrb[77].mxu0  ;;  %v30452_v29 = vpop.f32.mrb[76].mxu1 }
 0x3ff   : > { %v30432_v27 = vadd.f32 %v30431_v25, %v30430_v23  ;;  %v30433_v28 = vpop.f32.mrb[78].mxu0  ;;  %v30453_v33 = vpop.f32.mrb[77].mxu1  ;;  %30733 = vmatpush3.bf16.msra.mxu0 %v33799_v24  ;;  %v33834_v23 = vld [vmem:[%s35829_s11 + $0x1ba8] sm:$0xff]   ;;  %v33835_v24 = vld [vmem:[%s35829_s11 + $0x1b70] sm:$0xff]  }
 0x400   : > { %v30434_v32 = vpop.f32.mrb[79].mxu0  ;;  %v30454_v35 = vadd.f32 %v30453_v33, %v30452_v29  ;;  %v30455_v37 = vpop.f32.mrb[78].mxu1  ;;  %30734 = vmatprep.subr.bf16.mxu0 %v33802_v31  ;;  %30755 = vmatpush3.bf16.msra.mxu1 %v33801_v30  ;;  %v33837_v30 = vld [vmem:[%s35829_s11 + $0x1bf0] sm:$0xff]   ;;  %v33839_v33 = vld [vmem:[%s35829_s11 + $0x1b78] sm:$0xff]  }
 0x401   : > { %v22673_v34 = vadd.f32 %v30432_v27, %v36803_v50  ;;  %v30456_v39 = vpop.f32.mrb[79].mxu1  ;;  %30756 = vmatprep.subr.bf16.mxu1 %v33804_v38  ;;  %v33810_v50 = vld [vmem:[%s35829_s11 + $0x1b40] sm:$0xff]   ;;  %v33836_v27 = vld [vmem:[%s35829_s11 + $0x1b30] sm:$0xff]   ;;  %v33842_v38 = vld [vmem:[%s35829_s11 + $0x1bb8] sm:$0xff]  }
 0x402   : > { %v33838_v32 = vld [vmem:[%s35829_s11 + $0x1bb0] sm:$0xff]  }
 0x403   : > { %v36841_v40 = vadd.f32 %v30454_v35, %v22673_v34  ;;  %30735 = vmatpush3.bf16.msra.mxu0 %v33803_v36  ;;  %v33840_v34 = vld [vmem:[%s35829_s11 + $0x1b38] sm:$0xff]   ;;  %v344_v36 = vld [vmem:[%s35822_s13 + $0xd8] sm:$0xff] }
 0x404   : > { %30736 = vmatprep.subr.bf16.mxu0 %v33806_v43  ;;  %30757 = vmatpush3.bf16.msra.mxu1 %v33805_v41  ;;  %v33841_v35 = vld [vmem:[%s35829_s11 + $0x1bf8] sm:$0xff]   ;;  %v931_v37 = vrot.slane %v344_v36, %v35880_v42  ;;  %v924_v39 = vcombine.high %v344_v36, %v344_v36  ;;  %v33879_v36 = vld [vmem:[%s35829_s11 + $0x1dc0] sm:$0xff]  }
 0x405   : > { %30758 = vmatprep.subr.bf16.mxu1 %v33808_v45 }
 0x406   : > { %v939_v41 = vcombine.high %v931_v37, %v931_v37  ;;  %v938_v43 = vrot.slane %v924_v39, %v35880_v42  ;;  %v2116_v45 = vpack.c.bf16 %v931_v37, %v931_v37  ;;  %v33880_v39 = vld [vmem:[%s35829_s11 + $0x1d80] sm:$0xff]  }
 0x407   : > { %30737 = vmatpush3.bf16.msra.mxu0 %v33807_v44  ;;  %v33845_v44 = vld [vmem:[%s35829_s11 + $0x1c00] sm:$0xff]  }
 0x408   : > { %30766 = vmatprep.subr.bf16.mxu0 %v33810_v50  ;;  %30759 = vmatpush3.bf16.msra.mxu1 %v33809_v48  ;;  %v2117_v47 = vpack.c.bf16 %v939_v41, %v939_v41  ;;  %v940_v48 = vcombine.high %v938_v43, %v938_v43  ;;  %v2118_v50 = vpack.c.bf16 %v938_v43, %v938_v43  ;;  %v33881_v41 = vld [vmem:[%s35829_s11 + $0x1d48] sm:$0xff]  }
 0x409   : > { %30788 = vmatprep.subr.bf16.mxu1 %v33813_v55  ;;  %v33851_v55 = vld [vmem:[%s35829_s11 + $0x1c88] sm:$0xff]  }
 0x40a   : > { %23231 = vmatmul.mubr.bf16.vlgmr.msra.gmra.mrb[104].mxu0 %v2112_v54  ;;  %v2119_v52 = vpack.c.bf16 %v940_v48, %v940_v48  ;;  %v33850_v54 = vld [vmem:[%s35829_s11 + $0x1cc8] sm:$0xff]   ;;  %v33886_v48 = vld [vmem:[%s35829_s11 + $0x1d10] sm:$0xff]  }
 0x40b   : > { %30767 = vmatpush3.bf16.msra.mxu0 %v33812_v53  ;;  %23271 = vmatmul.mubr.bf16.vlgmr.msra.gmra.mrb[104].mxu1 %v2114_v59  ;;  %v33849_v53 = vld [vmem:[%s35829_s11 + $0x1c08] sm:$0xff]   ;;  %v33855_v59 = vld [vmem:[%s35829_s11 + $0x1c90] sm:$0xff]  }
 0x40c   : > { %30768 = vmatprep.subr.bf16.mxu0 %v33815_v60  ;;  %30789 = vmatpush3.bf16.msra.mxu1 %v33814_v58  ;;  %v33854_v58 = vld [vmem:[%s35829_s11 + $0x1cd0] sm:$0xff]   ;;  %v33856_v60 = vld [vmem:[%s35829_s11 + $0x1c58] sm:$0xff]  }
 0x40d   : > { %30790 = vmatprep.subr.bf16.mxu1 %v33817_v63  ;;  %23310 = vmatprep.mubr.bf16.mxu0 %v2117_v47  ;;  %v33859_v63 = vld [vmem:[%s35829_s11 + $0x1c98] sm:$0xff]   ;;  %v33885_v47 = vld [vmem:[%s35829_s11 + $0x1d50] sm:$0xff]  }
 0x40e   : > { %23350 = vmatprep.mubr.bf16.mxu1 %v2119_v52  ;;  %v33890_v52 = vld [vmem:[%s35829_s11 + $0x1d18] sm:$0xff]  }
 0x40f   : > { %30769 = vmatpush3.bf16.msra.mxu0 %v33816_v62  ;;  %v33858_v62 = vld [vmem:[%s35829_s11 + $0x1cd8] sm:$0xff]  }
 0x410   : > { %30770 = vmatprep.subr.bf16.mxu0 %v33819_v1  ;;  %30791 = vmatpush3.bf16.msra.mxu1 %v33818_v0  ;;  %v33860_v0 = vld [vmem:[%s35829_s11 + $0x1c60] sm:$0xff]  }
 0x411   : > { %30792 = vmatprep.subr.bf16.mxu1 %v33821_v3  ;;  %v33861_v1 = vld [vmem:[%s35829_s11 + $0x1c20] sm:$0xff]  }
 0x412   : > { %v33863_v3 = vld [vmem:[%s35829_s11 + $0x1ca0] sm:$0xff]  }
 0x413   : > { %30771 = vmatpush3.bf16.msra.mxu0 %v33820_v2  ;;  %v33862_v2 = vld [vmem:[%s35829_s11 + $0x1ce0] sm:$0xff]  }
 0x414   : > { %30772 = vmatprep.subr.bf16.mxu0 %v33823_v5  ;;  %30793 = vmatpush3.bf16.msra.mxu1 %v33822_v4  ;;  %v33864_v4 = vld [vmem:[%s35829_s11 + $0x1c68] sm:$0xff]  }
 0x415   : > { %30794 = vmatprep.subr.bf16.mxu1 %v33825_v7 }
 0x417   : > { %30773 = vmatpush3.bf16.msra.mxu0 %v33824_v6  ;;  %v33865_v6 = vld [vmem:[%s35829_s11 + $0x1c28] sm:$0xff]  }
 0x418   : > { %30774 = vmatprep.subr.bf16.mxu0 %v33827_v9  ;;  %30795 = vmatpush3.bf16.msra.mxu1 %v33826_v8  ;;  %v33866_v8 = vld [vmem:[%s35829_s11 + $0x1ce8] sm:$0xff]  }
 0x419   : > { %30796 = vmatprep.subr.bf16.mxu1 %v33829_v11 }
 0x41b   : > { %30775 = vmatpush3.bf16.msra.mxu0 %v33828_v10 }
 0x41c   : > { %30776 = vmatprep.subr.bf16.mxu0 %v33831_v13  ;;  %30797 = vmatpush3.bf16.msra.mxu1 %v33830_v12  ;;  %v33867_v12 = vld [vmem:[%s35829_s11 + $0x1ca8] sm:$0xff]   ;;  %v33868_v13 = vld [vmem:[%s35829_s11 + $0x1c70] sm:$0xff]  }
 0x41d   : > { %v30474_v14 = vpop.f32.mrb[80].mxu0  ;;  %30798 = vmatprep.subr.bf16.mxu1 %v33833_v17 }
 0x41e   : > { %v30475_v16 = vpop.f32.mrb[81].mxu0  ;;  %v30496_v20 = vpop.f32.mrb[80].mxu1 }
 0x41f   : > { %v30476_v18 = vadd.f32 %v30475_v16, %v30474_v14  ;;  %v30477_v19 = vpop.f32.mrb[82].mxu0  ;;  %v30497_v22 = vpop.f32.mrb[81].mxu1  ;;  %30777 = vmatpush3.bf16.msra.mxu0 %v33832_v15 }
 0x420   : > { %v30478_v21 = vpop.f32.mrb[83].mxu0  ;;  %v30498_v26 = vadd.f32 %v30497_v22, %v30496_v20  ;;  %v30499_v28 = vpop.f32.mrb[82].mxu1  ;;  %30778 = vmatprep.subr.bf16.mxu0 %v33835_v24  ;;  %30799 = vmatpush3.bf16.msra.mxu1 %v33834_v23  ;;  %v33870_v20 = vld [vmem:[%s35829_s11 + $0x1cf0] sm:$0xff]   ;;  %v33872_v24 = vld [vmem:[%s35829_s11 + $0x1c78] sm:$0xff]  }
 0x421   : > { %v22753_v25 = vadd.f32 %v30476_v18, %v36841_v40  ;;  %v30500_v31 = vpop.f32.mrb[83].mxu1  ;;  %30800 = vmatprep.subr.bf16.mxu1 %v33837_v30  ;;  %v33843_v40 = vld [vmem:[%s35829_s11 + $0x1c40] sm:$0xff]   ;;  %v33869_v18 = vld [vmem:[%s35829_s11 + $0x1c30] sm:$0xff]  }
 0x422   : > { %v33871_v23 = vld [vmem:[%s35829_s11 + $0x1cb0] sm:$0xff]   ;;  %v33876_v31 = vld [vmem:[%s35829_s11 + $0x1d40] sm:$0xff]  }
 0x423   : > { %v36878_v29 = vadd.f32 %v30498_v26, %v22753_v25  ;;  %30779 = vmatpush3.bf16.msra.mxu0 %v33836_v27  ;;  %v33873_v25 = vld [vmem:[%s35829_s11 + $0x1c38] sm:$0xff]  }
 0x424   : > { %30780 = vmatprep.subr.bf16.mxu0 %v33839_v33  ;;  %30801 = vmatpush3.bf16.msra.mxu1 %v33838_v32  ;;  %v33874_v26 = vld [vmem:[%s35829_s11 + $0x1cf8] sm:$0xff]  }
 0x425   : > { %30802 = vmatprep.subr.bf16.mxu1 %v33841_v35  ;;  %v345_v27 = vld [vmem:[%s35822_s13 + $0xe0] sm:$0xff] }
 0x426   : > { %v948_v28 = vrot.slane %v345_v27, %v35880_v42  ;;  %v941_v30 = vcombine.high %v345_v27, %v345_v27  ;;  %v33912_v27 = vld [vmem:[%s35829_s11 + $0x1ec0] sm:$0xff]  }
 0x427   : > { %30781 = vmatpush3.bf16.msra.mxu0 %v33840_v34  ;;  %v33878_v34 = vld [vmem:[%s35829_s11 + $0x1d00] sm:$0xff]  }
 0x428   : > { %30810 = vmatprep.subr.bf16.mxu0 %v33843_v40  ;;  %30803 = vmatpush3.bf16.msra.mxu1 %v33842_v38  ;;  %v956_v32 = vcombine.high %v948_v28, %v948_v28  ;;  %v955_v33 = vrot.slane %v941_v30, %v35880_v42  ;;  %v2120_v35 = vpack.c.bf16 %v948_v28, %v948_v28  ;;  %v33913_v30 = vld [vmem:[%s35829_s11 + $0x1e80] sm:$0xff]  }
 0x429   : > { %30832 = vmatprep.subr.bf16.mxu1 %v33846_v46  ;;  %v33884_v46 = vld [vmem:[%s35829_s11 + $0x1d88] sm:$0xff]  }
 0x42a   : > { %23311 = vmatmul.mubr.bf16.vlgmr.msra.gmra.mrb[108].mxu0 %v2116_v45  ;;  %v2121_v37 = vpack.c.bf16 %v956_v32, %v956_v32  ;;  %v957_v38 = vcombine.high %v955_v33, %v955_v33  ;;  %v2122_v40 = vpack.c.bf16 %v955_v33, %v955_v33  ;;  %v33883_v45 = vld [vmem:[%s35829_s11 + $0x1dc8] sm:$0xff]  }
 0x42b   : > { %30811 = vmatpush3.bf16.msra.mxu0 %v33845_v44  ;;  %23351 = vmatmul.mubr.bf16.vlgmr.msra.gmra.mrb[108].mxu1 %v2118_v50  ;;  %v33882_v44 = vld [vmem:[%s35829_s11 + $0x1d08] sm:$0xff]   ;;  %v33888_v50 = vld [vmem:[%s35829_s11 + $0x1d90] sm:$0xff]  }
 0x42c   : > { %30812 = vmatprep.subr.bf16.mxu0 %v33848_v51  ;;  %30833 = vmatpush3.bf16.msra.mxu1 %v33847_v49  ;;  %v2123_v43 = vpack.c.bf16 %v957_v38, %v957_v38  ;;  %v33887_v49 = vld [vmem:[%s35829_s11 + $0x1dd0] sm:$0xff]   ;;  %v33889_v51 = vld [vmem:[%s35829_s11 + $0x1d58] sm:$0xff]   ;;  %v33914_v32 = vld [vmem:[%s35829_s11 + $0x1e48] sm:$0xff]  }
 0x42d   : > { %30834 = vmatprep.subr.bf16.mxu1 %v33850_v54  ;;  %23390 = vmatprep.mubr.bf16.mxu0 %v2121_v37  ;;  %v33892_v54 = vld [vmem:[%s35829_s11 + $0x1d98] sm:$0xff]   ;;  %v33918_v37 = vld [vmem:[%s35829_s11 + $0x1e50] sm:$0xff]  }
 0x42e   : > { %23430 = vmatprep.mubr.bf16.mxu1 %v2123_v43  ;;  %v33919_v38 = vld [vmem:[%s35829_s11 + $0x1e10] sm:$0xff]   ;;  %v33923_v43 = vld [vmem:[%s35829_s11 + $0x1e18] sm:$0xff]  }
 0x42f   : > { %30813 = vmatpush3.bf16.msra.mxu0 %v33849_v53  ;;  %v33891_v53 = vld [vmem:[%s35829_s11 + $0x1dd8] sm:$0xff]  }
 0x430   : > { %30814 = vmatprep.subr.bf16.mxu0 %v33852_v56  ;;  %30835 = vmatpush3.bf16.msra.mxu1 %v33851_v55  ;;  %v33893_v55 = vld [vmem:[%s35829_s11 + $0x1d60] sm:$0xff]  }
 0x431   : > { %30836 = vmatprep.subr.bf16.mxu1 %v33854_v58  ;;  %v33894_v56 = vld [vmem:[%s35829_s11 + $0x1d20] sm:$0xff]  }
 0x432   : > { %v33896_v58 = vld [vmem:[%s35829_s11 + $0x1da0] sm:$0xff]  }
 0x433   : > { %30815 = vmatpush3.bf16.msra.mxu0 %v33853_v57  ;;  %v33895_v57 = vld [vmem:[%s35829_s11 + $0x1de0] sm:$0xff]  }
 0x434   : > { %30816 = vmatprep.subr.bf16.mxu0 %v33856_v60  ;;  %30837 = vmatpush3.bf16.msra.mxu1 %v33855_v59  ;;  %v33897_v59 = vld [vmem:[%s35829_s11 + $0x1d68] sm:$0xff]  }
 0x435   : > { %30838 = vmatprep.subr.bf16.mxu1 %v33858_v62 }
 0x437   : > { %30817 = vmatpush3.bf16.msra.mxu0 %v33857_v61  ;;  %v33898_v61 = vld [vmem:[%s35829_s11 + $0x1d28] sm:$0xff]  }
 0x438   : > { %30818 = vmatprep.subr.bf16.mxu0 %v33860_v0  ;;  %30839 = vmatpush3.bf16.msra.mxu1 %v33859_v63  ;;  %v33899_v63 = vld [vmem:[%s35829_s11 + $0x1de8] sm:$0xff]  }
 0x439   : > { %30840 = vmatprep.subr.bf16.mxu1 %v33862_v2 }
 0x43b   : > { %30819 = vmatpush3.bf16.msra.mxu0 %v33861_v1 }
 0x43c   : > { %30820 = vmatprep.subr.bf16.mxu0 %v33864_v4  ;;  %30841 = vmatpush3.bf16.msra.mxu1 %v33863_v3  ;;  %v33900_v3 = vld [vmem:[%s35829_s11 + $0x1da8] sm:$0xff]   ;;  %v33901_v4 = vld [vmem:[%s35829_s11 + $0x1d70] sm:$0xff]  }
 0x43d   : > { %v30518_v5 = vpop.f32.mrb[84].mxu0  ;;  %30842 = vmatprep.subr.bf16.mxu1 %v33866_v8 }
 0x43e   : > { %v30519_v7 = vpop.f32.mrb[85].mxu0  ;;  %v30540_v11 = vpop.f32.mrb[84].mxu1 }
 0x43f   : > { %v30520_v9 = vadd.f32 %v30519_v7, %v30518_v5  ;;  %v30521_v10 = vpop.f32.mrb[86].mxu0  ;;  %v30541_v15 = vpop.f32.mrb[85].mxu1  ;;  %30821 = vmatpush3.bf16.msra.mxu0 %v33865_v6 }
 0x440   : > { %v30522_v14 = vpop.f32.mrb[87].mxu0  ;;  %v30542_v17 = vadd.f32 %v30541_v15, %v30540_v11  ;;  %v30543_v19 = vpop.f32.mrb[86].mxu1  ;;  %30822 = vmatprep.subr.bf16.mxu0 %v33868_v13  ;;  %30843 = vmatpush3.bf16.msra.mxu1 %v33867_v12  ;;  %v33903_v11 = vld [vmem:[%s35829_s11 + $0x1df0] sm:$0xff]   ;;  %v33905_v15 = vld [vmem:[%s35829_s11 + $0x1d78] sm:$0xff]  }
 0x441   : > { %v22833_v16 = vadd.f32 %v30520_v9, %v36878_v29  ;;  %v30544_v21 = vpop.f32.mrb[87].mxu1  ;;  %30844 = vmatprep.subr.bf16.mxu1 %v33870_v20  ;;  %v33875_v29 = vld [vmem:[%s35829_s11 + $0x1cb8] sm:$0xff]   ;;  %v33902_v9 = vld [vmem:[%s35829_s11 + $0x1d30] sm:$0xff]  }
 0x442   : > { %v33904_v14 = vld [vmem:[%s35829_s11 + $0x1db0] sm:$0xff]   ;;  %v33908_v20 = vld [vmem:[%s35829_s11 + $0x1db8] sm:$0xff]  }
 0x443   : > { %v36917_v22 = vadd.f32 %v30542_v17, %v22833_v16  ;;  %30823 = vmatpush3.bf16.msra.mxu0 %v33869_v18  ;;  %v33906_v16 = vld [vmem:[%s35829_s11 + $0x1d38] sm:$0xff]  }
 0x444   : > { %30824 = vmatprep.subr.bf16.mxu0 %v33872_v24  ;;  %30845 = vmatpush3.bf16.msra.mxu1 %v33871_v23  ;;  %v33907_v17 = vld [vmem:[%s35829_s11 + $0x1df8] sm:$0xff]  }
 0x445   : > { %30846 = vmatprep.subr.bf16.mxu1 %v33874_v26  ;;  %v346_v18 = vld [vmem:[%s35822_s13 + $0xe8] sm:$0xff] }
 0x446   : > { %v965_v19 = vrot.slane %v346_v18, %v35880_v42  ;;  %v958_v21 = vcombine.high %v346_v18, %v346_v18  ;;  %v33945_v18 = vld [vmem:[%s35829_s11 + $0x1fc0] sm:$0xff]  }
 0x447   : > { %30825 = vmatpush3.bf16.msra.mxu0 %v33873_v25  ;;  %v33911_v25 = vld [vmem:[%s35829_s11 + $0x1e00] sm:$0xff]  }
 0x448   : > { %30854 = vmatprep.subr.bf16.mxu0 %v33876_v31  ;;  %30847 = vmatpush3.bf16.msra.mxu1 %v33875_v29  ;;  %v973_v23 = vcombine.high %v965_v19, %v965_v19  ;;  %v972_v24 = vrot.slane %v958_v21, %v35880_v42  ;;  %v2124_v26 = vpack.c.bf16 %v965_v19, %v965_v19  ;;  %v33946_v21 = vld [vmem:[%s35829_s11 + $0x1f80] sm:$0xff]  }
 0x449   : > { %30876 = vmatprep.subr.bf16.mxu1 %v33879_v36  ;;  %v33917_v36 = vld [vmem:[%s35829_s11 + $0x1e88] sm:$0xff]  }
 0x44a   : > { %23391 = vmatmul.mubr.bf16.vlgmr.msra.gmra.mrb[112].mxu0 %v2120_v35  ;;  %v2125_v28 = vpack.c.bf16 %v973_v23, %v973_v23  ;;  %v974_v29 = vcombine.high %v972_v24, %v972_v24  ;;  %v2126_v31 = vpack.c.bf16 %v972_v24, %v972_v24  ;;  %v33916_v35 = vld [vmem:[%s35829_s11 + $0x1ec8] sm:$0xff]  }
 0x44b   : > { %30855 = vmatpush3.bf16.msra.mxu0 %v33878_v34  ;;  %23431 = vmatmul.mubr.bf16.vlgmr.msra.gmra.mrb[112].mxu1 %v2122_v40  ;;  %v33915_v34 = vld [vmem:[%s35829_s11 + $0x1e08] sm:$0xff]   ;;  %v33921_v40 = vld [vmem:[%s35829_s11 + $0x1e90] sm:$0xff]  }
 0x44c   : > { %30856 = vmatprep.subr.bf16.mxu0 %v33881_v41  ;;  %30877 = vmatpush3.bf16.msra.mxu1 %v33880_v39  ;;  %v2127_v33 = vpack.c.bf16 %v974_v29, %v974_v29  ;;  %v33920_v39 = vld [vmem:[%s35829_s11 + $0x1ed0] sm:$0xff]   ;;  %v33922_v41 = vld [vmem:[%s35829_s11 + $0x1e58] sm:$0xff]   ;;  %v33947_v23 = vld [vmem:[%s35829_s11 + $0x1f48] sm:$0xff]  }
 0x44d   : > { %30878 = vmatprep.subr.bf16.mxu1 %v33883_v45  ;;  %23470 = vmatprep.mubr.bf16.mxu0 %v2125_v28  ;;  %v33925_v45 = vld [vmem:[%s35829_s11 + $0x1e98] sm:$0xff]   ;;  %v33951_v28 = vld [vmem:[%s35829_s11 + $0x1f50] sm:$0xff]  }
 0x44e   : > { %23510 = vmatprep.mubr.bf16.mxu1 %v2127_v33  ;;  %v33952_v29 = vld [vmem:[%s35829_s11 + $0x1f10] sm:$0xff]   ;;  %v33956_v33 = vld [vmem:[%s35829_s11 + $0x1f18] sm:$0xff]  }
 0x44f   : > { %30857 = vmatpush3.bf16.msra.mxu0 %v33882_v44  ;;  %v33924_v44 = vld [vmem:[%s35829_s11 + $0x1ed8] sm:$0xff]  }
 0x450   : > { %30858 = vmatprep.subr.bf16.mxu0 %v33885_v47  ;;  %30879 = vmatpush3.bf16.msra.mxu1 %v33884_v46  ;;  %v33926_v46 = vld [vmem:[%s35829_s11 + $0x1e60] sm:$0xff]  }
 0x451   : > { %30880 = vmatprep.subr.bf16.mxu1 %v33887_v49  ;;  %v33927_v47 = vld [vmem:[%s35829_s11 + $0x1e20] sm:$0xff]  }
 0x452   : > { %v33929_v49 = vld [vmem:[%s35829_s11 + $0x1ea0] sm:$0xff]  }
 0x453   : > { %30859 = vmatpush3.bf16.msra.mxu0 %v33886_v48  ;;  %v33928_v48 = vld [vmem:[%s35829_s11 + $0x1ee0] sm:$0xff]  }
 0x454   : > { %30860 = vmatprep.subr.bf16.mxu0 %v33889_v51  ;;  %30881 = vmatpush3.bf16.msra.mxu1 %v33888_v50  ;;  %v33930_v50 = vld [vmem:[%s35829_s11 + $0x1e68] sm:$0xff]  }
 0x455   : > { %30882 = vmatprep.subr.bf16.mxu1 %v33891_v53 }
 0x457   : > { %30861 = vmatpush3.bf16.msra.mxu0 %v33890_v52  ;;  %v33931_v52 = vld [vmem:[%s35829_s11 + $0x1e28] sm:$0xff]  }
 0x458   : > { %30862 = vmatprep.subr.bf16.mxu0 %v33893_v55  ;;  %30883 = vmatpush3.bf16.msra.mxu1 %v33892_v54  ;;  %v33932_v54 = vld [vmem:[%s35829_s11 + $0x1ee8] sm:$0xff]  }
 0x459   : > { %30884 = vmatprep.subr.bf16.mxu1 %v33895_v57 }
 0x45b   : > { %30863 = vmatpush3.bf16.msra.mxu0 %v33894_v56 }
 0x45c   : > { %30864 = vmatprep.subr.bf16.mxu0 %v33897_v59  ;;  %30885 = vmatpush3.bf16.msra.mxu1 %v33896_v58 }
 0x45d   : > { %v30562_v60 = vpop.f32.mrb[88].mxu0  ;;  %30886 = vmatprep.subr.bf16.mxu1 %v33899_v63 }
 0x45e   : > { %v30563_v62 = vpop.f32.mrb[89].mxu0  ;;  %v30584_v2 = vpop.f32.mrb[88].mxu1 }
 0x45f   : > { %v30564_v0 = vadd.f32 %v30563_v62, %v30562_v60  ;;  %v30565_v1 = vpop.f32.mrb[90].mxu0  ;;  %v30585_v6 = vpop.f32.mrb[89].mxu1  ;;  %30865 = vmatpush3.bf16.msra.mxu0 %v33898_v61  ;;  %v33933_v60 = vld [vmem:[%s35829_s11 + $0x1ea8] sm:$0xff]   ;;  %v33934_v61 = vld [vmem:[%s35829_s11 + $0x1e70] sm:$0xff]  }
 0x460   : > { %v30566_v5 = vpop.f32.mrb[91].mxu0  ;;  %v30586_v8 = vadd.f32 %v30585_v6, %v30584_v2  ;;  %v30587_v10 = vpop.f32.mrb[90].mxu1  ;;  %30866 = vmatprep.subr.bf16.mxu0 %v33901_v4  ;;  %30887 = vmatpush3.bf16.msra.mxu1 %v33900_v3  ;;  %v33936_v3 = vld [vmem:[%s35829_s11 + $0x1ef0] sm:$0xff]   ;;  %v33938_v6 = vld [vmem:[%s35829_s11 + $0x1e78] sm:$0xff]  }
 0x461   : > { %v22913_v7 = vadd.f32 %v30564_v0, %v36917_v22  ;;  %v30588_v12 = vpop.f32.mrb[91].mxu1  ;;  %30888 = vmatprep.subr.bf16.mxu1 %v33903_v11  ;;  %v33909_v22 = vld [vmem:[%s35829_s11 + $0x1e40] sm:$0xff]   ;;  %v33935_v0 = vld [vmem:[%s35829_s11 + $0x1e30] sm:$0xff]   ;;  %v33941_v11 = vld [vmem:[%s35829_s11 + $0x1eb8] sm:$0xff]  }
 0x462   : > { %v33937_v5 = vld [vmem:[%s35829_s11 + $0x1eb0] sm:$0xff]  }
 0x463   : > { %v36955_v13 = vadd.f32 %v30586_v8, %v22913_v7  ;;  %30867 = vmatpush3.bf16.msra.mxu0 %v33902_v9  ;;  %v33939_v7 = vld [vmem:[%s35829_s11 + $0x1e38] sm:$0xff]  }
 0x464   : > { %30868 = vmatprep.subr.bf16.mxu0 %v33905_v15  ;;  %30889 = vmatpush3.bf16.msra.mxu1 %v33904_v14  ;;  %v33940_v8 = vld [vmem:[%s35829_s11 + $0x1ef8] sm:$0xff]  }
 0x465   : > { %30890 = vmatprep.subr.bf16.mxu1 %v33907_v17  ;;  %v347_v9 = vld [vmem:[%s35822_s13 + $0xf0] sm:$0xff] }
 0x466   : > { %v982_v10 = vrot.slane %v347_v9, %v35880_v42  ;;  %v975_v12 = vcombine.high %v347_v9, %v347_v9  ;;  %v33978_v9 = vld [vmem:[%s35829_s11 + $0x20c0] sm:$0xff]  }
 0x467   : > { %30869 = vmatpush3.bf16.msra.mxu0 %v33906_v16  ;;  %v33944_v16 = vld [vmem:[%s35829_s11 + $0x1f00] sm:$0xff]  }
 0x468   : > { %30898 = vmatprep.subr.bf16.mxu0 %v33909_v22  ;;  %30891 = vmatpush3.bf16.msra.mxu1 %v33908_v20  ;;  %v990_v14 = vcombine.high %v982_v10, %v982_v10  ;;  %v989_v15 = vrot.slane %v975_v12, %v35880_v42  ;;  %v2128_v17 = vpack.c.bf16 %v982_v10, %v982_v10  ;;  %v33979_v12 = vld [vmem:[%s35829_s11 + $0x2080] sm:$0xff]  }
 0x469   : > { %30920 = vmatprep.subr.bf16.mxu1 %v33912_v27  ;;  %v33950_v27 = vld [vmem:[%s35829_s11 + $0x1f88] sm:$0xff]  }
 0x46a   : > { %23471 = vmatmul.mubr.bf16.vlgmr.msra.gmra.mrb[116].mxu0 %v2124_v26  ;;  %v2129_v19 = vpack.c.bf16 %v990_v14, %v990_v14  ;;  %v991_v20 = vcombine.high %v989_v15, %v989_v15  ;;  %v2130_v22 = vpack.c.bf16 %v989_v15, %v989_v15  ;;  %v33949_v26 = vld [vmem:[%s35829_s11 + $0x1fc8] sm:$0xff]  }
 0x46b   : > { %30899 = vmatpush3.bf16.msra.mxu0 %v33911_v25  ;;  %23511 = vmatmul.mubr.bf16.vlgmr.msra.gmra.mrb[116].mxu1 %v2126_v31  ;;  %v33948_v25 = vld [vmem:[%s35829_s11 + $0x1f08] sm:$0xff]   ;;  %v33954_v31 = vld [vmem:[%s35829_s11 + $0x1f90] sm:$0xff]  }
 0x46c   : > { %30900 = vmatprep.subr.bf16.mxu0 %v33914_v32  ;;  %30921 = vmatpush3.bf16.msra.mxu1 %v33913_v30  ;;  %v2131_v24 = vpack.c.bf16 %v991_v20, %v991_v20  ;;  %v33953_v30 = vld [vmem:[%s35829_s11 + $0x1fd0] sm:$0xff]   ;;  %v33955_v32 = vld [vmem:[%s35829_s11 + $0x1f58] sm:$0xff]   ;;  %v33980_v14 = vld [vmem:[%s35829_s11 + $0x2048] sm:$0xff]  }
 0x46d   : > { %30922 = vmatprep.subr.bf16.mxu1 %v33916_v35  ;;  %23550 = vmatprep.mubr.bf16.mxu0 %v2129_v19  ;;  %v33958_v35 = vld [vmem:[%s35829_s11 + $0x1f98] sm:$0xff]   ;;  %v33984_v19 = vld [vmem:[%s35829_s11 + $0x2050] sm:$0xff]  }
 0x46e   : > { %23590 = vmatprep.mubr.bf16.mxu1 %v2131_v24  ;;  %v33985_v20 = vld [vmem:[%s35829_s11 + $0x2010] sm:$0xff]   ;;  %v33989_v24 = vld [vmem:[%s35829_s11 + $0x2018] sm:$0xff]  }
 0x46f   : > { %30901 = vmatpush3.bf16.msra.mxu0 %v33915_v34  ;;  %v33957_v34 = vld [vmem:[%s35829_s11 + $0x1fd8] sm:$0xff]  }
 0x470   : > { %30902 = vmatprep.subr.bf16.mxu0 %v33918_v37  ;;  %30923 = vmatpush3.bf16.msra.mxu1 %v33917_v36  ;;  %v33959_v36 = vld [vmem:[%s35829_s11 + $0x1f60] sm:$0xff]  }
 0x471   : > { %30924 = vmatprep.subr.bf16.mxu1 %v33920_v39  ;;  %v33960_v37 = vld [vmem:[%s35829_s11 + $0x1f20] sm:$0xff]  }
 0x472   : > { %v33962_v39 = vld [vmem:[%s35829_s11 + $0x1fa0] sm:$0xff]  }
 0x473   : > { %30903 = vmatpush3.bf16.msra.mxu0 %v33919_v38  ;;  %v33961_v38 = vld [vmem:[%s35829_s11 + $0x1fe0] sm:$0xff]  }
 0x474   : > { %30904 = vmatprep.subr.bf16.mxu0 %v33922_v41  ;;  %30925 = vmatpush3.bf16.msra.mxu1 %v33921_v40  ;;  %v33963_v40 = vld [vmem:[%s35829_s11 + $0x1f68] sm:$0xff]  }
 0x475   : > { %30926 = vmatprep.subr.bf16.mxu1 %v33924_v44 }
 0x477   : > { %30905 = vmatpush3.bf16.msra.mxu0 %v33923_v43  ;;  %v33964_v43 = vld [vmem:[%s35829_s11 + $0x1f28] sm:$0xff]  }
 0x478   : > { %30906 = vmatprep.subr.bf16.mxu0 %v33926_v46  ;;  %30927 = vmatpush3.bf16.msra.mxu1 %v33925_v45  ;;  %v33965_v45 = vld [vmem:[%s35829_s11 + $0x1fe8] sm:$0xff]  }
 0x479   : > { %30928 = vmatprep.subr.bf16.mxu1 %v33928_v48 }
 0x47b   : > { %30907 = vmatpush3.bf16.msra.mxu0 %v33927_v47 }
 0x47c   : > { %30908 = vmatprep.subr.bf16.mxu0 %v33930_v50  ;;  %30929 = vmatpush3.bf16.msra.mxu1 %v33929_v49  ;;  %v33966_v49 = vld [vmem:[%s35829_s11 + $0x1fa8] sm:$0xff]   ;;  %v33967_v50 = vld [vmem:[%s35829_s11 + $0x1f70] sm:$0xff]  }
 0x47d   : > { %v30606_v51 = vpop.f32.mrb[92].mxu0  ;;  %30930 = vmatprep.subr.bf16.mxu1 %v33932_v54 }
 0x47e   : > { %v30607_v53 = vpop.f32.mrb[93].mxu0  ;;  %v30628_v57 = vpop.f32.mrb[92].mxu1 }
 0x47f   : > { %v30608_v55 = vadd.f32 %v30607_v53, %v30606_v51  ;;  %v30609_v56 = vpop.f32.mrb[94].mxu0  ;;  %v30629_v59 = vpop.f32.mrb[93].mxu1  ;;  %30909 = vmatpush3.bf16.msra.mxu0 %v33931_v52 }
 0x480   : > { %v30610_v58 = vpop.f32.mrb[95].mxu0  ;;  %v30630_v63 = vadd.f32 %v30629_v59, %v30628_v57  ;;  %v30631_v1 = vpop.f32.mrb[94].mxu1  ;;  %30910 = vmatprep.subr.bf16.mxu0 %v33934_v61  ;;  %30931 = vmatpush3.bf16.msra.mxu1 %v33933_v60  ;;  %v33969_v57 = vld [vmem:[%s35829_s11 + $0x1ff0] sm:$0xff]   ;;  %v33971_v61 = vld [vmem:[%s35829_s11 + $0x1f78] sm:$0xff]  }
 0x481   : > { %v22993_v62 = vadd.f32 %v30608_v55, %v36955_v13  ;;  %v30632_v4 = vpop.f32.mrb[95].mxu1  ;;  %30932 = vmatprep.subr.bf16.mxu1 %v33936_v3  ;;  %v33942_v13 = vld [vmem:[%s35829_s11 + $0x1f40] sm:$0xff]   ;;  %v33968_v55 = vld [vmem:[%s35829_s11 + $0x1f30] sm:$0xff]  }
 0x482   : > { %v33970_v60 = vld [vmem:[%s35829_s11 + $0x1fb0] sm:$0xff]   ;;  %v33975_v4 = vld [vmem:[%s35829_s11 + $0x2040] sm:$0xff]  }
 0x483   : > { %v36992_v2 = vadd.f32 %v30630_v63, %v22993_v62  ;;  %30911 = vmatpush3.bf16.msra.mxu0 %v33935_v0  ;;  %v33972_v62 = vld [vmem:[%s35829_s11 + $0x1f38] sm:$0xff]   ;;  %v348_v0 = vld [vmem:[%s35822_s13 + $0xf8] sm:$0xff] }
 0x484   : > { %30912 = vmatprep.subr.bf16.mxu0 %v33938_v6  ;;  %30933 = vmatpush3.bf16.msra.mxu1 %v33937_v5  ;;  %v33973_v63 = vld [vmem:[%s35829_s11 + $0x1ff8] sm:$0xff]   ;;  %v999_v1 = vrot.slane %v348_v0, %v35880_v42  ;;  %v992_v3 = vcombine.high %v348_v0, %v348_v0  ;;  %v34011_v0 = vld [vmem:[%s35829_s11 + $0x21c0] sm:$0xff]  }
 0x485   : > { %30934 = vmatprep.subr.bf16.mxu1 %v33940_v8 }
 0x486   : > { %v1007_v5 = vcombine.high %v999_v1, %v999_v1  ;;  %v1006_v6 = vrot.slane %v992_v3, %v35880_v42  ;;  %v2132_v8 = vpack.c.bf16 %v999_v1, %v999_v1  ;;  %v34012_v3 = vld [vmem:[%s35829_s11 + $0x2180] sm:$0xff]  }
 0x487   : > { %30913 = vmatpush3.bf16.msra.mxu0 %v33939_v7  ;;  %v33977_v7 = vld [vmem:[%s35829_s11 + $0x2000] sm:$0xff]  }
 0x488   : > { %30942 = vmatprep.subr.bf16.mxu0 %v33942_v13  ;;  %30935 = vmatpush3.bf16.msra.mxu1 %v33941_v11  ;;  %v2133_v10 = vpack.c.bf16 %v1007_v5, %v1007_v5  ;;  %v1008_v11 = vcombine.high %v1006_v6, %v1006_v6  ;;  %v2134_v13 = vpack.c.bf16 %v1006_v6, %v1006_v6  ;;  %v34013_v5 = vld [vmem:[%s35829_s11 + $0x2148] sm:$0xff]  }
 0x489   : > { %30964 = vmatprep.subr.bf16.mxu1 %v33945_v18  ;;  %v33983_v18 = vld [vmem:[%s35829_s11 + $0x2088] sm:$0xff]  }
 0x48a   : > { %23551 = vmatmul.mubr.bf16.vlgmr.msra.gmra.mrb[120].mxu0 %v2128_v17  ;;  %v2135_v15 = vpack.c.bf16 %v1008_v11, %v1008_v11  ;;  %v33982_v17 = vld [vmem:[%s35829_s11 + $0x20c8] sm:$0xff]   ;;  %v34018_v11 = vld [vmem:[%s35829_s11 + $0x2110] sm:$0xff]  }
 0x48b   : > { %30943 = vmatpush3.bf16.msra.mxu0 %v33944_v16  ;;  %23591 = vmatmul.mubr.bf16.vlgmr.msra.gmra.mrb[120].mxu1 %v2130_v22  ;;  %v33981_v16 = vld [vmem:[%s35829_s11 + $0x2008] sm:$0xff]   ;;  %v33987_v22 = vld [vmem:[%s35829_s11 + $0x2090] sm:$0xff]  }
 0x48c   : > { %30944 = vmatprep.subr.bf16.mxu0 %v33947_v23  ;;  %30965 = vmatpush3.bf16.msra.mxu1 %v33946_v21  ;;  %v33986_v21 = vld [vmem:[%s35829_s11 + $0x20d0] sm:$0xff]   ;;  %v33988_v23 = vld [vmem:[%s35829_s11 + $0x2058] sm:$0xff]  }
 0x48d   : > { %30966 = vmatprep.subr.bf16.mxu1 %v33949_v26  ;;  %23630 = vmatprep.mubr.bf16.mxu0 %v2133_v10  ;;  %v33991_v26 = vld [vmem:[%s35829_s11 + $0x2098] sm:$0xff]   ;;  %v34017_v10 = vld [vmem:[%s35829_s11 + $0x2150] sm:$0xff]  }
 0x48e   : > { %23670 = vmatprep.mubr.bf16.mxu1 %v2135_v15  ;;  %v34022_v15 = vld [vmem:[%s35829_s11 + $0x2118] sm:$0xff]  }
 0x48f   : > { %30945 = vmatpush3.bf16.msra.mxu0 %v33948_v25  ;;  %v33990_v25 = vld [vmem:[%s35829_s11 + $0x20d8] sm:$0xff]  }
 0x490   : > { %30946 = vmatprep.subr.bf16.mxu0 %v33951_v28  ;;  %30967 = vmatpush3.bf16.msra.mxu1 %v33950_v27  ;;  %v33992_v27 = vld [vmem:[%s35829_s11 + $0x2060] sm:$0xff]  }
 0x491   : > { %30968 = vmatprep.subr.bf16.mxu1 %v33953_v30  ;;  %v33993_v28 = vld [vmem:[%s35829_s11 + $0x2020] sm:$0xff]  }
 0x492   : > { %v33995_v30 = vld [vmem:[%s35829_s11 + $0x20a0] sm:$0xff]  }
 0x493   : > { %30947 = vmatpush3.bf16.msra.mxu0 %v33952_v29  ;;  %v33994_v29 = vld [vmem:[%s35829_s11 + $0x20e0] sm:$0xff]  }
 0x494   : > { %30948 = vmatprep.subr.bf16.mxu0 %v33955_v32  ;;  %30969 = vmatpush3.bf16.msra.mxu1 %v33954_v31  ;;  %v33996_v31 = vld [vmem:[%s35829_s11 + $0x2068] sm:$0xff]  }
 0x495   : > { %30970 = vmatprep.subr.bf16.mxu1 %v33957_v34 }
 0x497   : > { %30949 = vmatpush3.bf16.msra.mxu0 %v33956_v33  ;;  %v33997_v33 = vld [vmem:[%s35829_s11 + $0x2028] sm:$0xff]  }
 0x498   : > { %30950 = vmatprep.subr.bf16.mxu0 %v33959_v36  ;;  %30971 = vmatpush3.bf16.msra.mxu1 %v33958_v35  ;;  %v33998_v35 = vld [vmem:[%s35829_s11 + $0x20e8] sm:$0xff]  }
 0x499   : > { %30972 = vmatprep.subr.bf16.mxu1 %v33961_v38 }
 0x49b   : > { %30951 = vmatpush3.bf16.msra.mxu0 %v33960_v37 }
 0x49c   : > { %30952 = vmatprep.subr.bf16.mxu0 %v33963_v40  ;;  %30973 = vmatpush3.bf16.msra.mxu1 %v33962_v39  ;;  %v33999_v39 = vld [vmem:[%s35829_s11 + $0x20a8] sm:$0xff]   ;;  %v34000_v40 = vld [vmem:[%s35829_s11 + $0x2070] sm:$0xff]  }
 0x49d   : > { %v30650_v41 = vpop.f32.mrb[96].mxu0  ;;  %30974 = vmatprep.subr.bf16.mxu1 %v33965_v45 }
 0x49e   : > { %v30651_v44 = vpop.f32.mrb[97].mxu0  ;;  %v30672_v48 = vpop.f32.mrb[96].mxu1 }
 0x49f   : > { %v30652_v46 = vadd.f32 %v30651_v44, %v30650_v41  ;;  %v30653_v47 = vpop.f32.mrb[98].mxu0  ;;  %v30673_v52 = vpop.f32.mrb[97].mxu1  ;;  %30953 = vmatpush3.bf16.msra.mxu0 %v33964_v43 }
 0x4a0   : > { %v30654_v51 = vpop.f32.mrb[99].mxu0  ;;  %v30674_v54 = vadd.f32 %v30673_v52, %v30672_v48  ;;  %v30675_v56 = vpop.f32.mrb[98].mxu1  ;;  %30954 = vmatprep.subr.bf16.mxu0 %v33967_v50  ;;  %30975 = vmatpush3.bf16.msra.mxu1 %v33966_v49  ;;  %v34002_v48 = vld [vmem:[%s35829_s11 + $0x20f0] sm:$0xff]   ;;  %v34004_v52 = vld [vmem:[%s35829_s11 + $0x2078] sm:$0xff]  }
 0x4a1   : > { %v23073_v53 = vadd.f32 %v30652_v46, %v36992_v2  ;;  %v30676_v58 = vpop.f32.mrb[99].mxu1  ;;  %30976 = vmatprep.subr.bf16.mxu1 %v33969_v57  ;;  %v33974_v2 = vld [vmem:[%s35829_s11 + $0x1fb8] sm:$0xff]   ;;  %v34001_v46 = vld [vmem:[%s35829_s11 + $0x2030] sm:$0xff]  }
 0x4a2   : > { %v34003_v51 = vld [vmem:[%s35829_s11 + $0x20b0] sm:$0xff]   ;;  %v34007_v57 = vld [vmem:[%s35829_s11 + $0x20b8] sm:$0xff]  }
 0x4a3   : > { %v37031_v59 = vadd.f32 %v30674_v54, %v23073_v53  ;;  %30955 = vmatpush3.bf16.msra.mxu0 %v33968_v55  ;;  %v34005_v53 = vld [vmem:[%s35829_s11 + $0x2038] sm:$0xff]  }
 0x4a4   : > { %30956 = vmatprep.subr.bf16.mxu0 %v33971_v61  ;;  %30977 = vmatpush3.bf16.msra.mxu1 %v33970_v60  ;;  %v34006_v54 = vld [vmem:[%s35829_s11 + $0x20f8] sm:$0xff]  }
 0x4a5   : > { %30978 = vmatprep.subr.bf16.mxu1 %v33973_v63  ;;  %v349_v55 = vld [vmem:[%s35822_s13 + $0x100] sm:$0xff] }
 0x4a6   : > { %v1016_v56 = vrot.slane %v349_v55, %v35880_v42  ;;  %v1009_v58 = vcombine.high %v349_v55, %v349_v55  ;;  %v34044_v55 = vld [vmem:[%s35829_s11 + $0x22c0] sm:$0xff]  }
 0x4a7   : > { %30957 = vmatpush3.bf16.msra.mxu0 %v33972_v62  ;;  %v34010_v62 = vld [vmem:[%s35829_s11 + $0x2100] sm:$0xff]  }
 0x4a8   : > { %30986 = vmatprep.subr.bf16.mxu0 %v33975_v4  ;;  %30979 = vmatpush3.bf16.msra.mxu1 %v33974_v2  ;;  %v1024_v60 = vcombine.high %v1016_v56, %v1016_v56  ;;  %v1023_v61 = vrot.slane %v1009_v58, %v35880_v42  ;;  %v2136_v63 = vpack.c.bf16 %v1016_v56, %v1016_v56  ;;  %v34045_v58 = vld [vmem:[%s35829_s11 + $0x2280] sm:$0xff]  }
 0x4a9   : > { %31008 = vmatprep.subr.bf16.mxu1 %v33978_v9  ;;  %v34016_v9 = vld [vmem:[%s35829_s11 + $0x2188] sm:$0xff]  }
 0x4aa   : > { %23631 = vmatmul.mubr.bf16.vlgmr.msra.gmra.mrb[124].mxu0 %v2132_v8  ;;  %v2137_v1 = vpack.c.bf16 %v1024_v60, %v1024_v60  ;;  %v1025_v2 = vcombine.high %v1023_v61, %v1023_v61  ;;  %v2138_v4 = vpack.c.bf16 %v1023_v61, %v1023_v61  ;;  %v34015_v8 = vld [vmem:[%s35829_s11 + $0x21c8] sm:$0xff]  }
 0x4ab   : > { %30987 = vmatpush3.bf16.msra.mxu0 %v33977_v7  ;;  %23671 = vmatmul.mubr.bf16.vlgmr.msra.gmra.mrb[124].mxu1 %v2134_v13  ;;  %v34014_v7 = vld [vmem:[%s35829_s11 + $0x2108] sm:$0xff]   ;;  %v34020_v13 = vld [vmem:[%s35829_s11 + $0x2190] sm:$0xff]  }
 0x4ac   : > { %30988 = vmatprep.subr.bf16.mxu0 %v33980_v14  ;;  %31009 = vmatpush3.bf16.msra.mxu1 %v33979_v12  ;;  %v2139_v6 = vpack.c.bf16 %v1025_v2, %v1025_v2  ;;  %v34019_v12 = vld [vmem:[%s35829_s11 + $0x21d0] sm:$0xff]   ;;  %v34021_v14 = vld [vmem:[%s35829_s11 + $0x2158] sm:$0xff]   ;;  %v34046_v60 = vld [vmem:[%s35829_s11 + $0x2248] sm:$0xff]  }
 0x4ad   : > { %31010 = vmatprep.subr.bf16.mxu1 %v33982_v17  ;;  %23710 = vmatprep.mubr.bf16.mxu0 %v2137_v1  ;;  %v34024_v17 = vld [vmem:[%s35829_s11 + $0x2198] sm:$0xff]   ;;  %v34050_v1 = vld [vmem:[%s35829_s11 + $0x2250] sm:$0xff]  }
 0x4ae   : > { %23750 = vmatprep.mubr.bf16.mxu1 %v2139_v6  ;;  %v34051_v2 = vld [vmem:[%s35829_s11 + $0x2210] sm:$0xff]   ;;  %v34055_v6 = vld [vmem:[%s35829_s11 + $0x2218] sm:$0xff]  }
 0x4af   : > { %30989 = vmatpush3.bf16.msra.mxu0 %v33981_v16  ;;  %v34023_v16 = vld [vmem:[%s35829_s11 + $0x21d8] sm:$0xff]  }
 0x4b0   : > { %30990 = vmatprep.subr.bf16.mxu0 %v33984_v19  ;;  %31011 = vmatpush3.bf16.msra.mxu1 %v33983_v18  ;;  %v34025_v18 = vld [vmem:[%s35829_s11 + $0x2160] sm:$0xff]  }
 0x4b1   : > { %31012 = vmatprep.subr.bf16.mxu1 %v33986_v21  ;;  %v34026_v19 = vld [vmem:[%s35829_s11 + $0x2120] sm:$0xff]  }
 0x4b2   : > { %v34028_v21 = vld [vmem:[%s35829_s11 + $0x21a0] sm:$0xff]  }
 0x4b3   : > { %30991 = vmatpush3.bf16.msra.mxu0 %v33985_v20  ;;  %v34027_v20 = vld [vmem:[%s35829_s11 + $0x21e0] sm:$0xff]  }
 0x4b4   : > { %30992 = vmatprep.subr.bf16.mxu0 %v33988_v23  ;;  %31013 = vmatpush3.bf16.msra.mxu1 %v33987_v22  ;;  %v34029_v22 = vld [vmem:[%s35829_s11 + $0x2168] sm:$0xff]  }
 0x4b5   : > { %31014 = vmatprep.subr.bf16.mxu1 %v33990_v25 }
 0x4b7   : > { %30993 = vmatpush3.bf16.msra.mxu0 %v33989_v24  ;;  %v34030_v24 = vld [vmem:[%s35829_s11 + $0x2128] sm:$0xff]  }
 0x4b8   : > { %30994 = vmatprep.subr.bf16.mxu0 %v33992_v27  ;;  %31015 = vmatpush3.bf16.msra.mxu1 %v33991_v26  ;;  %v34031_v26 = vld [vmem:[%s35829_s11 + $0x21e8] sm:$0xff]  }
 0x4b9   : > { %31016 = vmatprep.subr.bf16.mxu1 %v33994_v29 }
 0x4bb   : > { %30995 = vmatpush3.bf16.msra.mxu0 %v33993_v28 }
 0x4bc   : > { %30996 = vmatprep.subr.bf16.mxu0 %v33996_v31  ;;  %31017 = vmatpush3.bf16.msra.mxu1 %v33995_v30 }
 0x4bd   : > { %v30694_v32 = vpop.f32.mrb[100].mxu0  ;;  %31018 = vmatprep.subr.bf16.mxu1 %v33998_v35 }
 0x4be   : > { %v30695_v34 = vpop.f32.mrb[101].mxu0  ;;  %v30716_v38 = vpop.f32.mrb[100].mxu1 }
 0x4bf   : > { %v30696_v36 = vadd.f32 %v30695_v34, %v30694_v32  ;;  %v30697_v37 = vpop.f32.mrb[102].mxu0  ;;  %v30717_v43 = vpop.f32.mrb[101].mxu1  ;;  %30997 = vmatpush3.bf16.msra.mxu0 %v33997_v33  ;;  %v34032_v32 = vld [vmem:[%s35829_s11 + $0x21a8] sm:$0xff]   ;;  %v34033_v33 = vld [vmem:[%s35829_s11 + $0x2170] sm:$0xff]  }
 0x4c0   : > { %v30698_v41 = vpop.f32.mrb[103].mxu0  ;;  %v30718_v45 = vadd.f32 %v30717_v43, %v30716_v38  ;;  %v30719_v47 = vpop.f32.mrb[102].mxu1  ;;  %30998 = vmatprep.subr.bf16.mxu0 %v34000_v40  ;;  %31019 = vmatpush3.bf16.msra.mxu1 %v33999_v39  ;;  %v34035_v39 = vld [vmem:[%s35829_s11 + $0x21f0] sm:$0xff]   ;;  %v34037_v43 = vld [vmem:[%s35829_s11 + $0x2178] sm:$0xff]  }
 0x4c1   : > { %v23153_v44 = vadd.f32 %v30696_v36, %v37031_v59  ;;  %v30720_v49 = vpop.f32.mrb[103].mxu1  ;;  %31020 = vmatprep.subr.bf16.mxu1 %v34002_v48  ;;  %v34008_v59 = vld [vmem:[%s35829_s11 + $0x2140] sm:$0xff]   ;;  %v34034_v36 = vld [vmem:[%s35829_s11 + $0x2130] sm:$0xff]   ;;  %v34040_v48 = vld [vmem:[%s35829_s11 + $0x21b8] sm:$0xff]  }
 0x4c2   : > { %v34036_v41 = vld [vmem:[%s35829_s11 + $0x21b0] sm:$0xff]  }
 0x4c3   : > { %v37069_v50 = vadd.f32 %v30718_v45, %v23153_v44  ;;  %30999 = vmatpush3.bf16.msra.mxu0 %v34001_v46  ;;  %v34038_v44 = vld [vmem:[%s35829_s11 + $0x2138] sm:$0xff]  }
 0x4c4   : > { %31000 = vmatprep.subr.bf16.mxu0 %v34004_v52  ;;  %31021 = vmatpush3.bf16.msra.mxu1 %v34003_v51  ;;  %v34039_v45 = vld [vmem:[%s35829_s11 + $0x21f8] sm:$0xff]  }
 0x4c5   : > { %31022 = vmatprep.subr.bf16.mxu1 %v34006_v54  ;;  %v350_v46 = vld [vmem:[%s35822_s13 + $0x108] sm:$0xff] }
 0x4c6   : > { %v1033_v47 = vrot.slane %v350_v46, %v35880_v42  ;;  %v1026_v49 = vcombine.high %v350_v46, %v350_v46  ;;  %v34077_v46 = vld [vmem:[%s35829_s11 + $0x23c0] sm:$0xff]  }
 0x4c7   : > { %31001 = vmatpush3.bf16.msra.mxu0 %v34005_v53  ;;  %v34043_v53 = vld [vmem:[%s35829_s11 + $0x2200] sm:$0xff]  }
 0x4c8   : > { %31030 = vmatprep.subr.bf16.mxu0 %v34008_v59  ;;  %31023 = vmatpush3.bf16.msra.mxu1 %v34007_v57  ;;  %v1041_v51 = vcombine.high %v1033_v47, %v1033_v47  ;;  %v1040_v52 = vrot.slane %v1026_v49, %v35880_v42  ;;  %v2140_v54 = vpack.c.bf16 %v1033_v47, %v1033_v47  ;;  %v34078_v49 = vld [vmem:[%s35829_s11 + $0x2380] sm:$0xff]  }
 0x4c9   : > { %31052 = vmatprep.subr.bf16.mxu1 %v34011_v0  ;;  %v34049_v0 = vld [vmem:[%s35829_s11 + $0x2288] sm:$0xff]  }
 0x4ca   : > { %23711 = vmatmul.mubr.bf16.vlgmr.msra.gmra.mrb[128].mxu0 %v2136_v63  ;;  %v2141_v56 = vpack.c.bf16 %v1041_v51, %v1041_v51  ;;  %v1042_v57 = vcombine.high %v1040_v52, %v1040_v52  ;;  %v2142_v59 = vpack.c.bf16 %v1040_v52, %v1040_v52  ;;  %v34048_v63 = vld [vmem:[%s35829_s11 + $0x22c8] sm:$0xff]  }
 0x4cb   : > { %31031 = vmatpush3.bf16.msra.mxu0 %v34010_v62  ;;  %23751 = vmatmul.mubr.bf16.vlgmr.msra.gmra.mrb[128].mxu1 %v2138_v4  ;;  %v34047_v62 = vld [vmem:[%s35829_s11 + $0x2208] sm:$0xff]   ;;  %v34053_v4 = vld [vmem:[%s35829_s11 + $0x2290] sm:$0xff]  }
 0x4cc   : > { %31032 = vmatprep.subr.bf16.mxu0 %v34013_v5  ;;  %31053 = vmatpush3.bf16.msra.mxu1 %v34012_v3  ;;  %v2143_v61 = vpack.c.bf16 %v1042_v57, %v1042_v57  ;;  %v34052_v3 = vld [vmem:[%s35829_s11 + $0x22d0] sm:$0xff]   ;;  %v34054_v5 = vld [vmem:[%s35829_s11 + $0x2258] sm:$0xff]   ;;  %v34079_v51 = vld [vmem:[%s35829_s11 + $0x2348] sm:$0xff]  }
 0x4cd   : > { %31054 = vmatprep.subr.bf16.mxu1 %v34015_v8  ;;  %23790 = vmatprep.mubr.bf16.mxu0 %v2141_v56  ;;  %v34057_v8 = vld [vmem:[%s35829_s11 + $0x2298] sm:$0xff]   ;;  %v34083_v56 = vld [vmem:[%s35829_s11 + $0x2350] sm:$0xff]  }
 0x4ce   : > { %23830 = vmatprep.mubr.bf16.mxu1 %v2143_v61  ;;  %v34084_v57 = vld [vmem:[%s35829_s11 + $0x2310] sm:$0xff]   ;;  %v34088_v61 = vld [vmem:[%s35829_s11 + $0x2318] sm:$0xff]  }
 0x4cf   : > { %31033 = vmatpush3.bf16.msra.mxu0 %v34014_v7  ;;  %v34056_v7 = vld [vmem:[%s35829_s11 + $0x22d8] sm:$0xff]  }
 0x4d0   : > { %31034 = vmatprep.subr.bf16.mxu0 %v34017_v10  ;;  %31055 = vmatpush3.bf16.msra.mxu1 %v34016_v9  ;;  %v34058_v9 = vld [vmem:[%s35829_s11 + $0x2260] sm:$0xff]  }
 0x4d1   : > { %31056 = vmatprep.subr.bf16.mxu1 %v34019_v12  ;;  %v34059_v10 = vld [vmem:[%s35829_s11 + $0x2220] sm:$0xff]  }
 0x4d2   : > { %v34061_v12 = vld [vmem:[%s35829_s11 + $0x22a0] sm:$0xff]  }
 0x4d3   : > { %31035 = vmatpush3.bf16.msra.mxu0 %v34018_v11  ;;  %v34060_v11 = vld [vmem:[%s35829_s11 + $0x22e0] sm:$0xff]  }
 0x4d4   : > { %31036 = vmatprep.subr.bf16.mxu0 %v34021_v14  ;;  %31057 = vmatpush3.bf16.msra.mxu1 %v34020_v13  ;;  %v34062_v13 = vld [vmem:[%s35829_s11 + $0x2268] sm:$0xff]  }
 0x4d5   : > { %31058 = vmatprep.subr.bf16.mxu1 %v34023_v16 }
 0x4d7   : > { %31037 = vmatpush3.bf16.msra.mxu0 %v34022_v15  ;;  %v34063_v15 = vld [vmem:[%s35829_s11 + $0x2228] sm:$0xff]  }
 0x4d8   : > { %31038 = vmatprep.subr.bf16.mxu0 %v34025_v18  ;;  %31059 = vmatpush3.bf16.msra.mxu1 %v34024_v17  ;;  %v34064_v17 = vld [vmem:[%s35829_s11 + $0x22e8] sm:$0xff]  }
 0x4d9   : > { %31060 = vmatprep.subr.bf16.mxu1 %v34027_v20 }
 0x4db   : > { %31039 = vmatpush3.bf16.msra.mxu0 %v34026_v19 }
 0x4dc   : > { %31040 = vmatprep.subr.bf16.mxu0 %v34029_v22  ;;  %31061 = vmatpush3.bf16.msra.mxu1 %v34028_v21  ;;  %v34065_v21 = vld [vmem:[%s35829_s11 + $0x22a8] sm:$0xff]   ;;  %v34066_v22 = vld [vmem:[%s35829_s11 + $0x2270] sm:$0xff]  }
 0x4dd   : > { %v30738_v23 = vpop.f32.mrb[104].mxu0  ;;  %31062 = vmatprep.subr.bf16.mxu1 %v34031_v26 }
 0x4de   : > { %v30739_v25 = vpop.f32.mrb[105].mxu0  ;;  %v30760_v29 = vpop.f32.mrb[104].mxu1 }
 0x4df   : > { %v30740_v27 = vadd.f32 %v30739_v25, %v30738_v23  ;;  %v30741_v28 = vpop.f32.mrb[106].mxu0  ;;  %v30761_v31 = vpop.f32.mrb[105].mxu1  ;;  %31041 = vmatpush3.bf16.msra.mxu0 %v34030_v24 }
 0x4e0   : > { %v30742_v30 = vpop.f32.mrb[107].mxu0  ;;  %v30762_v35 = vadd.f32 %v30761_v31, %v30760_v29  ;;  %v30763_v37 = vpop.f32.mrb[106].mxu1  ;;  %31042 = vmatprep.subr.bf16.mxu0 %v34033_v33  ;;  %31063 = vmatpush3.bf16.msra.mxu1 %v34032_v32  ;;  %v34068_v29 = vld [vmem:[%s35829_s11 + $0x22f0] sm:$0xff]   ;;  %v34070_v33 = vld [vmem:[%s35829_s11 + $0x2278] sm:$0xff]  }
 0x4e1   : > { %v23233_v34 = vadd.f32 %v30740_v27, %v37069_v50  ;;  %v30764_v40 = vpop.f32.mrb[107].mxu1  ;;  %31064 = vmatprep.subr.bf16.mxu1 %v34035_v39  ;;  %v34041_v50 = vld [vmem:[%s35829_s11 + $0x2240] sm:$0xff]   ;;  %v34067_v27 = vld [vmem:[%s35829_s11 + $0x2230] sm:$0xff]  }
 0x4e2   : > { %v34069_v32 = vld [vmem:[%s35829_s11 + $0x22b0] sm:$0xff]   ;;  %v34074_v40 = vld [vmem:[%s35829_s11 + $0x2340] sm:$0xff]  }
 0x4e3   : > { %v37106_v38 = vadd.f32 %v30762_v35, %v23233_v34  ;;  %31043 = vmatpush3.bf16.msra.mxu0 %v34034_v36  ;;  %v34071_v34 = vld [vmem:[%s35829_s11 + $0x2238] sm:$0xff]  }
 0x4e4   : > { %31044 = vmatprep.subr.bf16.mxu0 %v34037_v43  ;;  %31065 = vmatpush3.bf16.msra.mxu1 %v34036_v41  ;;  %v34072_v35 = vld [vmem:[%s35829_s11 + $0x22f8] sm:$0xff]  }
 0x4e5   : > { %31066 = vmatprep.subr.bf16.mxu1 %v34039_v45  ;;  %v351_v36 = vld [vmem:[%s35822_s13 + $0x110] sm:$0xff] }
 0x4e6   : > { %v1050_v37 = vrot.slane %v351_v36, %v35880_v42  ;;  %v1043_v39 = vcombine.high %v351_v36, %v351_v36  ;;  %v34110_v36 = vld [vmem:[%s35829_s11 + $0x24c0] sm:$0xff]  }
 0x4e7   : > { %31045 = vmatpush3.bf16.msra.mxu0 %v34038_v44  ;;  %v34076_v44 = vld [vmem:[%s35829_s11 + $0x2300] sm:$0xff]  }
 0x4e8   : > { %31074 = vmatprep.subr.bf16.mxu0 %v34041_v50  ;;  %31067 = vmatpush3.bf16.msra.mxu1 %v34040_v48  ;;  %v1058_v41 = vcombine.high %v1050_v37, %v1050_v37  ;;  %v1057_v43 = vrot.slane %v1043_v39, %v35880_v42  ;;  %v2144_v45 = vpack.c.bf16 %v1050_v37, %v1050_v37  ;;  %v34111_v39 = vld [vmem:[%s35829_s11 + $0x2480] sm:$0xff]  }
 0x4e9   : > { %31096 = vmatprep.subr.bf16.mxu1 %v34044_v55  ;;  %v34082_v55 = vld [vmem:[%s35829_s11 + $0x2388] sm:$0xff]  }
 0x4ea   : > { %23791 = vmatmul.mubr.bf16.vlgmr.msra.gmra.mrb[132].mxu0 %v2140_v54  ;;  %v2145_v47 = vpack.c.bf16 %v1058_v41, %v1058_v41  ;;  %v1059_v48 = vcombine.high %v1057_v43, %v1057_v43  ;;  %v2146_v50 = vpack.c.bf16 %v1057_v43, %v1057_v43  ;;  %v34081_v54 = vld [vmem:[%s35829_s11 + $0x23c8] sm:$0xff]  }
 0x4eb   : > { %31075 = vmatpush3.bf16.msra.mxu0 %v34043_v53  ;;  %23831 = vmatmul.mubr.bf16.vlgmr.msra.gmra.mrb[132].mxu1 %v2142_v59  ;;  %v34080_v53 = vld [vmem:[%s35829_s11 + $0x2308] sm:$0xff]   ;;  %v34086_v59 = vld [vmem:[%s35829_s11 + $0x2390] sm:$0xff]  }
 0x4ec   : > { %31076 = vmatprep.subr.bf16.mxu0 %v34046_v60  ;;  %31097 = vmatpush3.bf16.msra.mxu1 %v34045_v58  ;;  %v2147_v52 = vpack.c.bf16 %v1059_v48, %v1059_v48  ;;  %v34085_v58 = vld [vmem:[%s35829_s11 + $0x23d0] sm:$0xff]   ;;  %v34087_v60 = vld [vmem:[%s35829_s11 + $0x2358] sm:$0xff]   ;;  %v34112_v41 = vld [vmem:[%s35829_s11 + $0x2448] sm:$0xff]  }
 0x4ed   : > { %31098 = vmatprep.subr.bf16.mxu1 %v34048_v63  ;;  %23870 = vmatprep.mubr.bf16.mxu0 %v2145_v47  ;;  %v34090_v63 = vld [vmem:[%s35829_s11 + $0x2398] sm:$0xff]   ;;  %v34116_v47 = vld [vmem:[%s35829_s11 + $0x2450] sm:$0xff]  }
 0x4ee   : > { %23910 = vmatprep.mubr.bf16.mxu1 %v2147_v52  ;;  %v34117_v48 = vld [vmem:[%s35829_s11 + $0x2410] sm:$0xff]   ;;  %v34121_v52 = vld [vmem:[%s35829_s11 + $0x2418] sm:$0xff]  }
 0x4ef   : > { %31077 = vmatpush3.bf16.msra.mxu0 %v34047_v62  ;;  %v34089_v62 = vld [vmem:[%s35829_s11 + $0x23d8] sm:$0xff]  }
 0x4f0   : > { %31078 = vmatprep.subr.bf16.mxu0 %v34050_v1  ;;  %31099 = vmatpush3.bf16.msra.mxu1 %v34049_v0  ;;  %v34091_v0 = vld [vmem:[%s35829_s11 + $0x2360] sm:$0xff]  }
 0x4f1   : > { %31100 = vmatprep.subr.bf16.mxu1 %v34052_v3  ;;  %v34092_v1 = vld [vmem:[%s35829_s11 + $0x2320] sm:$0xff]  }
 0x4f2   : > { %v34094_v3 = vld [vmem:[%s35829_s11 + $0x23a0] sm:$0xff]  }
 0x4f3   : > { %31079 = vmatpush3.bf16.msra.mxu0 %v34051_v2  ;;  %v34093_v2 = vld [vmem:[%s35829_s11 + $0x23e0] sm:$0xff]  }
 0x4f4   : > { %31080 = vmatprep.subr.bf16.mxu0 %v34054_v5  ;;  %31101 = vmatpush3.bf16.msra.mxu1 %v34053_v4  ;;  %v34095_v4 = vld [vmem:[%s35829_s11 + $0x2368] sm:$0xff]  }
 0x4f5   : > { %31102 = vmatprep.subr.bf16.mxu1 %v34056_v7 }
 0x4f7   : > { %31081 = vmatpush3.bf16.msra.mxu0 %v34055_v6  ;;  %v34096_v6 = vld [vmem:[%s35829_s11 + $0x2328] sm:$0xff]  }
 0x4f8   : > { %31082 = vmatprep.subr.bf16.mxu0 %v34058_v9  ;;  %31103 = vmatpush3.bf16.msra.mxu1 %v34057_v8  ;;  %v34097_v8 = vld [vmem:[%s35829_s11 + $0x23e8] sm:$0xff]  }
 0x4f9   : > { %31104 = vmatprep.subr.bf16.mxu1 %v34060_v11 }
 0x4fb   : > { %31083 = vmatpush3.bf16.msra.mxu0 %v34059_v10 }
 0x4fc   : > { %31084 = vmatprep.subr.bf16.mxu0 %v34062_v13  ;;  %31105 = vmatpush3.bf16.msra.mxu1 %v34061_v12  ;;  %v34098_v12 = vld [vmem:[%s35829_s11 + $0x23a8] sm:$0xff]   ;;  %v34099_v13 = vld [vmem:[%s35829_s11 + $0x2370] sm:$0xff]  }
 0x4fd   : > { %v30782_v14 = vpop.f32.mrb[108].mxu0  ;;  %31106 = vmatprep.subr.bf16.mxu1 %v34064_v17 }
 0x4fe   : > { %v30783_v16 = vpop.f32.mrb[109].mxu0  ;;  %v30804_v20 = vpop.f32.mrb[108].mxu1 }
 0x4ff   : > { %v30784_v18 = vadd.f32 %v30783_v16, %v30782_v14  ;;  %v30785_v19 = vpop.f32.mrb[110].mxu0  ;;  %v30805_v24 = vpop.f32.mrb[109].mxu1  ;;  %31085 = vmatpush3.bf16.msra.mxu0 %v34063_v15 }
 0x500   : > { %v30786_v23 = vpop.f32.mrb[111].mxu0  ;;  %v30806_v26 = vadd.f32 %v30805_v24, %v30804_v20  ;;  %v30807_v28 = vpop.f32.mrb[110].mxu1  ;;  %31086 = vmatprep.subr.bf16.mxu0 %v34066_v22  ;;  %31107 = vmatpush3.bf16.msra.mxu1 %v34065_v21  ;;  %v34101_v20 = vld [vmem:[%s35829_s11 + $0x23f0] sm:$0xff]   ;;  %v34103_v24 = vld [vmem:[%s35829_s11 + $0x2378] sm:$0xff]  }
 0x501   : > { %v23313_v25 = vadd.f32 %v30784_v18, %v37106_v38  ;;  %v30808_v30 = vpop.f32.mrb[111].mxu1  ;;  %31108 = vmatprep.subr.bf16.mxu1 %v34068_v29  ;;  %v34073_v38 = vld [vmem:[%s35829_s11 + $0x22b8] sm:$0xff]   ;;  %v34100_v18 = vld [vmem:[%s35829_s11 + $0x2330] sm:$0xff]  }
 0x502   : > { %v34102_v23 = vld [vmem:[%s35829_s11 + $0x23b0] sm:$0xff]   ;;  %v34106_v29 = vld [vmem:[%s35829_s11 + $0x23b8] sm:$0xff]  }
 0x503   : > { %v37145_v31 = vadd.f32 %v30806_v26, %v23313_v25  ;;  %31087 = vmatpush3.bf16.msra.mxu0 %v34067_v27  ;;  %v34104_v25 = vld [vmem:[%s35829_s11 + $0x2338] sm:$0xff]   ;;  %v352_v27 = vld [vmem:[%s35822_s13 + $0x118] sm:$0xff] }
 0x504   : > { %31088 = vmatprep.subr.bf16.mxu0 %v34070_v33  ;;  %31109 = vmatpush3.bf16.msra.mxu1 %v34069_v32  ;;  %v34105_v26 = vld [vmem:[%s35829_s11 + $0x23f8] sm:$0xff]   ;;  %v1067_v28 = vrot.slane %v352_v27, %v35880_v42  ;;  %v1060_v30 = vcombine.high %v352_v27, %v352_v27  ;;  %v34143_v27 = vld [vmem:[%s35829_s11 + $0x25c0] sm:$0xff]  }
 0x505   : > { %31110 = vmatprep.subr.bf16.mxu1 %v34072_v35 }
 0x506   : > { %v1075_v32 = vcombine.high %v1067_v28, %v1067_v28  ;;  %v1074_v33 = vrot.slane %v1060_v30, %v35880_v42  ;;  %v2148_v35 = vpack.c.bf16 %v1067_v28, %v1067_v28  ;;  %v34144_v30 = vld [vmem:[%s35829_s11 + $0x2580] sm:$0xff]  }
 0x507   : > { %31089 = vmatpush3.bf16.msra.mxu0 %v34071_v34  ;;  %v34109_v34 = vld [vmem:[%s35829_s11 + $0x2400] sm:$0xff]  }
 0x508   : > { %31118 = vmatprep.subr.bf16.mxu0 %v34074_v40  ;;  %31111 = vmatpush3.bf16.msra.mxu1 %v34073_v38  ;;  %v2149_v37 = vpack.c.bf16 %v1075_v32, %v1075_v32  ;;  %v1076_v38 = vcombine.high %v1074_v33, %v1074_v33  ;;  %v2150_v40 = vpack.c.bf16 %v1074_v33, %v1074_v33  ;;  %v34145_v32 = vld [vmem:[%s35829_s11 + $0x2548] sm:$0xff]  }
 0x509   : > { %31140 = vmatprep.subr.bf16.mxu1 %v34077_v46  ;;  %v34115_v46 = vld [vmem:[%s35829_s11 + $0x2488] sm:$0xff]  }
 0x50a   : > { %23871 = vmatmul.mubr.bf16.vlgmr.msra.gmra.mrb[136].mxu0 %v2144_v45  ;;  %v2151_v43 = vpack.c.bf16 %v1076_v38, %v1076_v38  ;;  %v34114_v45 = vld [vmem:[%s35829_s11 + $0x24c8] sm:$0xff]   ;;  %v34150_v38 = vld [vmem:[%s35829_s11 + $0x2510] sm:$0xff]  }
 0x50b   : > { %31119 = vmatpush3.bf16.msra.mxu0 %v34076_v44  ;;  %23911 = vmatmul.mubr.bf16.vlgmr.msra.gmra.mrb[136].mxu1 %v2146_v50  ;;  %v34113_v44 = vld [vmem:[%s35829_s11 + $0x2408] sm:$0xff]   ;;  %v34119_v50 = vld [vmem:[%s35829_s11 + $0x2490] sm:$0xff]  }
 0x50c   : > { %31120 = vmatprep.subr.bf16.mxu0 %v34079_v51  ;;  %31141 = vmatpush3.bf16.msra.mxu1 %v34078_v49  ;;  %v34118_v49 = vld [vmem:[%s35829_s11 + $0x24d0] sm:$0xff]   ;;  %v34120_v51 = vld [vmem:[%s35829_s11 + $0x2458] sm:$0xff]  }
 0x50d   : > { %31142 = vmatprep.subr.bf16.mxu1 %v34081_v54  ;;  %23950 = vmatprep.mubr.bf16.mxu0 %v2149_v37  ;;  %v34123_v54 = vld [vmem:[%s35829_s11 + $0x2498] sm:$0xff]   ;;  %v34149_v37 = vld [vmem:[%s35829_s11 + $0x2550] sm:$0xff]  }
 0x50e   : > { %23990 = vmatprep.mubr.bf16.mxu1 %v2151_v43  ;;  %v34154_v43 = vld [vmem:[%s35829_s11 + $0x2518] sm:$0xff]  }
 0x50f   : > { %31121 = vmatpush3.bf16.msra.mxu0 %v34080_v53  ;;  %v34122_v53 = vld [vmem:[%s35829_s11 + $0x24d8] sm:$0xff]  }
 0x510   : > { %31122 = vmatprep.subr.bf16.mxu0 %v34083_v56  ;;  %31143 = vmatpush3.bf16.msra.mxu1 %v34082_v55  ;;  %v34124_v55 = vld [vmem:[%s35829_s11 + $0x2460] sm:$0xff]  }
 0x511   : > { %31144 = vmatprep.subr.bf16.mxu1 %v34085_v58  ;;  %v34125_v56 = vld [vmem:[%s35829_s11 + $0x2420] sm:$0xff]  }
 0x512   : > { %v34127_v58 = vld [vmem:[%s35829_s11 + $0x24a0] sm:$0xff]  }
 0x513   : > { %31123 = vmatpush3.bf16.msra.mxu0 %v34084_v57  ;;  %v34126_v57 = vld [vmem:[%s35829_s11 + $0x24e0] sm:$0xff]  }
 0x514   : > { %31124 = vmatprep.subr.bf16.mxu0 %v34087_v60  ;;  %31145 = vmatpush3.bf16.msra.mxu1 %v34086_v59  ;;  %v34128_v59 = vld [vmem:[%s35829_s11 + $0x2468] sm:$0xff]  }
 0x515   : > { %31146 = vmatprep.subr.bf16.mxu1 %v34089_v62 }
 0x517   : > { %31125 = vmatpush3.bf16.msra.mxu0 %v34088_v61  ;;  %v34129_v61 = vld [vmem:[%s35829_s11 + $0x2428] sm:$0xff]  }
 0x518   : > { %31126 = vmatprep.subr.bf16.mxu0 %v34091_v0  ;;  %31147 = vmatpush3.bf16.msra.mxu1 %v34090_v63  ;;  %v34130_v63 = vld [vmem:[%s35829_s11 + $0x24e8] sm:$0xff]  }
 0x519   : > { %31148 = vmatprep.subr.bf16.mxu1 %v34093_v2 }
 0x51b   : > { %31127 = vmatpush3.bf16.msra.mxu0 %v34092_v1 }
 0x51c   : > { %31128 = vmatprep.subr.bf16.mxu0 %v34095_v4  ;;  %31149 = vmatpush3.bf16.msra.mxu1 %v34094_v3 }
 0x51d   : > { %v30826_v5 = vpop.f32.mrb[112].mxu0  ;;  %31150 = vmatprep.subr.bf16.mxu1 %v34097_v8 }
 0x51e   : > { %v30827_v7 = vpop.f32.mrb[113].mxu0  ;;  %v30848_v11 = vpop.f32.mrb[112].mxu1 }
 0x51f   : > { %v30828_v9 = vadd.f32 %v30827_v7, %v30826_v5  ;;  %v30829_v10 = vpop.f32.mrb[114].mxu0  ;;  %v30849_v15 = vpop.f32.mrb[113].mxu1  ;;  %31129 = vmatpush3.bf16.msra.mxu0 %v34096_v6  ;;  %v34131_v5 = vld [vmem:[%s35829_s11 + $0x24a8] sm:$0xff]   ;;  %v34132_v6 = vld [vmem:[%s35829_s11 + $0x2470] sm:$0xff]  }
 0x520   : > { %v30830_v14 = vpop.f32.mrb[115].mxu0  ;;  %v30850_v17 = vadd.f32 %v30849_v15, %v30848_v11  ;;  %v30851_v19 = vpop.f32.mrb[114].mxu1  ;;  %31130 = vmatprep.subr.bf16.mxu0 %v34099_v13  ;;  %31151 = vmatpush3.bf16.msra.mxu1 %v34098_v12  ;;  %v34134_v12 = vld [vmem:[%s35829_s11 + $0x24f0] sm:$0xff]   ;;  %v34136_v15 = vld [vmem:[%s35829_s11 + $0x2478] sm:$0xff]  }
 0x521   : > { %v23393_v16 = vadd.f32 %v30828_v9, %v37145_v31  ;;  %v30852_v21 = vpop.f32.mrb[115].mxu1  ;;  %31152 = vmatprep.subr.bf16.mxu1 %v34101_v20  ;;  %v34107_v31 = vld [vmem:[%s35829_s11 + $0x2440] sm:$0xff]   ;;  %v34133_v9 = vld [vmem:[%s35829_s11 + $0x2430] sm:$0xff]   ;;  %v34139_v20 = vld [vmem:[%s35829_s11 + $0x24b8] sm:$0xff]  }
 0x522   : > { %v34135_v14 = vld [vmem:[%s35829_s11 + $0x24b0] sm:$0xff]  }
 0x523   : > { %v37183_v22 = vadd.f32 %v30850_v17, %v23393_v16  ;;  %31131 = vmatpush3.bf16.msra.mxu0 %v34100_v18  ;;  %v34137_v16 = vld [vmem:[%s35829_s11 + $0x2438] sm:$0xff]  }
 0x524   : > { %31132 = vmatprep.subr.bf16.mxu0 %v34103_v24  ;;  %31153 = vmatpush3.bf16.msra.mxu1 %v34102_v23  ;;  %v34138_v17 = vld [vmem:[%s35829_s11 + $0x24f8] sm:$0xff]  }
 0x525   : > { %31154 = vmatprep.subr.bf16.mxu1 %v34105_v26  ;;  %v353_v18 = vld [vmem:[%s35822_s13 + $0x120] sm:$0xff] }
 0x526   : > { %v1084_v19 = vrot.slane %v353_v18, %v35880_v42  ;;  %v1077_v21 = vcombine.high %v353_v18, %v353_v18  ;;  %v34176_v18 = vld [vmem:[%s35829_s11 + $0x26c0] sm:$0xff]  }
 0x527   : > { %31133 = vmatpush3.bf16.msra.mxu0 %v34104_v25  ;;  %v34142_v25 = vld [vmem:[%s35829_s11 + $0x2500] sm:$0xff]  }
 0x528   : > { %31162 = vmatprep.subr.bf16.mxu0 %v34107_v31  ;;  %31155 = vmatpush3.bf16.msra.mxu1 %v34106_v29  ;;  %v1092_v23 = vcombine.high %v1084_v19, %v1084_v19  ;;  %v1091_v24 = vrot.slane %v1077_v21, %v35880_v42  ;;  %v2152_v26 = vpack.c.bf16 %v1084_v19, %v1084_v19  ;;  %v34177_v21 = vld [vmem:[%s35829_s11 + $0x2680] sm:$0xff]  }
 0x529   : > { %31184 = vmatprep.subr.bf16.mxu1 %v34110_v36  ;;  %v34148_v36 = vld [vmem:[%s35829_s11 + $0x2588] sm:$0xff]  }
 0x52a   : > { %23951 = vmatmul.mubr.bf16.vlgmr.msra.gmra.mrb[140].mxu0 %v2148_v35  ;;  %v2153_v28 = vpack.c.bf16 %v1092_v23, %v1092_v23  ;;  %v1093_v29 = vcombine.high %v1091_v24, %v1091_v24  ;;  %v2154_v31 = vpack.c.bf16 %v1091_v24, %v1091_v24  ;;  %v34147_v35 = vld [vmem:[%s35829_s11 + $0x25c8] sm:$0xff]  }
 0x52b   : > { %31163 = vmatpush3.bf16.msra.mxu0 %v34109_v34  ;;  %23991 = vmatmul.mubr.bf16.vlgmr.msra.gmra.mrb[140].mxu1 %v2150_v40  ;;  %v34146_v34 = vld [vmem:[%s35829_s11 + $0x2508] sm:$0xff]   ;;  %v34152_v40 = vld [vmem:[%s35829_s11 + $0x2590] sm:$0xff]  }
 0x52c   : > { %31164 = vmatprep.subr.bf16.mxu0 %v34112_v41  ;;  %31185 = vmatpush3.bf16.msra.mxu1 %v34111_v39  ;;  %v2155_v33 = vpack.c.bf16 %v1093_v29, %v1093_v29  ;;  %v34151_v39 = vld [vmem:[%s35829_s11 + $0x25d0] sm:$0xff]   ;;  %v34153_v41 = vld [vmem:[%s35829_s11 + $0x2558] sm:$0xff]   ;;  %v34178_v23 = vld [vmem:[%s35829_s11 + $0x2648] sm:$0xff]  }
 0x52d   : > { %31186 = vmatprep.subr.bf16.mxu1 %v34114_v45  ;;  %24030 = vmatprep.mubr.bf16.mxu0 %v2153_v28  ;;  %v34156_v45 = vld [vmem:[%s35829_s11 + $0x2598] sm:$0xff]   ;;  %v34182_v28 = vld [vmem:[%s35829_s11 + $0x2650] sm:$0xff]  }
 0x52e   : > { %24070 = vmatprep.mubr.bf16.mxu1 %v2155_v33  ;;  %v34183_v29 = vld [vmem:[%s35829_s11 + $0x2610] sm:$0xff]   ;;  %v34187_v33 = vld [vmem:[%s35829_s11 + $0x2618] sm:$0xff]  }
 0x52f   : > { %31165 = vmatpush3.bf16.msra.mxu0 %v34113_v44  ;;  %v34155_v44 = vld [vmem:[%s35829_s11 + $0x25d8] sm:$0xff]  }
 0x530   : > { %31166 = vmatprep.subr.bf16.mxu0 %v34116_v47  ;;  %31187 = vmatpush3.bf16.msra.mxu1 %v34115_v46  ;;  %v34157_v46 = vld [vmem:[%s35829_s11 + $0x2560] sm:$0xff]  }
 0x531   : > { %31188 = vmatprep.subr.bf16.mxu1 %v34118_v49  ;;  %v34158_v47 = vld [vmem:[%s35829_s11 + $0x2520] sm:$0xff]  }
 0x532   : > { %v34160_v49 = vld [vmem:[%s35829_s11 + $0x25a0] sm:$0xff]  }
 0x533   : > { %31167 = vmatpush3.bf16.msra.mxu0 %v34117_v48  ;;  %v34159_v48 = vld [vmem:[%s35829_s11 + $0x25e0] sm:$0xff]  }
 0x534   : > { %31168 = vmatprep.subr.bf16.mxu0 %v34120_v51  ;;  %31189 = vmatpush3.bf16.msra.mxu1 %v34119_v50  ;;  %v34161_v50 = vld [vmem:[%s35829_s11 + $0x2568] sm:$0xff]  }
 0x535   : > { %31190 = vmatprep.subr.bf16.mxu1 %v34122_v53 }
 0x537   : > { %31169 = vmatpush3.bf16.msra.mxu0 %v34121_v52  ;;  %v34162_v52 = vld [vmem:[%s35829_s11 + $0x2528] sm:$0xff]  }
 0x538   : > { %31170 = vmatprep.subr.bf16.mxu0 %v34124_v55  ;;  %31191 = vmatpush3.bf16.msra.mxu1 %v34123_v54  ;;  %v34163_v54 = vld [vmem:[%s35829_s11 + $0x25e8] sm:$0xff]  }
 0x539   : > { %31192 = vmatprep.subr.bf16.mxu1 %v34126_v57 }
 0x53b   : > { %31171 = vmatpush3.bf16.msra.mxu0 %v34125_v56 }
 0x53c   : > { %31172 = vmatprep.subr.bf16.mxu0 %v34128_v59  ;;  %31193 = vmatpush3.bf16.msra.mxu1 %v34127_v58  ;;  %v34164_v58 = vld [vmem:[%s35829_s11 + $0x25a8] sm:$0xff]   ;;  %v34165_v59 = vld [vmem:[%s35829_s11 + $0x2570] sm:$0xff]  }
 0x53d   : > { %v30870_v60 = vpop.f32.mrb[116].mxu0  ;;  %31194 = vmatprep.subr.bf16.mxu1 %v34130_v63 }
 0x53e   : > { %v30871_v62 = vpop.f32.mrb[117].mxu0  ;;  %v30892_v2 = vpop.f32.mrb[116].mxu1 }
 0x53f   : > { %v30872_v0 = vadd.f32 %v30871_v62, %v30870_v60  ;;  %v30873_v1 = vpop.f32.mrb[118].mxu0  ;;  %v30893_v4 = vpop.f32.mrb[117].mxu1  ;;  %31173 = vmatpush3.bf16.msra.mxu0 %v34129_v61 }
 0x540   : > { %v30874_v3 = vpop.f32.mrb[119].mxu0  ;;  %v30894_v8 = vadd.f32 %v30893_v4, %v30892_v2  ;;  %v30895_v10 = vpop.f32.mrb[118].mxu1  ;;  %31174 = vmatprep.subr.bf16.mxu0 %v34132_v6  ;;  %31195 = vmatpush3.bf16.msra.mxu1 %v34131_v5  ;;  %v34167_v2 = vld [vmem:[%s35829_s11 + $0x25f0] sm:$0xff]   ;;  %v34169_v6 = vld [vmem:[%s35829_s11 + $0x2578] sm:$0xff]  }
 0x541   : > { %v23473_v7 = vadd.f32 %v30872_v0, %v37183_v22  ;;  %v30896_v13 = vpop.f32.mrb[119].mxu1  ;;  %31196 = vmatprep.subr.bf16.mxu1 %v34134_v12  ;;  %v34140_v22 = vld [vmem:[%s35829_s11 + $0x2540] sm:$0xff]   ;;  %v34166_v0 = vld [vmem:[%s35829_s11 + $0x2530] sm:$0xff]  }
 0x542   : > { %v34168_v5 = vld [vmem:[%s35829_s11 + $0x25b0] sm:$0xff]   ;;  %v34173_v13 = vld [vmem:[%s35829_s11 + $0x2640] sm:$0xff]  }
 0x543   : > { %v37220_v11 = vadd.f32 %v30894_v8, %v23473_v7  ;;  %31175 = vmatpush3.bf16.msra.mxu0 %v34133_v9  ;;  %v34170_v7 = vld [vmem:[%s35829_s11 + $0x2538] sm:$0xff]  }
 0x544   : > { %31176 = vmatprep.subr.bf16.mxu0 %v34136_v15  ;;  %31197 = vmatpush3.bf16.msra.mxu1 %v34135_v14  ;;  %v34171_v8 = vld [vmem:[%s35829_s11 + $0x25f8] sm:$0xff]  }
 0x545   : > { %31198 = vmatprep.subr.bf16.mxu1 %v34138_v17  ;;  %v354_v9 = vld [vmem:[%s35822_s13 + $0x128] sm:$0xff] }
 0x546   : > { %v1101_v10 = vrot.slane %v354_v9, %v35880_v42  ;;  %v1094_v12 = vcombine.high %v354_v9, %v354_v9  ;;  %v34209_v9 = vld [vmem:[%s35829_s11 + $0x27c0] sm:$0xff]  }
 0x547   : > { %31177 = vmatpush3.bf16.msra.mxu0 %v34137_v16  ;;  %v34175_v16 = vld [vmem:[%s35829_s11 + $0x2600] sm:$0xff]  }
 0x548   : > { %31206 = vmatprep.subr.bf16.mxu0 %v34140_v22  ;;  %31199 = vmatpush3.bf16.msra.mxu1 %v34139_v20  ;;  %v1109_v14 = vcombine.high %v1101_v10, %v1101_v10  ;;  %v1108_v15 = vrot.slane %v1094_v12, %v35880_v42  ;;  %v2156_v17 = vpack.c.bf16 %v1101_v10, %v1101_v10  ;;  %v34210_v12 = vld [vmem:[%s35829_s11 + $0x2780] sm:$0xff]  }
 0x549   : > { %31228 = vmatprep.subr.bf16.mxu1 %v34143_v27  ;;  %v34181_v27 = vld [vmem:[%s35829_s11 + $0x2688] sm:$0xff]  }
 0x54a   : > { %24031 = vmatmul.mubr.bf16.vlgmr.msra.gmra.mrb[144].mxu0 %v2152_v26  ;;  %v2157_v19 = vpack.c.bf16 %v1109_v14, %v1109_v14  ;;  %v1110_v20 = vcombine.high %v1108_v15, %v1108_v15  ;;  %v2158_v22 = vpack.c.bf16 %v1108_v15, %v1108_v15  ;;  %v34180_v26 = vld [vmem:[%s35829_s11 + $0x26c8] sm:$0xff]  }
 0x54b   : > { %31207 = vmatpush3.bf16.msra.mxu0 %v34142_v25  ;;  %24071 = vmatmul.mubr.bf16.vlgmr.msra.gmra.mrb[144].mxu1 %v2154_v31  ;;  %v34179_v25 = vld [vmem:[%s35829_s11 + $0x2608] sm:$0xff]   ;;  %v34185_v31 = vld [vmem:[%s35829_s11 + $0x2690] sm:$0xff]  }
 0x54c   : > { %31208 = vmatprep.subr.bf16.mxu0 %v34145_v32  ;;  %31229 = vmatpush3.bf16.msra.mxu1 %v34144_v30  ;;  %v2159_v24 = vpack.c.bf16 %v1110_v20, %v1110_v20  ;;  %v34184_v30 = vld [vmem:[%s35829_s11 + $0x26d0] sm:$0xff]   ;;  %v34186_v32 = vld [vmem:[%s35829_s11 + $0x2658] sm:$0xff]   ;;  %v34211_v14 = vld [vmem:[%s35829_s11 + $0x2748] sm:$0xff]  }
 0x54d   : > { %31230 = vmatprep.subr.bf16.mxu1 %v34147_v35  ;;  %24110 = vmatprep.mubr.bf16.mxu0 %v2157_v19  ;;  %v34189_v35 = vld [vmem:[%s35829_s11 + $0x2698] sm:$0xff]   ;;  %v34215_v19 = vld [vmem:[%s35829_s11 + $0x2750] sm:$0xff]  }
 0x54e   : > { %24150 = vmatprep.mubr.bf16.mxu1 %v2159_v24  ;;  %v34216_v20 = vld [vmem:[%s35829_s11 + $0x2710] sm:$0xff]   ;;  %v34220_v24 = vld [vmem:[%s35829_s11 + $0x2718] sm:$0xff]  }
 0x54f   : > { %31209 = vmatpush3.bf16.msra.mxu0 %v34146_v34  ;;  %v34188_v34 = vld [vmem:[%s35829_s11 + $0x26d8] sm:$0xff]  }
 0x550   : > { %31210 = vmatprep.subr.bf16.mxu0 %v34149_v37  ;;  %31231 = vmatpush3.bf16.msra.mxu1 %v34148_v36  ;;  %v34190_v36 = vld [vmem:[%s35829_s11 + $0x2660] sm:$0xff]  }
 0x551   : > { %31232 = vmatprep.subr.bf16.mxu1 %v34151_v39  ;;  %v34191_v37 = vld [vmem:[%s35829_s11 + $0x2620] sm:$0xff]  }
 0x552   : > { %v34193_v39 = vld [vmem:[%s35829_s11 + $0x26a0] sm:$0xff]  }
 0x553   : > { %31211 = vmatpush3.bf16.msra.mxu0 %v34150_v38  ;;  %v34192_v38 = vld [vmem:[%s35829_s11 + $0x26e0] sm:$0xff]  }
 0x554   : > { %31212 = vmatprep.subr.bf16.mxu0 %v34153_v41  ;;  %31233 = vmatpush3.bf16.msra.mxu1 %v34152_v40  ;;  %v34194_v40 = vld [vmem:[%s35829_s11 + $0x2668] sm:$0xff]  }
 0x555   : > { %31234 = vmatprep.subr.bf16.mxu1 %v34155_v44 }
 0x557   : > { %31213 = vmatpush3.bf16.msra.mxu0 %v34154_v43  ;;  %v34195_v43 = vld [vmem:[%s35829_s11 + $0x2628] sm:$0xff]  }
 0x558   : > { %31214 = vmatprep.subr.bf16.mxu0 %v34157_v46  ;;  %31235 = vmatpush3.bf16.msra.mxu1 %v34156_v45  ;;  %v34196_v45 = vld [vmem:[%s35829_s11 + $0x26e8] sm:$0xff]  }
 0x559   : > { %31236 = vmatprep.subr.bf16.mxu1 %v34159_v48 }
 0x55b   : > { %31215 = vmatpush3.bf16.msra.mxu0 %v34158_v47 }
 0x55c   : > { %31216 = vmatprep.subr.bf16.mxu0 %v34161_v50  ;;  %31237 = vmatpush3.bf16.msra.mxu1 %v34160_v49  ;;  %v34197_v49 = vld [vmem:[%s35829_s11 + $0x26a8] sm:$0xff]   ;;  %v34198_v50 = vld [vmem:[%s35829_s11 + $0x2670] sm:$0xff]  }
 0x55d   : > { %v30914_v51 = vpop.f32.mrb[120].mxu0  ;;  %31238 = vmatprep.subr.bf16.mxu1 %v34163_v54 }
 0x55e   : > { %v30915_v53 = vpop.f32.mrb[121].mxu0  ;;  %v30936_v57 = vpop.f32.mrb[120].mxu1 }
 0x55f   : > { %v30916_v55 = vadd.f32 %v30915_v53, %v30914_v51  ;;  %v30917_v56 = vpop.f32.mrb[122].mxu0  ;;  %v30937_v61 = vpop.f32.mrb[121].mxu1  ;;  %31217 = vmatpush3.bf16.msra.mxu0 %v34162_v52 }
 0x560   : > { %v30918_v60 = vpop.f32.mrb[123].mxu0  ;;  %v30938_v63 = vadd.f32 %v30937_v61, %v30936_v57  ;;  %v30939_v1 = vpop.f32.mrb[122].mxu1  ;;  %31218 = vmatprep.subr.bf16.mxu0 %v34165_v59  ;;  %31239 = vmatpush3.bf16.msra.mxu1 %v34164_v58  ;;  %v34200_v57 = vld [vmem:[%s35829_s11 + $0x26f0] sm:$0xff]   ;;  %v34202_v61 = vld [vmem:[%s35829_s11 + $0x2678] sm:$0xff]  }
 0x561   : > { %v23553_v62 = vadd.f32 %v30916_v55, %v37220_v11  ;;  %v30940_v3 = vpop.f32.mrb[123].mxu1  ;;  %31240 = vmatprep.subr.bf16.mxu1 %v34167_v2  ;;  %v34172_v11 = vld [vmem:[%s35829_s11 + $0x25b8] sm:$0xff]   ;;  %v34199_v55 = vld [vmem:[%s35829_s11 + $0x2630] sm:$0xff]  }
 0x562   : > { %v34201_v60 = vld [vmem:[%s35829_s11 + $0x26b0] sm:$0xff]   ;;  %v34205_v2 = vld [vmem:[%s35829_s11 + $0x26b8] sm:$0xff]  }
 0x563   : > { %v37259_v4 = vadd.f32 %v30938_v63, %v23553_v62  ;;  %31219 = vmatpush3.bf16.msra.mxu0 %v34166_v0  ;;  %v34203_v62 = vld [vmem:[%s35829_s11 + $0x2638] sm:$0xff]  }
 0x564   : > { %31220 = vmatprep.subr.bf16.mxu0 %v34169_v6  ;;  %31241 = vmatpush3.bf16.msra.mxu1 %v34168_v5  ;;  %v34204_v63 = vld [vmem:[%s35829_s11 + $0x26f8] sm:$0xff]  }
 0x565   : > { %31242 = vmatprep.subr.bf16.mxu1 %v34171_v8  ;;  %v355_v0 = vld [vmem:[%s35822_s13 + $0x130] sm:$0xff] }
 0x566   : > { %v1118_v1 = vrot.slane %v355_v0, %v35880_v42  ;;  %v1111_v3 = vcombine.high %v355_v0, %v355_v0  ;;  %v34242_v0 = vld [vmem:[%s35829_s11 + $0x28c0] sm:$0xff]  }
 0x567   : > { %31221 = vmatpush3.bf16.msra.mxu0 %v34170_v7  ;;  %v34208_v7 = vld [vmem:[%s35829_s11 + $0x2700] sm:$0xff]  }
 0x568   : > { %31250 = vmatprep.subr.bf16.mxu0 %v34173_v13  ;;  %31243 = vmatpush3.bf16.msra.mxu1 %v34172_v11  ;;  %v1126_v5 = vcombine.high %v1118_v1, %v1118_v1  ;;  %v1125_v6 = vrot.slane %v1111_v3, %v35880_v42  ;;  %v2160_v8 = vpack.c.bf16 %v1118_v1, %v1118_v1  ;;  %v34243_v3 = vld [vmem:[%s35829_s11 + $0x2880] sm:$0xff]  }
 0x569   : > { %31272 = vmatprep.subr.bf16.mxu1 %v34176_v18  ;;  %v34214_v18 = vld [vmem:[%s35829_s11 + $0x2788] sm:$0xff]  }
 0x56a   : > { %24111 = vmatmul.mubr.bf16.vlgmr.msra.gmra.mrb[148].mxu0 %v2156_v17  ;;  %v2161_v10 = vpack.c.bf16 %v1126_v5, %v1126_v5  ;;  %v1127_v11 = vcombine.high %v1125_v6, %v1125_v6  ;;  %v2162_v13 = vpack.c.bf16 %v1125_v6, %v1125_v6  ;;  %v34213_v17 = vld [vmem:[%s35829_s11 + $0x27c8] sm:$0xff]  }
 0x56b   : > { %31251 = vmatpush3.bf16.msra.mxu0 %v34175_v16  ;;  %24151 = vmatmul.mubr.bf16.vlgmr.msra.gmra.mrb[148].mxu1 %v2158_v22  ;;  %v34212_v16 = vld [vmem:[%s35829_s11 + $0x2708] sm:$0xff]   ;;  %v34218_v22 = vld [vmem:[%s35829_s11 + $0x2790] sm:$0xff]  }
 0x56c   : > { %31252 = vmatprep.subr.bf16.mxu0 %v34178_v23  ;;  %31273 = vmatpush3.bf16.msra.mxu1 %v34177_v21  ;;  %v2163_v15 = vpack.c.bf16 %v1127_v11, %v1127_v11  ;;  %v34217_v21 = vld [vmem:[%s35829_s11 + $0x27d0] sm:$0xff]   ;;  %v34219_v23 = vld [vmem:[%s35829_s11 + $0x2758] sm:$0xff]   ;;  %v34244_v5 = vld [vmem:[%s35829_s11 + $0x2848] sm:$0xff]  }
 0x56d   : > { %31274 = vmatprep.subr.bf16.mxu1 %v34180_v26  ;;  %24190 = vmatprep.mubr.bf16.mxu0 %v2161_v10  ;;  %v34222_v26 = vld [vmem:[%s35829_s11 + $0x2798] sm:$0xff]   ;;  %v34248_v10 = vld [vmem:[%s35829_s11 + $0x2850] sm:$0xff]  }
 0x56e   : > { %24230 = vmatprep.mubr.bf16.mxu1 %v2163_v15  ;;  %v34249_v11 = vld [vmem:[%s35829_s11 + $0x2810] sm:$0xff]   ;;  %v34253_v15 = vld [vmem:[%s35829_s11 + $0x2818] sm:$0xff]  }
 0x56f   : > { %31253 = vmatpush3.bf16.msra.mxu0 %v34179_v25  ;;  %v34221_v25 = vld [vmem:[%s35829_s11 + $0x27d8] sm:$0xff]  }
 0x570   : > { %31254 = vmatprep.subr.bf16.mxu0 %v34182_v28  ;;  %31275 = vmatpush3.bf16.msra.mxu1 %v34181_v27  ;;  %v34223_v27 = vld [vmem:[%s35829_s11 + $0x2760] sm:$0xff]  }
 0x571   : > { %31276 = vmatprep.subr.bf16.mxu1 %v34184_v30  ;;  %v34224_v28 = vld [vmem:[%s35829_s11 + $0x2720] sm:$0xff]  }
 0x572   : > { %v34226_v30 = vld [vmem:[%s35829_s11 + $0x27a0] sm:$0xff]  }
 0x573   : > { %31255 = vmatpush3.bf16.msra.mxu0 %v34183_v29  ;;  %v34225_v29 = vld [vmem:[%s35829_s11 + $0x27e0] sm:$0xff]  }
 0x574   : > { %31256 = vmatprep.subr.bf16.mxu0 %v34186_v32  ;;  %31277 = vmatpush3.bf16.msra.mxu1 %v34185_v31  ;;  %v34227_v31 = vld [vmem:[%s35829_s11 + $0x2768] sm:$0xff]  }
 0x575   : > { %31278 = vmatprep.subr.bf16.mxu1 %v34188_v34 }
 0x577   : > { %31257 = vmatpush3.bf16.msra.mxu0 %v34187_v33  ;;  %v34228_v33 = vld [vmem:[%s35829_s11 + $0x2728] sm:$0xff]  }
 0x578   : > { %31258 = vmatprep.subr.bf16.mxu0 %v34190_v36  ;;  %31279 = vmatpush3.bf16.msra.mxu1 %v34189_v35  ;;  %v34229_v35 = vld [vmem:[%s35829_s11 + $0x27e8] sm:$0xff]  }
 0x579   : > { %31280 = vmatprep.subr.bf16.mxu1 %v34192_v38 }
 0x57b   : > { %31259 = vmatpush3.bf16.msra.mxu0 %v34191_v37 }
 0x57c   : > { %31260 = vmatprep.subr.bf16.mxu0 %v34194_v40  ;;  %31281 = vmatpush3.bf16.msra.mxu1 %v34193_v39 }
 0x57d   : > { %v30958_v41 = vpop.f32.mrb[124].mxu0  ;;  %31282 = vmatprep.subr.bf16.mxu1 %v34196_v45 }
 0x57e   : > { %v30959_v44 = vpop.f32.mrb[125].mxu0  ;;  %v30980_v48 = vpop.f32.mrb[124].mxu1 }
 0x57f   : > { %v30960_v46 = vadd.f32 %v30959_v44, %v30958_v41  ;;  %v30961_v47 = vpop.f32.mrb[126].mxu0  ;;  %v30981_v52 = vpop.f32.mrb[125].mxu1  ;;  %31261 = vmatpush3.bf16.msra.mxu0 %v34195_v43  ;;  %v34230_v41 = vld [vmem:[%s35829_s11 + $0x27a8] sm:$0xff]   ;;  %v34231_v43 = vld [vmem:[%s35829_s11 + $0x2770] sm:$0xff]  }
 0x580   : > { %v30962_v51 = vpop.f32.mrb[127].mxu0  ;;  %v30982_v54 = vadd.f32 %v30981_v52, %v30980_v48  ;;  %v30983_v56 = vpop.f32.mrb[126].mxu1  ;;  %31262 = vmatprep.subr.bf16.mxu0 %v34198_v50  ;;  %31283 = vmatpush3.bf16.msra.mxu1 %v34197_v49  ;;  %v34233_v49 = vld [vmem:[%s35829_s11 + $0x27f0] sm:$0xff]   ;;  %v34235_v52 = vld [vmem:[%s35829_s11 + $0x2778] sm:$0xff]  }
 0x581   : > { %v23633_v53 = vadd.f32 %v30960_v46, %v37259_v4  ;;  %v30984_v58 = vpop.f32.mrb[127].mxu1  ;;  %31284 = vmatprep.subr.bf16.mxu1 %v34200_v57  ;;  %v34206_v4 = vld [vmem:[%s35829_s11 + $0x2740] sm:$0xff]   ;;  %v34232_v46 = vld [vmem:[%s35829_s11 + $0x2730] sm:$0xff]   ;;  %v34238_v57 = vld [vmem:[%s35829_s11 + $0x27b8] sm:$0xff]  }
 0x582   : > { %v34234_v51 = vld [vmem:[%s35829_s11 + $0x27b0] sm:$0xff]  }
 0x583   : > { %v37297_v59 = vadd.f32 %v30982_v54, %v23633_v53  ;;  %31263 = vmatpush3.bf16.msra.mxu0 %v34199_v55  ;;  %v34236_v53 = vld [vmem:[%s35829_s11 + $0x2738] sm:$0xff]   ;;  %v356_v55 = vld [vmem:[%s35822_s13 + $0x138] sm:$0xff] }
 0x584   : > { %31264 = vmatprep.subr.bf16.mxu0 %v34202_v61  ;;  %31285 = vmatpush3.bf16.msra.mxu1 %v34201_v60  ;;  %v34237_v54 = vld [vmem:[%s35829_s11 + $0x27f8] sm:$0xff]   ;;  %v1135_v56 = vrot.slane %v356_v55, %v35880_v42  ;;  %v1128_v58 = vcombine.high %v356_v55, %v356_v55  ;;  %v34275_v55 = vld [vmem:[%s35829_s11 + $0x29c0] sm:$0xff]  }
 0x585   : > { %31286 = vmatprep.subr.bf16.mxu1 %v34204_v63 }
 0x586   : > { %v1143_v60 = vcombine.high %v1135_v56, %v1135_v56  ;;  %v1142_v61 = vrot.slane %v1128_v58, %v35880_v42  ;;  %v2164_v63 = vpack.c.bf16 %v1135_v56, %v1135_v56  ;;  %v34276_v58 = vld [vmem:[%s35829_s11 + $0x2980] sm:$0xff]  }
 0x587   : > { %31265 = vmatpush3.bf16.msra.mxu0 %v34203_v62  ;;  %v34241_v62 = vld [vmem:[%s35829_s11 + $0x2800] sm:$0xff]  }
 0x588   : > { %31294 = vmatprep.subr.bf16.mxu0 %v34206_v4  ;;  %31287 = vmatpush3.bf16.msra.mxu1 %v34205_v2  ;;  %v2165_v1 = vpack.c.bf16 %v1143_v60, %v1143_v60  ;;  %v1144_v2 = vcombine.high %v1142_v61, %v1142_v61  ;;  %v2166_v4 = vpack.c.bf16 %v1142_v61, %v1142_v61  ;;  %v34277_v60 = vld [vmem:[%s35829_s11 + $0x2948] sm:$0xff]  }
 0x589   : > { %31316 = vmatprep.subr.bf16.mxu1 %v34209_v9  ;;  %v34247_v9 = vld [vmem:[%s35829_s11 + $0x2888] sm:$0xff]  }
 0x58a   : > { %24191 = vmatmul.mubr.bf16.vlgmr.msra.gmra.mrb[152].mxu0 %v2160_v8  ;;  %v2167_v6 = vpack.c.bf16 %v1144_v2, %v1144_v2  ;;  %v34246_v8 = vld [vmem:[%s35829_s11 + $0x28c8] sm:$0xff]   ;;  %v34282_v2 = vld [vmem:[%s35829_s11 + $0x2910] sm:$0xff]  }
 0x58b   : > { %31295 = vmatpush3.bf16.msra.mxu0 %v34208_v7  ;;  %24231 = vmatmul.mubr.bf16.vlgmr.msra.gmra.mrb[152].mxu1 %v2162_v13  ;;  %v34245_v7 = vld [vmem:[%s35829_s11 + $0x2808] sm:$0xff]   ;;  %v34251_v13 = vld [vmem:[%s35829_s11 + $0x2890] sm:$0xff]  }
 0x58c   : > { %31296 = vmatprep.subr.bf16.mxu0 %v34211_v14  ;;  %31317 = vmatpush3.bf16.msra.mxu1 %v34210_v12  ;;  %v34250_v12 = vld [vmem:[%s35829_s11 + $0x28d0] sm:$0xff]   ;;  %v34252_v14 = vld [vmem:[%s35829_s11 + $0x2858] sm:$0xff]  }
 0x58d   : > { %31318 = vmatprep.subr.bf16.mxu1 %v34213_v17  ;;  %24270 = vmatprep.mubr.bf16.mxu0 %v2165_v1  ;;  %v34255_v17 = vld [vmem:[%s35829_s11 + $0x2898] sm:$0xff]   ;;  %v34281_v1 = vld [vmem:[%s35829_s11 + $0x2950] sm:$0xff]  }
 0x58e   : > { %24310 = vmatprep.mubr.bf16.mxu1 %v2167_v6  ;;  %v34286_v6 = vld [vmem:[%s35829_s11 + $0x2918] sm:$0xff]  }
 0x58f   : > { %31297 = vmatpush3.bf16.msra.mxu0 %v34212_v16  ;;  %v34254_v16 = vld [vmem:[%s35829_s11 + $0x28d8] sm:$0xff]  }
 0x590   : > { %31298 = vmatprep.subr.bf16.mxu0 %v34215_v19  ;;  %31319 = vmatpush3.bf16.msra.mxu1 %v34214_v18  ;;  %v34256_v18 = vld [vmem:[%s35829_s11 + $0x2860] sm:$0xff]  }
 0x591   : > { %31320 = vmatprep.subr.bf16.mxu1 %v34217_v21  ;;  %v34257_v19 = vld [vmem:[%s35829_s11 + $0x2820] sm:$0xff]  }
 0x592   : > { %v34259_v21 = vld [vmem:[%s35829_s11 + $0x28a0] sm:$0xff]  }
 0x593   : > { %31299 = vmatpush3.bf16.msra.mxu0 %v34216_v20  ;;  %v34258_v20 = vld [vmem:[%s35829_s11 + $0x28e0] sm:$0xff]  }
 0x594   : > { %31300 = vmatprep.subr.bf16.mxu0 %v34219_v23  ;;  %31321 = vmatpush3.bf16.msra.mxu1 %v34218_v22  ;;  %v34260_v22 = vld [vmem:[%s35829_s11 + $0x2868] sm:$0xff]  }
 0x595   : > { %31322 = vmatprep.subr.bf16.mxu1 %v34221_v25 }
 0x597   : > { %31301 = vmatpush3.bf16.msra.mxu0 %v34220_v24  ;;  %v34261_v24 = vld [vmem:[%s35829_s11 + $0x2828] sm:$0xff]  }
 0x598   : > { %31302 = vmatprep.subr.bf16.mxu0 %v34223_v27  ;;  %31323 = vmatpush3.bf16.msra.mxu1 %v34222_v26  ;;  %v34262_v26 = vld [vmem:[%s35829_s11 + $0x28e8] sm:$0xff]  }
 0x599   : > { %31324 = vmatprep.subr.bf16.mxu1 %v34225_v29 }
 0x59b   : > { %31303 = vmatpush3.bf16.msra.mxu0 %v34224_v28 }
 0x59c   : > { %31304 = vmatprep.subr.bf16.mxu0 %v34227_v31  ;;  %31325 = vmatpush3.bf16.msra.mxu1 %v34226_v30  ;;  %v34263_v30 = vld [vmem:[%s35829_s11 + $0x28a8] sm:$0xff]   ;;  %v34264_v31 = vld [vmem:[%s35829_s11 + $0x2870] sm:$0xff]  }
 0x59d   : > { %v31002_v32 = vpop.f32.mrb[128].mxu0  ;;  %31326 = vmatprep.subr.bf16.mxu1 %v34229_v35 }
 0x59e   : > { %v31003_v34 = vpop.f32.mrb[129].mxu0  ;;  %v31024_v38 = vpop.f32.mrb[128].mxu1 }
 0x59f   : > { %v31004_v36 = vadd.f32 %v31003_v34, %v31002_v32  ;;  %v31005_v37 = vpop.f32.mrb[130].mxu0  ;;  %v31025_v40 = vpop.f32.mrb[129].mxu1  ;;  %31305 = vmatpush3.bf16.msra.mxu0 %v34228_v33 }
 0x5a0   : > { %v31006_v39 = vpop.f32.mrb[131].mxu0  ;;  %v31026_v45 = vadd.f32 %v31025_v40, %v31024_v38  ;;  %v31027_v47 = vpop.f32.mrb[130].mxu1  ;;  %31306 = vmatprep.subr.bf16.mxu0 %v34231_v43  ;;  %31327 = vmatpush3.bf16.msra.mxu1 %v34230_v41  ;;  %v34266_v38 = vld [vmem:[%s35829_s11 + $0x28f0] sm:$0xff]   ;;  %v34268_v43 = vld [vmem:[%s35829_s11 + $0x2878] sm:$0xff]  }
 0x5a1   : > { %v23713_v44 = vadd.f32 %v31004_v36, %v37297_v59  ;;  %v31028_v50 = vpop.f32.mrb[131].mxu1  ;;  %31328 = vmatprep.subr.bf16.mxu1 %v34233_v49  ;;  %v34239_v59 = vld [vmem:[%s35829_s11 + $0x2840] sm:$0xff]   ;;  %v34265_v36 = vld [vmem:[%s35829_s11 + $0x2830] sm:$0xff]  }
 0x5a2   : > { %v34267_v41 = vld [vmem:[%s35829_s11 + $0x28b0] sm:$0xff]   ;;  %v34272_v50 = vld [vmem:[%s35829_s11 + $0x2940] sm:$0xff]  }
 0x5a3   : > { %v37334_v48 = vadd.f32 %v31026_v45, %v23713_v44  ;;  %31307 = vmatpush3.bf16.msra.mxu0 %v34232_v46  ;;  %v34269_v44 = vld [vmem:[%s35829_s11 + $0x2838] sm:$0xff]  }
 0x5a4   : > { %31308 = vmatprep.subr.bf16.mxu0 %v34235_v52  ;;  %31329 = vmatpush3.bf16.msra.mxu1 %v34234_v51  ;;  %v34270_v45 = vld [vmem:[%s35829_s11 + $0x28f8] sm:$0xff]  }
 0x5a5   : > { %31330 = vmatprep.subr.bf16.mxu1 %v34237_v54  ;;  %v357_v46 = vld [vmem:[%s35822_s13 + $0x140] sm:$0xff] }
 0x5a6   : > { %v1152_v47 = vrot.slane %v357_v46, %v35880_v42  ;;  %v1145_v49 = vcombine.high %v357_v46, %v357_v46  ;;  %v34308_v46 = vld [vmem:[%s35829_s11 + $0x2ac0] sm:$0xff]  }
 0x5a7   : > { %31309 = vmatpush3.bf16.msra.mxu0 %v34236_v53  ;;  %v34274_v53 = vld [vmem:[%s35829_s11 + $0x2900] sm:$0xff]  }
 0x5a8   : > { %31338 = vmatprep.subr.bf16.mxu0 %v34239_v59  ;;  %31331 = vmatpush3.bf16.msra.mxu1 %v34238_v57  ;;  %v1160_v51 = vcombine.high %v1152_v47, %v1152_v47  ;;  %v1159_v52 = vrot.slane %v1145_v49, %v35880_v42  ;;  %v2168_v54 = vpack.c.bf16 %v1152_v47, %v1152_v47  ;;  %v34309_v49 = vld [vmem:[%s35829_s11 + $0x2a80] sm:$0xff]  }
 0x5a9   : > { %31360 = vmatprep.subr.bf16.mxu1 %v34242_v0  ;;  %v34280_v0 = vld [vmem:[%s35829_s11 + $0x2988] sm:$0xff]  }
 0x5aa   : > { %24271 = vmatmul.mubr.bf16.vlgmr.msra.gmra.mrb[156].mxu0 %v2164_v63  ;;  %v2169_v56 = vpack.c.bf16 %v1160_v51, %v1160_v51  ;;  %v1161_v57 = vcombine.high %v1159_v52, %v1159_v52  ;;  %v2170_v59 = vpack.c.bf16 %v1159_v52, %v1159_v52  ;;  %v34279_v63 = vld [vmem:[%s35829_s11 + $0x29c8] sm:$0xff]  }
 0x5ab   : > { %31339 = vmatpush3.bf16.msra.mxu0 %v34241_v62  ;;  %24311 = vmatmul.mubr.bf16.vlgmr.msra.gmra.mrb[156].mxu1 %v2166_v4  ;;  %v34278_v62 = vld [vmem:[%s35829_s11 + $0x2908] sm:$0xff]   ;;  %v34284_v4 = vld [vmem:[%s35829_s11 + $0x2990] sm:$0xff]  }
 0x5ac   : > { %31340 = vmatprep.subr.bf16.mxu0 %v34244_v5  ;;  %31361 = vmatpush3.bf16.msra.mxu1 %v34243_v3  ;;  %v2171_v61 = vpack.c.bf16 %v1161_v57, %v1161_v57  ;;  %v34283_v3 = vld [vmem:[%s35829_s11 + $0x29d0] sm:$0xff]   ;;  %v34285_v5 = vld [vmem:[%s35829_s11 + $0x2958] sm:$0xff]   ;;  %v34310_v51 = vld [vmem:[%s35829_s11 + $0x2a48] sm:$0xff]  }
 0x5ad   : > { %31362 = vmatprep.subr.bf16.mxu1 %v34246_v8  ;;  %24350 = vmatprep.mubr.bf16.mxu0 %v2169_v56  ;;  %v34288_v8 = vld [vmem:[%s35829_s11 + $0x2998] sm:$0xff]   ;;  %v34314_v56 = vld [vmem:[%s35829_s11 + $0x2a50] sm:$0xff]  }
 0x5ae   : > { %24390 = vmatprep.mubr.bf16.mxu1 %v2171_v61  ;;  %v34315_v57 = vld [vmem:[%s35829_s11 + $0x2a10] sm:$0xff]   ;;  %v34319_v61 = vld [vmem:[%s35829_s11 + $0x2a18] sm:$0xff]  }
 0x5af   : > { %31341 = vmatpush3.bf16.msra.mxu0 %v34245_v7  ;;  %v34287_v7 = vld [vmem:[%s35829_s11 + $0x29d8] sm:$0xff]  }
 0x5b0   : > { %31342 = vmatprep.subr.bf16.mxu0 %v34248_v10  ;;  %31363 = vmatpush3.bf16.msra.mxu1 %v34247_v9  ;;  %v34289_v9 = vld [vmem:[%s35829_s11 + $0x2960] sm:$0xff]  }
 0x5b1   : > { %31364 = vmatprep.subr.bf16.mxu1 %v34250_v12  ;;  %v34290_v10 = vld [vmem:[%s35829_s11 + $0x2920] sm:$0xff]  }
 0x5b2   : > { %v34292_v12 = vld [vmem:[%s35829_s11 + $0x29a0] sm:$0xff]  }
 0x5b3   : > { %31343 = vmatpush3.bf16.msra.mxu0 %v34249_v11  ;;  %v34291_v11 = vld [vmem:[%s35829_s11 + $0x29e0] sm:$0xff]  }
 0x5b4   : > { %31344 = vmatprep.subr.bf16.mxu0 %v34252_v14  ;;  %31365 = vmatpush3.bf16.msra.mxu1 %v34251_v13  ;;  %v34293_v13 = vld [vmem:[%s35829_s11 + $0x2968] sm:$0xff]  }
 0x5b5   : > { %31366 = vmatprep.subr.bf16.mxu1 %v34254_v16 }
 0x5b7   : > { %31345 = vmatpush3.bf16.msra.mxu0 %v34253_v15  ;;  %v34294_v15 = vld [vmem:[%s35829_s11 + $0x2928] sm:$0xff]  }
 0x5b8   : > { %31346 = vmatprep.subr.bf16.mxu0 %v34256_v18  ;;  %31367 = vmatpush3.bf16.msra.mxu1 %v34255_v17  ;;  %v34295_v17 = vld [vmem:[%s35829_s11 + $0x29e8] sm:$0xff]  }
 0x5b9   : > { %31368 = vmatprep.subr.bf16.mxu1 %v34258_v20 }
 0x5bb   : > { %31347 = vmatpush3.bf16.msra.mxu0 %v34257_v19 }
 0x5bc   : > { %31348 = vmatprep.subr.bf16.mxu0 %v34260_v22  ;;  %31369 = vmatpush3.bf16.msra.mxu1 %v34259_v21  ;;  %v34296_v21 = vld [vmem:[%s35829_s11 + $0x29a8] sm:$0xff]   ;;  %v34297_v22 = vld [vmem:[%s35829_s11 + $0x2970] sm:$0xff]  }
 0x5bd   : > { %v31046_v23 = vpop.f32.mrb[132].mxu0  ;;  %31370 = vmatprep.subr.bf16.mxu1 %v34262_v26 }
 0x5be   : > { %v31047_v25 = vpop.f32.mrb[133].mxu0  ;;  %v31068_v29 = vpop.f32.mrb[132].mxu1 }
 0x5bf   : > { %v31048_v27 = vadd.f32 %v31047_v25, %v31046_v23  ;;  %v31049_v28 = vpop.f32.mrb[134].mxu0  ;;  %v31069_v33 = vpop.f32.mrb[133].mxu1  ;;  %31349 = vmatpush3.bf16.msra.mxu0 %v34261_v24 }
 0x5c0   : > { %v31050_v32 = vpop.f32.mrb[135].mxu0  ;;  %v31070_v35 = vadd.f32 %v31069_v33, %v31068_v29  ;;  %v31071_v37 = vpop.f32.mrb[134].mxu1  ;;  %31350 = vmatprep.subr.bf16.mxu0 %v34264_v31  ;;  %31371 = vmatpush3.bf16.msra.mxu1 %v34263_v30  ;;  %v34299_v29 = vld [vmem:[%s35829_s11 + $0x29f0] sm:$0xff]   ;;  %v34301_v33 = vld [vmem:[%s35829_s11 + $0x2978] sm:$0xff]  }
 0x5c1   : > { %v23793_v34 = vadd.f32 %v31048_v27, %v37334_v48  ;;  %v31072_v39 = vpop.f32.mrb[135].mxu1  ;;  %31372 = vmatprep.subr.bf16.mxu1 %v34266_v38  ;;  %v34271_v48 = vld [vmem:[%s35829_s11 + $0x28b8] sm:$0xff]   ;;  %v34298_v27 = vld [vmem:[%s35829_s11 + $0x2930] sm:$0xff]  }
 0x5c2   : > { %v34300_v32 = vld [vmem:[%s35829_s11 + $0x29b0] sm:$0xff]   ;;  %v34304_v38 = vld [vmem:[%s35829_s11 + $0x29b8] sm:$0xff]  }
 0x5c3   : > { %v37373_v40 = vadd.f32 %v31070_v35, %v23793_v34  ;;  %31351 = vmatpush3.bf16.msra.mxu0 %v34265_v36  ;;  %v34302_v34 = vld [vmem:[%s35829_s11 + $0x2938] sm:$0xff]  }
 0x5c4   : > { %31352 = vmatprep.subr.bf16.mxu0 %v34268_v43  ;;  %31373 = vmatpush3.bf16.msra.mxu1 %v34267_v41  ;;  %v34303_v35 = vld [vmem:[%s35829_s11 + $0x29f8] sm:$0xff]  }
 0x5c5   : > { %31374 = vmatprep.subr.bf16.mxu1 %v34270_v45  ;;  %v358_v36 = vld [vmem:[%s35822_s13 + $0x148] sm:$0xff] }
 0x5c6   : > { %v1169_v37 = vrot.slane %v358_v36, %v35880_v42  ;;  %v1162_v39 = vcombine.high %v358_v36, %v358_v36  ;;  %v34341_v36 = vld [vmem:[%s35829_s11 + $0x2bc0] sm:$0xff]  }
 0x5c7   : > { %31353 = vmatpush3.bf16.msra.mxu0 %v34269_v44  ;;  %v34307_v44 = vld [vmem:[%s35829_s11 + $0x2a00] sm:$0xff]  }
 0x5c8   : > { %31382 = vmatprep.subr.bf16.mxu0 %v34272_v50  ;;  %31375 = vmatpush3.bf16.msra.mxu1 %v34271_v48  ;;  %v1177_v41 = vcombine.high %v1169_v37, %v1169_v37  ;;  %v1176_v43 = vrot.slane %v1162_v39, %v35880_v42  ;;  %v2172_v45 = vpack.c.bf16 %v1169_v37, %v1169_v37  ;;  %v34342_v39 = vld [vmem:[%s35829_s11 + $0x2b80] sm:$0xff]  }
 0x5c9   : > { %31404 = vmatprep.subr.bf16.mxu1 %v34275_v55  ;;  %v34313_v55 = vld [vmem:[%s35829_s11 + $0x2a88] sm:$0xff]  }
 0x5ca   : > { %24351 = vmatmul.mubr.bf16.vlgmr.msra.gmra.mrb[160].mxu0 %v2168_v54  ;;  %v2173_v47 = vpack.c.bf16 %v1177_v41, %v1177_v41  ;;  %v1178_v48 = vcombine.high %v1176_v43, %v1176_v43  ;;  %v2174_v50 = vpack.c.bf16 %v1176_v43, %v1176_v43  ;;  %v34312_v54 = vld [vmem:[%s35829_s11 + $0x2ac8] sm:$0xff]  }
 0x5cb   : > { %31383 = vmatpush3.bf16.msra.mxu0 %v34274_v53  ;;  %24391 = vmatmul.mubr.bf16.vlgmr.msra.gmra.mrb[160].mxu1 %v2170_v59  ;;  %v34311_v53 = vld [vmem:[%s35829_s11 + $0x2a08] sm:$0xff]   ;;  %v34317_v59 = vld [vmem:[%s35829_s11 + $0x2a90] sm:$0xff]  }
 0x5cc   : > { %31384 = vmatprep.subr.bf16.mxu0 %v34277_v60  ;;  %31405 = vmatpush3.bf16.msra.mxu1 %v34276_v58  ;;  %v2175_v52 = vpack.c.bf16 %v1178_v48, %v1178_v48  ;;  %v34316_v58 = vld [vmem:[%s35829_s11 + $0x2ad0] sm:$0xff]   ;;  %v34318_v60 = vld [vmem:[%s35829_s11 + $0x2a58] sm:$0xff]   ;;  %v34343_v41 = vld [vmem:[%s35829_s11 + $0x2b48] sm:$0xff]  }
 0x5cd   : > { %31406 = vmatprep.subr.bf16.mxu1 %v34279_v63  ;;  %24430 = vmatprep.mubr.bf16.mxu0 %v2173_v47  ;;  %v34321_v63 = vld [vmem:[%s35829_s11 + $0x2a98] sm:$0xff]   ;;  %v34347_v47 = vld [vmem:[%s35829_s11 + $0x2b50] sm:$0xff]  }
 0x5ce   : > { %24470 = vmatprep.mubr.bf16.mxu1 %v2175_v52  ;;  %v34348_v48 = vld [vmem:[%s35829_s11 + $0x2b10] sm:$0xff]   ;;  %v34352_v52 = vld [vmem:[%s35829_s11 + $0x2b18] sm:$0xff]  }
 0x5cf   : > { %31385 = vmatpush3.bf16.msra.mxu0 %v34278_v62  ;;  %v34320_v62 = vld [vmem:[%s35829_s11 + $0x2ad8] sm:$0xff]  }
 0x5d0   : > { %31386 = vmatprep.subr.bf16.mxu0 %v34281_v1  ;;  %31407 = vmatpush3.bf16.msra.mxu1 %v34280_v0  ;;  %v34322_v0 = vld [vmem:[%s35829_s11 + $0x2a60] sm:$0xff]  }
 0x5d1   : > { %31408 = vmatprep.subr.bf16.mxu1 %v34283_v3  ;;  %v34323_v1 = vld [vmem:[%s35829_s11 + $0x2a20] sm:$0xff]  }
 0x5d2   : > { %v34325_v3 = vld [vmem:[%s35829_s11 + $0x2aa0] sm:$0xff]  }
 0x5d3   : > { %31387 = vmatpush3.bf16.msra.mxu0 %v34282_v2  ;;  %v34324_v2 = vld [vmem:[%s35829_s11 + $0x2ae0] sm:$0xff]  }
 0x5d4   : > { %31388 = vmatprep.subr.bf16.mxu0 %v34285_v5  ;;  %31409 = vmatpush3.bf16.msra.mxu1 %v34284_v4  ;;  %v34326_v4 = vld [vmem:[%s35829_s11 + $0x2a68] sm:$0xff]  }
 0x5d5   : > { %31410 = vmatprep.subr.bf16.mxu1 %v34287_v7 }
 0x5d7   : > { %31389 = vmatpush3.bf16.msra.mxu0 %v34286_v6  ;;  %v34327_v6 = vld [vmem:[%s35829_s11 + $0x2a28] sm:$0xff]  }
 0x5d8   : > { %31390 = vmatprep.subr.bf16.mxu0 %v34289_v9  ;;  %31411 = vmatpush3.bf16.msra.mxu1 %v34288_v8  ;;  %v34328_v8 = vld [vmem:[%s35829_s11 + $0x2ae8] sm:$0xff]  }
 0x5d9   : > { %31412 = vmatprep.subr.bf16.mxu1 %v34291_v11 }
 0x5db   : > { %31391 = vmatpush3.bf16.msra.mxu0 %v34290_v10 }
 0x5dc   : > { %31392 = vmatprep.subr.bf16.mxu0 %v34293_v13  ;;  %31413 = vmatpush3.bf16.msra.mxu1 %v34292_v12 }
 0x5dd   : > { %v31090_v14 = vpop.f32.mrb[136].mxu0  ;;  %31414 = vmatprep.subr.bf16.mxu1 %v34295_v17 }
 0x5de   : > { %v31091_v16 = vpop.f32.mrb[137].mxu0  ;;  %v31112_v20 = vpop.f32.mrb[136].mxu1 }
 0x5df   : > { %v31092_v18 = vadd.f32 %v31091_v16, %v31090_v14  ;;  %v31093_v19 = vpop.f32.mrb[138].mxu0  ;;  %v31113_v24 = vpop.f32.mrb[137].mxu1  ;;  %31393 = vmatpush3.bf16.msra.mxu0 %v34294_v15  ;;  %v34329_v14 = vld [vmem:[%s35829_s11 + $0x2aa8] sm:$0xff]   ;;  %v34330_v15 = vld [vmem:[%s35829_s11 + $0x2a70] sm:$0xff]  }
 0x5e0   : > { %v31094_v23 = vpop.f32.mrb[139].mxu0  ;;  %v31114_v26 = vadd.f32 %v31113_v24, %v31112_v20  ;;  %v31115_v28 = vpop.f32.mrb[138].mxu1  ;;  %31394 = vmatprep.subr.bf16.mxu0 %v34297_v22  ;;  %31415 = vmatpush3.bf16.msra.mxu1 %v34296_v21  ;;  %v34332_v21 = vld [vmem:[%s35829_s11 + $0x2af0] sm:$0xff]   ;;  %v34334_v24 = vld [vmem:[%s35829_s11 + $0x2a78] sm:$0xff]  }
 0x5e1   : > { %v23873_v25 = vadd.f32 %v31092_v18, %v37373_v40  ;;  %v31116_v30 = vpop.f32.mrb[139].mxu1  ;;  %31416 = vmatprep.subr.bf16.mxu1 %v34299_v29  ;;  %v34305_v40 = vld [vmem:[%s35829_s11 + $0x2a40] sm:$0xff]   ;;  %v34331_v18 = vld [vmem:[%s35829_s11 + $0x2a30] sm:$0xff]   ;;  %v34337_v29 = vld [vmem:[%s35829_s11 + $0x2ab8] sm:$0xff]  }
 0x5e2   : > { %v34333_v23 = vld [vmem:[%s35829_s11 + $0x2ab0] sm:$0xff]  }
 0x5e3   : > { %v37411_v31 = vadd.f32 %v31114_v26, %v23873_v25  ;;  %31395 = vmatpush3.bf16.msra.mxu0 %v34298_v27  ;;  %v34335_v25 = vld [vmem:[%s35829_s11 + $0x2a38] sm:$0xff]  }
 0x5e4   : > { %31396 = vmatprep.subr.bf16.mxu0 %v34301_v33  ;;  %31417 = vmatpush3.bf16.msra.mxu1 %v34300_v32  ;;  %v34336_v26 = vld [vmem:[%s35829_s11 + $0x2af8] sm:$0xff]  }
 0x5e5   : > { %31418 = vmatprep.subr.bf16.mxu1 %v34303_v35  ;;  %v359_v27 = vld [vmem:[%s35822_s13 + $0x150] sm:$0xff] }
 0x5e6   : > { %v1186_v28 = vrot.slane %v359_v27, %v35880_v42  ;;  %v1179_v30 = vcombine.high %v359_v27, %v359_v27  ;;  %v34374_v27 = vld [vmem:[%s35829_s11 + $0x2cc0] sm:$0xff]  }
 0x5e7   : > { %31397 = vmatpush3.bf16.msra.mxu0 %v34302_v34  ;;  %v34340_v34 = vld [vmem:[%s35829_s11 + $0x2b00] sm:$0xff]  }
 0x5e8   : > { %31426 = vmatprep.subr.bf16.mxu0 %v34305_v40  ;;  %31419 = vmatpush3.bf16.msra.mxu1 %v34304_v38  ;;  %v1194_v32 = vcombine.high %v1186_v28, %v1186_v28  ;;  %v1193_v33 = vrot.slane %v1179_v30, %v35880_v42  ;;  %v2176_v35 = vpack.c.bf16 %v1186_v28, %v1186_v28  ;;  %v34375_v30 = vld [vmem:[%s35829_s11 + $0x2c80] sm:$0xff]  }
 0x5e9   : > { %31448 = vmatprep.subr.bf16.mxu1 %v34308_v46  ;;  %v34346_v46 = vld [vmem:[%s35829_s11 + $0x2b88] sm:$0xff]  }
 0x5ea   : > { %24431 = vmatmul.mubr.bf16.vlgmr.msra.gmra.mrb[164].mxu0 %v2172_v45  ;;  %v2177_v37 = vpack.c.bf16 %v1194_v32, %v1194_v32  ;;  %v1195_v38 = vcombine.high %v1193_v33, %v1193_v33  ;;  %v2178_v40 = vpack.c.bf16 %v1193_v33, %v1193_v33  ;;  %v34345_v45 = vld [vmem:[%s35829_s11 + $0x2bc8] sm:$0xff]  }
 0x5eb   : > { %31427 = vmatpush3.bf16.msra.mxu0 %v34307_v44  ;;  %24471 = vmatmul.mubr.bf16.vlgmr.msra.gmra.mrb[164].mxu1 %v2174_v50  ;;  %v34344_v44 = vld [vmem:[%s35829_s11 + $0x2b08] sm:$0xff]   ;;  %v34350_v50 = vld [vmem:[%s35829_s11 + $0x2b90] sm:$0xff]  }
 0x5ec   : > { %31428 = vmatprep.subr.bf16.mxu0 %v34310_v51  ;;  %31449 = vmatpush3.bf16.msra.mxu1 %v34309_v49  ;;  %v2179_v43 = vpack.c.bf16 %v1195_v38, %v1195_v38  ;;  %v34349_v49 = vld [vmem:[%s35829_s11 + $0x2bd0] sm:$0xff]   ;;  %v34351_v51 = vld [vmem:[%s35829_s11 + $0x2b58] sm:$0xff]   ;;  %v34376_v32 = vld [vmem:[%s35829_s11 + $0x2c48] sm:$0xff]  }
 0x5ed   : > { %31450 = vmatprep.subr.bf16.mxu1 %v34312_v54  ;;  %24510 = vmatprep.mubr.bf16.mxu0 %v2177_v37  ;;  %v34354_v54 = vld [vmem:[%s35829_s11 + $0x2b98] sm:$0xff]   ;;  %v34380_v37 = vld [vmem:[%s35829_s11 + $0x2c50] sm:$0xff]  }
 0x5ee   : > { %24550 = vmatprep.mubr.bf16.mxu1 %v2179_v43  ;;  %v34381_v38 = vld [vmem:[%s35829_s11 + $0x2c10] sm:$0xff]   ;;  %v34385_v43 = vld [vmem:[%s35829_s11 + $0x2c18] sm:$0xff]  }
 0x5ef   : > { %31429 = vmatpush3.bf16.msra.mxu0 %v34311_v53  ;;  %v34353_v53 = vld [vmem:[%s35829_s11 + $0x2bd8] sm:$0xff]  }
 0x5f0   : > { %31430 = vmatprep.subr.bf16.mxu0 %v34314_v56  ;;  %31451 = vmatpush3.bf16.msra.mxu1 %v34313_v55  ;;  %v34355_v55 = vld [vmem:[%s35829_s11 + $0x2b60] sm:$0xff]  }
 0x5f1   : > { %31452 = vmatprep.subr.bf16.mxu1 %v34316_v58  ;;  %v34356_v56 = vld [vmem:[%s35829_s11 + $0x2b20] sm:$0xff]  }
 0x5f2   : > { %v34358_v58 = vld [vmem:[%s35829_s11 + $0x2ba0] sm:$0xff]  }
 0x5f3   : > { %31431 = vmatpush3.bf16.msra.mxu0 %v34315_v57  ;;  %v34357_v57 = vld [vmem:[%s35829_s11 + $0x2be0] sm:$0xff]  }
 0x5f4   : > { %31432 = vmatprep.subr.bf16.mxu0 %v34318_v60  ;;  %31453 = vmatpush3.bf16.msra.mxu1 %v34317_v59  ;;  %v34359_v59 = vld [vmem:[%s35829_s11 + $0x2b68] sm:$0xff]  }
 0x5f5   : > { %31454 = vmatprep.subr.bf16.mxu1 %v34320_v62 }
 0x5f7   : > { %31433 = vmatpush3.bf16.msra.mxu0 %v34319_v61  ;;  %v34360_v61 = vld [vmem:[%s35829_s11 + $0x2b28] sm:$0xff]  }
 0x5f8   : > { %31434 = vmatprep.subr.bf16.mxu0 %v34322_v0  ;;  %31455 = vmatpush3.bf16.msra.mxu1 %v34321_v63  ;;  %v34361_v63 = vld [vmem:[%s35829_s11 + $0x2be8] sm:$0xff]  }
 0x5f9   : > { %31456 = vmatprep.subr.bf16.mxu1 %v34324_v2 }
 0x5fb   : > { %31435 = vmatpush3.bf16.msra.mxu0 %v34323_v1 }
 0x5fc   : > { %31436 = vmatprep.subr.bf16.mxu0 %v34326_v4  ;;  %31457 = vmatpush3.bf16.msra.mxu1 %v34325_v3  ;;  %v34362_v3 = vld [vmem:[%s35829_s11 + $0x2ba8] sm:$0xff]   ;;  %v34363_v4 = vld [vmem:[%s35829_s11 + $0x2b70] sm:$0xff]  }
 0x5fd   : > { %v31134_v5 = vpop.f32.mrb[140].mxu0  ;;  %31458 = vmatprep.subr.bf16.mxu1 %v34328_v8 }
 0x5fe   : > { %v31135_v7 = vpop.f32.mrb[141].mxu0  ;;  %v31156_v11 = vpop.f32.mrb[140].mxu1 }
 0x5ff   : > { %v31136_v9 = vadd.f32 %v31135_v7, %v31134_v5  ;;  %v31137_v10 = vpop.f32.mrb[142].mxu0  ;;  %v31157_v13 = vpop.f32.mrb[141].mxu1  ;;  %31437 = vmatpush3.bf16.msra.mxu0 %v34327_v6 }
 0x600   : > { %v31138_v12 = vpop.f32.mrb[143].mxu0  ;;  %v31158_v17 = vadd.f32 %v31157_v13, %v31156_v11  ;;  %v31159_v19 = vpop.f32.mrb[142].mxu1  ;;  %31438 = vmatprep.subr.bf16.mxu0 %v34330_v15  ;;  %31459 = vmatpush3.bf16.msra.mxu1 %v34329_v14  ;;  %v34365_v11 = vld [vmem:[%s35829_s11 + $0x2bf0] sm:$0xff]   ;;  %v34367_v15 = vld [vmem:[%s35829_s11 + $0x2b78] sm:$0xff]  }
 0x601   : > { %v23953_v16 = vadd.f32 %v31136_v9, %v37411_v31  ;;  %v31160_v22 = vpop.f32.mrb[143].mxu1  ;;  %31460 = vmatprep.subr.bf16.mxu1 %v34332_v21  ;;  %v34338_v31 = vld [vmem:[%s35829_s11 + $0x2b40] sm:$0xff]   ;;  %v34364_v9 = vld [vmem:[%s35829_s11 + $0x2b30] sm:$0xff]  }
 0x602   : > { %v34366_v14 = vld [vmem:[%s35829_s11 + $0x2bb0] sm:$0xff]   ;;  %v34371_v22 = vld [vmem:[%s35829_s11 + $0x2c40] sm:$0xff]  }
 0x603   : > { %v37448_v20 = vadd.f32 %v31158_v17, %v23953_v16  ;;  %31439 = vmatpush3.bf16.msra.mxu0 %v34331_v18  ;;  %v34368_v16 = vld [vmem:[%s35829_s11 + $0x2b38] sm:$0xff]   ;;  %v360_v18 = vld [vmem:[%s35822_s13 + $0x158] sm:$0xff] }
 0x604   : > { %31440 = vmatprep.subr.bf16.mxu0 %v34334_v24  ;;  %31461 = vmatpush3.bf16.msra.mxu1 %v34333_v23  ;;  %v34369_v17 = vld [vmem:[%s35829_s11 + $0x2bf8] sm:$0xff]   ;;  %v1203_v19 = vrot.slane %v360_v18, %v35880_v42  ;;  %v1196_v21 = vcombine.high %v360_v18, %v360_v18  ;;  %v34407_v18 = vld [vmem:[%s35829_s11 + $0x2dc0] sm:$0xff]  }
 0x605   : > { %31462 = vmatprep.subr.bf16.mxu1 %v34336_v26 }
 0x606   : > { %v1211_v23 = vcombine.high %v1203_v19, %v1203_v19  ;;  %v1210_v24 = vrot.slane %v1196_v21, %v35880_v42  ;;  %v2180_v26 = vpack.c.bf16 %v1203_v19, %v1203_v19  ;;  %v34408_v21 = vld [vmem:[%s35829_s11 + $0x2d80] sm:$0xff]  }
 0x607   : > { %31441 = vmatpush3.bf16.msra.mxu0 %v34335_v25  ;;  %v34373_v25 = vld [vmem:[%s35829_s11 + $0x2c00] sm:$0xff]  }
 0x608   : > { %31470 = vmatprep.subr.bf16.mxu0 %v34338_v31  ;;  %31463 = vmatpush3.bf16.msra.mxu1 %v34337_v29  ;;  %v2181_v28 = vpack.c.bf16 %v1211_v23, %v1211_v23  ;;  %v1212_v29 = vcombine.high %v1210_v24, %v1210_v24  ;;  %v2182_v31 = vpack.c.bf16 %v1210_v24, %v1210_v24  ;;  %v34409_v23 = vld [vmem:[%s35829_s11 + $0x2d48] sm:$0xff]  }
 0x609   : > { %31492 = vmatprep.subr.bf16.mxu1 %v34341_v36  ;;  %v34379_v36 = vld [vmem:[%s35829_s11 + $0x2c88] sm:$0xff]  }
 0x60a   : > { %24511 = vmatmul.mubr.bf16.vlgmr.msra.gmra.mrb[168].mxu0 %v2176_v35  ;;  %v2183_v33 = vpack.c.bf16 %v1212_v29, %v1212_v29  ;;  %v34378_v35 = vld [vmem:[%s35829_s11 + $0x2cc8] sm:$0xff]   ;;  %v34414_v29 = vld [vmem:[%s35829_s11 + $0x2d10] sm:$0xff]  }
 0x60b   : > { %31471 = vmatpush3.bf16.msra.mxu0 %v34340_v34  ;;  %24551 = vmatmul.mubr.bf16.vlgmr.msra.gmra.mrb[168].mxu1 %v2178_v40  ;;  %v34377_v34 = vld [vmem:[%s35829_s11 + $0x2c08] sm:$0xff]   ;;  %v34383_v40 = vld [vmem:[%s35829_s11 + $0x2c90] sm:$0xff]  }
 0x60c   : > { %31472 = vmatprep.subr.bf16.mxu0 %v34343_v41  ;;  %31493 = vmatpush3.bf16.msra.mxu1 %v34342_v39  ;;  %v34382_v39 = vld [vmem:[%s35829_s11 + $0x2cd0] sm:$0xff]   ;;  %v34384_v41 = vld [vmem:[%s35829_s11 + $0x2c58] sm:$0xff]  }
 0x60d   : > { %31494 = vmatprep.subr.bf16.mxu1 %v34345_v45  ;;  %24590 = vmatprep.mubr.bf16.mxu0 %v2181_v28  ;;  %v34387_v45 = vld [vmem:[%s35829_s11 + $0x2c98] sm:$0xff]   ;;  %v34413_v28 = vld [vmem:[%s35829_s11 + $0x2d50] sm:$0xff]  }
 0x60e   : > { %24630 = vmatprep.mubr.bf16.mxu1 %v2183_v33  ;;  %v34418_v33 = vld [vmem:[%s35829_s11 + $0x2d18] sm:$0xff]  }
 0x60f   : > { %31473 = vmatpush3.bf16.msra.mxu0 %v34344_v44  ;;  %v34386_v44 = vld [vmem:[%s35829_s11 + $0x2cd8] sm:$0xff]  }
 0x610   : > { %31474 = vmatprep.subr.bf16.mxu0 %v34347_v47  ;;  %31495 = vmatpush3.bf16.msra.mxu1 %v34346_v46  ;;  %v34388_v46 = vld [vmem:[%s35829_s11 + $0x2c60] sm:$0xff]  }
 0x611   : > { %31496 = vmatprep.subr.bf16.mxu1 %v34349_v49  ;;  %v34389_v47 = vld [vmem:[%s35829_s11 + $0x2c20] sm:$0xff]  }
 0x612   : > { %v34391_v49 = vld [vmem:[%s35829_s11 + $0x2ca0] sm:$0xff]  }
 0x613   : > { %31475 = vmatpush3.bf16.msra.mxu0 %v34348_v48  ;;  %v34390_v48 = vld [vmem:[%s35829_s11 + $0x2ce0] sm:$0xff]  }
 0x614   : > { %31476 = vmatprep.subr.bf16.mxu0 %v34351_v51  ;;  %31497 = vmatpush3.bf16.msra.mxu1 %v34350_v50  ;;  %v34392_v50 = vld [vmem:[%s35829_s11 + $0x2c68] sm:$0xff]  }
 0x615   : > { %31498 = vmatprep.subr.bf16.mxu1 %v34353_v53 }
 0x617   : > { %31477 = vmatpush3.bf16.msra.mxu0 %v34352_v52  ;;  %v34393_v52 = vld [vmem:[%s35829_s11 + $0x2c28] sm:$0xff]  }
 0x618   : > { %31478 = vmatprep.subr.bf16.mxu0 %v34355_v55  ;;  %31499 = vmatpush3.bf16.msra.mxu1 %v34354_v54  ;;  %v34394_v54 = vld [vmem:[%s35829_s11 + $0x2ce8] sm:$0xff]  }
 0x619   : > { %31500 = vmatprep.subr.bf16.mxu1 %v34357_v57 }
 0x61b   : > { %31479 = vmatpush3.bf16.msra.mxu0 %v34356_v56 }
 0x61c   : > { %31480 = vmatprep.subr.bf16.mxu0 %v34359_v59  ;;  %31501 = vmatpush3.bf16.msra.mxu1 %v34358_v58  ;;  %v34395_v58 = vld [vmem:[%s35829_s11 + $0x2ca8] sm:$0xff]   ;;  %v34396_v59 = vld [vmem:[%s35829_s11 + $0x2c70] sm:$0xff]  }
 0x61d   : > { %v31178_v60 = vpop.f32.mrb[144].mxu0  ;;  %31502 = vmatprep.subr.bf16.mxu1 %v34361_v63 }
 0x61e   : > { %v31179_v62 = vpop.f32.mrb[145].mxu0  ;;  %v31200_v2 = vpop.f32.mrb[144].mxu1 }
 0x61f   : > { %v31180_v0 = vadd.f32 %v31179_v62, %v31178_v60  ;;  %v31181_v1 = vpop.f32.mrb[146].mxu0  ;;  %v31201_v6 = vpop.f32.mrb[145].mxu1  ;;  %31481 = vmatpush3.bf16.msra.mxu0 %v34360_v61 }
 0x620   : > { %v31182_v5 = vpop.f32.mrb[147].mxu0  ;;  %v31202_v8 = vadd.f32 %v31201_v6, %v31200_v2  ;;  %v31203_v10 = vpop.f32.mrb[146].mxu1  ;;  %31482 = vmatprep.subr.bf16.mxu0 %v34363_v4  ;;  %31503 = vmatpush3.bf16.msra.mxu1 %v34362_v3  ;;  %v34398_v2 = vld [vmem:[%s35829_s11 + $0x2cf0] sm:$0xff]   ;;  %v34400_v6 = vld [vmem:[%s35829_s11 + $0x2c78] sm:$0xff]  }
 0x621   : > { %v24033_v7 = vadd.f32 %v31180_v0, %v37448_v20  ;;  %v31204_v12 = vpop.f32.mrb[147].mxu1  ;;  %31504 = vmatprep.subr.bf16.mxu1 %v34365_v11  ;;  %v34370_v20 = vld [vmem:[%s35829_s11 + $0x2bb8] sm:$0xff]   ;;  %v34397_v0 = vld [vmem:[%s35829_s11 + $0x2c30] sm:$0xff]  }
 0x622   : > { %v34399_v5 = vld [vmem:[%s35829_s11 + $0x2cb0] sm:$0xff]   ;;  %v34403_v11 = vld [vmem:[%s35829_s11 + $0x2cb8] sm:$0xff]  }
 0x623   : > { %v37487_v13 = vadd.f32 %v31202_v8, %v24033_v7  ;;  %31483 = vmatpush3.bf16.msra.mxu0 %v34364_v9  ;;  %v34401_v7 = vld [vmem:[%s35829_s11 + $0x2c38] sm:$0xff]  }
 0x624   : > { %31484 = vmatprep.subr.bf16.mxu0 %v34367_v15  ;;  %31505 = vmatpush3.bf16.msra.mxu1 %v34366_v14  ;;  %v34402_v8 = vld [vmem:[%s35829_s11 + $0x2cf8] sm:$0xff]  }
 0x625   : > { %31506 = vmatprep.subr.bf16.mxu1 %v34369_v17  ;;  %v361_v9 = vld [vmem:[%s35822_s13 + $0x160] sm:$0xff] }
 0x626   : > { %v1220_v10 = vrot.slane %v361_v9, %v35880_v42  ;;  %v1213_v12 = vcombine.high %v361_v9, %v361_v9  ;;  %v34440_v9 = vld [vmem:[%s35829_s11 + $0x2ec0] sm:$0xff]  }
 0x627   : > { %31485 = vmatpush3.bf16.msra.mxu0 %v34368_v16  ;;  %v34406_v16 = vld [vmem:[%s35829_s11 + $0x2d00] sm:$0xff]  }
 0x628   : > { %31514 = vmatprep.subr.bf16.mxu0 %v34371_v22  ;;  %31507 = vmatpush3.bf16.msra.mxu1 %v34370_v20  ;;  %v1228_v14 = vcombine.high %v1220_v10, %v1220_v10  ;;  %v1227_v15 = vrot.slane %v1213_v12, %v35880_v42  ;;  %v2184_v17 = vpack.c.bf16 %v1220_v10, %v1220_v10  ;;  %v34441_v12 = vld [vmem:[%s35829_s11 + $0x2e80] sm:$0xff]  }
 0x629   : > { %31536 = vmatprep.subr.bf16.mxu1 %v34374_v27  ;;  %v34412_v27 = vld [vmem:[%s35829_s11 + $0x2d88] sm:$0xff]  }
 0x62a   : > { %24591 = vmatmul.mubr.bf16.vlgmr.msra.gmra.mrb[172].mxu0 %v2180_v26  ;;  %v2185_v19 = vpack.c.bf16 %v1228_v14, %v1228_v14  ;;  %v1229_v20 = vcombine.high %v1227_v15, %v1227_v15  ;;  %v2186_v22 = vpack.c.bf16 %v1227_v15, %v1227_v15  ;;  %v34411_v26 = vld [vmem:[%s35829_s11 + $0x2dc8] sm:$0xff]  }
 0x62b   : > { %31515 = vmatpush3.bf16.msra.mxu0 %v34373_v25  ;;  %24631 = vmatmul.mubr.bf16.vlgmr.msra.gmra.mrb[172].mxu1 %v2182_v31  ;;  %v34410_v25 = vld [vmem:[%s35829_s11 + $0x2d08] sm:$0xff]   ;;  %v34416_v31 = vld [vmem:[%s35829_s11 + $0x2d90] sm:$0xff]  }
 0x62c   : > { %31516 = vmatprep.subr.bf16.mxu0 %v34376_v32  ;;  %31537 = vmatpush3.bf16.msra.mxu1 %v34375_v30  ;;  %v2187_v24 = vpack.c.bf16 %v1229_v20, %v1229_v20  ;;  %v34415_v30 = vld [vmem:[%s35829_s11 + $0x2dd0] sm:$0xff]   ;;  %v34417_v32 = vld [vmem:[%s35829_s11 + $0x2d58] sm:$0xff]   ;;  %v34442_v14 = vld [vmem:[%s35829_s11 + $0x2e48] sm:$0xff]  }
 0x62d   : > { %31538 = vmatprep.subr.bf16.mxu1 %v34378_v35  ;;  %24670 = vmatprep.mubr.bf16.mxu0 %v2185_v19  ;;  %v34420_v35 = vld [vmem:[%s35829_s11 + $0x2d98] sm:$0xff]   ;;  %v34446_v19 = vld [vmem:[%s35829_s11 + $0x2e50] sm:$0xff]  }
 0x62e   : > { %24710 = vmatprep.mubr.bf16.mxu1 %v2187_v24  ;;  %v34447_v20 = vld [vmem:[%s35829_s11 + $0x2e10] sm:$0xff]   ;;  %v34451_v24 = vld [vmem:[%s35829_s11 + $0x2e18] sm:$0xff]  }
 0x62f   : > { %31517 = vmatpush3.bf16.msra.mxu0 %v34377_v34  ;;  %v34419_v34 = vld [vmem:[%s35829_s11 + $0x2dd8] sm:$0xff]  }
 0x630   : > { %31518 = vmatprep.subr.bf16.mxu0 %v34380_v37  ;;  %31539 = vmatpush3.bf16.msra.mxu1 %v34379_v36  ;;  %v34421_v36 = vld [vmem:[%s35829_s11 + $0x2d60] sm:$0xff]  }
 0x631   : > { %31540 = vmatprep.subr.bf16.mxu1 %v34382_v39  ;;  %v34422_v37 = vld [vmem:[%s35829_s11 + $0x2d20] sm:$0xff]  }
 0x632   : > { %v34424_v39 = vld [vmem:[%s35829_s11 + $0x2da0] sm:$0xff]  }
 0x633   : > { %31519 = vmatpush3.bf16.msra.mxu0 %v34381_v38  ;;  %v34423_v38 = vld [vmem:[%s35829_s11 + $0x2de0] sm:$0xff]  }
 0x634   : > { %31520 = vmatprep.subr.bf16.mxu0 %v34384_v41  ;;  %31541 = vmatpush3.bf16.msra.mxu1 %v34383_v40  ;;  %v34425_v40 = vld [vmem:[%s35829_s11 + $0x2d68] sm:$0xff]  }
 0x635   : > { %31542 = vmatprep.subr.bf16.mxu1 %v34386_v44 }
 0x637   : > { %31521 = vmatpush3.bf16.msra.mxu0 %v34385_v43  ;;  %v34426_v43 = vld [vmem:[%s35829_s11 + $0x2d28] sm:$0xff]  }
 0x638   : > { %31522 = vmatprep.subr.bf16.mxu0 %v34388_v46  ;;  %31543 = vmatpush3.bf16.msra.mxu1 %v34387_v45  ;;  %v34427_v45 = vld [vmem:[%s35829_s11 + $0x2de8] sm:$0xff]  }
 0x639   : > { %31544 = vmatprep.subr.bf16.mxu1 %v34390_v48 }
 0x63b   : > { %31523 = vmatpush3.bf16.msra.mxu0 %v34389_v47 }
 0x63c   : > { %31524 = vmatprep.subr.bf16.mxu0 %v34392_v50  ;;  %31545 = vmatpush3.bf16.msra.mxu1 %v34391_v49 }
 0x63d   : > { %v31222_v51 = vpop.f32.mrb[148].mxu0  ;;  %31546 = vmatprep.subr.bf16.mxu1 %v34394_v54 }
 0x63e   : > { %v31223_v53 = vpop.f32.mrb[149].mxu0  ;;  %v31244_v57 = vpop.f32.mrb[148].mxu1 }
 0x63f   : > { %v31224_v55 = vadd.f32 %v31223_v53, %v31222_v51  ;;  %v31225_v56 = vpop.f32.mrb[150].mxu0  ;;  %v31245_v61 = vpop.f32.mrb[149].mxu1  ;;  %31525 = vmatpush3.bf16.msra.mxu0 %v34393_v52  ;;  %v34428_v51 = vld [vmem:[%s35829_s11 + $0x2da8] sm:$0xff]   ;;  %v34429_v52 = vld [vmem:[%s35829_s11 + $0x2d70] sm:$0xff]  }
 0x640   : > { %v31226_v60 = vpop.f32.mrb[151].mxu0  ;;  %v31246_v63 = vadd.f32 %v31245_v61, %v31244_v57  ;;  %v31247_v1 = vpop.f32.mrb[150].mxu1  ;;  %31526 = vmatprep.subr.bf16.mxu0 %v34396_v59  ;;  %31547 = vmatpush3.bf16.msra.mxu1 %v34395_v58  ;;  %v34431_v58 = vld [vmem:[%s35829_s11 + $0x2df0] sm:$0xff]   ;;  %v34433_v61 = vld [vmem:[%s35829_s11 + $0x2d78] sm:$0xff]  }
 0x641   : > { %v24113_v62 = vadd.f32 %v31224_v55, %v37487_v13  ;;  %v31248_v3 = vpop.f32.mrb[151].mxu1  ;;  %31548 = vmatprep.subr.bf16.mxu1 %v34398_v2  ;;  %v34404_v13 = vld [vmem:[%s35829_s11 + $0x2d40] sm:$0xff]   ;;  %v34430_v55 = vld [vmem:[%s35829_s11 + $0x2d30] sm:$0xff]   ;;  %v34436_v2 = vld [vmem:[%s35829_s11 + $0x2db8] sm:$0xff]  }
 0x642   : > { %v34432_v60 = vld [vmem:[%s35829_s11 + $0x2db0] sm:$0xff]  }
 0x643   : > { %v37525_v4 = vadd.f32 %v31246_v63, %v24113_v62  ;;  %31527 = vmatpush3.bf16.msra.mxu0 %v34397_v0  ;;  %v34434_v62 = vld [vmem:[%s35829_s11 + $0x2d38] sm:$0xff]  }
 0x644   : > { %31528 = vmatprep.subr.bf16.mxu0 %v34400_v6  ;;  %31549 = vmatpush3.bf16.msra.mxu1 %v34399_v5  ;;  %v34435_v63 = vld [vmem:[%s35829_s11 + $0x2df8] sm:$0xff]  }
 0x645   : > { %31550 = vmatprep.subr.bf16.mxu1 %v34402_v8  ;;  %v362_v0 = vld [vmem:[%s35822_s13 + $0x168] sm:$0xff] }
 0x646   : > { %v1237_v1 = vrot.slane %v362_v0, %v35880_v42  ;;  %v1230_v3 = vcombine.high %v362_v0, %v362_v0  ;;  %v34473_v0 = vld [vmem:[%s35829_s11 + $0x2fc0] sm:$0xff]  }
 0x647   : > { %31529 = vmatpush3.bf16.msra.mxu0 %v34401_v7  ;;  %v34439_v7 = vld [vmem:[%s35829_s11 + $0x2e00] sm:$0xff]  }
 0x648   : > { %31558 = vmatprep.subr.bf16.mxu0 %v34404_v13  ;;  %31551 = vmatpush3.bf16.msra.mxu1 %v34403_v11  ;;  %v1245_v5 = vcombine.high %v1237_v1, %v1237_v1  ;;  %v1244_v6 = vrot.slane %v1230_v3, %v35880_v42  ;;  %v2188_v8 = vpack.c.bf16 %v1237_v1, %v1237_v1  ;;  %v34474_v3 = vld [vmem:[%s35829_s11 + $0x2f80] sm:$0xff]  }
 0x649   : > { %31580 = vmatprep.subr.bf16.mxu1 %v34407_v18  ;;  %v34445_v18 = vld [vmem:[%s35829_s11 + $0x2e88] sm:$0xff]  }
 0x64a   : > { %24671 = vmatmul.mubr.bf16.vlgmr.msra.gmra.mrb[176].mxu0 %v2184_v17  ;;  %v2189_v10 = vpack.c.bf16 %v1245_v5, %v1245_v5  ;;  %v1246_v11 = vcombine.high %v1244_v6, %v1244_v6  ;;  %v2190_v13 = vpack.c.bf16 %v1244_v6, %v1244_v6  ;;  %v34444_v17 = vld [vmem:[%s35829_s11 + $0x2ec8] sm:$0xff]  }
 0x64b   : > { %31559 = vmatpush3.bf16.msra.mxu0 %v34406_v16  ;;  %24711 = vmatmul.mubr.bf16.vlgmr.msra.gmra.mrb[176].mxu1 %v2186_v22  ;;  %v34443_v16 = vld [vmem:[%s35829_s11 + $0x2e08] sm:$0xff]   ;;  %v34449_v22 = vld [vmem:[%s35829_s11 + $0x2e90] sm:$0xff]  }
 0x64c   : > { %31560 = vmatprep.subr.bf16.mxu0 %v34409_v23  ;;  %31581 = vmatpush3.bf16.msra.mxu1 %v34408_v21  ;;  %v2191_v15 = vpack.c.bf16 %v1246_v11, %v1246_v11  ;;  %v34448_v21 = vld [vmem:[%s35829_s11 + $0x2ed0] sm:$0xff]   ;;  %v34450_v23 = vld [vmem:[%s35829_s11 + $0x2e58] sm:$0xff]   ;;  %v34475_v5 = vld [vmem:[%s35829_s11 + $0x2f48] sm:$0xff]  }
 0x64d   : > { %31582 = vmatprep.subr.bf16.mxu1 %v34411_v26  ;;  %24750 = vmatprep.mubr.bf16.mxu0 %v2189_v10  ;;  %v34453_v26 = vld [vmem:[%s35829_s11 + $0x2e98] sm:$0xff]   ;;  %v34479_v10 = vld [vmem:[%s35829_s11 + $0x2f50] sm:$0xff]  }
 0x64e   : > { %24790 = vmatprep.mubr.bf16.mxu1 %v2191_v15  ;;  %v34480_v11 = vld [vmem:[%s35829_s11 + $0x2f10] sm:$0xff]   ;;  %v34484_v15 = vld [vmem:[%s35829_s11 + $0x2f18] sm:$0xff]  }
 0x64f   : > { %31561 = vmatpush3.bf16.msra.mxu0 %v34410_v25  ;;  %v34452_v25 = vld [vmem:[%s35829_s11 + $0x2ed8] sm:$0xff]  }
 0x650   : > { %31562 = vmatprep.subr.bf16.mxu0 %v34413_v28  ;;  %31583 = vmatpush3.bf16.msra.mxu1 %v34412_v27  ;;  %v34454_v27 = vld [vmem:[%s35829_s11 + $0x2e60] sm:$0xff]  }
 0x651   : > { %31584 = vmatprep.subr.bf16.mxu1 %v34415_v30  ;;  %v34455_v28 = vld [vmem:[%s35829_s11 + $0x2e20] sm:$0xff]  }
 0x652   : > { %v34457_v30 = vld [vmem:[%s35829_s11 + $0x2ea0] sm:$0xff]  }
 0x653   : > { %31563 = vmatpush3.bf16.msra.mxu0 %v34414_v29  ;;  %v34456_v29 = vld [vmem:[%s35829_s11 + $0x2ee0] sm:$0xff]  }
 0x654   : > { %31564 = vmatprep.subr.bf16.mxu0 %v34417_v32  ;;  %31585 = vmatpush3.bf16.msra.mxu1 %v34416_v31  ;;  %v34458_v31 = vld [vmem:[%s35829_s11 + $0x2e68] sm:$0xff]  }
 0x655   : > { %31586 = vmatprep.subr.bf16.mxu1 %v34419_v34 }
 0x657   : > { %31565 = vmatpush3.bf16.msra.mxu0 %v34418_v33  ;;  %v34459_v33 = vld [vmem:[%s35829_s11 + $0x2e28] sm:$0xff]  }
 0x658   : > { %31566 = vmatprep.subr.bf16.mxu0 %v34421_v36  ;;  %31587 = vmatpush3.bf16.msra.mxu1 %v34420_v35  ;;  %v34460_v35 = vld [vmem:[%s35829_s11 + $0x2ee8] sm:$0xff]  }
 0x659   : > { %31588 = vmatprep.subr.bf16.mxu1 %v34423_v38 }
 0x65b   : > { %31567 = vmatpush3.bf16.msra.mxu0 %v34422_v37 }
 0x65c   : > { %31568 = vmatprep.subr.bf16.mxu0 %v34425_v40  ;;  %31589 = vmatpush3.bf16.msra.mxu1 %v34424_v39  ;;  %v34461_v39 = vld [vmem:[%s35829_s11 + $0x2ea8] sm:$0xff]   ;;  %v34462_v40 = vld [vmem:[%s35829_s11 + $0x2e70] sm:$0xff]  }
 0x65d   : > { %v31266_v41 = vpop.f32.mrb[152].mxu0  ;;  %31590 = vmatprep.subr.bf16.mxu1 %v34427_v45 }
 0x65e   : > { %v31267_v44 = vpop.f32.mrb[153].mxu0  ;;  %v31288_v48 = vpop.f32.mrb[152].mxu1 }
 0x65f   : > { %v31268_v46 = vadd.f32 %v31267_v44, %v31266_v41  ;;  %v31269_v47 = vpop.f32.mrb[154].mxu0  ;;  %v31289_v50 = vpop.f32.mrb[153].mxu1  ;;  %31569 = vmatpush3.bf16.msra.mxu0 %v34426_v43 }
 0x660   : > { %v31270_v49 = vpop.f32.mrb[155].mxu0  ;;  %v31290_v54 = vadd.f32 %v31289_v50, %v31288_v48  ;;  %v31291_v56 = vpop.f32.mrb[154].mxu1  ;;  %31570 = vmatprep.subr.bf16.mxu0 %v34429_v52  ;;  %31591 = vmatpush3.bf16.msra.mxu1 %v34428_v51  ;;  %v34464_v48 = vld [vmem:[%s35829_s11 + $0x2ef0] sm:$0xff]   ;;  %v34466_v52 = vld [vmem:[%s35829_s11 + $0x2e78] sm:$0xff]  }
 0x661   : > { %v24193_v53 = vadd.f32 %v31268_v46, %v37525_v4  ;;  %v31292_v59 = vpop.f32.mrb[155].mxu1  ;;  %31592 = vmatprep.subr.bf16.mxu1 %v34431_v58  ;;  %v34437_v4 = vld [vmem:[%s35829_s11 + $0x2e40] sm:$0xff]   ;;  %v34463_v46 = vld [vmem:[%s35829_s11 + $0x2e30] sm:$0xff]  }
 0x662   : > { %v34465_v51 = vld [vmem:[%s35829_s11 + $0x2eb0] sm:$0xff]   ;;  %v34470_v59 = vld [vmem:[%s35829_s11 + $0x2f40] sm:$0xff]  }
 0x663   : > { %v37562_v57 = vadd.f32 %v31290_v54, %v24193_v53  ;;  %31571 = vmatpush3.bf16.msra.mxu0 %v34430_v55  ;;  %v34467_v53 = vld [vmem:[%s35829_s11 + $0x2e38] sm:$0xff]  }
 0x664   : > { %31572 = vmatprep.subr.bf16.mxu0 %v34433_v61  ;;  %31593 = vmatpush3.bf16.msra.mxu1 %v34432_v60  ;;  %v34468_v54 = vld [vmem:[%s35829_s11 + $0x2ef8] sm:$0xff]  }
 0x665   : > { %31594 = vmatprep.subr.bf16.mxu1 %v34435_v63  ;;  %v363_v55 = vld [vmem:[%s35822_s13 + $0x170] sm:$0xff] }
 0x666   : > { %v1254_v56 = vrot.slane %v363_v55, %v35880_v42  ;;  %v1247_v58 = vcombine.high %v363_v55, %v363_v55  ;;  %v34506_v55 = vld [vmem:[%s35829_s11 + $0x30c0] sm:$0xff]  }
 0x667   : > { %31573 = vmatpush3.bf16.msra.mxu0 %v34434_v62  ;;  %v34472_v62 = vld [vmem:[%s35829_s11 + $0x2f00] sm:$0xff]  }
 0x668   : > { %31602 = vmatprep.subr.bf16.mxu0 %v34437_v4  ;;  %31595 = vmatpush3.bf16.msra.mxu1 %v34436_v2  ;;  %v1262_v60 = vcombine.high %v1254_v56, %v1254_v56  ;;  %v1261_v61 = vrot.slane %v1247_v58, %v35880_v42  ;;  %v2192_v63 = vpack.c.bf16 %v1254_v56, %v1254_v56  ;;  %v34507_v58 = vld [vmem:[%s35829_s11 + $0x3080] sm:$0xff]  }
 0x669   : > { %31624 = vmatprep.subr.bf16.mxu1 %v34440_v9  ;;  %v34478_v9 = vld [vmem:[%s35829_s11 + $0x2f88] sm:$0xff]  }
 0x66a   : > { %24751 = vmatmul.mubr.bf16.vlgmr.msra.gmra.mrb[180].mxu0 %v2188_v8  ;;  %v2193_v1 = vpack.c.bf16 %v1262_v60, %v1262_v60  ;;  %v1263_v2 = vcombine.high %v1261_v61, %v1261_v61  ;;  %v2194_v4 = vpack.c.bf16 %v1261_v61, %v1261_v61  ;;  %v34477_v8 = vld [vmem:[%s35829_s11 + $0x2fc8] sm:$0xff]  }
 0x66b   : > { %31603 = vmatpush3.bf16.msra.mxu0 %v34439_v7  ;;  %24791 = vmatmul.mubr.bf16.vlgmr.msra.gmra.mrb[180].mxu1 %v2190_v13  ;;  %v34476_v7 = vld [vmem:[%s35829_s11 + $0x2f08] sm:$0xff]   ;;  %v34482_v13 = vld [vmem:[%s35829_s11 + $0x2f90] sm:$0xff]  }
 0x66c   : > { %31604 = vmatprep.subr.bf16.mxu0 %v34442_v14  ;;  %31625 = vmatpush3.bf16.msra.mxu1 %v34441_v12  ;;  %v2195_v6 = vpack.c.bf16 %v1263_v2, %v1263_v2  ;;  %v34481_v12 = vld [vmem:[%s35829_s11 + $0x2fd0] sm:$0xff]   ;;  %v34483_v14 = vld [vmem:[%s35829_s11 + $0x2f58] sm:$0xff]   ;;  %v34508_v60 = vld [vmem:[%s35829_s11 + $0x3048] sm:$0xff]  }
 0x66d   : > { %31626 = vmatprep.subr.bf16.mxu1 %v34444_v17  ;;  %24830 = vmatprep.mubr.bf16.mxu0 %v2193_v1  ;;  %v34486_v17 = vld [vmem:[%s35829_s11 + $0x2f98] sm:$0xff]   ;;  %v34512_v1 = vld [vmem:[%s35829_s11 + $0x3050] sm:$0xff]  }
 0x66e   : > { %24870 = vmatprep.mubr.bf16.mxu1 %v2195_v6  ;;  %v34513_v2 = vld [vmem:[%s35829_s11 + $0x3010] sm:$0xff]   ;;  %v34517_v6 = vld [vmem:[%s35829_s11 + $0x3018] sm:$0xff]  }
 0x66f   : > { %31605 = vmatpush3.bf16.msra.mxu0 %v34443_v16  ;;  %v34485_v16 = vld [vmem:[%s35829_s11 + $0x2fd8] sm:$0xff]  }
 0x670   : > { %31606 = vmatprep.subr.bf16.mxu0 %v34446_v19  ;;  %31627 = vmatpush3.bf16.msra.mxu1 %v34445_v18  ;;  %v34487_v18 = vld [vmem:[%s35829_s11 + $0x2f60] sm:$0xff]  }
 0x671   : > { %31628 = vmatprep.subr.bf16.mxu1 %v34448_v21  ;;  %v34488_v19 = vld [vmem:[%s35829_s11 + $0x2f20] sm:$0xff]  }
 0x672   : > { %v34490_v21 = vld [vmem:[%s35829_s11 + $0x2fa0] sm:$0xff]  }
 0x673   : > { %31607 = vmatpush3.bf16.msra.mxu0 %v34447_v20  ;;  %v34489_v20 = vld [vmem:[%s35829_s11 + $0x2fe0] sm:$0xff]  }
 0x674   : > { %31608 = vmatprep.subr.bf16.mxu0 %v34450_v23  ;;  %31629 = vmatpush3.bf16.msra.mxu1 %v34449_v22  ;;  %v34491_v22 = vld [vmem:[%s35829_s11 + $0x2f68] sm:$0xff]  }
 0x675   : > { %31630 = vmatprep.subr.bf16.mxu1 %v34452_v25 }
 0x677   : > { %31609 = vmatpush3.bf16.msra.mxu0 %v34451_v24  ;;  %v34492_v24 = vld [vmem:[%s35829_s11 + $0x2f28] sm:$0xff]  }
 0x678   : > { %31610 = vmatprep.subr.bf16.mxu0 %v34454_v27  ;;  %31631 = vmatpush3.bf16.msra.mxu1 %v34453_v26  ;;  %v34493_v26 = vld [vmem:[%s35829_s11 + $0x2fe8] sm:$0xff]  }
 0x679   : > { %31632 = vmatprep.subr.bf16.mxu1 %v34456_v29 }
 0x67b   : > { %31611 = vmatpush3.bf16.msra.mxu0 %v34455_v28 }
 0x67c   : > { %31612 = vmatprep.subr.bf16.mxu0 %v34458_v31  ;;  %31633 = vmatpush3.bf16.msra.mxu1 %v34457_v30  ;;  %v34494_v30 = vld [vmem:[%s35829_s11 + $0x2fa8] sm:$0xff]   ;;  %v34495_v31 = vld [vmem:[%s35829_s11 + $0x2f70] sm:$0xff]  }
 0x67d   : > { %v31310_v32 = vpop.f32.mrb[156].mxu0  ;;  %31634 = vmatprep.subr.bf16.mxu1 %v34460_v35 }
 0x67e   : > { %v31311_v34 = vpop.f32.mrb[157].mxu0  ;;  %v31332_v38 = vpop.f32.mrb[156].mxu1 }
 0x67f   : > { %v31312_v36 = vadd.f32 %v31311_v34, %v31310_v32  ;;  %v31313_v37 = vpop.f32.mrb[158].mxu0  ;;  %v31333_v43 = vpop.f32.mrb[157].mxu1  ;;  %31613 = vmatpush3.bf16.msra.mxu0 %v34459_v33 }
 0x680   : > { %v31314_v41 = vpop.f32.mrb[159].mxu0  ;;  %v31334_v45 = vadd.f32 %v31333_v43, %v31332_v38  ;;  %v31335_v47 = vpop.f32.mrb[158].mxu1  ;;  %31614 = vmatprep.subr.bf16.mxu0 %v34462_v40  ;;  %31635 = vmatpush3.bf16.msra.mxu1 %v34461_v39  ;;  %v34497_v38 = vld [vmem:[%s35829_s11 + $0x2ff0] sm:$0xff]   ;;  %v34499_v43 = vld [vmem:[%s35829_s11 + $0x2f78] sm:$0xff]  }
 0x681   : > { %v24273_v44 = vadd.f32 %v31312_v36, %v37562_v57  ;;  %v31336_v49 = vpop.f32.mrb[159].mxu1  ;;  %31636 = vmatprep.subr.bf16.mxu1 %v34464_v48  ;;  %v34469_v57 = vld [vmem:[%s35829_s11 + $0x2eb8] sm:$0xff]   ;;  %v34496_v36 = vld [vmem:[%s35829_s11 + $0x2f30] sm:$0xff]  }
 0x682   : > { %v34498_v41 = vld [vmem:[%s35829_s11 + $0x2fb0] sm:$0xff]   ;;  %v34502_v48 = vld [vmem:[%s35829_s11 + $0x2fb8] sm:$0xff]  }
 0x683   : > { %v37601_v50 = vadd.f32 %v31334_v45, %v24273_v44  ;;  %31615 = vmatpush3.bf16.msra.mxu0 %v34463_v46  ;;  %v34500_v44 = vld [vmem:[%s35829_s11 + $0x2f38] sm:$0xff]   ;;  %v364_v46 = vld [vmem:[%s35822_s13 + $0x178] sm:$0xff] }
 0x684   : > { %31616 = vmatprep.subr.bf16.mxu0 %v34466_v52  ;;  %31637 = vmatpush3.bf16.msra.mxu1 %v34465_v51  ;;  %v34501_v45 = vld [vmem:[%s35829_s11 + $0x2ff8] sm:$0xff]   ;;  %v1271_v47 = vrot.slane %v364_v46, %v35880_v42  ;;  %v1264_v49 = vcombine.high %v364_v46, %v364_v46  ;;  %v34539_v46 = vld [vmem:[%s35829_s11 + $0x31c0] sm:$0xff]  }
 0x685   : > { %31638 = vmatprep.subr.bf16.mxu1 %v34468_v54 }
 0x686   : > { %v1279_v51 = vcombine.high %v1271_v47, %v1271_v47  ;;  %v1278_v52 = vrot.slane %v1264_v49, %v35880_v42  ;;  %v2196_v54 = vpack.c.bf16 %v1271_v47, %v1271_v47  ;;  %v34540_v49 = vld [vmem:[%s35829_s11 + $0x3180] sm:$0xff]  }
 0x687   : > { %31617 = vmatpush3.bf16.msra.mxu0 %v34467_v53  ;;  %v34505_v53 = vld [vmem:[%s35829_s11 + $0x3000] sm:$0xff]  }
 0x688   : > { %31646 = vmatprep.subr.bf16.mxu0 %v34470_v59  ;;  %31639 = vmatpush3.bf16.msra.mxu1 %v34469_v57  ;;  %v2197_v56 = vpack.c.bf16 %v1279_v51, %v1279_v51  ;;  %v1280_v57 = vcombine.high %v1278_v52, %v1278_v52  ;;  %v2198_v59 = vpack.c.bf16 %v1278_v52, %v1278_v52  ;;  %v34541_v51 = vld [vmem:[%s35829_s11 + $0x3148] sm:$0xff]  }
 0x689   : > { %31668 = vmatprep.subr.bf16.mxu1 %v34473_v0  ;;  %v34511_v0 = vld [vmem:[%s35829_s11 + $0x3088] sm:$0xff]  }
 0x68a   : > { %24831 = vmatmul.mubr.bf16.vlgmr.msra.gmra.mrb[184].mxu0 %v2192_v63  ;;  %v2199_v61 = vpack.c.bf16 %v1280_v57, %v1280_v57  ;;  %v34510_v63 = vld [vmem:[%s35829_s11 + $0x30c8] sm:$0xff]   ;;  %v34546_v57 = vld [vmem:[%s35829_s11 + $0x3110] sm:$0xff]  }
 0x68b   : > { %31647 = vmatpush3.bf16.msra.mxu0 %v34472_v62  ;;  %24871 = vmatmul.mubr.bf16.vlgmr.msra.gmra.mrb[184].mxu1 %v2194_v4  ;;  %v34509_v62 = vld [vmem:[%s35829_s11 + $0x3008] sm:$0xff]   ;;  %v34515_v4 = vld [vmem:[%s35829_s11 + $0x3090] sm:$0xff]  }
 0x68c   : > { %31648 = vmatprep.subr.bf16.mxu0 %v34475_v5  ;;  %31669 = vmatpush3.bf16.msra.mxu1 %v34474_v3  ;;  %v34514_v3 = vld [vmem:[%s35829_s11 + $0x30d0] sm:$0xff]   ;;  %v34516_v5 = vld [vmem:[%s35829_s11 + $0x3058] sm:$0xff]  }
 0x68d   : > { %31670 = vmatprep.subr.bf16.mxu1 %v34477_v8  ;;  %24910 = vmatprep.mubr.bf16.mxu0 %v2197_v56  ;;  %v34519_v8 = vld [vmem:[%s35829_s11 + $0x3098] sm:$0xff]   ;;  %v34545_v56 = vld [vmem:[%s35829_s11 + $0x3150] sm:$0xff]  }
 0x68e   : > { %24950 = vmatprep.mubr.bf16.mxu1 %v2199_v61  ;;  %v34550_v61 = vld [vmem:[%s35829_s11 + $0x3118] sm:$0xff]  }
 0x68f   : > { %31649 = vmatpush3.bf16.msra.mxu0 %v34476_v7  ;;  %v34518_v7 = vld [vmem:[%s35829_s11 + $0x30d8] sm:$0xff]  }
 0x690   : > { %31650 = vmatprep.subr.bf16.mxu0 %v34479_v10  ;;  %31671 = vmatpush3.bf16.msra.mxu1 %v34478_v9  ;;  %v34520_v9 = vld [vmem:[%s35829_s11 + $0x3060] sm:$0xff]  }
 0x691   : > { %31672 = vmatprep.subr.bf16.mxu1 %v34481_v12  ;;  %v34521_v10 = vld [vmem:[%s35829_s11 + $0x3020] sm:$0xff]  }
 0x692   : > { %v34523_v12 = vld [vmem:[%s35829_s11 + $0x30a0] sm:$0xff]  }
 0x693   : > { %31651 = vmatpush3.bf16.msra.mxu0 %v34480_v11  ;;  %v34522_v11 = vld [vmem:[%s35829_s11 + $0x30e0] sm:$0xff]  }
 0x694   : > { %31652 = vmatprep.subr.bf16.mxu0 %v34483_v14  ;;  %31673 = vmatpush3.bf16.msra.mxu1 %v34482_v13  ;;  %v34524_v13 = vld [vmem:[%s35829_s11 + $0x3068] sm:$0xff]  }
 0x695   : > { %31674 = vmatprep.subr.bf16.mxu1 %v34485_v16 }
 0x697   : > { %31653 = vmatpush3.bf16.msra.mxu0 %v34484_v15  ;;  %v34525_v15 = vld [vmem:[%s35829_s11 + $0x3028] sm:$0xff]  }
 0x698   : > { %31654 = vmatprep.subr.bf16.mxu0 %v34487_v18  ;;  %31675 = vmatpush3.bf16.msra.mxu1 %v34486_v17  ;;  %v34526_v17 = vld [vmem:[%s35829_s11 + $0x30e8] sm:$0xff]  }
 0x699   : > { %31676 = vmatprep.subr.bf16.mxu1 %v34489_v20 }
 0x69b   : > { %31655 = vmatpush3.bf16.msra.mxu0 %v34488_v19 }
 0x69c   : > { %31656 = vmatprep.subr.bf16.mxu0 %v34491_v22  ;;  %31677 = vmatpush3.bf16.msra.mxu1 %v34490_v21 }
 0x69d   : > { %v31354_v23 = vpop.f32.mrb[160].mxu0  ;;  %31678 = vmatprep.subr.bf16.mxu1 %v34493_v26 }
 0x69e   : > { %v31355_v25 = vpop.f32.mrb[161].mxu0  ;;  %v31376_v29 = vpop.f32.mrb[160].mxu1 }
 0x69f   : > { %v31356_v27 = vadd.f32 %v31355_v25, %v31354_v23  ;;  %v31357_v28 = vpop.f32.mrb[162].mxu0  ;;  %v31377_v33 = vpop.f32.mrb[161].mxu1  ;;  %31657 = vmatpush3.bf16.msra.mxu0 %v34492_v24  ;;  %v34527_v23 = vld [vmem:[%s35829_s11 + $0x30a8] sm:$0xff]   ;;  %v34528_v24 = vld [vmem:[%s35829_s11 + $0x3070] sm:$0xff]  }
 0x6a0   : > { %v31358_v32 = vpop.f32.mrb[163].mxu0  ;;  %v31378_v35 = vadd.f32 %v31377_v33, %v31376_v29  ;;  %v31379_v37 = vpop.f32.mrb[162].mxu1  ;;  %31658 = vmatprep.subr.bf16.mxu0 %v34495_v31  ;;  %31679 = vmatpush3.bf16.msra.mxu1 %v34494_v30  ;;  %v34530_v30 = vld [vmem:[%s35829_s11 + $0x30f0] sm:$0xff]   ;;  %v34532_v33 = vld [vmem:[%s35829_s11 + $0x3078] sm:$0xff]  }
 0x6a1   : > { %v24353_v34 = vadd.f32 %v31356_v27, %v37601_v50  ;;  %v31380_v39 = vpop.f32.mrb[163].mxu1  ;;  %31680 = vmatprep.subr.bf16.mxu1 %v34497_v38  ;;  %v34503_v50 = vld [vmem:[%s35829_s11 + $0x3040] sm:$0xff]   ;;  %v34529_v27 = vld [vmem:[%s35829_s11 + $0x3030] sm:$0xff]   ;;  %v34535_v38 = vld [vmem:[%s35829_s11 + $0x30b8] sm:$0xff]  }
 0x6a2   : > { %v34531_v32 = vld [vmem:[%s35829_s11 + $0x30b0] sm:$0xff]  }
 0x6a3   : > { %v37639_v40 = vadd.f32 %v31378_v35, %v24353_v34  ;;  %31659 = vmatpush3.bf16.msra.mxu0 %v34496_v36  ;;  %v34533_v34 = vld [vmem:[%s35829_s11 + $0x3038] sm:$0xff]  }
 0x6a4   : > { %31660 = vmatprep.subr.bf16.mxu0 %v34499_v43  ;;  %31681 = vmatpush3.bf16.msra.mxu1 %v34498_v41  ;;  %v34534_v35 = vld [vmem:[%s35829_s11 + $0x30f8] sm:$0xff]  }
 0x6a5   : > { %31682 = vmatprep.subr.bf16.mxu1 %v34501_v45  ;;  %v365_v36 = vld [vmem:[%s35822_s13 + $0x180] sm:$0xff] }
 0x6a6   : > { %v1288_v37 = vrot.slane %v365_v36, %v35880_v42  ;;  %v1281_v39 = vcombine.high %v365_v36, %v365_v36  ;;  %v34572_v36 = vld [vmem:[%s35829_s11 + $0x32c0] sm:$0xff]  }
 0x6a7   : > { %31661 = vmatpush3.bf16.msra.mxu0 %v34500_v44  ;;  %v34538_v44 = vld [vmem:[%s35829_s11 + $0x3100] sm:$0xff]  }
 0x6a8   : > { %31690 = vmatprep.subr.bf16.mxu0 %v34503_v50  ;;  %31683 = vmatpush3.bf16.msra.mxu1 %v34502_v48  ;;  %v1296_v41 = vcombine.high %v1288_v37, %v1288_v37  ;;  %v1295_v43 = vrot.slane %v1281_v39, %v35880_v42  ;;  %v2200_v45 = vpack.c.bf16 %v1288_v37, %v1288_v37  ;;  %v34573_v39 = vld [vmem:[%s35829_s11 + $0x3280] sm:$0xff]  }
 0x6a9   : > { %31712 = vmatprep.subr.bf16.mxu1 %v34506_v55  ;;  %v34544_v55 = vld [vmem:[%s35829_s11 + $0x3188] sm:$0xff]  }
 0x6aa   : > { %24911 = vmatmul.mubr.bf16.vlgmr.msra.gmra.mrb[188].mxu0 %v2196_v54  ;;  %v2201_v47 = vpack.c.bf16 %v1296_v41, %v1296_v41  ;;  %v1297_v48 = vcombine.high %v1295_v43, %v1295_v43  ;;  %v2202_v50 = vpack.c.bf16 %v1295_v43, %v1295_v43  ;;  %v34543_v54 = vld [vmem:[%s35829_s11 + $0x31c8] sm:$0xff]  }
 0x6ab   : > { %31691 = vmatpush3.bf16.msra.mxu0 %v34505_v53  ;;  %24951 = vmatmul.mubr.bf16.vlgmr.msra.gmra.mrb[188].mxu1 %v2198_v59  ;;  %v34542_v53 = vld [vmem:[%s35829_s11 + $0x3108] sm:$0xff]   ;;  %v34548_v59 = vld [vmem:[%s35829_s11 + $0x3190] sm:$0xff]  }
 0x6ac   : > { %31692 = vmatprep.subr.bf16.mxu0 %v34508_v60  ;;  %31713 = vmatpush3.bf16.msra.mxu1 %v34507_v58  ;;  %v2203_v52 = vpack.c.bf16 %v1297_v48, %v1297_v48  ;;  %v34547_v58 = vld [vmem:[%s35829_s11 + $0x31d0] sm:$0xff]   ;;  %v34549_v60 = vld [vmem:[%s35829_s11 + $0x3158] sm:$0xff]   ;;  %v34574_v41 = vld [vmem:[%s35829_s11 + $0x3248] sm:$0xff]  }
 0x6ad   : > { %31714 = vmatprep.subr.bf16.mxu1 %v34510_v63  ;;  %24990 = vmatprep.mubr.bf16.mxu0 %v2201_v47  ;;  %v34552_v63 = vld [vmem:[%s35829_s11 + $0x3198] sm:$0xff]   ;;  %v34578_v47 = vld [vmem:[%s35829_s11 + $0x3250] sm:$0xff]  }
 0x6ae   : > { %25030 = vmatprep.mubr.bf16.mxu1 %v2203_v52  ;;  %v34579_v48 = vld [vmem:[%s35829_s11 + $0x3210] sm:$0xff]   ;;  %v34583_v52 = vld [vmem:[%s35829_s11 + $0x3218] sm:$0xff]  }
 0x6af   : > { %31693 = vmatpush3.bf16.msra.mxu0 %v34509_v62  ;;  %v34551_v62 = vld [vmem:[%s35829_s11 + $0x31d8] sm:$0xff]  }
 0x6b0   : > { %31694 = vmatprep.subr.bf16.mxu0 %v34512_v1  ;;  %31715 = vmatpush3.bf16.msra.mxu1 %v34511_v0  ;;  %v34553_v0 = vld [vmem:[%s35829_s11 + $0x3160] sm:$0xff]  }
 0x6b1   : > { %31716 = vmatprep.subr.bf16.mxu1 %v34514_v3  ;;  %v34554_v1 = vld [vmem:[%s35829_s11 + $0x3120] sm:$0xff]  }
 0x6b2   : > { %v34556_v3 = vld [vmem:[%s35829_s11 + $0x31a0] sm:$0xff]  }
 0x6b3   : > { %31695 = vmatpush3.bf16.msra.mxu0 %v34513_v2  ;;  %v34555_v2 = vld [vmem:[%s35829_s11 + $0x31e0] sm:$0xff]  }
 0x6b4   : > { %31696 = vmatprep.subr.bf16.mxu0 %v34516_v5  ;;  %31717 = vmatpush3.bf16.msra.mxu1 %v34515_v4  ;;  %v34557_v4 = vld [vmem:[%s35829_s11 + $0x3168] sm:$0xff]  }
 0x6b5   : > { %31718 = vmatprep.subr.bf16.mxu1 %v34518_v7 }
 0x6b7   : > { %31697 = vmatpush3.bf16.msra.mxu0 %v34517_v6  ;;  %v34558_v6 = vld [vmem:[%s35829_s11 + $0x3128] sm:$0xff]  }
 0x6b8   : > { %31698 = vmatprep.subr.bf16.mxu0 %v34520_v9  ;;  %31719 = vmatpush3.bf16.msra.mxu1 %v34519_v8  ;;  %v34559_v8 = vld [vmem:[%s35829_s11 + $0x31e8] sm:$0xff]  }
 0x6b9   : > { %31720 = vmatprep.subr.bf16.mxu1 %v34522_v11 }
 0x6bb   : > { %31699 = vmatpush3.bf16.msra.mxu0 %v34521_v10 }
 0x6bc   : > { %31700 = vmatprep.subr.bf16.mxu0 %v34524_v13  ;;  %31721 = vmatpush3.bf16.msra.mxu1 %v34523_v12  ;;  %v34560_v12 = vld [vmem:[%s35829_s11 + $0x31a8] sm:$0xff]   ;;  %v34561_v13 = vld [vmem:[%s35829_s11 + $0x3170] sm:$0xff]  }
 0x6bd   : > { %v31398_v14 = vpop.f32.mrb[164].mxu0  ;;  %31722 = vmatprep.subr.bf16.mxu1 %v34526_v17 }
 0x6be   : > { %v31399_v16 = vpop.f32.mrb[165].mxu0  ;;  %v31420_v20 = vpop.f32.mrb[164].mxu1 }
 0x6bf   : > { %v31400_v18 = vadd.f32 %v31399_v16, %v31398_v14  ;;  %v31401_v19 = vpop.f32.mrb[166].mxu0  ;;  %v31421_v22 = vpop.f32.mrb[165].mxu1  ;;  %31701 = vmatpush3.bf16.msra.mxu0 %v34525_v15 }
 0x6c0   : > { %v31402_v21 = vpop.f32.mrb[167].mxu0  ;;  %v31422_v26 = vadd.f32 %v31421_v22, %v31420_v20  ;;  %v31423_v28 = vpop.f32.mrb[166].mxu1  ;;  %31702 = vmatprep.subr.bf16.mxu0 %v34528_v24  ;;  %31723 = vmatpush3.bf16.msra.mxu1 %v34527_v23  ;;  %v34563_v20 = vld [vmem:[%s35829_s11 + $0x31f0] sm:$0xff]   ;;  %v34565_v24 = vld [vmem:[%s35829_s11 + $0x3178] sm:$0xff]  }
 0x6c1   : > { %v24433_v25 = vadd.f32 %v31400_v18, %v37639_v40  ;;  %v31424_v31 = vpop.f32.mrb[167].mxu1  ;;  %31724 = vmatprep.subr.bf16.mxu1 %v34530_v30  ;;  %v34536_v40 = vld [vmem:[%s35829_s11 + $0x3140] sm:$0xff]   ;;  %v34562_v18 = vld [vmem:[%s35829_s11 + $0x3130] sm:$0xff]  }
 0x6c2   : > { %v34564_v23 = vld [vmem:[%s35829_s11 + $0x31b0] sm:$0xff]   ;;  %v34569_v31 = vld [vmem:[%s35829_s11 + $0x3240] sm:$0xff]  }
 0x6c3   : > { %v37676_v29 = vadd.f32 %v31422_v26, %v24433_v25  ;;  %31703 = vmatpush3.bf16.msra.mxu0 %v34529_v27  ;;  %v34566_v25 = vld [vmem:[%s35829_s11 + $0x3138] sm:$0xff]  }
 0x6c4   : > { %31704 = vmatprep.subr.bf16.mxu0 %v34532_v33  ;;  %31725 = vmatpush3.bf16.msra.mxu1 %v34531_v32  ;;  %v34567_v26 = vld [vmem:[%s35829_s11 + $0x31f8] sm:$0xff]  }
 0x6c5   : > { %31726 = vmatprep.subr.bf16.mxu1 %v34534_v35  ;;  %v366_v27 = vld [vmem:[%s35822_s13 + $0x188] sm:$0xff] }
 0x6c6   : > { %v1305_v28 = vrot.slane %v366_v27, %v35880_v42  ;;  %v1298_v30 = vcombine.high %v366_v27, %v366_v27  ;;  %v34605_v27 = vld [vmem:[%s35829_s11 + $0x33c0] sm:$0xff]  }
 0x6c7   : > { %31705 = vmatpush3.bf16.msra.mxu0 %v34533_v34  ;;  %v34571_v34 = vld [vmem:[%s35829_s11 + $0x3200] sm:$0xff]  }
 0x6c8   : > { %31734 = vmatprep.subr.bf16.mxu0 %v34536_v40  ;;  %31727 = vmatpush3.bf16.msra.mxu1 %v34535_v38  ;;  %v1313_v32 = vcombine.high %v1305_v28, %v1305_v28  ;;  %v1312_v33 = vrot.slane %v1298_v30, %v35880_v42  ;;  %v2204_v35 = vpack.c.bf16 %v1305_v28, %v1305_v28  ;;  %v34606_v30 = vld [vmem:[%s35829_s11 + $0x3380] sm:$0xff]  }
 0x6c9   : > { %31756 = vmatprep.subr.bf16.mxu1 %v34539_v46  ;;  %v34577_v46 = vld [vmem:[%s35829_s11 + $0x3288] sm:$0xff]  }
 0x6ca   : > { %24991 = vmatmul.mubr.bf16.vlgmr.msra.gmra.mrb[192].mxu0 %v2200_v45  ;;  %v2205_v37 = vpack.c.bf16 %v1313_v32, %v1313_v32  ;;  %v1314_v38 = vcombine.high %v1312_v33, %v1312_v33  ;;  %v2206_v40 = vpack.c.bf16 %v1312_v33, %v1312_v33  ;;  %v34576_v45 = vld [vmem:[%s35829_s11 + $0x32c8] sm:$0xff]  }
 0x6cb   : > { %31735 = vmatpush3.bf16.msra.mxu0 %v34538_v44  ;;  %25031 = vmatmul.mubr.bf16.vlgmr.msra.gmra.mrb[192].mxu1 %v2202_v50  ;;  %v34575_v44 = vld [vmem:[%s35829_s11 + $0x3208] sm:$0xff]   ;;  %v34581_v50 = vld [vmem:[%s35829_s11 + $0x3290] sm:$0xff]  }
 0x6cc   : > { %31736 = vmatprep.subr.bf16.mxu0 %v34541_v51  ;;  %31757 = vmatpush3.bf16.msra.mxu1 %v34540_v49  ;;  %v2207_v43 = vpack.c.bf16 %v1314_v38, %v1314_v38  ;;  %v34580_v49 = vld [vmem:[%s35829_s11 + $0x32d0] sm:$0xff]   ;;  %v34582_v51 = vld [vmem:[%s35829_s11 + $0x3258] sm:$0xff]   ;;  %v34607_v32 = vld [vmem:[%s35829_s11 + $0x3348] sm:$0xff]  }
 0x6cd   : > { %31758 = vmatprep.subr.bf16.mxu1 %v34543_v54  ;;  %25070 = vmatprep.mubr.bf16.mxu0 %v2205_v37  ;;  %v34585_v54 = vld [vmem:[%s35829_s11 + $0x3298] sm:$0xff]   ;;  %v34611_v37 = vld [vmem:[%s35829_s11 + $0x3350] sm:$0xff]  }
 0x6ce   : > { %25110 = vmatprep.mubr.bf16.mxu1 %v2207_v43  ;;  %v34612_v38 = vld [vmem:[%s35829_s11 + $0x3310] sm:$0xff]   ;;  %v34616_v43 = vld [vmem:[%s35829_s11 + $0x3318] sm:$0xff]  }
 0x6cf   : > { %31737 = vmatpush3.bf16.msra.mxu0 %v34542_v53  ;;  %v34584_v53 = vld [vmem:[%s35829_s11 + $0x32d8] sm:$0xff]  }
 0x6d0   : > { %31738 = vmatprep.subr.bf16.mxu0 %v34545_v56  ;;  %31759 = vmatpush3.bf16.msra.mxu1 %v34544_v55  ;;  %v34586_v55 = vld [vmem:[%s35829_s11 + $0x3260] sm:$0xff]  }
 0x6d1   : > { %31760 = vmatprep.subr.bf16.mxu1 %v34547_v58  ;;  %v34587_v56 = vld [vmem:[%s35829_s11 + $0x3220] sm:$0xff]  }
 0x6d2   : > { %v34589_v58 = vld [vmem:[%s35829_s11 + $0x32a0] sm:$0xff]  }
 0x6d3   : > { %31739 = vmatpush3.bf16.msra.mxu0 %v34546_v57  ;;  %v34588_v57 = vld [vmem:[%s35829_s11 + $0x32e0] sm:$0xff]  }
 0x6d4   : > { %31740 = vmatprep.subr.bf16.mxu0 %v34549_v60  ;;  %31761 = vmatpush3.bf16.msra.mxu1 %v34548_v59  ;;  %v34590_v59 = vld [vmem:[%s35829_s11 + $0x3268] sm:$0xff]  }
 0x6d5   : > { %31762 = vmatprep.subr.bf16.mxu1 %v34551_v62 }
 0x6d7   : > { %31741 = vmatpush3.bf16.msra.mxu0 %v34550_v61  ;;  %v34591_v61 = vld [vmem:[%s35829_s11 + $0x3228] sm:$0xff]  }
 0x6d8   : > { %31742 = vmatprep.subr.bf16.mxu0 %v34553_v0  ;;  %31763 = vmatpush3.bf16.msra.mxu1 %v34552_v63  ;;  %v34592_v63 = vld [vmem:[%s35829_s11 + $0x32e8] sm:$0xff]  }
 0x6d9   : > { %31764 = vmatprep.subr.bf16.mxu1 %v34555_v2 }
 0x6db   : > { %31743 = vmatpush3.bf16.msra.mxu0 %v34554_v1 }
 0x6dc   : > { %31744 = vmatprep.subr.bf16.mxu0 %v34557_v4  ;;  %31765 = vmatpush3.bf16.msra.mxu1 %v34556_v3  ;;  %v34593_v3 = vld [vmem:[%s35829_s11 + $0x32a8] sm:$0xff]   ;;  %v34594_v4 = vld [vmem:[%s35829_s11 + $0x3270] sm:$0xff]  }
 0x6dd   : > { %v31442_v5 = vpop.f32.mrb[168].mxu0  ;;  %31766 = vmatprep.subr.bf16.mxu1 %v34559_v8 }
 0x6de   : > { %v31443_v7 = vpop.f32.mrb[169].mxu0  ;;  %v31464_v11 = vpop.f32.mrb[168].mxu1 }
 0x6df   : > { %v31444_v9 = vadd.f32 %v31443_v7, %v31442_v5  ;;  %v31445_v10 = vpop.f32.mrb[170].mxu0  ;;  %v31465_v15 = vpop.f32.mrb[169].mxu1  ;;  %31745 = vmatpush3.bf16.msra.mxu0 %v34558_v6 }
 0x6e0   : > { %v31446_v14 = vpop.f32.mrb[171].mxu0  ;;  %v31466_v17 = vadd.f32 %v31465_v15, %v31464_v11  ;;  %v31467_v19 = vpop.f32.mrb[170].mxu1  ;;  %31746 = vmatprep.subr.bf16.mxu0 %v34561_v13  ;;  %31767 = vmatpush3.bf16.msra.mxu1 %v34560_v12  ;;  %v34596_v11 = vld [vmem:[%s35829_s11 + $0x32f0] sm:$0xff]   ;;  %v34598_v15 = vld [vmem:[%s35829_s11 + $0x3278] sm:$0xff]  }
 0x6e1   : > { %v24513_v16 = vadd.f32 %v31444_v9, %v37676_v29  ;;  %v31468_v21 = vpop.f32.mrb[171].mxu1  ;;  %31768 = vmatprep.subr.bf16.mxu1 %v34563_v20  ;;  %v34568_v29 = vld [vmem:[%s35829_s11 + $0x31b8] sm:$0xff]   ;;  %v34595_v9 = vld [vmem:[%s35829_s11 + $0x3230] sm:$0xff]  }
 0x6e2   : > { %v34597_v14 = vld [vmem:[%s35829_s11 + $0x32b0] sm:$0xff]   ;;  %v34601_v20 = vld [vmem:[%s35829_s11 + $0x32b8] sm:$0xff]  }
 0x6e3   : > { %v37715_v22 = vadd.f32 %v31466_v17, %v24513_v16  ;;  %31747 = vmatpush3.bf16.msra.mxu0 %v34562_v18  ;;  %v34599_v16 = vld [vmem:[%s35829_s11 + $0x3238] sm:$0xff]  }
 0x6e4   : > { %31748 = vmatprep.subr.bf16.mxu0 %v34565_v24  ;;  %31769 = vmatpush3.bf16.msra.mxu1 %v34564_v23  ;;  %v34600_v17 = vld [vmem:[%s35829_s11 + $0x32f8] sm:$0xff]  }
 0x6e5   : > { %31770 = vmatprep.subr.bf16.mxu1 %v34567_v26  ;;  %v367_v18 = vld [vmem:[%s35822_s13 + $0x190] sm:$0xff] }
 0x6e6   : > { %v1322_v19 = vrot.slane %v367_v18, %v35880_v42  ;;  %v1315_v21 = vcombine.high %v367_v18, %v367_v18  ;;  %v34638_v18 = vld [vmem:[%s35829_s11 + $0x34c0] sm:$0xff]  }
 0x6e7   : > { %31749 = vmatpush3.bf16.msra.mxu0 %v34566_v25  ;;  %v34604_v25 = vld [vmem:[%s35829_s11 + $0x3300] sm:$0xff]  }
 0x6e8   : > { %31778 = vmatprep.subr.bf16.mxu0 %v34569_v31  ;;  %31771 = vmatpush3.bf16.msra.mxu1 %v34568_v29  ;;  %v1330_v23 = vcombine.high %v1322_v19, %v1322_v19  ;;  %v1329_v24 = vrot.slane %v1315_v21, %v35880_v42  ;;  %v2208_v26 = vpack.c.bf16 %v1322_v19, %v1322_v19  ;;  %v34639_v21 = vld [vmem:[%s35829_s11 + $0x3480] sm:$0xff]  }
 0x6e9   : > { %31800 = vmatprep.subr.bf16.mxu1 %v34572_v36  ;;  %v34610_v36 = vld [vmem:[%s35829_s11 + $0x3388] sm:$0xff]  }
 0x6ea   : > { %25071 = vmatmul.mubr.bf16.vlgmr.msra.gmra.mrb[196].mxu0 %v2204_v35  ;;  %v2209_v28 = vpack.c.bf16 %v1330_v23, %v1330_v23  ;;  %v1331_v29 = vcombine.high %v1329_v24, %v1329_v24  ;;  %v2210_v31 = vpack.c.bf16 %v1329_v24, %v1329_v24  ;;  %v34609_v35 = vld [vmem:[%s35829_s11 + $0x33c8] sm:$0xff]  }
 0x6eb   : > { %31779 = vmatpush3.bf16.msra.mxu0 %v34571_v34  ;;  %25111 = vmatmul.mubr.bf16.vlgmr.msra.gmra.mrb[196].mxu1 %v2206_v40  ;;  %v34608_v34 = vld [vmem:[%s35829_s11 + $0x3308] sm:$0xff]   ;;  %v34614_v40 = vld [vmem:[%s35829_s11 + $0x3390] sm:$0xff]  }
 0x6ec   : > { %31780 = vmatprep.subr.bf16.mxu0 %v34574_v41  ;;  %31801 = vmatpush3.bf16.msra.mxu1 %v34573_v39  ;;  %v2211_v33 = vpack.c.bf16 %v1331_v29, %v1331_v29  ;;  %v34613_v39 = vld [vmem:[%s35829_s11 + $0x33d0] sm:$0xff]   ;;  %v34615_v41 = vld [vmem:[%s35829_s11 + $0x3358] sm:$0xff]   ;;  %v34640_v23 = vld [vmem:[%s35829_s11 + $0x3448] sm:$0xff]  }
 0x6ed   : > { %31802 = vmatprep.subr.bf16.mxu1 %v34576_v45  ;;  %25150 = vmatprep.mubr.bf16.mxu0 %v2209_v28  ;;  %v34618_v45 = vld [vmem:[%s35829_s11 + $0x3398] sm:$0xff]   ;;  %v34644_v28 = vld [vmem:[%s35829_s11 + $0x3450] sm:$0xff]  }
 0x6ee   : > { %25190 = vmatprep.mubr.bf16.mxu1 %v2211_v33  ;;  %v34645_v29 = vld [vmem:[%s35829_s11 + $0x3410] sm:$0xff]   ;;  %v34649_v33 = vld [vmem:[%s35829_s11 + $0x3418] sm:$0xff]  }
 0x6ef   : > { %31781 = vmatpush3.bf16.msra.mxu0 %v34575_v44  ;;  %v34617_v44 = vld [vmem:[%s35829_s11 + $0x33d8] sm:$0xff]  }
 0x6f0   : > { %31782 = vmatprep.subr.bf16.mxu0 %v34578_v47  ;;  %31803 = vmatpush3.bf16.msra.mxu1 %v34577_v46  ;;  %v34619_v46 = vld [vmem:[%s35829_s11 + $0x3360] sm:$0xff]  }
 0x6f1   : > { %31804 = vmatprep.subr.bf16.mxu1 %v34580_v49  ;;  %v34620_v47 = vld [vmem:[%s35829_s11 + $0x3320] sm:$0xff]  }
 0x6f2   : > { %v34622_v49 = vld [vmem:[%s35829_s11 + $0x33a0] sm:$0xff]  }
 0x6f3   : > { %31783 = vmatpush3.bf16.msra.mxu0 %v34579_v48  ;;  %v34621_v48 = vld [vmem:[%s35829_s11 + $0x33e0] sm:$0xff]  }
 0x6f4   : > { %31784 = vmatprep.subr.bf16.mxu0 %v34582_v51  ;;  %31805 = vmatpush3.bf16.msra.mxu1 %v34581_v50  ;;  %v34623_v50 = vld [vmem:[%s35829_s11 + $0x3368] sm:$0xff]  }
 0x6f5   : > { %31806 = vmatprep.subr.bf16.mxu1 %v34584_v53 }
 0x6f7   : > { %31785 = vmatpush3.bf16.msra.mxu0 %v34583_v52  ;;  %v34624_v52 = vld [vmem:[%s35829_s11 + $0x3328] sm:$0xff]  }
 0x6f8   : > { %31786 = vmatprep.subr.bf16.mxu0 %v34586_v55  ;;  %31807 = vmatpush3.bf16.msra.mxu1 %v34585_v54  ;;  %v34625_v54 = vld [vmem:[%s35829_s11 + $0x33e8] sm:$0xff]  }
 0x6f9   : > { %31808 = vmatprep.subr.bf16.mxu1 %v34588_v57 }
 0x6fb   : > { %31787 = vmatpush3.bf16.msra.mxu0 %v34587_v56 }
 0x6fc   : > { %31788 = vmatprep.subr.bf16.mxu0 %v34590_v59  ;;  %31809 = vmatpush3.bf16.msra.mxu1 %v34589_v58 }
 0x6fd   : > { %v31486_v60 = vpop.f32.mrb[172].mxu0  ;;  %31810 = vmatprep.subr.bf16.mxu1 %v34592_v63 }
 0x6fe   : > { %v31487_v62 = vpop.f32.mrb[173].mxu0  ;;  %v31508_v2 = vpop.f32.mrb[172].mxu1 }
 0x6ff   : > { %v31488_v0 = vadd.f32 %v31487_v62, %v31486_v60  ;;  %v31489_v1 = vpop.f32.mrb[174].mxu0  ;;  %v31509_v6 = vpop.f32.mrb[173].mxu1  ;;  %31789 = vmatpush3.bf16.msra.mxu0 %v34591_v61  ;;  %v34626_v60 = vld [vmem:[%s35829_s11 + $0x33a8] sm:$0xff]   ;;  %v34627_v61 = vld [vmem:[%s35829_s11 + $0x3370] sm:$0xff]  }
 0x700   : > { %v31490_v5 = vpop.f32.mrb[175].mxu0  ;;  %v31510_v8 = vadd.f32 %v31509_v6, %v31508_v2  ;;  %v31511_v10 = vpop.f32.mrb[174].mxu1  ;;  %31790 = vmatprep.subr.bf16.mxu0 %v34594_v4  ;;  %31811 = vmatpush3.bf16.msra.mxu1 %v34593_v3  ;;  %v34629_v3 = vld [vmem:[%s35829_s11 + $0x33f0] sm:$0xff]   ;;  %v34631_v6 = vld [vmem:[%s35829_s11 + $0x3378] sm:$0xff]  }
 0x701   : > { %v24593_v7 = vadd.f32 %v31488_v0, %v37715_v22  ;;  %v31512_v12 = vpop.f32.mrb[175].mxu1  ;;  %31812 = vmatprep.subr.bf16.mxu1 %v34596_v11  ;;  %v34602_v22 = vld [vmem:[%s35829_s11 + $0x3340] sm:$0xff]   ;;  %v34628_v0 = vld [vmem:[%s35829_s11 + $0x3330] sm:$0xff]   ;;  %v34634_v11 = vld [vmem:[%s35829_s11 + $0x33b8] sm:$0xff]  }
 0x702   : > { %v34630_v5 = vld [vmem:[%s35829_s11 + $0x33b0] sm:$0xff]  }
 0x703   : > { %v37753_v13 = vadd.f32 %v31510_v8, %v24593_v7  ;;  %31791 = vmatpush3.bf16.msra.mxu0 %v34595_v9  ;;  %v34632_v7 = vld [vmem:[%s35829_s11 + $0x3338] sm:$0xff]   ;;  %v368_v9 = vld [vmem:[%s35822_s13 + $0x198] sm:$0xff] }
 0x704   : > { %31792 = vmatprep.subr.bf16.mxu0 %v34598_v15  ;;  %31813 = vmatpush3.bf16.msra.mxu1 %v34597_v14  ;;  %v34633_v8 = vld [vmem:[%s35829_s11 + $0x33f8] sm:$0xff]   ;;  %v1339_v10 = vrot.slane %v368_v9, %v35880_v42  ;;  %v1332_v12 = vcombine.high %v368_v9, %v368_v9  ;;  %v34671_v9 = vld [vmem:[%s35829_s11 + $0x35c0] sm:$0xff]  }
 0x705   : > { %31814 = vmatprep.subr.bf16.mxu1 %v34600_v17 }
 0x706   : > { %v1347_v14 = vcombine.high %v1339_v10, %v1339_v10  ;;  %v1346_v15 = vrot.slane %v1332_v12, %v35880_v42  ;;  %v2212_v17 = vpack.c.bf16 %v1339_v10, %v1339_v10  ;;  %v34672_v12 = vld [vmem:[%s35829_s11 + $0x3580] sm:$0xff]  }
 0x707   : > { %31793 = vmatpush3.bf16.msra.mxu0 %v34599_v16  ;;  %v34637_v16 = vld [vmem:[%s35829_s11 + $0x3400] sm:$0xff]  }
 0x708   : > { %31822 = vmatprep.subr.bf16.mxu0 %v34602_v22  ;;  %31815 = vmatpush3.bf16.msra.mxu1 %v34601_v20  ;;  %v2213_v19 = vpack.c.bf16 %v1347_v14, %v1347_v14  ;;  %v1348_v20 = vcombine.high %v1346_v15, %v1346_v15  ;;  %v2214_v22 = vpack.c.bf16 %v1346_v15, %v1346_v15  ;;  %v34673_v14 = vld [vmem:[%s35829_s11 + $0x3548] sm:$0xff]  }
 0x709   : > { %31844 = vmatprep.subr.bf16.mxu1 %v34605_v27  ;;  %v34643_v27 = vld [vmem:[%s35829_s11 + $0x3488] sm:$0xff]  }
 0x70a   : > { %25151 = vmatmul.mubr.bf16.vlgmr.msra.gmra.mrb[200].mxu0 %v2208_v26  ;;  %v2215_v24 = vpack.c.bf16 %v1348_v20, %v1348_v20  ;;  %v34642_v26 = vld [vmem:[%s35829_s11 + $0x34c8] sm:$0xff]   ;;  %v34678_v20 = vld [vmem:[%s35829_s11 + $0x3510] sm:$0xff]  }
 0x70b   : > { %31823 = vmatpush3.bf16.msra.mxu0 %v34604_v25  ;;  %25191 = vmatmul.mubr.bf16.vlgmr.msra.gmra.mrb[200].mxu1 %v2210_v31  ;;  %v34641_v25 = vld [vmem:[%s35829_s11 + $0x3408] sm:$0xff]   ;;  %v34647_v31 = vld [vmem:[%s35829_s11 + $0x3490] sm:$0xff]  }
 0x70c   : > { %31824 = vmatprep.subr.bf16.mxu0 %v34607_v32  ;;  %31845 = vmatpush3.bf16.msra.mxu1 %v34606_v30  ;;  %v34646_v30 = vld [vmem:[%s35829_s11 + $0x34d0] sm:$0xff]   ;;  %v34648_v32 = vld [vmem:[%s35829_s11 + $0x3458] sm:$0xff]  }
 0x70d   : > { %31846 = vmatprep.subr.bf16.mxu1 %v34609_v35  ;;  %25230 = vmatprep.mubr.bf16.mxu0 %v2213_v19  ;;  %v34651_v35 = vld [vmem:[%s35829_s11 + $0x3498] sm:$0xff]   ;;  %v34677_v19 = vld [vmem:[%s35829_s11 + $0x3550] sm:$0xff]  }
 0x70e   : > { %25270 = vmatprep.mubr.bf16.mxu1 %v2215_v24  ;;  %v34682_v24 = vld [vmem:[%s35829_s11 + $0x3518] sm:$0xff]  }
 0x70f   : > { %31825 = vmatpush3.bf16.msra.mxu0 %v34608_v34  ;;  %v34650_v34 = vld [vmem:[%s35829_s11 + $0x34d8] sm:$0xff]  }
 0x710   : > { %31826 = vmatprep.subr.bf16.mxu0 %v34611_v37  ;;  %31847 = vmatpush3.bf16.msra.mxu1 %v34610_v36  ;;  %v34652_v36 = vld [vmem:[%s35829_s11 + $0x3460] sm:$0xff]  }
 0x711   : > { %31848 = vmatprep.subr.bf16.mxu1 %v34613_v39  ;;  %v34653_v37 = vld [vmem:[%s35829_s11 + $0x3420] sm:$0xff]  }
 0x712   : > { %v34655_v39 = vld [vmem:[%s35829_s11 + $0x34a0] sm:$0xff]  }
 0x713   : > { %31827 = vmatpush3.bf16.msra.mxu0 %v34612_v38  ;;  %v34654_v38 = vld [vmem:[%s35829_s11 + $0x34e0] sm:$0xff]  }
 0x714   : > { %31828 = vmatprep.subr.bf16.mxu0 %v34615_v41  ;;  %31849 = vmatpush3.bf16.msra.mxu1 %v34614_v40  ;;  %v34656_v40 = vld [vmem:[%s35829_s11 + $0x3468] sm:$0xff]  }
 0x715   : > { %31850 = vmatprep.subr.bf16.mxu1 %v34617_v44 }
 0x717   : > { %31829 = vmatpush3.bf16.msra.mxu0 %v34616_v43  ;;  %v34657_v43 = vld [vmem:[%s35829_s11 + $0x3428] sm:$0xff]  }
 0x718   : > { %31830 = vmatprep.subr.bf16.mxu0 %v34619_v46  ;;  %31851 = vmatpush3.bf16.msra.mxu1 %v34618_v45  ;;  %v34658_v45 = vld [vmem:[%s35829_s11 + $0x34e8] sm:$0xff]  }
 0x719   : > { %31852 = vmatprep.subr.bf16.mxu1 %v34621_v48 }
 0x71b   : > { %31831 = vmatpush3.bf16.msra.mxu0 %v34620_v47 }
 0x71c   : > { %31832 = vmatprep.subr.bf16.mxu0 %v34623_v50  ;;  %31853 = vmatpush3.bf16.msra.mxu1 %v34622_v49  ;;  %v34659_v49 = vld [vmem:[%s35829_s11 + $0x34a8] sm:$0xff]   ;;  %v34660_v50 = vld [vmem:[%s35829_s11 + $0x3470] sm:$0xff]  }
 0x71d   : > { %v31530_v51 = vpop.f32.mrb[176].mxu0  ;;  %31854 = vmatprep.subr.bf16.mxu1 %v34625_v54 }
 0x71e   : > { %v31531_v53 = vpop.f32.mrb[177].mxu0  ;;  %v31552_v57 = vpop.f32.mrb[176].mxu1 }
 0x71f   : > { %v31532_v55 = vadd.f32 %v31531_v53, %v31530_v51  ;;  %v31533_v56 = vpop.f32.mrb[178].mxu0  ;;  %v31553_v59 = vpop.f32.mrb[177].mxu1  ;;  %31833 = vmatpush3.bf16.msra.mxu0 %v34624_v52 }
 0x720   : > { %v31534_v58 = vpop.f32.mrb[179].mxu0  ;;  %v31554_v63 = vadd.f32 %v31553_v59, %v31552_v57  ;;  %v31555_v1 = vpop.f32.mrb[178].mxu1  ;;  %31834 = vmatprep.subr.bf16.mxu0 %v34627_v61  ;;  %31855 = vmatpush3.bf16.msra.mxu1 %v34626_v60  ;;  %v34662_v57 = vld [vmem:[%s35829_s11 + $0x34f0] sm:$0xff]   ;;  %v34664_v61 = vld [vmem:[%s35829_s11 + $0x3478] sm:$0xff]  }
 0x721   : > { %v24673_v62 = vadd.f32 %v31532_v55, %v37753_v13  ;;  %v31556_v4 = vpop.f32.mrb[179].mxu1  ;;  %31856 = vmatprep.subr.bf16.mxu1 %v34629_v3  ;;  %v34635_v13 = vld [vmem:[%s35829_s11 + $0x3440] sm:$0xff]   ;;  %v34661_v55 = vld [vmem:[%s35829_s11 + $0x3430] sm:$0xff]  }
 0x722   : > { %v34663_v60 = vld [vmem:[%s35829_s11 + $0x34b0] sm:$0xff]   ;;  %v34668_v4 = vld [vmem:[%s35829_s11 + $0x3540] sm:$0xff]  }
 0x723   : > { %v37790_v2 = vadd.f32 %v31554_v63, %v24673_v62  ;;  %31835 = vmatpush3.bf16.msra.mxu0 %v34628_v0  ;;  %v34665_v62 = vld [vmem:[%s35829_s11 + $0x3438] sm:$0xff]  }
 0x724   : > { %31836 = vmatprep.subr.bf16.mxu0 %v34631_v6  ;;  %31857 = vmatpush3.bf16.msra.mxu1 %v34630_v5  ;;  %v34666_v63 = vld [vmem:[%s35829_s11 + $0x34f8] sm:$0xff]  }
 0x725   : > { %31858 = vmatprep.subr.bf16.mxu1 %v34633_v8  ;;  %v369_v0 = vld [vmem:[%s35822_s13 + $0x1a0] sm:$0xff] }
 0x726   : > { %v1356_v1 = vrot.slane %v369_v0, %v35880_v42  ;;  %v1349_v3 = vcombine.high %v369_v0, %v369_v0  ;;  %v34704_v0 = vld [vmem:[%s35829_s11 + $0x36c0] sm:$0xff]  }
 0x727   : > { %31837 = vmatpush3.bf16.msra.mxu0 %v34632_v7  ;;  %v34670_v7 = vld [vmem:[%s35829_s11 + $0x3500] sm:$0xff]  }
 0x728   : > { %31866 = vmatprep.subr.bf16.mxu0 %v34635_v13  ;;  %31859 = vmatpush3.bf16.msra.mxu1 %v34634_v11  ;;  %v1364_v5 = vcombine.high %v1356_v1, %v1356_v1  ;;  %v1363_v6 = vrot.slane %v1349_v3, %v35880_v42  ;;  %v2216_v8 = vpack.c.bf16 %v1356_v1, %v1356_v1  ;;  %v34705_v3 = vld [vmem:[%s35829_s11 + $0x3680] sm:$0xff]  }
 0x729   : > { %31888 = vmatprep.subr.bf16.mxu1 %v34638_v18  ;;  %v34676_v18 = vld [vmem:[%s35829_s11 + $0x3588] sm:$0xff]  }
 0x72a   : > { %25231 = vmatmul.mubr.bf16.vlgmr.msra.gmra.mrb[204].mxu0 %v2212_v17  ;;  %v2217_v10 = vpack.c.bf16 %v1364_v5, %v1364_v5  ;;  %v1365_v11 = vcombine.high %v1363_v6, %v1363_v6  ;;  %v2218_v13 = vpack.c.bf16 %v1363_v6, %v1363_v6  ;;  %v34675_v17 = vld [vmem:[%s35829_s11 + $0x35c8] sm:$0xff]  }
 0x72b   : > { %31867 = vmatpush3.bf16.msra.mxu0 %v34637_v16  ;;  %25271 = vmatmul.mubr.bf16.vlgmr.msra.gmra.mrb[204].mxu1 %v2214_v22  ;;  %v34674_v16 = vld [vmem:[%s35829_s11 + $0x3508] sm:$0xff]   ;;  %v34680_v22 = vld [vmem:[%s35829_s11 + $0x3590] sm:$0xff]  }
 0x72c   : > { %31868 = vmatprep.subr.bf16.mxu0 %v34640_v23  ;;  %31889 = vmatpush3.bf16.msra.mxu1 %v34639_v21  ;;  %v2219_v15 = vpack.c.bf16 %v1365_v11, %v1365_v11  ;;  %v34679_v21 = vld [vmem:[%s35829_s11 + $0x35d0] sm:$0xff]   ;;  %v34681_v23 = vld [vmem:[%s35829_s11 + $0x3558] sm:$0xff]   ;;  %v34706_v5 = vld [vmem:[%s35829_s11 + $0x3648] sm:$0xff]  }
 0x72d   : > { %31890 = vmatprep.subr.bf16.mxu1 %v34642_v26  ;;  %25310 = vmatprep.mubr.bf16.mxu0 %v2217_v10  ;;  %v34684_v26 = vld [vmem:[%s35829_s11 + $0x3598] sm:$0xff]   ;;  %v34710_v10 = vld [vmem:[%s35829_s11 + $0x3650] sm:$0xff]  }
 0x72e   : > { %25350 = vmatprep.mubr.bf16.mxu1 %v2219_v15  ;;  %v34711_v11 = vld [vmem:[%s35829_s11 + $0x3610] sm:$0xff]   ;;  %v34715_v15 = vld [vmem:[%s35829_s11 + $0x3618] sm:$0xff]  }
 0x72f   : > { %31869 = vmatpush3.bf16.msra.mxu0 %v34641_v25  ;;  %v34683_v25 = vld [vmem:[%s35829_s11 + $0x35d8] sm:$0xff]  }
 0x730   : > { %31870 = vmatprep.subr.bf16.mxu0 %v34644_v28  ;;  %31891 = vmatpush3.bf16.msra.mxu1 %v34643_v27  ;;  %v34685_v27 = vld [vmem:[%s35829_s11 + $0x3560] sm:$0xff]  }
 0x731   : > { %31892 = vmatprep.subr.bf16.mxu1 %v34646_v30  ;;  %v34686_v28 = vld [vmem:[%s35829_s11 + $0x3520] sm:$0xff]  }
 0x732   : > { %v34688_v30 = vld [vmem:[%s35829_s11 + $0x35a0] sm:$0xff]  }
 0x733   : > { %31871 = vmatpush3.bf16.msra.mxu0 %v34645_v29  ;;  %v34687_v29 = vld [vmem:[%s35829_s11 + $0x35e0] sm:$0xff]  }
 0x734   : > { %31872 = vmatprep.subr.bf16.mxu0 %v34648_v32  ;;  %31893 = vmatpush3.bf16.msra.mxu1 %v34647_v31  ;;  %v34689_v31 = vld [vmem:[%s35829_s11 + $0x3568] sm:$0xff]  }
 0x735   : > { %31894 = vmatprep.subr.bf16.mxu1 %v34650_v34 }
 0x737   : > { %31873 = vmatpush3.bf16.msra.mxu0 %v34649_v33  ;;  %v34690_v33 = vld [vmem:[%s35829_s11 + $0x3528] sm:$0xff]  }
 0x738   : > { %31874 = vmatprep.subr.bf16.mxu0 %v34652_v36  ;;  %31895 = vmatpush3.bf16.msra.mxu1 %v34651_v35  ;;  %v34691_v35 = vld [vmem:[%s35829_s11 + $0x35e8] sm:$0xff]  }
 0x739   : > { %31896 = vmatprep.subr.bf16.mxu1 %v34654_v38 }
 0x73b   : > { %31875 = vmatpush3.bf16.msra.mxu0 %v34653_v37 }
 0x73c   : > { %31876 = vmatprep.subr.bf16.mxu0 %v34656_v40  ;;  %31897 = vmatpush3.bf16.msra.mxu1 %v34655_v39  ;;  %v34692_v39 = vld [vmem:[%s35829_s11 + $0x35a8] sm:$0xff]   ;;  %v34693_v40 = vld [vmem:[%s35829_s11 + $0x3570] sm:$0xff]  }
 0x73d   : > { %v31574_v41 = vpop.f32.mrb[180].mxu0  ;;  %31898 = vmatprep.subr.bf16.mxu1 %v34658_v45 }
 0x73e   : > { %v31575_v44 = vpop.f32.mrb[181].mxu0  ;;  %v31596_v48 = vpop.f32.mrb[180].mxu1 }
 0x73f   : > { %v31576_v46 = vadd.f32 %v31575_v44, %v31574_v41  ;;  %v31577_v47 = vpop.f32.mrb[182].mxu0  ;;  %v31597_v52 = vpop.f32.mrb[181].mxu1  ;;  %31877 = vmatpush3.bf16.msra.mxu0 %v34657_v43 }
 0x740   : > { %v31578_v51 = vpop.f32.mrb[183].mxu0  ;;  %v31598_v54 = vadd.f32 %v31597_v52, %v31596_v48  ;;  %v31599_v56 = vpop.f32.mrb[182].mxu1  ;;  %31878 = vmatprep.subr.bf16.mxu0 %v34660_v50  ;;  %31899 = vmatpush3.bf16.msra.mxu1 %v34659_v49  ;;  %v34695_v48 = vld [vmem:[%s35829_s11 + $0x35f0] sm:$0xff]   ;;  %v34697_v52 = vld [vmem:[%s35829_s11 + $0x3578] sm:$0xff]  }
 0x741   : > { %v24753_v53 = vadd.f32 %v31576_v46, %v37790_v2  ;;  %v31600_v58 = vpop.f32.mrb[183].mxu1  ;;  %31900 = vmatprep.subr.bf16.mxu1 %v34662_v57  ;;  %v34667_v2 = vld [vmem:[%s35829_s11 + $0x34b8] sm:$0xff]   ;;  %v34694_v46 = vld [vmem:[%s35829_s11 + $0x3530] sm:$0xff]  }
 0x742   : > { %v34696_v51 = vld [vmem:[%s35829_s11 + $0x35b0] sm:$0xff]   ;;  %v34700_v57 = vld [vmem:[%s35829_s11 + $0x35b8] sm:$0xff]  }
 0x743   : > { %v37829_v59 = vadd.f32 %v31598_v54, %v24753_v53  ;;  %31879 = vmatpush3.bf16.msra.mxu0 %v34661_v55  ;;  %v34698_v53 = vld [vmem:[%s35829_s11 + $0x3538] sm:$0xff]  }
 0x744   : > { %31880 = vmatprep.subr.bf16.mxu0 %v34664_v61  ;;  %31901 = vmatpush3.bf16.msra.mxu1 %v34663_v60  ;;  %v34699_v54 = vld [vmem:[%s35829_s11 + $0x35f8] sm:$0xff]  }
 0x745   : > { %31902 = vmatprep.subr.bf16.mxu1 %v34666_v63  ;;  %v370_v55 = vld [vmem:[%s35822_s13 + $0x1a8] sm:$0xff] }
 0x746   : > { %v1373_v56 = vrot.slane %v370_v55, %v35880_v42  ;;  %v1366_v58 = vcombine.high %v370_v55, %v370_v55  ;;  %v34737_v55 = vld [vmem:[%s35829_s11 + $0x37c0] sm:$0xff]  }
 0x747   : > { %31881 = vmatpush3.bf16.msra.mxu0 %v34665_v62  ;;  %v34703_v62 = vld [vmem:[%s35829_s11 + $0x3600] sm:$0xff]  }
 0x748   : > { %31910 = vmatprep.subr.bf16.mxu0 %v34668_v4  ;;  %31903 = vmatpush3.bf16.msra.mxu1 %v34667_v2  ;;  %v1381_v60 = vcombine.high %v1373_v56, %v1373_v56  ;;  %v1380_v61 = vrot.slane %v1366_v58, %v35880_v42  ;;  %v2220_v63 = vpack.c.bf16 %v1373_v56, %v1373_v56  ;;  %v34738_v58 = vld [vmem:[%s35829_s11 + $0x3780] sm:$0xff]  }
 0x749   : > { %31932 = vmatprep.subr.bf16.mxu1 %v34671_v9  ;;  %v34709_v9 = vld [vmem:[%s35829_s11 + $0x3688] sm:$0xff]  }
 0x74a   : > { %25311 = vmatmul.mubr.bf16.vlgmr.msra.gmra.mrb[208].mxu0 %v2216_v8  ;;  %v2221_v1 = vpack.c.bf16 %v1381_v60, %v1381_v60  ;;  %v1382_v2 = vcombine.high %v1380_v61, %v1380_v61  ;;  %v2222_v4 = vpack.c.bf16 %v1380_v61, %v1380_v61  ;;  %v34708_v8 = vld [vmem:[%s35829_s11 + $0x36c8] sm:$0xff]  }
 0x74b   : > { %31911 = vmatpush3.bf16.msra.mxu0 %v34670_v7  ;;  %25351 = vmatmul.mubr.bf16.vlgmr.msra.gmra.mrb[208].mxu1 %v2218_v13  ;;  %v34707_v7 = vld [vmem:[%s35829_s11 + $0x3608] sm:$0xff]   ;;  %v34713_v13 = vld [vmem:[%s35829_s11 + $0x3690] sm:$0xff]  }
 0x74c   : > { %31912 = vmatprep.subr.bf16.mxu0 %v34673_v14  ;;  %31933 = vmatpush3.bf16.msra.mxu1 %v34672_v12  ;;  %v2223_v6 = vpack.c.bf16 %v1382_v2, %v1382_v2  ;;  %v34712_v12 = vld [vmem:[%s35829_s11 + $0x36d0] sm:$0xff]   ;;  %v34714_v14 = vld [vmem:[%s35829_s11 + $0x3658] sm:$0xff]   ;;  %v34739_v60 = vld [vmem:[%s35829_s11 + $0x3748] sm:$0xff]  }
 0x74d   : > { %31934 = vmatprep.subr.bf16.mxu1 %v34675_v17  ;;  %25390 = vmatprep.mubr.bf16.mxu0 %v2221_v1  ;;  %v34717_v17 = vld [vmem:[%s35829_s11 + $0x3698] sm:$0xff]   ;;  %v34743_v1 = vld [vmem:[%s35829_s11 + $0x3750] sm:$0xff]  }
 0x74e   : > { %25430 = vmatprep.mubr.bf16.mxu1 %v2223_v6  ;;  %v34744_v2 = vld [vmem:[%s35829_s11 + $0x3710] sm:$0xff]   ;;  %v34748_v6 = vld [vmem:[%s35829_s11 + $0x3718] sm:$0xff]  }
 0x74f   : > { %31913 = vmatpush3.bf16.msra.mxu0 %v34674_v16  ;;  %v34716_v16 = vld [vmem:[%s35829_s11 + $0x36d8] sm:$0xff]  }
 0x750   : > { %31914 = vmatprep.subr.bf16.mxu0 %v34677_v19  ;;  %31935 = vmatpush3.bf16.msra.mxu1 %v34676_v18  ;;  %v34718_v18 = vld [vmem:[%s35829_s11 + $0x3660] sm:$0xff]  }
 0x751   : > { %31936 = vmatprep.subr.bf16.mxu1 %v34679_v21  ;;  %v34719_v19 = vld [vmem:[%s35829_s11 + $0x3620] sm:$0xff]  }
 0x752   : > { %v34721_v21 = vld [vmem:[%s35829_s11 + $0x36a0] sm:$0xff]  }
 0x753   : > { %31915 = vmatpush3.bf16.msra.mxu0 %v34678_v20  ;;  %v34720_v20 = vld [vmem:[%s35829_s11 + $0x36e0] sm:$0xff]  }
 0x754   : > { %31916 = vmatprep.subr.bf16.mxu0 %v34681_v23  ;;  %31937 = vmatpush3.bf16.msra.mxu1 %v34680_v22  ;;  %v34722_v22 = vld [vmem:[%s35829_s11 + $0x3668] sm:$0xff]  }
 0x755   : > { %31938 = vmatprep.subr.bf16.mxu1 %v34683_v25 }
 0x757   : > { %31917 = vmatpush3.bf16.msra.mxu0 %v34682_v24  ;;  %v34723_v24 = vld [vmem:[%s35829_s11 + $0x3628] sm:$0xff]  }
 0x758   : > { %31918 = vmatprep.subr.bf16.mxu0 %v34685_v27  ;;  %31939 = vmatpush3.bf16.msra.mxu1 %v34684_v26  ;;  %v34724_v26 = vld [vmem:[%s35829_s11 + $0x36e8] sm:$0xff]  }
 0x759   : > { %31940 = vmatprep.subr.bf16.mxu1 %v34687_v29 }
 0x75b   : > { %31919 = vmatpush3.bf16.msra.mxu0 %v34686_v28 }
 0x75c   : > { %31920 = vmatprep.subr.bf16.mxu0 %v34689_v31  ;;  %31941 = vmatpush3.bf16.msra.mxu1 %v34688_v30 }
 0x75d   : > { %v31618_v32 = vpop.f32.mrb[184].mxu0  ;;  %31942 = vmatprep.subr.bf16.mxu1 %v34691_v35 }
 0x75e   : > { %v31619_v34 = vpop.f32.mrb[185].mxu0  ;;  %v31640_v38 = vpop.f32.mrb[184].mxu1 }
 0x75f   : > { %v31620_v36 = vadd.f32 %v31619_v34, %v31618_v32  ;;  %v31621_v37 = vpop.f32.mrb[186].mxu0  ;;  %v31641_v43 = vpop.f32.mrb[185].mxu1  ;;  %31921 = vmatpush3.bf16.msra.mxu0 %v34690_v33  ;;  %v34725_v32 = vld [vmem:[%s35829_s11 + $0x36a8] sm:$0xff]   ;;  %v34726_v33 = vld [vmem:[%s35829_s11 + $0x3670] sm:$0xff]  }
 0x760   : > { %v31622_v41 = vpop.f32.mrb[187].mxu0  ;;  %v31642_v45 = vadd.f32 %v31641_v43, %v31640_v38  ;;  %v31643_v47 = vpop.f32.mrb[186].mxu1  ;;  %31922 = vmatprep.subr.bf16.mxu0 %v34693_v40  ;;  %31943 = vmatpush3.bf16.msra.mxu1 %v34692_v39  ;;  %v34728_v39 = vld [vmem:[%s35829_s11 + $0x36f0] sm:$0xff]   ;;  %v34730_v43 = vld [vmem:[%s35829_s11 + $0x3678] sm:$0xff]  }
 0x761   : > { %v24833_v44 = vadd.f32 %v31620_v36, %v37829_v59  ;;  %v31644_v49 = vpop.f32.mrb[187].mxu1  ;;  %31944 = vmatprep.subr.bf16.mxu1 %v34695_v48  ;;  %v34701_v59 = vld [vmem:[%s35829_s11 + $0x3640] sm:$0xff]   ;;  %v34727_v36 = vld [vmem:[%s35829_s11 + $0x3630] sm:$0xff]   ;;  %v34733_v48 = vld [vmem:[%s35829_s11 + $0x36b8] sm:$0xff]  }
 0x762   : > { %v34729_v41 = vld [vmem:[%s35829_s11 + $0x36b0] sm:$0xff]  }
 0x763   : > { %v37867_v50 = vadd.f32 %v31642_v45, %v24833_v44  ;;  %31923 = vmatpush3.bf16.msra.mxu0 %v34694_v46  ;;  %v34731_v44 = vld [vmem:[%s35829_s11 + $0x3638] sm:$0xff]  }
 0x764   : > { %31924 = vmatprep.subr.bf16.mxu0 %v34697_v52  ;;  %31945 = vmatpush3.bf16.msra.mxu1 %v34696_v51  ;;  %v34732_v45 = vld [vmem:[%s35829_s11 + $0x36f8] sm:$0xff]  }
 0x765   : > { %31946 = vmatprep.subr.bf16.mxu1 %v34699_v54  ;;  %v371_v46 = vld [vmem:[%s35822_s13 + $0x1b0] sm:$0xff] }
 0x766   : > { %v1390_v47 = vrot.slane %v371_v46, %v35880_v42  ;;  %v1383_v49 = vcombine.high %v371_v46, %v371_v46  ;;  %v34770_v46 = vld [vmem:[%s35829_s11 + $0x38c0] sm:$0xff]  }
 0x767   : > { %31925 = vmatpush3.bf16.msra.mxu0 %v34698_v53  ;;  %v34736_v53 = vld [vmem:[%s35829_s11 + $0x3700] sm:$0xff]  }
 0x768   : > { %31954 = vmatprep.subr.bf16.mxu0 %v34701_v59  ;;  %31947 = vmatpush3.bf16.msra.mxu1 %v34700_v57  ;;  %v1398_v51 = vcombine.high %v1390_v47, %v1390_v47  ;;  %v1397_v52 = vrot.slane %v1383_v49, %v35880_v42  ;;  %v2224_v54 = vpack.c.bf16 %v1390_v47, %v1390_v47  ;;  %v34771_v49 = vld [vmem:[%s35829_s11 + $0x3880] sm:$0xff]  }
 0x769   : > { %31976 = vmatprep.subr.bf16.mxu1 %v34704_v0  ;;  %v34742_v0 = vld [vmem:[%s35829_s11 + $0x3788] sm:$0xff]  }
 0x76a   : > { %25391 = vmatmul.mubr.bf16.vlgmr.msra.gmra.mrb[212].mxu0 %v2220_v63  ;;  %v2225_v56 = vpack.c.bf16 %v1398_v51, %v1398_v51  ;;  %v1399_v57 = vcombine.high %v1397_v52, %v1397_v52  ;;  %v2226_v59 = vpack.c.bf16 %v1397_v52, %v1397_v52  ;;  %v34741_v63 = vld [vmem:[%s35829_s11 + $0x37c8] sm:$0xff]  }
 0x76b   : > { %31955 = vmatpush3.bf16.msra.mxu0 %v34703_v62  ;;  %25431 = vmatmul.mubr.bf16.vlgmr.msra.gmra.mrb[212].mxu1 %v2222_v4  ;;  %v34740_v62 = vld [vmem:[%s35829_s11 + $0x3708] sm:$0xff]   ;;  %v34746_v4 = vld [vmem:[%s35829_s11 + $0x3790] sm:$0xff]  }
 0x76c   : > { %31956 = vmatprep.subr.bf16.mxu0 %v34706_v5  ;;  %31977 = vmatpush3.bf16.msra.mxu1 %v34705_v3  ;;  %v2227_v61 = vpack.c.bf16 %v1399_v57, %v1399_v57  ;;  %v34745_v3 = vld [vmem:[%s35829_s11 + $0x37d0] sm:$0xff]   ;;  %v34747_v5 = vld [vmem:[%s35829_s11 + $0x3758] sm:$0xff]   ;;  %v34772_v51 = vld [vmem:[%s35829_s11 + $0x3848] sm:$0xff]  }
 0x76d   : > { %31978 = vmatprep.subr.bf16.mxu1 %v34708_v8  ;;  %25470 = vmatprep.mubr.bf16.mxu0 %v2225_v56  ;;  %v34750_v8 = vld [vmem:[%s35829_s11 + $0x3798] sm:$0xff]   ;;  %v34776_v56 = vld [vmem:[%s35829_s11 + $0x3850] sm:$0xff]  }
 0x76e   : > { %25510 = vmatprep.mubr.bf16.mxu1 %v2227_v61  ;;  %v34777_v57 = vld [vmem:[%s35829_s11 + $0x3810] sm:$0xff]   ;;  %v34781_v61 = vld [vmem:[%s35829_s11 + $0x3818] sm:$0xff]  }
 0x76f   : > { %31957 = vmatpush3.bf16.msra.mxu0 %v34707_v7  ;;  %v34749_v7 = vld [vmem:[%s35829_s11 + $0x37d8] sm:$0xff]  }
 0x770   : > { %31958 = vmatprep.subr.bf16.mxu0 %v34710_v10  ;;  %31979 = vmatpush3.bf16.msra.mxu1 %v34709_v9  ;;  %v34751_v9 = vld [vmem:[%s35829_s11 + $0x3760] sm:$0xff]  }
 0x771   : > { %31980 = vmatprep.subr.bf16.mxu1 %v34712_v12  ;;  %v34752_v10 = vld [vmem:[%s35829_s11 + $0x3720] sm:$0xff]  }
 0x772   : > { %v34754_v12 = vld [vmem:[%s35829_s11 + $0x37a0] sm:$0xff]  }
 0x773   : > { %31959 = vmatpush3.bf16.msra.mxu0 %v34711_v11  ;;  %v34753_v11 = vld [vmem:[%s35829_s11 + $0x37e0] sm:$0xff]  }
 0x774   : > { %31960 = vmatprep.subr.bf16.mxu0 %v34714_v14  ;;  %31981 = vmatpush3.bf16.msra.mxu1 %v34713_v13  ;;  %v34755_v13 = vld [vmem:[%s35829_s11 + $0x3768] sm:$0xff]  }
 0x775   : > { %31982 = vmatprep.subr.bf16.mxu1 %v34716_v16 }
 0x777   : > { %31961 = vmatpush3.bf16.msra.mxu0 %v34715_v15  ;;  %v34756_v15 = vld [vmem:[%s35829_s11 + $0x3728] sm:$0xff]  }
 0x778   : > { %31962 = vmatprep.subr.bf16.mxu0 %v34718_v18  ;;  %31983 = vmatpush3.bf16.msra.mxu1 %v34717_v17  ;;  %v34757_v17 = vld [vmem:[%s35829_s11 + $0x37e8] sm:$0xff]  }
 0x779   : > { %31984 = vmatprep.subr.bf16.mxu1 %v34720_v20 }
 0x77b   : > { %31963 = vmatpush3.bf16.msra.mxu0 %v34719_v19 }
 0x77c   : > { %31964 = vmatprep.subr.bf16.mxu0 %v34722_v22  ;;  %31985 = vmatpush3.bf16.msra.mxu1 %v34721_v21  ;;  %v34758_v21 = vld [vmem:[%s35829_s11 + $0x37a8] sm:$0xff]   ;;  %v34759_v22 = vld [vmem:[%s35829_s11 + $0x3770] sm:$0xff]  }
 0x77d   : > { %v31662_v23 = vpop.f32.mrb[188].mxu0  ;;  %31986 = vmatprep.subr.bf16.mxu1 %v34724_v26 }
 0x77e   : > { %v31663_v25 = vpop.f32.mrb[189].mxu0  ;;  %v31684_v29 = vpop.f32.mrb[188].mxu1 }
 0x77f   : > { %v31664_v27 = vadd.f32 %v31663_v25, %v31662_v23  ;;  %v31665_v28 = vpop.f32.mrb[190].mxu0  ;;  %v31685_v31 = vpop.f32.mrb[189].mxu1  ;;  %31965 = vmatpush3.bf16.msra.mxu0 %v34723_v24 }
 0x780   : > { %v31666_v30 = vpop.f32.mrb[191].mxu0  ;;  %v31686_v35 = vadd.f32 %v31685_v31, %v31684_v29  ;;  %v31687_v37 = vpop.f32.mrb[190].mxu1  ;;  %31966 = vmatprep.subr.bf16.mxu0 %v34726_v33  ;;  %31987 = vmatpush3.bf16.msra.mxu1 %v34725_v32  ;;  %v34761_v29 = vld [vmem:[%s35829_s11 + $0x37f0] sm:$0xff]   ;;  %v34763_v33 = vld [vmem:[%s35829_s11 + $0x3778] sm:$0xff]  }
 0x781   : > { %v24913_v34 = vadd.f32 %v31664_v27, %v37867_v50  ;;  %v31688_v40 = vpop.f32.mrb[191].mxu1  ;;  %31988 = vmatprep.subr.bf16.mxu1 %v34728_v39  ;;  %v34734_v50 = vld [vmem:[%s35829_s11 + $0x3740] sm:$0xff]   ;;  %v34760_v27 = vld [vmem:[%s35829_s11 + $0x3730] sm:$0xff]  }
 0x782   : > { %v34762_v32 = vld [vmem:[%s35829_s11 + $0x37b0] sm:$0xff]   ;;  %v34767_v40 = vld [vmem:[%s35829_s11 + $0x3840] sm:$0xff]  }
 0x783   : > { %v37904_v38 = vadd.f32 %v31686_v35, %v24913_v34  ;;  %31967 = vmatpush3.bf16.msra.mxu0 %v34727_v36  ;;  %v34764_v34 = vld [vmem:[%s35829_s11 + $0x3738] sm:$0xff]   ;;  %v372_v36 = vld [vmem:[%s35822_s13 + $0x1b8] sm:$0xff] }
 0x784   : > { %31968 = vmatprep.subr.bf16.mxu0 %v34730_v43  ;;  %31989 = vmatpush3.bf16.msra.mxu1 %v34729_v41  ;;  %v34765_v35 = vld [vmem:[%s35829_s11 + $0x37f8] sm:$0xff]   ;;  %v1407_v37 = vrot.slane %v372_v36, %v35880_v42  ;;  %v1400_v39 = vcombine.high %v372_v36, %v372_v36  ;;  %v34803_v36 = vld [vmem:[%s35829_s11 + $0x39c0] sm:$0xff]  }
 0x785   : > { %31990 = vmatprep.subr.bf16.mxu1 %v34732_v45 }
 0x786   : > { %v1415_v41 = vcombine.high %v1407_v37, %v1407_v37  ;;  %v1414_v43 = vrot.slane %v1400_v39, %v35880_v42  ;;  %v2228_v45 = vpack.c.bf16 %v1407_v37, %v1407_v37  ;;  %v34804_v39 = vld [vmem:[%s35829_s11 + $0x3980] sm:$0xff]  }
 0x787   : > { %31969 = vmatpush3.bf16.msra.mxu0 %v34731_v44  ;;  %v34769_v44 = vld [vmem:[%s35829_s11 + $0x3800] sm:$0xff]  }
 0x788   : > { %31998 = vmatprep.subr.bf16.mxu0 %v34734_v50  ;;  %31991 = vmatpush3.bf16.msra.mxu1 %v34733_v48  ;;  %v2229_v47 = vpack.c.bf16 %v1415_v41, %v1415_v41  ;;  %v1416_v48 = vcombine.high %v1414_v43, %v1414_v43  ;;  %v2230_v50 = vpack.c.bf16 %v1414_v43, %v1414_v43  ;;  %v34805_v41 = vld [vmem:[%s35829_s11 + $0x3948] sm:$0xff]  }
 0x789   : > { %32020 = vmatprep.subr.bf16.mxu1 %v34737_v55  ;;  %v34775_v55 = vld [vmem:[%s35829_s11 + $0x3888] sm:$0xff]  }
 0x78a   : > { %25471 = vmatmul.mubr.bf16.vlgmr.msra.gmra.mrb[216].mxu0 %v2224_v54  ;;  %v2231_v52 = vpack.c.bf16 %v1416_v48, %v1416_v48  ;;  %v34774_v54 = vld [vmem:[%s35829_s11 + $0x38c8] sm:$0xff]   ;;  %v34810_v48 = vld [vmem:[%s35829_s11 + $0x3910] sm:$0xff]  }
 0x78b   : > { %31999 = vmatpush3.bf16.msra.mxu0 %v34736_v53  ;;  %25511 = vmatmul.mubr.bf16.vlgmr.msra.gmra.mrb[216].mxu1 %v2226_v59  ;;  %v34773_v53 = vld [vmem:[%s35829_s11 + $0x3808] sm:$0xff]   ;;  %v34779_v59 = vld [vmem:[%s35829_s11 + $0x3890] sm:$0xff]  }
 0x78c   : > { %32000 = vmatprep.subr.bf16.mxu0 %v34739_v60  ;;  %32021 = vmatpush3.bf16.msra.mxu1 %v34738_v58  ;;  %v34778_v58 = vld [vmem:[%s35829_s11 + $0x38d0] sm:$0xff]   ;;  %v34780_v60 = vld [vmem:[%s35829_s11 + $0x3858] sm:$0xff]  }
 0x78d   : > { %32022 = vmatprep.subr.bf16.mxu1 %v34741_v63  ;;  %25550 = vmatprep.mubr.bf16.mxu0 %v2229_v47  ;;  %v34783_v63 = vld [vmem:[%s35829_s11 + $0x3898] sm:$0xff]   ;;  %v34809_v47 = vld [vmem:[%s35829_s11 + $0x3950] sm:$0xff]  }
 0x78e   : > { %25590 = vmatprep.mubr.bf16.mxu1 %v2231_v52  ;;  %v34814_v52 = vld [vmem:[%s35829_s11 + $0x3918] sm:$0xff]  }
 0x78f   : > { %32001 = vmatpush3.bf16.msra.mxu0 %v34740_v62  ;;  %v34782_v62 = vld [vmem:[%s35829_s11 + $0x38d8] sm:$0xff]  }
 0x790   : > { %32002 = vmatprep.subr.bf16.mxu0 %v34743_v1  ;;  %32023 = vmatpush3.bf16.msra.mxu1 %v34742_v0  ;;  %v34784_v0 = vld [vmem:[%s35829_s11 + $0x3860] sm:$0xff]  }
 0x791   : > { %32024 = vmatprep.subr.bf16.mxu1 %v34745_v3  ;;  %v34785_v1 = vld [vmem:[%s35829_s11 + $0x3820] sm:$0xff]  }
 0x792   : > { %v34787_v3 = vld [vmem:[%s35829_s11 + $0x38a0] sm:$0xff]  }
 0x793   : > { %32003 = vmatpush3.bf16.msra.mxu0 %v34744_v2  ;;  %v34786_v2 = vld [vmem:[%s35829_s11 + $0x38e0] sm:$0xff]  }
 0x794   : > { %32004 = vmatprep.subr.bf16.mxu0 %v34747_v5  ;;  %32025 = vmatpush3.bf16.msra.mxu1 %v34746_v4  ;;  %v34788_v4 = vld [vmem:[%s35829_s11 + $0x3868] sm:$0xff]  }
 0x795   : > { %32026 = vmatprep.subr.bf16.mxu1 %v34749_v7 }
 0x797   : > { %32005 = vmatpush3.bf16.msra.mxu0 %v34748_v6  ;;  %v34789_v6 = vld [vmem:[%s35829_s11 + $0x3828] sm:$0xff]  }
 0x798   : > { %32006 = vmatprep.subr.bf16.mxu0 %v34751_v9  ;;  %32027 = vmatpush3.bf16.msra.mxu1 %v34750_v8  ;;  %v34790_v8 = vld [vmem:[%s35829_s11 + $0x38e8] sm:$0xff]  }
 0x799   : > { %32028 = vmatprep.subr.bf16.mxu1 %v34753_v11 }
 0x79b   : > { %32007 = vmatpush3.bf16.msra.mxu0 %v34752_v10 }
 0x79c   : > { %32008 = vmatprep.subr.bf16.mxu0 %v34755_v13  ;;  %32029 = vmatpush3.bf16.msra.mxu1 %v34754_v12  ;;  %v34791_v12 = vld [vmem:[%s35829_s11 + $0x38a8] sm:$0xff]   ;;  %v34792_v13 = vld [vmem:[%s35829_s11 + $0x3870] sm:$0xff]  }
 0x79d   : > { %v31706_v14 = vpop.f32.mrb[192].mxu0  ;;  %32030 = vmatprep.subr.bf16.mxu1 %v34757_v17 }
 0x79e   : > { %v31707_v16 = vpop.f32.mrb[193].mxu0  ;;  %v31728_v20 = vpop.f32.mrb[192].mxu1 }
 0x79f   : > { %v31708_v18 = vadd.f32 %v31707_v16, %v31706_v14  ;;  %v31709_v19 = vpop.f32.mrb[194].mxu0  ;;  %v31729_v24 = vpop.f32.mrb[193].mxu1  ;;  %32009 = vmatpush3.bf16.msra.mxu0 %v34756_v15 }
 0x7a0   : > { %v31710_v23 = vpop.f32.mrb[195].mxu0  ;;  %v31730_v26 = vadd.f32 %v31729_v24, %v31728_v20  ;;  %v31731_v28 = vpop.f32.mrb[194].mxu1  ;;  %32010 = vmatprep.subr.bf16.mxu0 %v34759_v22  ;;  %32031 = vmatpush3.bf16.msra.mxu1 %v34758_v21  ;;  %v34794_v20 = vld [vmem:[%s35829_s11 + $0x38f0] sm:$0xff]   ;;  %v34796_v24 = vld [vmem:[%s35829_s11 + $0x3878] sm:$0xff]  }
 0x7a1   : > { %v24993_v25 = vadd.f32 %v31708_v18, %v37904_v38  ;;  %v31732_v30 = vpop.f32.mrb[195].mxu1  ;;  %32032 = vmatprep.subr.bf16.mxu1 %v34761_v29  ;;  %v34766_v38 = vld [vmem:[%s35829_s11 + $0x37b8] sm:$0xff]   ;;  %v34793_v18 = vld [vmem:[%s35829_s11 + $0x3830] sm:$0xff]  }
 0x7a2   : > { %v34795_v23 = vld [vmem:[%s35829_s11 + $0x38b0] sm:$0xff]   ;;  %v34799_v29 = vld [vmem:[%s35829_s11 + $0x38b8] sm:$0xff]  }
 0x7a3   : > { %v37943_v31 = vadd.f32 %v31730_v26, %v24993_v25  ;;  %32011 = vmatpush3.bf16.msra.mxu0 %v34760_v27  ;;  %v34797_v25 = vld [vmem:[%s35829_s11 + $0x3838] sm:$0xff]  }
 0x7a4   : > { %32012 = vmatprep.subr.bf16.mxu0 %v34763_v33  ;;  %32033 = vmatpush3.bf16.msra.mxu1 %v34762_v32  ;;  %v34798_v26 = vld [vmem:[%s35829_s11 + $0x38f8] sm:$0xff]  }
 0x7a5   : > { %32034 = vmatprep.subr.bf16.mxu1 %v34765_v35  ;;  %v373_v27 = vld [vmem:[%s35822_s13 + $0x1c0] sm:$0xff] }
 0x7a6   : > { %v1424_v28 = vrot.slane %v373_v27, %v35880_v42  ;;  %v1417_v30 = vcombine.high %v373_v27, %v373_v27  ;;  %v34836_v27 = vld [vmem:[%s35829_s11 + $0x3ac0] sm:$0xff]  }
 0x7a7   : > { %32013 = vmatpush3.bf16.msra.mxu0 %v34764_v34  ;;  %v34802_v34 = vld [vmem:[%s35829_s11 + $0x3900] sm:$0xff]  }
 0x7a8   : > { %32042 = vmatprep.subr.bf16.mxu0 %v34767_v40  ;;  %32035 = vmatpush3.bf16.msra.mxu1 %v34766_v38  ;;  %v1432_v32 = vcombine.high %v1424_v28, %v1424_v28  ;;  %v1431_v33 = vrot.slane %v1417_v30, %v35880_v42  ;;  %v2232_v35 = vpack.c.bf16 %v1424_v28, %v1424_v28  ;;  %v34837_v30 = vld [vmem:[%s35829_s11 + $0x3a80] sm:$0xff]  }
 0x7a9   : > { %32064 = vmatprep.subr.bf16.mxu1 %v34770_v46  ;;  %v34808_v46 = vld [vmem:[%s35829_s11 + $0x3988] sm:$0xff]  }
 0x7aa   : > { %25551 = vmatmul.mubr.bf16.vlgmr.msra.gmra.mrb[220].mxu0 %v2228_v45  ;;  %v2233_v37 = vpack.c.bf16 %v1432_v32, %v1432_v32  ;;  %v1433_v38 = vcombine.high %v1431_v33, %v1431_v33  ;;  %v2234_v40 = vpack.c.bf16 %v1431_v33, %v1431_v33  ;;  %v34807_v45 = vld [vmem:[%s35829_s11 + $0x39c8] sm:$0xff]  }
 0x7ab   : > { %32043 = vmatpush3.bf16.msra.mxu0 %v34769_v44  ;;  %25591 = vmatmul.mubr.bf16.vlgmr.msra.gmra.mrb[220].mxu1 %v2230_v50  ;;  %v34806_v44 = vld [vmem:[%s35829_s11 + $0x3908] sm:$0xff]   ;;  %v34812_v50 = vld [vmem:[%s35829_s11 + $0x3990] sm:$0xff]  }
 0x7ac   : > { %32044 = vmatprep.subr.bf16.mxu0 %v34772_v51  ;;  %32065 = vmatpush3.bf16.msra.mxu1 %v34771_v49  ;;  %v2235_v43 = vpack.c.bf16 %v1433_v38, %v1433_v38  ;;  %v34811_v49 = vld [vmem:[%s35829_s11 + $0x39d0] sm:$0xff]   ;;  %v34813_v51 = vld [vmem:[%s35829_s11 + $0x3958] sm:$0xff]   ;;  %v34838_v32 = vld [vmem:[%s35829_s11 + $0x3a48] sm:$0xff]  }
 0x7ad   : > { %32066 = vmatprep.subr.bf16.mxu1 %v34774_v54  ;;  %25630 = vmatprep.mubr.bf16.mxu0 %v2233_v37  ;;  %v34816_v54 = vld [vmem:[%s35829_s11 + $0x3998] sm:$0xff]   ;;  %v34842_v37 = vld [vmem:[%s35829_s11 + $0x3a50] sm:$0xff]  }
 0x7ae   : > { %25670 = vmatprep.mubr.bf16.mxu1 %v2235_v43  ;;  %v34843_v38 = vld [vmem:[%s35829_s11 + $0x3a10] sm:$0xff]   ;;  %v34847_v43 = vld [vmem:[%s35829_s11 + $0x3a18] sm:$0xff]  }
 0x7af   : > { %32045 = vmatpush3.bf16.msra.mxu0 %v34773_v53  ;;  %v34815_v53 = vld [vmem:[%s35829_s11 + $0x39d8] sm:$0xff]  }
 0x7b0   : > { %32046 = vmatprep.subr.bf16.mxu0 %v34776_v56  ;;  %32067 = vmatpush3.bf16.msra.mxu1 %v34775_v55  ;;  %v34817_v55 = vld [vmem:[%s35829_s11 + $0x3960] sm:$0xff]  }
 0x7b1   : > { %32068 = vmatprep.subr.bf16.mxu1 %v34778_v58  ;;  %v34818_v56 = vld [vmem:[%s35829_s11 + $0x3920] sm:$0xff]  }
 0x7b2   : > { %v34820_v58 = vld [vmem:[%s35829_s11 + $0x39a0] sm:$0xff]  }
 0x7b3   : > { %32047 = vmatpush3.bf16.msra.mxu0 %v34777_v57  ;;  %v34819_v57 = vld [vmem:[%s35829_s11 + $0x39e0] sm:$0xff]  }
 0x7b4   : > { %32048 = vmatprep.subr.bf16.mxu0 %v34780_v60  ;;  %32069 = vmatpush3.bf16.msra.mxu1 %v34779_v59  ;;  %v34821_v59 = vld [vmem:[%s35829_s11 + $0x3968] sm:$0xff]  }
 0x7b5   : > { %32070 = vmatprep.subr.bf16.mxu1 %v34782_v62 }
 0x7b7   : > { %32049 = vmatpush3.bf16.msra.mxu0 %v34781_v61  ;;  %v34822_v61 = vld [vmem:[%s35829_s11 + $0x3928] sm:$0xff]  }
 0x7b8   : > { %32050 = vmatprep.subr.bf16.mxu0 %v34784_v0  ;;  %32071 = vmatpush3.bf16.msra.mxu1 %v34783_v63  ;;  %v34823_v63 = vld [vmem:[%s35829_s11 + $0x39e8] sm:$0xff]  }
 0x7b9   : > { %32072 = vmatprep.subr.bf16.mxu1 %v34786_v2 }
 0x7bb   : > { %32051 = vmatpush3.bf16.msra.mxu0 %v34785_v1 }
 0x7bc   : > { %32052 = vmatprep.subr.bf16.mxu0 %v34788_v4  ;;  %32073 = vmatpush3.bf16.msra.mxu1 %v34787_v3 }
 0x7bd   : > { %v31750_v5 = vpop.f32.mrb[196].mxu0  ;;  %32074 = vmatprep.subr.bf16.mxu1 %v34790_v8 }
 0x7be   : > { %v31751_v7 = vpop.f32.mrb[197].mxu0  ;;  %v31772_v11 = vpop.f32.mrb[196].mxu1 }
 0x7bf   : > { %v31752_v9 = vadd.f32 %v31751_v7, %v31750_v5  ;;  %v31753_v10 = vpop.f32.mrb[198].mxu0  ;;  %v31773_v15 = vpop.f32.mrb[197].mxu1  ;;  %32053 = vmatpush3.bf16.msra.mxu0 %v34789_v6  ;;  %v34824_v5 = vld [vmem:[%s35829_s11 + $0x39a8] sm:$0xff]   ;;  %v34825_v6 = vld [vmem:[%s35829_s11 + $0x3970] sm:$0xff]  }
 0x7c0   : > { %v31754_v14 = vpop.f32.mrb[199].mxu0  ;;  %v31774_v17 = vadd.f32 %v31773_v15, %v31772_v11  ;;  %v31775_v19 = vpop.f32.mrb[198].mxu1  ;;  %32054 = vmatprep.subr.bf16.mxu0 %v34792_v13  ;;  %32075 = vmatpush3.bf16.msra.mxu1 %v34791_v12  ;;  %v34827_v12 = vld [vmem:[%s35829_s11 + $0x39f0] sm:$0xff]   ;;  %v34829_v15 = vld [vmem:[%s35829_s11 + $0x3978] sm:$0xff]  }
 0x7c1   : > { %v25073_v16 = vadd.f32 %v31752_v9, %v37943_v31  ;;  %v31776_v21 = vpop.f32.mrb[199].mxu1  ;;  %32076 = vmatprep.subr.bf16.mxu1 %v34794_v20  ;;  %v34800_v31 = vld [vmem:[%s35829_s11 + $0x3940] sm:$0xff]   ;;  %v34826_v9 = vld [vmem:[%s35829_s11 + $0x3930] sm:$0xff]   ;;  %v34832_v20 = vld [vmem:[%s35829_s11 + $0x39b8] sm:$0xff]  }
 0x7c2   : > { %v34828_v14 = vld [vmem:[%s35829_s11 + $0x39b0] sm:$0xff]  }
 0x7c3   : > { %v37981_v22 = vadd.f32 %v31774_v17, %v25073_v16  ;;  %32055 = vmatpush3.bf16.msra.mxu0 %v34793_v18  ;;  %v34830_v16 = vld [vmem:[%s35829_s11 + $0x3938] sm:$0xff]  }
 0x7c4   : > { %32056 = vmatprep.subr.bf16.mxu0 %v34796_v24  ;;  %32077 = vmatpush3.bf16.msra.mxu1 %v34795_v23  ;;  %v34831_v17 = vld [vmem:[%s35829_s11 + $0x39f8] sm:$0xff]  }
 0x7c5   : > { %32078 = vmatprep.subr.bf16.mxu1 %v34798_v26  ;;  %v374_v18 = vld [vmem:[%s35822_s13 + $0x1c8] sm:$0xff] }
 0x7c6   : > { %v1441_v19 = vrot.slane %v374_v18, %v35880_v42  ;;  %v1434_v21 = vcombine.high %v374_v18, %v374_v18  ;;  %v34869_v18 = vld [vmem:[%s35829_s11 + $0x3bc0] sm:$0xff]  }
 0x7c7   : > { %32057 = vmatpush3.bf16.msra.mxu0 %v34797_v25  ;;  %v34835_v25 = vld [vmem:[%s35829_s11 + $0x3a00] sm:$0xff]  }
 0x7c8   : > { %32086 = vmatprep.subr.bf16.mxu0 %v34800_v31  ;;  %32079 = vmatpush3.bf16.msra.mxu1 %v34799_v29  ;;  %v1449_v23 = vcombine.high %v1441_v19, %v1441_v19  ;;  %v1448_v24 = vrot.slane %v1434_v21, %v35880_v42  ;;  %v2236_v26 = vpack.c.bf16 %v1441_v19, %v1441_v19  ;;  %v34870_v21 = vld [vmem:[%s35829_s11 + $0x3b80] sm:$0xff]  }
 0x7c9   : > { %32108 = vmatprep.subr.bf16.mxu1 %v34803_v36  ;;  %v34841_v36 = vld [vmem:[%s35829_s11 + $0x3a88] sm:$0xff]  }
 0x7ca   : > { %25631 = vmatmul.mubr.bf16.vlgmr.msra.gmra.mrb[224].mxu0 %v2232_v35  ;;  %v2237_v28 = vpack.c.bf16 %v1449_v23, %v1449_v23  ;;  %v1450_v29 = vcombine.high %v1448_v24, %v1448_v24  ;;  %v2238_v31 = vpack.c.bf16 %v1448_v24, %v1448_v24  ;;  %v34840_v35 = vld [vmem:[%s35829_s11 + $0x3ac8] sm:$0xff]  }
 0x7cb   : > { %32087 = vmatpush3.bf16.msra.mxu0 %v34802_v34  ;;  %25671 = vmatmul.mubr.bf16.vlgmr.msra.gmra.mrb[224].mxu1 %v2234_v40  ;;  %v34839_v34 = vld [vmem:[%s35829_s11 + $0x3a08] sm:$0xff]   ;;  %v34845_v40 = vld [vmem:[%s35829_s11 + $0x3a90] sm:$0xff]  }
 0x7cc   : > { %32088 = vmatprep.subr.bf16.mxu0 %v34805_v41  ;;  %32109 = vmatpush3.bf16.msra.mxu1 %v34804_v39  ;;  %v2239_v33 = vpack.c.bf16 %v1450_v29, %v1450_v29  ;;  %v34844_v39 = vld [vmem:[%s35829_s11 + $0x3ad0] sm:$0xff]   ;;  %v34846_v41 = vld [vmem:[%s35829_s11 + $0x3a58] sm:$0xff]   ;;  %v34871_v23 = vld [vmem:[%s35829_s11 + $0x3b48] sm:$0xff]  }
 0x7cd   : > { %32110 = vmatprep.subr.bf16.mxu1 %v34807_v45  ;;  %25710 = vmatprep.mubr.bf16.mxu0 %v2237_v28  ;;  %v34849_v45 = vld [vmem:[%s35829_s11 + $0x3a98] sm:$0xff]   ;;  %v34875_v28 = vld [vmem:[%s35829_s11 + $0x3b50] sm:$0xff]  }
 0x7ce   : > { %25750 = vmatprep.mubr.bf16.mxu1 %v2239_v33  ;;  %v34876_v29 = vld [vmem:[%s35829_s11 + $0x3b10] sm:$0xff]   ;;  %v34880_v33 = vld [vmem:[%s35829_s11 + $0x3b18] sm:$0xff]  }
 0x7cf   : > { %32089 = vmatpush3.bf16.msra.mxu0 %v34806_v44  ;;  %v34848_v44 = vld [vmem:[%s35829_s11 + $0x3ad8] sm:$0xff]  }
 0x7d0   : > { %32090 = vmatprep.subr.bf16.mxu0 %v34809_v47  ;;  %32111 = vmatpush3.bf16.msra.mxu1 %v34808_v46  ;;  %v34850_v46 = vld [vmem:[%s35829_s11 + $0x3a60] sm:$0xff]  }
 0x7d1   : > { %32112 = vmatprep.subr.bf16.mxu1 %v34811_v49  ;;  %v34851_v47 = vld [vmem:[%s35829_s11 + $0x3a20] sm:$0xff]  }
 0x7d2   : > { %v34853_v49 = vld [vmem:[%s35829_s11 + $0x3aa0] sm:$0xff]  }
 0x7d3   : > { %32091 = vmatpush3.bf16.msra.mxu0 %v34810_v48  ;;  %v34852_v48 = vld [vmem:[%s35829_s11 + $0x3ae0] sm:$0xff]  }
 0x7d4   : > { %32092 = vmatprep.subr.bf16.mxu0 %v34813_v51  ;;  %32113 = vmatpush3.bf16.msra.mxu1 %v34812_v50  ;;  %v34854_v50 = vld [vmem:[%s35829_s11 + $0x3a68] sm:$0xff]  }
 0x7d5   : > { %32114 = vmatprep.subr.bf16.mxu1 %v34815_v53 }
 0x7d7   : > { %32093 = vmatpush3.bf16.msra.mxu0 %v34814_v52  ;;  %v34855_v52 = vld [vmem:[%s35829_s11 + $0x3a28] sm:$0xff]  }
 0x7d8   : > { %32094 = vmatprep.subr.bf16.mxu0 %v34817_v55  ;;  %32115 = vmatpush3.bf16.msra.mxu1 %v34816_v54  ;;  %v34856_v54 = vld [vmem:[%s35829_s11 + $0x3ae8] sm:$0xff]  }
 0x7d9   : > { %32116 = vmatprep.subr.bf16.mxu1 %v34819_v57 }
 0x7db   : > { %32095 = vmatpush3.bf16.msra.mxu0 %v34818_v56 }
 0x7dc   : > { %32096 = vmatprep.subr.bf16.mxu0 %v34821_v59  ;;  %32117 = vmatpush3.bf16.msra.mxu1 %v34820_v58  ;;  %v34857_v58 = vld [vmem:[%s35829_s11 + $0x3aa8] sm:$0xff]   ;;  %v34858_v59 = vld [vmem:[%s35829_s11 + $0x3a70] sm:$0xff]  }
 0x7dd   : > { %v31794_v60 = vpop.f32.mrb[200].mxu0  ;;  %32118 = vmatprep.subr.bf16.mxu1 %v34823_v63 }
 0x7de   : > { %v31795_v62 = vpop.f32.mrb[201].mxu0  ;;  %v31816_v2 = vpop.f32.mrb[200].mxu1 }
 0x7df   : > { %v31796_v0 = vadd.f32 %v31795_v62, %v31794_v60  ;;  %v31797_v1 = vpop.f32.mrb[202].mxu0  ;;  %v31817_v4 = vpop.f32.mrb[201].mxu1  ;;  %32097 = vmatpush3.bf16.msra.mxu0 %v34822_v61 }
 0x7e0   : > { %v31798_v3 = vpop.f32.mrb[203].mxu0  ;;  %v31818_v8 = vadd.f32 %v31817_v4, %v31816_v2  ;;  %v31819_v10 = vpop.f32.mrb[202].mxu1  ;;  %32098 = vmatprep.subr.bf16.mxu0 %v34825_v6  ;;  %32119 = vmatpush3.bf16.msra.mxu1 %v34824_v5  ;;  %v34860_v2 = vld [vmem:[%s35829_s11 + $0x3af0] sm:$0xff]   ;;  %v34862_v6 = vld [vmem:[%s35829_s11 + $0x3a78] sm:$0xff]  }
 0x7e1   : > { %v25153_v7 = vadd.f32 %v31796_v0, %v37981_v22  ;;  %v31820_v13 = vpop.f32.mrb[203].mxu1  ;;  %32120 = vmatprep.subr.bf16.mxu1 %v34827_v12  ;;  %v34833_v22 = vld [vmem:[%s35829_s11 + $0x3a40] sm:$0xff]   ;;  %v34859_v0 = vld [vmem:[%s35829_s11 + $0x3a30] sm:$0xff]  }
 0x7e2   : > { %v34861_v5 = vld [vmem:[%s35829_s11 + $0x3ab0] sm:$0xff]   ;;  %v34866_v13 = vld [vmem:[%s35829_s11 + $0x3b40] sm:$0xff]  }
 0x7e3   : > { %v38018_v11 = vadd.f32 %v31818_v8, %v25153_v7  ;;  %32099 = vmatpush3.bf16.msra.mxu0 %v34826_v9  ;;  %v34863_v7 = vld [vmem:[%s35829_s11 + $0x3a38] sm:$0xff]  }
 0x7e4   : > { %32100 = vmatprep.subr.bf16.mxu0 %v34829_v15  ;;  %32121 = vmatpush3.bf16.msra.mxu1 %v34828_v14  ;;  %v34864_v8 = vld [vmem:[%s35829_s11 + $0x3af8] sm:$0xff]  }
 0x7e5   : > { %32122 = vmatprep.subr.bf16.mxu1 %v34831_v17  ;;  %v375_v9 = vld [vmem:[%s35822_s13 + $0x1d0] sm:$0xff] }
 0x7e6   : > { %v1458_v10 = vrot.slane %v375_v9, %v35880_v42  ;;  %v1451_v12 = vcombine.high %v375_v9, %v375_v9  ;;  %v34902_v9 = vld [vmem:[%s35829_s11 + $0x3cc0] sm:$0xff]  }
 0x7e7   : > { %32101 = vmatpush3.bf16.msra.mxu0 %v34830_v16  ;;  %v34868_v16 = vld [vmem:[%s35829_s11 + $0x3b00] sm:$0xff]  }
 0x7e8   : > { %32130 = vmatprep.subr.bf16.mxu0 %v34833_v22  ;;  %32123 = vmatpush3.bf16.msra.mxu1 %v34832_v20  ;;  %v1466_v14 = vcombine.high %v1458_v10, %v1458_v10  ;;  %v1465_v15 = vrot.slane %v1451_v12, %v35880_v42  ;;  %v2240_v17 = vpack.c.bf16 %v1458_v10, %v1458_v10  ;;  %v34903_v12 = vld [vmem:[%s35829_s11 + $0x3c80] sm:$0xff]  }
 0x7e9   : > { %32152 = vmatprep.subr.bf16.mxu1 %v34836_v27  ;;  %v34874_v27 = vld [vmem:[%s35829_s11 + $0x3b88] sm:$0xff]  }
 0x7ea   : > { %25711 = vmatmul.mubr.bf16.vlgmr.msra.gmra.mrb[228].mxu0 %v2236_v26  ;;  %v2241_v19 = vpack.c.bf16 %v1466_v14, %v1466_v14  ;;  %v1467_v20 = vcombine.high %v1465_v15, %v1465_v15  ;;  %v2242_v22 = vpack.c.bf16 %v1465_v15, %v1465_v15  ;;  %v34873_v26 = vld [vmem:[%s35829_s11 + $0x3bc8] sm:$0xff]  }
 0x7eb   : > { %32131 = vmatpush3.bf16.msra.mxu0 %v34835_v25  ;;  %25751 = vmatmul.mubr.bf16.vlgmr.msra.gmra.mrb[228].mxu1 %v2238_v31  ;;  %v34872_v25 = vld [vmem:[%s35829_s11 + $0x3b08] sm:$0xff]   ;;  %v34878_v31 = vld [vmem:[%s35829_s11 + $0x3b90] sm:$0xff]  }
 0x7ec   : > { %32132 = vmatprep.subr.bf16.mxu0 %v34838_v32  ;;  %32153 = vmatpush3.bf16.msra.mxu1 %v34837_v30  ;;  %v2243_v24 = vpack.c.bf16 %v1467_v20, %v1467_v20  ;;  %v34877_v30 = vld [vmem:[%s35829_s11 + $0x3bd0] sm:$0xff]   ;;  %v34879_v32 = vld [vmem:[%s35829_s11 + $0x3b58] sm:$0xff]   ;;  %v34904_v14 = vld [vmem:[%s35829_s11 + $0x3c48] sm:$0xff]  }
 0x7ed   : > { %32154 = vmatprep.subr.bf16.mxu1 %v34840_v35  ;;  %25790 = vmatprep.mubr.bf16.mxu0 %v2241_v19  ;;  %v34882_v35 = vld [vmem:[%s35829_s11 + $0x3b98] sm:$0xff]   ;;  %v34908_v19 = vld [vmem:[%s35829_s11 + $0x3c50] sm:$0xff]  }
 0x7ee   : > { %25830 = vmatprep.mubr.bf16.mxu1 %v2243_v24  ;;  %v34909_v20 = vld [vmem:[%s35829_s11 + $0x3c10] sm:$0xff]   ;;  %v34913_v24 = vld [vmem:[%s35829_s11 + $0x3c18] sm:$0xff]  }
 0x7ef   : > { %32133 = vmatpush3.bf16.msra.mxu0 %v34839_v34  ;;  %v34881_v34 = vld [vmem:[%s35829_s11 + $0x3bd8] sm:$0xff]  }
 0x7f0   : > { %32134 = vmatprep.subr.bf16.mxu0 %v34842_v37  ;;  %32155 = vmatpush3.bf16.msra.mxu1 %v34841_v36  ;;  %v34883_v36 = vld [vmem:[%s35829_s11 + $0x3b60] sm:$0xff]  }
 0x7f1   : > { %32156 = vmatprep.subr.bf16.mxu1 %v34844_v39  ;;  %v34884_v37 = vld [vmem:[%s35829_s11 + $0x3b20] sm:$0xff]  }
 0x7f2   : > { %v34886_v39 = vld [vmem:[%s35829_s11 + $0x3ba0] sm:$0xff]  }
 0x7f3   : > { %32135 = vmatpush3.bf16.msra.mxu0 %v34843_v38  ;;  %v34885_v38 = vld [vmem:[%s35829_s11 + $0x3be0] sm:$0xff]  }
 0x7f4   : > { %32136 = vmatprep.subr.bf16.mxu0 %v34846_v41  ;;  %32157 = vmatpush3.bf16.msra.mxu1 %v34845_v40  ;;  %v34887_v40 = vld [vmem:[%s35829_s11 + $0x3b68] sm:$0xff]  }
 0x7f5   : > { %32158 = vmatprep.subr.bf16.mxu1 %v34848_v44 }
 0x7f7   : > { %32137 = vmatpush3.bf16.msra.mxu0 %v34847_v43  ;;  %v34888_v43 = vld [vmem:[%s35829_s11 + $0x3b28] sm:$0xff]  }
 0x7f8   : > { %32138 = vmatprep.subr.bf16.mxu0 %v34850_v46  ;;  %32159 = vmatpush3.bf16.msra.mxu1 %v34849_v45  ;;  %v34889_v45 = vld [vmem:[%s35829_s11 + $0x3be8] sm:$0xff]  }
 0x7f9   : > { %32160 = vmatprep.subr.bf16.mxu1 %v34852_v48 }
 0x7fb   : > { %32139 = vmatpush3.bf16.msra.mxu0 %v34851_v47 }
 0x7fc   : > { %32140 = vmatprep.subr.bf16.mxu0 %v34854_v50  ;;  %32161 = vmatpush3.bf16.msra.mxu1 %v34853_v49  ;;  %v34890_v49 = vld [vmem:[%s35829_s11 + $0x3ba8] sm:$0xff]   ;;  %v34891_v50 = vld [vmem:[%s35829_s11 + $0x3b70] sm:$0xff]  }
 0x7fd   : > { %v31838_v51 = vpop.f32.mrb[204].mxu0  ;;  %32162 = vmatprep.subr.bf16.mxu1 %v34856_v54 }
 0x7fe   : > { %v31839_v53 = vpop.f32.mrb[205].mxu0  ;;  %v31860_v57 = vpop.f32.mrb[204].mxu1 }
 0x7ff   : > { %v31840_v55 = vadd.f32 %v31839_v53, %v31838_v51  ;;  %v31841_v56 = vpop.f32.mrb[206].mxu0  ;;  %v31861_v61 = vpop.f32.mrb[205].mxu1  ;;  %32141 = vmatpush3.bf16.msra.mxu0 %v34855_v52 }
 0x800   : > { %v31842_v60 = vpop.f32.mrb[207].mxu0  ;;  %v31862_v63 = vadd.f32 %v31861_v61, %v31860_v57  ;;  %v31863_v1 = vpop.f32.mrb[206].mxu1  ;;  %32142 = vmatprep.subr.bf16.mxu0 %v34858_v59  ;;  %32163 = vmatpush3.bf16.msra.mxu1 %v34857_v58  ;;  %v34893_v57 = vld [vmem:[%s35829_s11 + $0x3bf0] sm:$0xff]   ;;  %v34895_v61 = vld [vmem:[%s35829_s11 + $0x3b78] sm:$0xff]  }
 0x801   : > { %v25233_v62 = vadd.f32 %v31840_v55, %v38018_v11  ;;  %v31864_v3 = vpop.f32.mrb[207].mxu1  ;;  %32164 = vmatprep.subr.bf16.mxu1 %v34860_v2  ;;  %v34865_v11 = vld [vmem:[%s35829_s11 + $0x3ab8] sm:$0xff]   ;;  %v34892_v55 = vld [vmem:[%s35829_s11 + $0x3b30] sm:$0xff]  }
 0x802   : > { %v34894_v60 = vld [vmem:[%s35829_s11 + $0x3bb0] sm:$0xff]   ;;  %v34898_v2 = vld [vmem:[%s35829_s11 + $0x3bb8] sm:$0xff]  }
 0x803   : > { %v38057_v4 = vadd.f32 %v31862_v63, %v25233_v62  ;;  %32143 = vmatpush3.bf16.msra.mxu0 %v34859_v0  ;;  %v34896_v62 = vld [vmem:[%s35829_s11 + $0x3b38] sm:$0xff]   ;;  %v376_v0 = vld [vmem:[%s35822_s13 + $0x1d8] sm:$0xff] }
 0x804   : > { %32144 = vmatprep.subr.bf16.mxu0 %v34862_v6  ;;  %32165 = vmatpush3.bf16.msra.mxu1 %v34861_v5  ;;  %v34897_v63 = vld [vmem:[%s35829_s11 + $0x3bf8] sm:$0xff]   ;;  %v1475_v1 = vrot.slane %v376_v0, %v35880_v42  ;;  %v1468_v3 = vcombine.high %v376_v0, %v376_v0  ;;  %v34935_v0 = vld [vmem:[%s35829_s11 + $0x3dc0] sm:$0xff]  }
 0x805   : > { %32166 = vmatprep.subr.bf16.mxu1 %v34864_v8 }
 0x806   : > { %v1483_v5 = vcombine.high %v1475_v1, %v1475_v1  ;;  %v1482_v6 = vrot.slane %v1468_v3, %v35880_v42  ;;  %v2244_v8 = vpack.c.bf16 %v1475_v1, %v1475_v1  ;;  %v34936_v3 = vld [vmem:[%s35829_s11 + $0x3d80] sm:$0xff]  }
 0x807   : > { %32145 = vmatpush3.bf16.msra.mxu0 %v34863_v7  ;;  %v34901_v7 = vld [vmem:[%s35829_s11 + $0x3c00] sm:$0xff]  }
 0x808   : > { %32174 = vmatprep.subr.bf16.mxu0 %v34866_v13  ;;  %32167 = vmatpush3.bf16.msra.mxu1 %v34865_v11  ;;  %v2245_v10 = vpack.c.bf16 %v1483_v5, %v1483_v5  ;;  %v1484_v11 = vcombine.high %v1482_v6, %v1482_v6  ;;  %v2246_v13 = vpack.c.bf16 %v1482_v6, %v1482_v6  ;;  %v34937_v5 = vld [vmem:[%s35829_s11 + $0x3d48] sm:$0xff]  }
 0x809   : > { %32196 = vmatprep.subr.bf16.mxu1 %v34869_v18  ;;  %v34907_v18 = vld [vmem:[%s35829_s11 + $0x3c88] sm:$0xff]  }
 0x80a   : > { %25791 = vmatmul.mubr.bf16.vlgmr.msra.gmra.mrb[232].mxu0 %v2240_v17  ;;  %v2247_v15 = vpack.c.bf16 %v1484_v11, %v1484_v11  ;;  %v34906_v17 = vld [vmem:[%s35829_s11 + $0x3cc8] sm:$0xff]   ;;  %v34942_v11 = vld [vmem:[%s35829_s11 + $0x3d10] sm:$0xff]  }
 0x80b   : > { %32175 = vmatpush3.bf16.msra.mxu0 %v34868_v16  ;;  %25831 = vmatmul.mubr.bf16.vlgmr.msra.gmra.mrb[232].mxu1 %v2242_v22  ;;  %v34905_v16 = vld [vmem:[%s35829_s11 + $0x3c08] sm:$0xff]   ;;  %v34911_v22 = vld [vmem:[%s35829_s11 + $0x3c90] sm:$0xff]  }
 0x80c   : > { %32176 = vmatprep.subr.bf16.mxu0 %v34871_v23  ;;  %32197 = vmatpush3.bf16.msra.mxu1 %v34870_v21  ;;  %v34910_v21 = vld [vmem:[%s35829_s11 + $0x3cd0] sm:$0xff]   ;;  %v34912_v23 = vld [vmem:[%s35829_s11 + $0x3c58] sm:$0xff]  }
 0x80d   : > { %32198 = vmatprep.subr.bf16.mxu1 %v34873_v26  ;;  %25870 = vmatprep.mubr.bf16.mxu0 %v2245_v10  ;;  %v34915_v26 = vld [vmem:[%s35829_s11 + $0x3c98] sm:$0xff]   ;;  %v34941_v10 = vld [vmem:[%s35829_s11 + $0x3d50] sm:$0xff]  }
 0x80e   : > { %25910 = vmatprep.mubr.bf16.mxu1 %v2247_v15  ;;  %v34946_v15 = vld [vmem:[%s35829_s11 + $0x3d18] sm:$0xff]  }
 0x80f   : > { %32177 = vmatpush3.bf16.msra.mxu0 %v34872_v25  ;;  %v34914_v25 = vld [vmem:[%s35829_s11 + $0x3cd8] sm:$0xff]  }
 0x810   : > { %32178 = vmatprep.subr.bf16.mxu0 %v34875_v28  ;;  %32199 = vmatpush3.bf16.msra.mxu1 %v34874_v27  ;;  %v34916_v27 = vld [vmem:[%s35829_s11 + $0x3c60] sm:$0xff]  }
 0x811   : > { %32200 = vmatprep.subr.bf16.mxu1 %v34877_v30  ;;  %v34917_v28 = vld [vmem:[%s35829_s11 + $0x3c20] sm:$0xff]  }
 0x812   : > { %v34919_v30 = vld [vmem:[%s35829_s11 + $0x3ca0] sm:$0xff]  }
 0x813   : > { %32179 = vmatpush3.bf16.msra.mxu0 %v34876_v29  ;;  %v34918_v29 = vld [vmem:[%s35829_s11 + $0x3ce0] sm:$0xff]  }
 0x814   : > { %32180 = vmatprep.subr.bf16.mxu0 %v34879_v32  ;;  %32201 = vmatpush3.bf16.msra.mxu1 %v34878_v31  ;;  %v34920_v31 = vld [vmem:[%s35829_s11 + $0x3c68] sm:$0xff]  }
 0x815   : > { %32202 = vmatprep.subr.bf16.mxu1 %v34881_v34 }
 0x817   : > { %32181 = vmatpush3.bf16.msra.mxu0 %v34880_v33  ;;  %v34921_v33 = vld [vmem:[%s35829_s11 + $0x3c28] sm:$0xff]  }
 0x818   : > { %32182 = vmatprep.subr.bf16.mxu0 %v34883_v36  ;;  %32203 = vmatpush3.bf16.msra.mxu1 %v34882_v35  ;;  %v34922_v35 = vld [vmem:[%s35829_s11 + $0x3ce8] sm:$0xff]  }
 0x819   : > { %32204 = vmatprep.subr.bf16.mxu1 %v34885_v38 }
 0x81b   : > { %32183 = vmatpush3.bf16.msra.mxu0 %v34884_v37 }
 0x81c   : > { %32184 = vmatprep.subr.bf16.mxu0 %v34887_v40  ;;  %32205 = vmatpush3.bf16.msra.mxu1 %v34886_v39 }
 0x81d   : > { %v31882_v41 = vpop.f32.mrb[208].mxu0  ;;  %32206 = vmatprep.subr.bf16.mxu1 %v34889_v45 }
 0x81e   : > { %v31883_v44 = vpop.f32.mrb[209].mxu0  ;;  %v31904_v48 = vpop.f32.mrb[208].mxu1 }
 0x81f   : > { %v31884_v46 = vadd.f32 %v31883_v44, %v31882_v41  ;;  %v31885_v47 = vpop.f32.mrb[210].mxu0  ;;  %v31905_v52 = vpop.f32.mrb[209].mxu1  ;;  %32185 = vmatpush3.bf16.msra.mxu0 %v34888_v43  ;;  %v34923_v41 = vld [vmem:[%s35829_s11 + $0x3ca8] sm:$0xff]   ;;  %v34924_v43 = vld [vmem:[%s35829_s11 + $0x3c70] sm:$0xff]  }
 0x820   : > { %v31886_v51 = vpop.f32.mrb[211].mxu0  ;;  %v31906_v54 = vadd.f32 %v31905_v52, %v31904_v48  ;;  %v31907_v56 = vpop.f32.mrb[210].mxu1  ;;  %32186 = vmatprep.subr.bf16.mxu0 %v34891_v50  ;;  %32207 = vmatpush3.bf16.msra.mxu1 %v34890_v49  ;;  %v34926_v49 = vld [vmem:[%s35829_s11 + $0x3cf0] sm:$0xff]   ;;  %v34928_v52 = vld [vmem:[%s35829_s11 + $0x3c78] sm:$0xff]  }
 0x821   : > { %v25313_v53 = vadd.f32 %v31884_v46, %v38057_v4  ;;  %v31908_v58 = vpop.f32.mrb[211].mxu1  ;;  %32208 = vmatprep.subr.bf16.mxu1 %v34893_v57  ;;  %v34899_v4 = vld [vmem:[%s35829_s11 + $0x3c40] sm:$0xff]   ;;  %v34925_v46 = vld [vmem:[%s35829_s11 + $0x3c30] sm:$0xff]   ;;  %v34931_v57 = vld [vmem:[%s35829_s11 + $0x3cb8] sm:$0xff]  }
 0x822   : > { %v34927_v51 = vld [vmem:[%s35829_s11 + $0x3cb0] sm:$0xff]  }
 0x823   : > { %v38095_v59 = vadd.f32 %v31906_v54, %v25313_v53  ;;  %32187 = vmatpush3.bf16.msra.mxu0 %v34892_v55  ;;  %v34929_v53 = vld [vmem:[%s35829_s11 + $0x3c38] sm:$0xff]  }
 0x824   : > { %32188 = vmatprep.subr.bf16.mxu0 %v34895_v61  ;;  %32209 = vmatpush3.bf16.msra.mxu1 %v34894_v60  ;;  %v34930_v54 = vld [vmem:[%s35829_s11 + $0x3cf8] sm:$0xff]  }
 0x825   : > { %32210 = vmatprep.subr.bf16.mxu1 %v34897_v63  ;;  %v377_v55 = vld [vmem:[%s35822_s13 + $0x1e0] sm:$0xff] }
 0x826   : > { %v1492_v56 = vrot.slane %v377_v55, %v35880_v42  ;;  %v1485_v58 = vcombine.high %v377_v55, %v377_v55  ;;  %v34968_v55 = vld [vmem:[%s35829_s11 + $0x3ec0] sm:$0xff]  }
 0x827   : > { %32189 = vmatpush3.bf16.msra.mxu0 %v34896_v62  ;;  %v34934_v62 = vld [vmem:[%s35829_s11 + $0x3d00] sm:$0xff]  }
 0x828   : > { %32218 = vmatprep.subr.bf16.mxu0 %v34899_v4  ;;  %32211 = vmatpush3.bf16.msra.mxu1 %v34898_v2  ;;  %v1500_v60 = vcombine.high %v1492_v56, %v1492_v56  ;;  %v1499_v61 = vrot.slane %v1485_v58, %v35880_v42  ;;  %v2248_v63 = vpack.c.bf16 %v1492_v56, %v1492_v56  ;;  %v34969_v58 = vld [vmem:[%s35829_s11 + $0x3e80] sm:$0xff]  }
 0x829   : > { %32240 = vmatprep.subr.bf16.mxu1 %v34902_v9  ;;  %v34940_v9 = vld [vmem:[%s35829_s11 + $0x3d88] sm:$0xff]  }
 0x82a   : > { %25871 = vmatmul.mubr.bf16.vlgmr.msra.gmra.mrb[236].mxu0 %v2244_v8  ;;  %v2249_v1 = vpack.c.bf16 %v1500_v60, %v1500_v60  ;;  %v1501_v2 = vcombine.high %v1499_v61, %v1499_v61  ;;  %v2250_v4 = vpack.c.bf16 %v1499_v61, %v1499_v61  ;;  %v34939_v8 = vld [vmem:[%s35829_s11 + $0x3dc8] sm:$0xff]  }
 0x82b   : > { %32219 = vmatpush3.bf16.msra.mxu0 %v34901_v7  ;;  %25911 = vmatmul.mubr.bf16.vlgmr.msra.gmra.mrb[236].mxu1 %v2246_v13  ;;  %v34938_v7 = vld [vmem:[%s35829_s11 + $0x3d08] sm:$0xff]   ;;  %v34944_v13 = vld [vmem:[%s35829_s11 + $0x3d90] sm:$0xff]  }
 0x82c   : > { %32220 = vmatprep.subr.bf16.mxu0 %v34904_v14  ;;  %32241 = vmatpush3.bf16.msra.mxu1 %v34903_v12  ;;  %v2251_v6 = vpack.c.bf16 %v1501_v2, %v1501_v2  ;;  %v34943_v12 = vld [vmem:[%s35829_s11 + $0x3dd0] sm:$0xff]   ;;  %v34945_v14 = vld [vmem:[%s35829_s11 + $0x3d58] sm:$0xff]   ;;  %v34970_v60 = vld [vmem:[%s35829_s11 + $0x3e48] sm:$0xff]  }
 0x82d   : > { %32242 = vmatprep.subr.bf16.mxu1 %v34906_v17  ;;  %25950 = vmatprep.mubr.bf16.mxu0 %v2249_v1  ;;  %v34948_v17 = vld [vmem:[%s35829_s11 + $0x3d98] sm:$0xff]   ;;  %v34974_v1 = vld [vmem:[%s35829_s11 + $0x3e50] sm:$0xff]  }
 0x82e   : > { %25990 = vmatprep.mubr.bf16.mxu1 %v2251_v6  ;;  %v34975_v2 = vld [vmem:[%s35829_s11 + $0x3e10] sm:$0xff]   ;;  %v34979_v6 = vld [vmem:[%s35829_s11 + $0x3e18] sm:$0xff]  }
 0x82f   : > { %32221 = vmatpush3.bf16.msra.mxu0 %v34905_v16  ;;  %v34947_v16 = vld [vmem:[%s35829_s11 + $0x3dd8] sm:$0xff]  }
 0x830   : > { %32222 = vmatprep.subr.bf16.mxu0 %v34908_v19  ;;  %32243 = vmatpush3.bf16.msra.mxu1 %v34907_v18  ;;  %v34949_v18 = vld [vmem:[%s35829_s11 + $0x3d60] sm:$0xff]  }
 0x831   : > { %32244 = vmatprep.subr.bf16.mxu1 %v34910_v21  ;;  %v34950_v19 = vld [vmem:[%s35829_s11 + $0x3d20] sm:$0xff]  }
 0x832   : > { %v34952_v21 = vld [vmem:[%s35829_s11 + $0x3da0] sm:$0xff]  }
 0x833   : > { %32223 = vmatpush3.bf16.msra.mxu0 %v34909_v20  ;;  %v34951_v20 = vld [vmem:[%s35829_s11 + $0x3de0] sm:$0xff]  }
 0x834   : > { %32224 = vmatprep.subr.bf16.mxu0 %v34912_v23  ;;  %32245 = vmatpush3.bf16.msra.mxu1 %v34911_v22  ;;  %v34953_v22 = vld [vmem:[%s35829_s11 + $0x3d68] sm:$0xff]  }
 0x835   : > { %32246 = vmatprep.subr.bf16.mxu1 %v34914_v25 }
 0x837   : > { %32225 = vmatpush3.bf16.msra.mxu0 %v34913_v24  ;;  %v34954_v24 = vld [vmem:[%s35829_s11 + $0x3d28] sm:$0xff]  }
 0x838   : > { %32226 = vmatprep.subr.bf16.mxu0 %v34916_v27  ;;  %32247 = vmatpush3.bf16.msra.mxu1 %v34915_v26  ;;  %v34955_v26 = vld [vmem:[%s35829_s11 + $0x3de8] sm:$0xff]  }
 0x839   : > { %32248 = vmatprep.subr.bf16.mxu1 %v34918_v29 }
 0x83b   : > { %32227 = vmatpush3.bf16.msra.mxu0 %v34917_v28 }
 0x83c   : > { %32228 = vmatprep.subr.bf16.mxu0 %v34920_v31  ;;  %32249 = vmatpush3.bf16.msra.mxu1 %v34919_v30  ;;  %v34956_v30 = vld [vmem:[%s35829_s11 + $0x3da8] sm:$0xff]   ;;  %v34957_v31 = vld [vmem:[%s35829_s11 + $0x3d70] sm:$0xff]  }
 0x83d   : > { %v31926_v32 = vpop.f32.mrb[212].mxu0  ;;  %32250 = vmatprep.subr.bf16.mxu1 %v34922_v35 }
 0x83e   : > { %v31927_v34 = vpop.f32.mrb[213].mxu0  ;;  %v31948_v38 = vpop.f32.mrb[212].mxu1 }
 0x83f   : > { %v31928_v36 = vadd.f32 %v31927_v34, %v31926_v32  ;;  %v31929_v37 = vpop.f32.mrb[214].mxu0  ;;  %v31949_v40 = vpop.f32.mrb[213].mxu1  ;;  %32229 = vmatpush3.bf16.msra.mxu0 %v34921_v33 }
 0x840   : > { %v31930_v39 = vpop.f32.mrb[215].mxu0  ;;  %v31950_v45 = vadd.f32 %v31949_v40, %v31948_v38  ;;  %v31951_v47 = vpop.f32.mrb[214].mxu1  ;;  %32230 = vmatprep.subr.bf16.mxu0 %v34924_v43  ;;  %32251 = vmatpush3.bf16.msra.mxu1 %v34923_v41  ;;  %v34959_v38 = vld [vmem:[%s35829_s11 + $0x3df0] sm:$0xff]   ;;  %v34961_v43 = vld [vmem:[%s35829_s11 + $0x3d78] sm:$0xff]  }
 0x841   : > { %v25393_v44 = vadd.f32 %v31928_v36, %v38095_v59  ;;  %v31952_v50 = vpop.f32.mrb[215].mxu1  ;;  %32252 = vmatprep.subr.bf16.mxu1 %v34926_v49  ;;  %v34932_v59 = vld [vmem:[%s35829_s11 + $0x3d40] sm:$0xff]   ;;  %v34958_v36 = vld [vmem:[%s35829_s11 + $0x3d30] sm:$0xff]  }
 0x842   : > { %v34960_v41 = vld [vmem:[%s35829_s11 + $0x3db0] sm:$0xff]   ;;  %v34965_v50 = vld [vmem:[%s35829_s11 + $0x3e40] sm:$0xff]  }
 0x843   : > { %v38132_v48 = vadd.f32 %v31950_v45, %v25393_v44  ;;  %32231 = vmatpush3.bf16.msra.mxu0 %v34925_v46  ;;  %v34962_v44 = vld [vmem:[%s35829_s11 + $0x3d38] sm:$0xff]  }
 0x844   : > { %32232 = vmatprep.subr.bf16.mxu0 %v34928_v52  ;;  %32253 = vmatpush3.bf16.msra.mxu1 %v34927_v51  ;;  %v34963_v45 = vld [vmem:[%s35829_s11 + $0x3df8] sm:$0xff]  }
 0x845   : > { %32254 = vmatprep.subr.bf16.mxu1 %v34930_v54  ;;  %v378_v46 = vld [vmem:[%s35822_s13 + $0x1e8] sm:$0xff] }
 0x846   : > { %v1509_v47 = vrot.slane %v378_v46, %v35880_v42  ;;  %v1502_v49 = vcombine.high %v378_v46, %v378_v46  ;;  %v35001_v46 = vld [vmem:[%s35829_s11 + $0x3fc0] sm:$0xff]  }
 0x847   : > { %32233 = vmatpush3.bf16.msra.mxu0 %v34929_v53  ;;  %v34967_v53 = vld [vmem:[%s35829_s11 + $0x3e00] sm:$0xff]  }
 0x848   : > { %32262 = vmatprep.subr.bf16.mxu0 %v34932_v59  ;;  %32255 = vmatpush3.bf16.msra.mxu1 %v34931_v57  ;;  %v1517_v51 = vcombine.high %v1509_v47, %v1509_v47  ;;  %v1516_v52 = vrot.slane %v1502_v49, %v35880_v42  ;;  %v2252_v54 = vpack.c.bf16 %v1509_v47, %v1509_v47  ;;  %v35002_v49 = vld [vmem:[%s35829_s11 + $0x3f80] sm:$0xff]  }
 0x849   : > { %32284 = vmatprep.subr.bf16.mxu1 %v34935_v0  ;;  %v34973_v0 = vld [vmem:[%s35829_s11 + $0x3e88] sm:$0xff]  }
 0x84a   : > { %25951 = vmatmul.mubr.bf16.vlgmr.msra.gmra.mrb[240].mxu0 %v2248_v63  ;;  %v2253_v56 = vpack.c.bf16 %v1517_v51, %v1517_v51  ;;  %v1518_v57 = vcombine.high %v1516_v52, %v1516_v52  ;;  %v2254_v59 = vpack.c.bf16 %v1516_v52, %v1516_v52  ;;  %v34972_v63 = vld [vmem:[%s35829_s11 + $0x3ec8] sm:$0xff]  }
 0x84b   : > { %32263 = vmatpush3.bf16.msra.mxu0 %v34934_v62  ;;  %25991 = vmatmul.mubr.bf16.vlgmr.msra.gmra.mrb[240].mxu1 %v2250_v4  ;;  %v34971_v62 = vld [vmem:[%s35829_s11 + $0x3e08] sm:$0xff]   ;;  %v34977_v4 = vld [vmem:[%s35829_s11 + $0x3e90] sm:$0xff]  }
 0x84c   : > { %32264 = vmatprep.subr.bf16.mxu0 %v34937_v5  ;;  %32285 = vmatpush3.bf16.msra.mxu1 %v34936_v3  ;;  %v2255_v61 = vpack.c.bf16 %v1518_v57, %v1518_v57  ;;  %v34976_v3 = vld [vmem:[%s35829_s11 + $0x3ed0] sm:$0xff]   ;;  %v34978_v5 = vld [vmem:[%s35829_s11 + $0x3e58] sm:$0xff]   ;;  %v35003_v51 = vld [vmem:[%s35829_s11 + $0x3f48] sm:$0xff]  }
 0x84d   : > { %32286 = vmatprep.subr.bf16.mxu1 %v34939_v8  ;;  %26030 = vmatprep.mubr.bf16.mxu0 %v2253_v56  ;;  %v34981_v8 = vld [vmem:[%s35829_s11 + $0x3e98] sm:$0xff]   ;;  %v35007_v56 = vld [vmem:[%s35829_s11 + $0x3f50] sm:$0xff]  }
 0x84e   : > { %26070 = vmatprep.mubr.bf16.mxu1 %v2255_v61  ;;  %v35008_v57 = vld [vmem:[%s35829_s11 + $0x3f10] sm:$0xff]   ;;  %v35012_v61 = vld [vmem:[%s35829_s11 + $0x3f18] sm:$0xff]  }
 0x84f   : > { %32265 = vmatpush3.bf16.msra.mxu0 %v34938_v7  ;;  %v34980_v7 = vld [vmem:[%s35829_s11 + $0x3ed8] sm:$0xff]  }
 0x850   : > { %32266 = vmatprep.subr.bf16.mxu0 %v34941_v10  ;;  %32287 = vmatpush3.bf16.msra.mxu1 %v34940_v9  ;;  %v34982_v9 = vld [vmem:[%s35829_s11 + $0x3e60] sm:$0xff]  }
 0x851   : > { %32288 = vmatprep.subr.bf16.mxu1 %v34943_v12  ;;  %v34983_v10 = vld [vmem:[%s35829_s11 + $0x3e20] sm:$0xff]  }
 0x852   : > { %v34985_v12 = vld [vmem:[%s35829_s11 + $0x3ea0] sm:$0xff]  }
 0x853   : > { %32267 = vmatpush3.bf16.msra.mxu0 %v34942_v11  ;;  %v34984_v11 = vld [vmem:[%s35829_s11 + $0x3ee0] sm:$0xff]  }
 0x854   : > { %32268 = vmatprep.subr.bf16.mxu0 %v34945_v14  ;;  %32289 = vmatpush3.bf16.msra.mxu1 %v34944_v13  ;;  %v34986_v13 = vld [vmem:[%s35829_s11 + $0x3e68] sm:$0xff]  }
 0x855   : > { %32290 = vmatprep.subr.bf16.mxu1 %v34947_v16 }
 0x857   : > { %32269 = vmatpush3.bf16.msra.mxu0 %v34946_v15  ;;  %v34987_v15 = vld [vmem:[%s35829_s11 + $0x3e28] sm:$0xff]  }
 0x858   : > { %32270 = vmatprep.subr.bf16.mxu0 %v34949_v18  ;;  %32291 = vmatpush3.bf16.msra.mxu1 %v34948_v17  ;;  %v34988_v17 = vld [vmem:[%s35829_s11 + $0x3ee8] sm:$0xff]  }
 0x859   : > { %32292 = vmatprep.subr.bf16.mxu1 %v34951_v20 }
 0x85b   : > { %32271 = vmatpush3.bf16.msra.mxu0 %v34950_v19 }
 0x85c   : > { %32272 = vmatprep.subr.bf16.mxu0 %v34953_v22  ;;  %32293 = vmatpush3.bf16.msra.mxu1 %v34952_v21  ;;  %v34989_v21 = vld [vmem:[%s35829_s11 + $0x3ea8] sm:$0xff]   ;;  %v34990_v22 = vld [vmem:[%s35829_s11 + $0x3e70] sm:$0xff]  }
 0x85d   : > { %v31970_v23 = vpop.f32.mrb[216].mxu0  ;;  %32294 = vmatprep.subr.bf16.mxu1 %v34955_v26 }
 0x85e   : > { %v31971_v25 = vpop.f32.mrb[217].mxu0  ;;  %v31992_v29 = vpop.f32.mrb[216].mxu1 }
 0x85f   : > { %v31972_v27 = vadd.f32 %v31971_v25, %v31970_v23  ;;  %v31973_v28 = vpop.f32.mrb[218].mxu0  ;;  %v31993_v33 = vpop.f32.mrb[217].mxu1  ;;  %32273 = vmatpush3.bf16.msra.mxu0 %v34954_v24 }
 0x860   : > { %v31974_v32 = vpop.f32.mrb[219].mxu0  ;;  %v31994_v35 = vadd.f32 %v31993_v33, %v31992_v29  ;;  %v31995_v37 = vpop.f32.mrb[218].mxu1  ;;  %32274 = vmatprep.subr.bf16.mxu0 %v34957_v31  ;;  %32295 = vmatpush3.bf16.msra.mxu1 %v34956_v30  ;;  %v34992_v29 = vld [vmem:[%s35829_s11 + $0x3ef0] sm:$0xff]   ;;  %v34994_v33 = vld [vmem:[%s35829_s11 + $0x3e78] sm:$0xff]  }
 0x861   : > { %v25473_v34 = vadd.f32 %v31972_v27, %v38132_v48  ;;  %v31996_v39 = vpop.f32.mrb[219].mxu1  ;;  %32296 = vmatprep.subr.bf16.mxu1 %v34959_v38  ;;  %v34964_v48 = vld [vmem:[%s35829_s11 + $0x3db8] sm:$0xff]   ;;  %v34991_v27 = vld [vmem:[%s35829_s11 + $0x3e30] sm:$0xff]  }
 0x862   : > { %v34993_v32 = vld [vmem:[%s35829_s11 + $0x3eb0] sm:$0xff]   ;;  %v34997_v38 = vld [vmem:[%s35829_s11 + $0x3eb8] sm:$0xff]  }
 0x863   : > { %v38171_v40 = vadd.f32 %v31994_v35, %v25473_v34  ;;  %32275 = vmatpush3.bf16.msra.mxu0 %v34958_v36  ;;  %v34995_v34 = vld [vmem:[%s35829_s11 + $0x3e38] sm:$0xff]  }
 0x864   : > { %32276 = vmatprep.subr.bf16.mxu0 %v34961_v43  ;;  %32297 = vmatpush3.bf16.msra.mxu1 %v34960_v41  ;;  %v34996_v35 = vld [vmem:[%s35829_s11 + $0x3ef8] sm:$0xff]  }
 0x865   : > { %32298 = vmatprep.subr.bf16.mxu1 %v34963_v45  ;;  %v379_v36 = vld [vmem:[%s35822_s13 + $0x1f0] sm:$0xff] }
 0x866   : > { %v1526_v37 = vrot.slane %v379_v36, %v35880_v42  ;;  %v1519_v39 = vcombine.high %v379_v36, %v379_v36  ;;  %v35034_v36 = vld [vmem:[%s35829_s11 + $0x40c0] sm:$0xff]  }
 0x867   : > { %32277 = vmatpush3.bf16.msra.mxu0 %v34962_v44  ;;  %v35000_v44 = vld [vmem:[%s35829_s11 + $0x3f00] sm:$0xff]  }
 0x868   : > { %32306 = vmatprep.subr.bf16.mxu0 %v34965_v50  ;;  %32299 = vmatpush3.bf16.msra.mxu1 %v34964_v48  ;;  %v1534_v41 = vcombine.high %v1526_v37, %v1526_v37  ;;  %v1533_v43 = vrot.slane %v1519_v39, %v35880_v42  ;;  %v2256_v45 = vpack.c.bf16 %v1526_v37, %v1526_v37  ;;  %v35035_v39 = vld [vmem:[%s35829_s11 + $0x4080] sm:$0xff]  }
 0x869   : > { %32328 = vmatprep.subr.bf16.mxu1 %v34968_v55  ;;  %v35006_v55 = vld [vmem:[%s35829_s11 + $0x3f88] sm:$0xff]  }
 0x86a   : > { %26031 = vmatmul.mubr.bf16.vlgmr.msra.gmra.mrb[244].mxu0 %v2252_v54  ;;  %v2257_v47 = vpack.c.bf16 %v1534_v41, %v1534_v41  ;;  %v1535_v48 = vcombine.high %v1533_v43, %v1533_v43  ;;  %v2258_v50 = vpack.c.bf16 %v1533_v43, %v1533_v43  ;;  %v35005_v54 = vld [vmem:[%s35829_s11 + $0x3fc8] sm:$0xff]  }
 0x86b   : > { %32307 = vmatpush3.bf16.msra.mxu0 %v34967_v53  ;;  %26071 = vmatmul.mubr.bf16.vlgmr.msra.gmra.mrb[244].mxu1 %v2254_v59  ;;  %v35004_v53 = vld [vmem:[%s35829_s11 + $0x3f08] sm:$0xff]   ;;  %v35010_v59 = vld [vmem:[%s35829_s11 + $0x3f90] sm:$0xff]  }
 0x86c   : > { %32308 = vmatprep.subr.bf16.mxu0 %v34970_v60  ;;  %32329 = vmatpush3.bf16.msra.mxu1 %v34969_v58  ;;  %v2259_v52 = vpack.c.bf16 %v1535_v48, %v1535_v48  ;;  %v35009_v58 = vld [vmem:[%s35829_s11 + $0x3fd0] sm:$0xff]   ;;  %v35011_v60 = vld [vmem:[%s35829_s11 + $0x3f58] sm:$0xff]   ;;  %v35036_v41 = vld [vmem:[%s35829_s11 + $0x4048] sm:$0xff]  }
 0x86d   : > { %32330 = vmatprep.subr.bf16.mxu1 %v34972_v63  ;;  %26110 = vmatprep.mubr.bf16.mxu0 %v2257_v47  ;;  %v35014_v63 = vld [vmem:[%s35829_s11 + $0x3f98] sm:$0xff]   ;;  %v35040_v47 = vld [vmem:[%s35829_s11 + $0x4050] sm:$0xff]  }
 0x86e   : > { %26150 = vmatprep.mubr.bf16.mxu1 %v2259_v52  ;;  %v35041_v48 = vld [vmem:[%s35829_s11 + $0x4010] sm:$0xff]   ;;  %v35045_v52 = vld [vmem:[%s35829_s11 + $0x4018] sm:$0xff]  }
 0x86f   : > { %32309 = vmatpush3.bf16.msra.mxu0 %v34971_v62  ;;  %v35013_v62 = vld [vmem:[%s35829_s11 + $0x3fd8] sm:$0xff]  }
 0x870   : > { %32310 = vmatprep.subr.bf16.mxu0 %v34974_v1  ;;  %32331 = vmatpush3.bf16.msra.mxu1 %v34973_v0  ;;  %v35015_v0 = vld [vmem:[%s35829_s11 + $0x3f60] sm:$0xff]  }
 0x871   : > { %32332 = vmatprep.subr.bf16.mxu1 %v34976_v3  ;;  %v35016_v1 = vld [vmem:[%s35829_s11 + $0x3f20] sm:$0xff]  }
 0x872   : > { %v35018_v3 = vld [vmem:[%s35829_s11 + $0x3fa0] sm:$0xff]  }
 0x873   : > { %32311 = vmatpush3.bf16.msra.mxu0 %v34975_v2  ;;  %v35017_v2 = vld [vmem:[%s35829_s11 + $0x3fe0] sm:$0xff]  }
 0x874   : > { %32312 = vmatprep.subr.bf16.mxu0 %v34978_v5  ;;  %32333 = vmatpush3.bf16.msra.mxu1 %v34977_v4  ;;  %v35019_v4 = vld [vmem:[%s35829_s11 + $0x3f68] sm:$0xff]  }
 0x875   : > { %32334 = vmatprep.subr.bf16.mxu1 %v34980_v7 }
 0x877   : > { %32313 = vmatpush3.bf16.msra.mxu0 %v34979_v6  ;;  %v35020_v6 = vld [vmem:[%s35829_s11 + $0x3f28] sm:$0xff]  }
 0x878   : > { %32314 = vmatprep.subr.bf16.mxu0 %v34982_v9  ;;  %32335 = vmatpush3.bf16.msra.mxu1 %v34981_v8  ;;  %v35021_v8 = vld [vmem:[%s35829_s11 + $0x3fe8] sm:$0xff]  }
 0x879   : > { %32336 = vmatprep.subr.bf16.mxu1 %v34984_v11 }
 0x87b   : > { %32315 = vmatpush3.bf16.msra.mxu0 %v34983_v10 }
 0x87c   : > { %32316 = vmatprep.subr.bf16.mxu0 %v34986_v13  ;;  %32337 = vmatpush3.bf16.msra.mxu1 %v34985_v12 }
 0x87d   : > { %v32014_v14 = vpop.f32.mrb[220].mxu0  ;;  %32338 = vmatprep.subr.bf16.mxu1 %v34988_v17 }
 0x87e   : > { %v32015_v16 = vpop.f32.mrb[221].mxu0  ;;  %v32036_v20 = vpop.f32.mrb[220].mxu1 }
 0x87f   : > { %v32016_v18 = vadd.f32 %v32015_v16, %v32014_v14  ;;  %v32017_v19 = vpop.f32.mrb[222].mxu0  ;;  %v32037_v24 = vpop.f32.mrb[221].mxu1  ;;  %32317 = vmatpush3.bf16.msra.mxu0 %v34987_v15  ;;  %v35022_v14 = vld [vmem:[%s35829_s11 + $0x3fa8] sm:$0xff]   ;;  %v35023_v15 = vld [vmem:[%s35829_s11 + $0x3f70] sm:$0xff]  }
 0x880   : > { %v32018_v23 = vpop.f32.mrb[223].mxu0  ;;  %v32038_v26 = vadd.f32 %v32037_v24, %v32036_v20  ;;  %v32039_v28 = vpop.f32.mrb[222].mxu1  ;;  %32318 = vmatprep.subr.bf16.mxu0 %v34990_v22  ;;  %32339 = vmatpush3.bf16.msra.mxu1 %v34989_v21  ;;  %v35025_v21 = vld [vmem:[%s35829_s11 + $0x3ff0] sm:$0xff]   ;;  %v35027_v24 = vld [vmem:[%s35829_s11 + $0x3f78] sm:$0xff]  }
 0x881   : > { %v25553_v25 = vadd.f32 %v32016_v18, %v38171_v40  ;;  %v32040_v30 = vpop.f32.mrb[223].mxu1  ;;  %32340 = vmatprep.subr.bf16.mxu1 %v34992_v29  ;;  %v34998_v40 = vld [vmem:[%s35829_s11 + $0x3f40] sm:$0xff]   ;;  %v35024_v18 = vld [vmem:[%s35829_s11 + $0x3f30] sm:$0xff]   ;;  %v35030_v29 = vld [vmem:[%s35829_s11 + $0x3fb8] sm:$0xff]  }
 0x882   : > { %v35026_v23 = vld [vmem:[%s35829_s11 + $0x3fb0] sm:$0xff]  }
 0x883   : > { %v38209_v31 = vadd.f32 %v32038_v26, %v25553_v25  ;;  %32319 = vmatpush3.bf16.msra.mxu0 %v34991_v27  ;;  %v35028_v25 = vld [vmem:[%s35829_s11 + $0x3f38] sm:$0xff]   ;;  %v380_v27 = vld [vmem:[%s35822_s13 + $0x1f8] sm:$0xff] }
 0x884   : > { %32320 = vmatprep.subr.bf16.mxu0 %v34994_v33  ;;  %32341 = vmatpush3.bf16.msra.mxu1 %v34993_v32  ;;  %v35029_v26 = vld [vmem:[%s35829_s11 + $0x3ff8] sm:$0xff]   ;;  %v1543_v28 = vrot.slane %v380_v27, %v35880_v42  ;;  %v1536_v30 = vcombine.high %v380_v27, %v380_v27  ;;  %v35067_v27 = vld [vmem:[%s35829_s11 + $0x41c0] sm:$0xff]  }
 0x885   : > { %32342 = vmatprep.subr.bf16.mxu1 %v34996_v35 }
 0x886   : > { %v1551_v32 = vcombine.high %v1543_v28, %v1543_v28  ;;  %v1550_v33 = vrot.slane %v1536_v30, %v35880_v42  ;;  %v2260_v35 = vpack.c.bf16 %v1543_v28, %v1543_v28  ;;  %v35068_v30 = vld [vmem:[%s35829_s11 + $0x4180] sm:$0xff]  }
 0x887   : > { %32321 = vmatpush3.bf16.msra.mxu0 %v34995_v34  ;;  %v35033_v34 = vld [vmem:[%s35829_s11 + $0x4000] sm:$0xff]  }
 0x888   : > { %32350 = vmatprep.subr.bf16.mxu0 %v34998_v40  ;;  %32343 = vmatpush3.bf16.msra.mxu1 %v34997_v38  ;;  %v2261_v37 = vpack.c.bf16 %v1551_v32, %v1551_v32  ;;  %v1552_v38 = vcombine.high %v1550_v33, %v1550_v33  ;;  %v2262_v40 = vpack.c.bf16 %v1550_v33, %v1550_v33  ;;  %v35069_v32 = vld [vmem:[%s35829_s11 + $0x4148] sm:$0xff]  }
 0x889   : > { %32372 = vmatprep.subr.bf16.mxu1 %v35001_v46  ;;  %v35039_v46 = vld [vmem:[%s35829_s11 + $0x4088] sm:$0xff]  }
 0x88a   : > { %26111 = vmatmul.mubr.bf16.vlgmr.msra.gmra.mrb[248].mxu0 %v2256_v45  ;;  %v2263_v43 = vpack.c.bf16 %v1552_v38, %v1552_v38  ;;  %v35038_v45 = vld [vmem:[%s35829_s11 + $0x40c8] sm:$0xff]   ;;  %v35074_v38 = vld [vmem:[%s35829_s11 + $0x4110] sm:$0xff]  }
 0x88b   : > { %32351 = vmatpush3.bf16.msra.mxu0 %v35000_v44  ;;  %26151 = vmatmul.mubr.bf16.vlgmr.msra.gmra.mrb[248].mxu1 %v2258_v50  ;;  %v35037_v44 = vld [vmem:[%s35829_s11 + $0x4008] sm:$0xff]   ;;  %v35043_v50 = vld [vmem:[%s35829_s11 + $0x4090] sm:$0xff]  }
 0x88c   : > { %32352 = vmatprep.subr.bf16.mxu0 %v35003_v51  ;;  %32373 = vmatpush3.bf16.msra.mxu1 %v35002_v49  ;;  %v35042_v49 = vld [vmem:[%s35829_s11 + $0x40d0] sm:$0xff]   ;;  %v35044_v51 = vld [vmem:[%s35829_s11 + $0x4058] sm:$0xff]  }
 0x88d   : > { %32374 = vmatprep.subr.bf16.mxu1 %v35005_v54  ;;  %26190 = vmatprep.mubr.bf16.mxu0 %v2261_v37  ;;  %v35047_v54 = vld [vmem:[%s35829_s11 + $0x4098] sm:$0xff]   ;;  %v35073_v37 = vld [vmem:[%s35829_s11 + $0x4150] sm:$0xff]  }
 0x88e   : > { %26230 = vmatprep.mubr.bf16.mxu1 %v2263_v43  ;;  %v35078_v43 = vld [vmem:[%s35829_s11 + $0x4118] sm:$0xff]  }
 0x88f   : > { %32353 = vmatpush3.bf16.msra.mxu0 %v35004_v53  ;;  %v35046_v53 = vld [vmem:[%s35829_s11 + $0x40d8] sm:$0xff]  }
 0x890   : > { %32354 = vmatprep.subr.bf16.mxu0 %v35007_v56  ;;  %32375 = vmatpush3.bf16.msra.mxu1 %v35006_v55  ;;  %v35048_v55 = vld [vmem:[%s35829_s11 + $0x4060] sm:$0xff]  }
 0x891   : > { %32376 = vmatprep.subr.bf16.mxu1 %v35009_v58  ;;  %v35049_v56 = vld [vmem:[%s35829_s11 + $0x4020] sm:$0xff]  }
 0x892   : > { %v35051_v58 = vld [vmem:[%s35829_s11 + $0x40a0] sm:$0xff]  }
 0x893   : > { %32355 = vmatpush3.bf16.msra.mxu0 %v35008_v57  ;;  %v35050_v57 = vld [vmem:[%s35829_s11 + $0x40e0] sm:$0xff]  }
 0x894   : > { %32356 = vmatprep.subr.bf16.mxu0 %v35011_v60  ;;  %32377 = vmatpush3.bf16.msra.mxu1 %v35010_v59  ;;  %v35052_v59 = vld [vmem:[%s35829_s11 + $0x4068] sm:$0xff]  }
 0x895   : > { %32378 = vmatprep.subr.bf16.mxu1 %v35013_v62 }
 0x897   : > { %32357 = vmatpush3.bf16.msra.mxu0 %v35012_v61  ;;  %v35053_v61 = vld [vmem:[%s35829_s11 + $0x4028] sm:$0xff]  }
 0x898   : > { %32358 = vmatprep.subr.bf16.mxu0 %v35015_v0  ;;  %32379 = vmatpush3.bf16.msra.mxu1 %v35014_v63  ;;  %v35054_v63 = vld [vmem:[%s35829_s11 + $0x40e8] sm:$0xff]  }
 0x899   : > { %32380 = vmatprep.subr.bf16.mxu1 %v35017_v2 }
 0x89b   : > { %32359 = vmatpush3.bf16.msra.mxu0 %v35016_v1 }
 0x89c   : > { %32360 = vmatprep.subr.bf16.mxu0 %v35019_v4  ;;  %32381 = vmatpush3.bf16.msra.mxu1 %v35018_v3  ;;  %v35055_v3 = vld [vmem:[%s35829_s11 + $0x40a8] sm:$0xff]   ;;  %v35056_v4 = vld [vmem:[%s35829_s11 + $0x4070] sm:$0xff]  }
 0x89d   : > { %v32058_v5 = vpop.f32.mrb[224].mxu0  ;;  %32382 = vmatprep.subr.bf16.mxu1 %v35021_v8 }
 0x89e   : > { %v32059_v7 = vpop.f32.mrb[225].mxu0  ;;  %v32080_v11 = vpop.f32.mrb[224].mxu1 }
 0x89f   : > { %v32060_v9 = vadd.f32 %v32059_v7, %v32058_v5  ;;  %v32061_v10 = vpop.f32.mrb[226].mxu0  ;;  %v32081_v13 = vpop.f32.mrb[225].mxu1  ;;  %32361 = vmatpush3.bf16.msra.mxu0 %v35020_v6 }
 0x8a0   : > { %v32062_v12 = vpop.f32.mrb[227].mxu0  ;;  %v32082_v17 = vadd.f32 %v32081_v13, %v32080_v11  ;;  %v32083_v19 = vpop.f32.mrb[226].mxu1  ;;  %32362 = vmatprep.subr.bf16.mxu0 %v35023_v15  ;;  %32383 = vmatpush3.bf16.msra.mxu1 %v35022_v14  ;;  %v35058_v11 = vld [vmem:[%s35829_s11 + $0x40f0] sm:$0xff]   ;;  %v35060_v15 = vld [vmem:[%s35829_s11 + $0x4078] sm:$0xff]  }
 0x8a1   : > { %v25633_v16 = vadd.f32 %v32060_v9, %v38209_v31  ;;  %v32084_v22 = vpop.f32.mrb[227].mxu1  ;;  %32384 = vmatprep.subr.bf16.mxu1 %v35025_v21  ;;  %v35031_v31 = vld [vmem:[%s35829_s11 + $0x4040] sm:$0xff]   ;;  %v35057_v9 = vld [vmem:[%s35829_s11 + $0x4030] sm:$0xff]  }
 0x8a2   : > { %v35059_v14 = vld [vmem:[%s35829_s11 + $0x40b0] sm:$0xff]   ;;  %v35064_v22 = vld [vmem:[%s35829_s11 + $0x4140] sm:$0xff]  }
 0x8a3   : > { %v38246_v20 = vadd.f32 %v32082_v17, %v25633_v16  ;;  %32363 = vmatpush3.bf16.msra.mxu0 %v35024_v18  ;;  %v35061_v16 = vld [vmem:[%s35829_s11 + $0x4038] sm:$0xff]  }
 0x8a4   : > { %32364 = vmatprep.subr.bf16.mxu0 %v35027_v24  ;;  %32385 = vmatpush3.bf16.msra.mxu1 %v35026_v23  ;;  %v35062_v17 = vld [vmem:[%s35829_s11 + $0x40f8] sm:$0xff]  }
 0x8a5   : > { %32386 = vmatprep.subr.bf16.mxu1 %v35029_v26  ;;  %v381_v18 = vld [vmem:[%s35822_s13 + $0x200] sm:$0xff] }
 0x8a6   : > { %v1560_v19 = vrot.slane %v381_v18, %v35880_v42  ;;  %v1553_v21 = vcombine.high %v381_v18, %v381_v18  ;;  %v35100_v18 = vld [vmem:[%s35829_s11 + $0x42c0] sm:$0xff]  }
 0x8a7   : > { %32365 = vmatpush3.bf16.msra.mxu0 %v35028_v25  ;;  %v35066_v25 = vld [vmem:[%s35829_s11 + $0x4100] sm:$0xff]  }
 0x8a8   : > { %32394 = vmatprep.subr.bf16.mxu0 %v35031_v31  ;;  %32387 = vmatpush3.bf16.msra.mxu1 %v35030_v29  ;;  %v1568_v23 = vcombine.high %v1560_v19, %v1560_v19  ;;  %v1567_v24 = vrot.slane %v1553_v21, %v35880_v42  ;;  %v2264_v26 = vpack.c.bf16 %v1560_v19, %v1560_v19  ;;  %v35101_v21 = vld [vmem:[%s35829_s11 + $0x4280] sm:$0xff]  }
 0x8a9   : > { %32416 = vmatprep.subr.bf16.mxu1 %v35034_v36  ;;  %v35072_v36 = vld [vmem:[%s35829_s11 + $0x4188] sm:$0xff]  }
 0x8aa   : > { %26191 = vmatmul.mubr.bf16.vlgmr.msra.gmra.mrb[252].mxu0 %v2260_v35  ;;  %v2265_v28 = vpack.c.bf16 %v1568_v23, %v1568_v23  ;;  %v1569_v29 = vcombine.high %v1567_v24, %v1567_v24  ;;  %v2266_v31 = vpack.c.bf16 %v1567_v24, %v1567_v24  ;;  %v35071_v35 = vld [vmem:[%s35829_s11 + $0x41c8] sm:$0xff]  }
 0x8ab   : > { %32395 = vmatpush3.bf16.msra.mxu0 %v35033_v34  ;;  %26231 = vmatmul.mubr.bf16.vlgmr.msra.gmra.mrb[252].mxu1 %v2262_v40  ;;  %v35070_v34 = vld [vmem:[%s35829_s11 + $0x4108] sm:$0xff]   ;;  %v35076_v40 = vld [vmem:[%s35829_s11 + $0x4190] sm:$0xff]  }
 0x8ac   : > { %32396 = vmatprep.subr.bf16.mxu0 %v35036_v41  ;;  %32417 = vmatpush3.bf16.msra.mxu1 %v35035_v39  ;;  %v2267_v33 = vpack.c.bf16 %v1569_v29, %v1569_v29  ;;  %v35075_v39 = vld [vmem:[%s35829_s11 + $0x41d0] sm:$0xff]   ;;  %v35077_v41 = vld [vmem:[%s35829_s11 + $0x4158] sm:$0xff]   ;;  %v35102_v23 = vld [vmem:[%s35829_s11 + $0x4248] sm:$0xff]  }
 0x8ad   : > { %32418 = vmatprep.subr.bf16.mxu1 %v35038_v45  ;;  %26270 = vmatprep.mubr.bf16.mxu0 %v2265_v28  ;;  %v35080_v45 = vld [vmem:[%s35829_s11 + $0x4198] sm:$0xff]   ;;  %v35106_v28 = vld [vmem:[%s35829_s11 + $0x4250] sm:$0xff]  }
 0x8ae   : > { %26310 = vmatprep.mubr.bf16.mxu1 %v2267_v33  ;;  %v35107_v29 = vld [vmem:[%s35829_s11 + $0x4210] sm:$0xff]   ;;  %v35111_v33 = vld [vmem:[%s35829_s11 + $0x4218] sm:$0xff]  }
 0x8af   : > { %32397 = vmatpush3.bf16.msra.mxu0 %v35037_v44  ;;  %v35079_v44 = vld [vmem:[%s35829_s11 + $0x41d8] sm:$0xff]  }
 0x8b0   : > { %32398 = vmatprep.subr.bf16.mxu0 %v35040_v47  ;;  %32419 = vmatpush3.bf16.msra.mxu1 %v35039_v46  ;;  %v35081_v46 = vld [vmem:[%s35829_s11 + $0x4160] sm:$0xff]  }
 0x8b1   : > { %32420 = vmatprep.subr.bf16.mxu1 %v35042_v49  ;;  %v35082_v47 = vld [vmem:[%s35829_s11 + $0x4120] sm:$0xff]  }
 0x8b2   : > { %v35084_v49 = vld [vmem:[%s35829_s11 + $0x41a0] sm:$0xff]  }
 0x8b3   : > { %32399 = vmatpush3.bf16.msra.mxu0 %v35041_v48  ;;  %v35083_v48 = vld [vmem:[%s35829_s11 + $0x41e0] sm:$0xff]  }
 0x8b4   : > { %32400 = vmatprep.subr.bf16.mxu0 %v35044_v51  ;;  %32421 = vmatpush3.bf16.msra.mxu1 %v35043_v50  ;;  %v35085_v50 = vld [vmem:[%s35829_s11 + $0x4168] sm:$0xff]  }
 0x8b5   : > { %32422 = vmatprep.subr.bf16.mxu1 %v35046_v53 }
 0x8b7   : > { %32401 = vmatpush3.bf16.msra.mxu0 %v35045_v52  ;;  %v35086_v52 = vld [vmem:[%s35829_s11 + $0x4128] sm:$0xff]  }
 0x8b8   : > { %32402 = vmatprep.subr.bf16.mxu0 %v35048_v55  ;;  %32423 = vmatpush3.bf16.msra.mxu1 %v35047_v54  ;;  %v35087_v54 = vld [vmem:[%s35829_s11 + $0x41e8] sm:$0xff]  }
 0x8b9   : > { %32424 = vmatprep.subr.bf16.mxu1 %v35050_v57 }
 0x8bb   : > { %32403 = vmatpush3.bf16.msra.mxu0 %v35049_v56 }
 0x8bc   : > { %32404 = vmatprep.subr.bf16.mxu0 %v35052_v59  ;;  %32425 = vmatpush3.bf16.msra.mxu1 %v35051_v58  ;;  %v35088_v58 = vld [vmem:[%s35829_s11 + $0x41a8] sm:$0xff]   ;;  %v35089_v59 = vld [vmem:[%s35829_s11 + $0x4170] sm:$0xff]  }
 0x8bd   : > { %v32102_v60 = vpop.f32.mrb[228].mxu0  ;;  %32426 = vmatprep.subr.bf16.mxu1 %v35054_v63 }
 0x8be   : > { %v32103_v62 = vpop.f32.mrb[229].mxu0  ;;  %v32124_v2 = vpop.f32.mrb[228].mxu1 }
 0x8bf   : > { %v32104_v0 = vadd.f32 %v32103_v62, %v32102_v60  ;;  %v32105_v1 = vpop.f32.mrb[230].mxu0  ;;  %v32125_v6 = vpop.f32.mrb[229].mxu1  ;;  %32405 = vmatpush3.bf16.msra.mxu0 %v35053_v61 }
 0x8c0   : > { %v32106_v5 = vpop.f32.mrb[231].mxu0  ;;  %v32126_v8 = vadd.f32 %v32125_v6, %v32124_v2  ;;  %v32127_v10 = vpop.f32.mrb[230].mxu1  ;;  %32406 = vmatprep.subr.bf16.mxu0 %v35056_v4  ;;  %32427 = vmatpush3.bf16.msra.mxu1 %v35055_v3  ;;  %v35091_v2 = vld [vmem:[%s35829_s11 + $0x41f0] sm:$0xff]   ;;  %v35093_v6 = vld [vmem:[%s35829_s11 + $0x4178] sm:$0xff]  }
 0x8c1   : > { %v25713_v7 = vadd.f32 %v32104_v0, %v38246_v20  ;;  %v32128_v12 = vpop.f32.mrb[231].mxu1  ;;  %32428 = vmatprep.subr.bf16.mxu1 %v35058_v11  ;;  %v35063_v20 = vld [vmem:[%s35829_s11 + $0x40b8] sm:$0xff]   ;;  %v35090_v0 = vld [vmem:[%s35829_s11 + $0x4130] sm:$0xff]  }
 0x8c2   : > { %v35092_v5 = vld [vmem:[%s35829_s11 + $0x41b0] sm:$0xff]   ;;  %v35096_v11 = vld [vmem:[%s35829_s11 + $0x41b8] sm:$0xff]  }
 0x8c3   : > { %v38285_v13 = vadd.f32 %v32126_v8, %v25713_v7  ;;  %32407 = vmatpush3.bf16.msra.mxu0 %v35057_v9  ;;  %v35094_v7 = vld [vmem:[%s35829_s11 + $0x4138] sm:$0xff]  }
 0x8c4   : > { %32408 = vmatprep.subr.bf16.mxu0 %v35060_v15  ;;  %32429 = vmatpush3.bf16.msra.mxu1 %v35059_v14  ;;  %v35095_v8 = vld [vmem:[%s35829_s11 + $0x41f8] sm:$0xff]  }
 0x8c5   : > { %32430 = vmatprep.subr.bf16.mxu1 %v35062_v17  ;;  %v382_v9 = vld [vmem:[%s35822_s13 + $0x208] sm:$0xff] }
 0x8c6   : > { %v1577_v10 = vrot.slane %v382_v9, %v35880_v42  ;;  %v1570_v12 = vcombine.high %v382_v9, %v382_v9  ;;  %v35133_v9 = vld [vmem:[%s35829_s11 + $0x43c0] sm:$0xff]  }
 0x8c7   : > { %32409 = vmatpush3.bf16.msra.mxu0 %v35061_v16  ;;  %v35099_v16 = vld [vmem:[%s35829_s11 + $0x4200] sm:$0xff]  }
 0x8c8   : > { %32438 = vmatprep.subr.bf16.mxu0 %v35064_v22  ;;  %32431 = vmatpush3.bf16.msra.mxu1 %v35063_v20  ;;  %v1585_v14 = vcombine.high %v1577_v10, %v1577_v10  ;;  %v1584_v15 = vrot.slane %v1570_v12, %v35880_v42  ;;  %v2268_v17 = vpack.c.bf16 %v1577_v10, %v1577_v10  ;;  %v35134_v12 = vld [vmem:[%s35829_s11 + $0x4380] sm:$0xff]  }
 0x8c9   : > { %32460 = vmatprep.subr.bf16.mxu1 %v35067_v27  ;;  %v35105_v27 = vld [vmem:[%s35829_s11 + $0x4288] sm:$0xff]  }
 0x8ca   : > { %26271 = vmatmul.mubr.bf16.vlgmr.msra.gmra.mrb[0].mxu0 %v2264_v26  ;;  %v2269_v19 = vpack.c.bf16 %v1585_v14, %v1585_v14  ;;  %v1586_v20 = vcombine.high %v1584_v15, %v1584_v15  ;;  %v2270_v22 = vpack.c.bf16 %v1584_v15, %v1584_v15  ;;  %v35104_v26 = vld [vmem:[%s35829_s11 + $0x42c8] sm:$0xff]  }
 0x8cb   : > { %32439 = vmatpush3.bf16.msra.mxu0 %v35066_v25  ;;  %26311 = vmatmul.mubr.bf16.vlgmr.msra.gmra.mrb[0].mxu1 %v2266_v31  ;;  %v35103_v25 = vld [vmem:[%s35829_s11 + $0x4208] sm:$0xff]   ;;  %v35109_v31 = vld [vmem:[%s35829_s11 + $0x4290] sm:$0xff]  }
 0x8cc   : > { %32440 = vmatprep.subr.bf16.mxu0 %v35069_v32  ;;  %32461 = vmatpush3.bf16.msra.mxu1 %v35068_v30  ;;  %v2271_v24 = vpack.c.bf16 %v1586_v20, %v1586_v20  ;;  %v35108_v30 = vld [vmem:[%s35829_s11 + $0x42d0] sm:$0xff]   ;;  %v35110_v32 = vld [vmem:[%s35829_s11 + $0x4258] sm:$0xff]   ;;  %v35135_v14 = vld [vmem:[%s35829_s11 + $0x4348] sm:$0xff]  }
 0x8cd   : > { %32462 = vmatprep.subr.bf16.mxu1 %v35071_v35  ;;  %26350 = vmatprep.mubr.bf16.mxu0 %v2269_v19  ;;  %v35113_v35 = vld [vmem:[%s35829_s11 + $0x4298] sm:$0xff]   ;;  %v35139_v19 = vld [vmem:[%s35829_s11 + $0x4350] sm:$0xff]  }
 0x8ce   : > { %26390 = vmatprep.mubr.bf16.mxu1 %v2271_v24  ;;  %v35140_v20 = vld [vmem:[%s35829_s11 + $0x4310] sm:$0xff]   ;;  %v35144_v24 = vld [vmem:[%s35829_s11 + $0x4318] sm:$0xff]  }
 0x8cf   : > { %32441 = vmatpush3.bf16.msra.mxu0 %v35070_v34  ;;  %v35112_v34 = vld [vmem:[%s35829_s11 + $0x42d8] sm:$0xff]  }
 0x8d0   : > { %32442 = vmatprep.subr.bf16.mxu0 %v35073_v37  ;;  %32463 = vmatpush3.bf16.msra.mxu1 %v35072_v36  ;;  %v35114_v36 = vld [vmem:[%s35829_s11 + $0x4260] sm:$0xff]  }
 0x8d1   : > { %32464 = vmatprep.subr.bf16.mxu1 %v35075_v39  ;;  %v35115_v37 = vld [vmem:[%s35829_s11 + $0x4220] sm:$0xff]  }
 0x8d2   : > { %v35117_v39 = vld [vmem:[%s35829_s11 + $0x42a0] sm:$0xff]  }
 0x8d3   : > { %32443 = vmatpush3.bf16.msra.mxu0 %v35074_v38  ;;  %v35116_v38 = vld [vmem:[%s35829_s11 + $0x42e0] sm:$0xff]  }
 0x8d4   : > { %32444 = vmatprep.subr.bf16.mxu0 %v35077_v41  ;;  %32465 = vmatpush3.bf16.msra.mxu1 %v35076_v40  ;;  %v35118_v40 = vld [vmem:[%s35829_s11 + $0x4268] sm:$0xff]  }
 0x8d5   : > { %32466 = vmatprep.subr.bf16.mxu1 %v35079_v44 }
 0x8d7   : > { %32445 = vmatpush3.bf16.msra.mxu0 %v35078_v43  ;;  %v35119_v43 = vld [vmem:[%s35829_s11 + $0x4228] sm:$0xff]  }
 0x8d8   : > { %32446 = vmatprep.subr.bf16.mxu0 %v35081_v46  ;;  %32467 = vmatpush3.bf16.msra.mxu1 %v35080_v45  ;;  %v35120_v45 = vld [vmem:[%s35829_s11 + $0x42e8] sm:$0xff]  }
 0x8d9   : > { %32468 = vmatprep.subr.bf16.mxu1 %v35083_v48 }
 0x8db   : > { %32447 = vmatpush3.bf16.msra.mxu0 %v35082_v47 }
 0x8dc   : > { %32448 = vmatprep.subr.bf16.mxu0 %v35085_v50  ;;  %32469 = vmatpush3.bf16.msra.mxu1 %v35084_v49 }
 0x8dd   : > { %v32146_v51 = vpop.f32.mrb[232].mxu0  ;;  %32470 = vmatprep.subr.bf16.mxu1 %v35087_v54 }
 0x8de   : > { %v32147_v53 = vpop.f32.mrb[233].mxu0  ;;  %v32168_v57 = vpop.f32.mrb[232].mxu1 }
 0x8df   : > { %v32148_v55 = vadd.f32 %v32147_v53, %v32146_v51  ;;  %v32149_v56 = vpop.f32.mrb[234].mxu0  ;;  %v32169_v61 = vpop.f32.mrb[233].mxu1  ;;  %32449 = vmatpush3.bf16.msra.mxu0 %v35086_v52  ;;  %v35121_v51 = vld [vmem:[%s35829_s11 + $0x42a8] sm:$0xff]   ;;  %v35122_v52 = vld [vmem:[%s35829_s11 + $0x4270] sm:$0xff]  }
 0x8e0   : > { %v32150_v60 = vpop.f32.mrb[235].mxu0  ;;  %v32170_v63 = vadd.f32 %v32169_v61, %v32168_v57  ;;  %v32171_v1 = vpop.f32.mrb[234].mxu1  ;;  %32450 = vmatprep.subr.bf16.mxu0 %v35089_v59  ;;  %32471 = vmatpush3.bf16.msra.mxu1 %v35088_v58  ;;  %v35124_v58 = vld [vmem:[%s35829_s11 + $0x42f0] sm:$0xff]   ;;  %v35126_v61 = vld [vmem:[%s35829_s11 + $0x4278] sm:$0xff]  }
 0x8e1   : > { %v25793_v62 = vadd.f32 %v32148_v55, %v38285_v13  ;;  %v32172_v3 = vpop.f32.mrb[235].mxu1  ;;  %32472 = vmatprep.subr.bf16.mxu1 %v35091_v2  ;;  %v35097_v13 = vld [vmem:[%s35829_s11 + $0x4240] sm:$0xff]   ;;  %v35123_v55 = vld [vmem:[%s35829_s11 + $0x4230] sm:$0xff]   ;;  %v35129_v2 = vld [vmem:[%s35829_s11 + $0x42b8] sm:$0xff]  }
 0x8e2   : > { %v35125_v60 = vld [vmem:[%s35829_s11 + $0x42b0] sm:$0xff]  }
 0x8e3   : > { %v38323_v4 = vadd.f32 %v32170_v63, %v25793_v62  ;;  %32451 = vmatpush3.bf16.msra.mxu0 %v35090_v0  ;;  %v35127_v62 = vld [vmem:[%s35829_s11 + $0x4238] sm:$0xff]  }
 0x8e4   : > { %32452 = vmatprep.subr.bf16.mxu0 %v35093_v6  ;;  %32473 = vmatpush3.bf16.msra.mxu1 %v35092_v5  ;;  %v35128_v63 = vld [vmem:[%s35829_s11 + $0x42f8] sm:$0xff]  }
 0x8e5   : > { %32474 = vmatprep.subr.bf16.mxu1 %v35095_v8  ;;  %v383_v0 = vld [vmem:[%s35822_s13 + $0x210] sm:$0xff] }
 0x8e6   : > { %v1594_v1 = vrot.slane %v383_v0, %v35880_v42  ;;  %v1587_v3 = vcombine.high %v383_v0, %v383_v0  ;;  %v35166_v0 = vld [vmem:[%s35829_s11 + $0x44c0] sm:$0xff]  }
 0x8e7   : > { %32453 = vmatpush3.bf16.msra.mxu0 %v35094_v7  ;;  %v35132_v7 = vld [vmem:[%s35829_s11 + $0x4300] sm:$0xff]  }
 0x8e8   : > { %32482 = vmatprep.subr.bf16.mxu0 %v35097_v13  ;;  %32475 = vmatpush3.bf16.msra.mxu1 %v35096_v11  ;;  %v1602_v5 = vcombine.high %v1594_v1, %v1594_v1  ;;  %v1601_v6 = vrot.slane %v1587_v3, %v35880_v42  ;;  %v2272_v8 = vpack.c.bf16 %v1594_v1, %v1594_v1  ;;  %v35167_v3 = vld [vmem:[%s35829_s11 + $0x4480] sm:$0xff]  }
 0x8e9   : > { %32504 = vmatprep.subr.bf16.mxu1 %v35100_v18  ;;  %v35138_v18 = vld [vmem:[%s35829_s11 + $0x4388] sm:$0xff]  }
 0x8ea   : > { %26351 = vmatmul.mubr.bf16.vlgmr.msra.gmra.mrb[4].mxu0 %v2268_v17  ;;  %v2273_v10 = vpack.c.bf16 %v1602_v5, %v1602_v5  ;;  %v1603_v11 = vcombine.high %v1601_v6, %v1601_v6  ;;  %v2274_v13 = vpack.c.bf16 %v1601_v6, %v1601_v6  ;;  %v35137_v17 = vld [vmem:[%s35829_s11 + $0x43c8] sm:$0xff]  }
 0x8eb   : > { %32483 = vmatpush3.bf16.msra.mxu0 %v35099_v16  ;;  %26391 = vmatmul.mubr.bf16.vlgmr.msra.gmra.mrb[4].mxu1 %v2270_v22  ;;  %v35136_v16 = vld [vmem:[%s35829_s11 + $0x4308] sm:$0xff]   ;;  %v35142_v22 = vld [vmem:[%s35829_s11 + $0x4390] sm:$0xff]  }
 0x8ec   : > { %32484 = vmatprep.subr.bf16.mxu0 %v35102_v23  ;;  %32505 = vmatpush3.bf16.msra.mxu1 %v35101_v21  ;;  %v2275_v15 = vpack.c.bf16 %v1603_v11, %v1603_v11  ;;  %v35141_v21 = vld [vmem:[%s35829_s11 + $0x43d0] sm:$0xff]   ;;  %v35143_v23 = vld [vmem:[%s35829_s11 + $0x4358] sm:$0xff]   ;;  %v35168_v5 = vld [vmem:[%s35829_s11 + $0x4448] sm:$0xff]  }
 0x8ed   : > { %32506 = vmatprep.subr.bf16.mxu1 %v35104_v26  ;;  %26430 = vmatprep.mubr.bf16.mxu0 %v2273_v10  ;;  %v35146_v26 = vld [vmem:[%s35829_s11 + $0x4398] sm:$0xff]   ;;  %v35172_v10 = vld [vmem:[%s35829_s11 + $0x4450] sm:$0xff]  }
 0x8ee   : > { %26470 = vmatprep.mubr.bf16.mxu1 %v2275_v15  ;;  %v35173_v11 = vld [vmem:[%s35829_s11 + $0x4410] sm:$0xff]   ;;  %v35177_v15 = vld [vmem:[%s35829_s11 + $0x4418] sm:$0xff]  }
 0x8ef   : > { %32485 = vmatpush3.bf16.msra.mxu0 %v35103_v25  ;;  %v35145_v25 = vld [vmem:[%s35829_s11 + $0x43d8] sm:$0xff]  }
 0x8f0   : > { %32486 = vmatprep.subr.bf16.mxu0 %v35106_v28  ;;  %32507 = vmatpush3.bf16.msra.mxu1 %v35105_v27  ;;  %v35147_v27 = vld [vmem:[%s35829_s11 + $0x4360] sm:$0xff]  }
 0x8f1   : > { %32508 = vmatprep.subr.bf16.mxu1 %v35108_v30  ;;  %v35148_v28 = vld [vmem:[%s35829_s11 + $0x4320] sm:$0xff]  }
 0x8f2   : > { %v35150_v30 = vld [vmem:[%s35829_s11 + $0x43a0] sm:$0xff]  }
 0x8f3   : > { %32487 = vmatpush3.bf16.msra.mxu0 %v35107_v29  ;;  %v35149_v29 = vld [vmem:[%s35829_s11 + $0x43e0] sm:$0xff]  }
 0x8f4   : > { %32488 = vmatprep.subr.bf16.mxu0 %v35110_v32  ;;  %32509 = vmatpush3.bf16.msra.mxu1 %v35109_v31  ;;  %v35151_v31 = vld [vmem:[%s35829_s11 + $0x4368] sm:$0xff]  }
 0x8f5   : > { %32510 = vmatprep.subr.bf16.mxu1 %v35112_v34 }
 0x8f7   : > { %32489 = vmatpush3.bf16.msra.mxu0 %v35111_v33  ;;  %v35152_v33 = vld [vmem:[%s35829_s11 + $0x4328] sm:$0xff]  }
 0x8f8   : > { %32490 = vmatprep.subr.bf16.mxu0 %v35114_v36  ;;  %32511 = vmatpush3.bf16.msra.mxu1 %v35113_v35  ;;  %v35153_v35 = vld [vmem:[%s35829_s11 + $0x43e8] sm:$0xff]  }
 0x8f9   : > { %32512 = vmatprep.subr.bf16.mxu1 %v35116_v38 }
 0x8fb   : > { %32491 = vmatpush3.bf16.msra.mxu0 %v35115_v37 }
 0x8fc   : > { %32492 = vmatprep.subr.bf16.mxu0 %v35118_v40  ;;  %32513 = vmatpush3.bf16.msra.mxu1 %v35117_v39  ;;  %v35154_v39 = vld [vmem:[%s35829_s11 + $0x43a8] sm:$0xff]   ;;  %v35155_v40 = vld [vmem:[%s35829_s11 + $0x4370] sm:$0xff]  }
 0x8fd   : > { %v32190_v41 = vpop.f32.mrb[236].mxu0  ;;  %32514 = vmatprep.subr.bf16.mxu1 %v35120_v45 }
 0x8fe   : > { %v32191_v44 = vpop.f32.mrb[237].mxu0  ;;  %v32212_v48 = vpop.f32.mrb[236].mxu1 }
 0x8ff   : > { %v32192_v46 = vadd.f32 %v32191_v44, %v32190_v41  ;;  %v32193_v47 = vpop.f32.mrb[238].mxu0  ;;  %v32213_v50 = vpop.f32.mrb[237].mxu1  ;;  %32493 = vmatpush3.bf16.msra.mxu0 %v35119_v43 }
 0x900   : > { %v32194_v49 = vpop.f32.mrb[239].mxu0  ;;  %v32214_v54 = vadd.f32 %v32213_v50, %v32212_v48  ;;  %v32215_v56 = vpop.f32.mrb[238].mxu1  ;;  %32494 = vmatprep.subr.bf16.mxu0 %v35122_v52  ;;  %32515 = vmatpush3.bf16.msra.mxu1 %v35121_v51  ;;  %v35157_v48 = vld [vmem:[%s35829_s11 + $0x43f0] sm:$0xff]   ;;  %v35159_v52 = vld [vmem:[%s35829_s11 + $0x4378] sm:$0xff]  }
 0x901   : > { %v25873_v53 = vadd.f32 %v32192_v46, %v38323_v4  ;;  %v32216_v59 = vpop.f32.mrb[239].mxu1  ;;  %32516 = vmatprep.subr.bf16.mxu1 %v35124_v58  ;;  %v35130_v4 = vld [vmem:[%s35829_s11 + $0x4340] sm:$0xff]   ;;  %v35156_v46 = vld [vmem:[%s35829_s11 + $0x4330] sm:$0xff]  }
 0x902   : > { %v35158_v51 = vld [vmem:[%s35829_s11 + $0x43b0] sm:$0xff]   ;;  %v35163_v59 = vld [vmem:[%s35829_s11 + $0x4440] sm:$0xff]  }
 0x903   : > { %v38360_v57 = vadd.f32 %v32214_v54, %v25873_v53  ;;  %32495 = vmatpush3.bf16.msra.mxu0 %v35123_v55  ;;  %v35160_v53 = vld [vmem:[%s35829_s11 + $0x4338] sm:$0xff]   ;;  %v384_v55 = vld [vmem:[%s35822_s13 + $0x218] sm:$0xff] }
 0x904   : > { %32496 = vmatprep.subr.bf16.mxu0 %v35126_v61  ;;  %32517 = vmatpush3.bf16.msra.mxu1 %v35125_v60  ;;  %v35161_v54 = vld [vmem:[%s35829_s11 + $0x43f8] sm:$0xff]   ;;  %v1611_v56 = vrot.slane %v384_v55, %v35880_v42  ;;  %v1604_v58 = vcombine.high %v384_v55, %v384_v55  ;;  %v35199_v55 = vld [vmem:[%s35829_s11 + $0x45c0] sm:$0xff]  }
 0x905   : > { %32518 = vmatprep.subr.bf16.mxu1 %v35128_v63 }
 0x906   : > { %v1619_v60 = vcombine.high %v1611_v56, %v1611_v56  ;;  %v1618_v61 = vrot.slane %v1604_v58, %v35880_v42  ;;  %v2276_v63 = vpack.c.bf16 %v1611_v56, %v1611_v56  ;;  %v35200_v58 = vld [vmem:[%s35829_s11 + $0x4580] sm:$0xff]  }
 0x907   : > { %32497 = vmatpush3.bf16.msra.mxu0 %v35127_v62  ;;  %v35165_v62 = vld [vmem:[%s35829_s11 + $0x4400] sm:$0xff]  }
 0x908   : > { %32526 = vmatprep.subr.bf16.mxu0 %v35130_v4  ;;  %32519 = vmatpush3.bf16.msra.mxu1 %v35129_v2  ;;  %v2277_v1 = vpack.c.bf16 %v1619_v60, %v1619_v60  ;;  %v1620_v2 = vcombine.high %v1618_v61, %v1618_v61  ;;  %v2278_v4 = vpack.c.bf16 %v1618_v61, %v1618_v61  ;;  %v35201_v60 = vld [vmem:[%s35829_s11 + $0x4548] sm:$0xff]  }
 0x909   : > { %32548 = vmatprep.subr.bf16.mxu1 %v35133_v9  ;;  %v35171_v9 = vld [vmem:[%s35829_s11 + $0x4488] sm:$0xff]  }
 0x90a   : > { %26431 = vmatmul.mubr.bf16.vlgmr.msra.gmra.mrb[8].mxu0 %v2272_v8  ;;  %v2279_v6 = vpack.c.bf16 %v1620_v2, %v1620_v2  ;;  %v35170_v8 = vld [vmem:[%s35829_s11 + $0x44c8] sm:$0xff]   ;;  %v35206_v2 = vld [vmem:[%s35829_s11 + $0x4510] sm:$0xff]  }
 0x90b   : > { %32527 = vmatpush3.bf16.msra.mxu0 %v35132_v7  ;;  %26471 = vmatmul.mubr.bf16.vlgmr.msra.gmra.mrb[8].mxu1 %v2274_v13  ;;  %v35169_v7 = vld [vmem:[%s35829_s11 + $0x4408] sm:$0xff]   ;;  %v35175_v13 = vld [vmem:[%s35829_s11 + $0x4490] sm:$0xff]  }
 0x90c   : > { %32528 = vmatprep.subr.bf16.mxu0 %v35135_v14  ;;  %32549 = vmatpush3.bf16.msra.mxu1 %v35134_v12  ;;  %v35174_v12 = vld [vmem:[%s35829_s11 + $0x44d0] sm:$0xff]   ;;  %v35176_v14 = vld [vmem:[%s35829_s11 + $0x4458] sm:$0xff]  }
 0x90d   : > { %32550 = vmatprep.subr.bf16.mxu1 %v35137_v17  ;;  %26510 = vmatprep.mubr.bf16.mxu0 %v2277_v1  ;;  %v35179_v17 = vld [vmem:[%s35829_s11 + $0x4498] sm:$0xff]   ;;  %v35205_v1 = vld [vmem:[%s35829_s11 + $0x4550] sm:$0xff]  }
 0x90e   : > { %26550 = vmatprep.mubr.bf16.mxu1 %v2279_v6  ;;  %v35210_v6 = vld [vmem:[%s35829_s11 + $0x4518] sm:$0xff]  }
 0x90f   : > { %32529 = vmatpush3.bf16.msra.mxu0 %v35136_v16  ;;  %v35178_v16 = vld [vmem:[%s35829_s11 + $0x44d8] sm:$0xff]  }
 0x910   : > { %32530 = vmatprep.subr.bf16.mxu0 %v35139_v19  ;;  %32551 = vmatpush3.bf16.msra.mxu1 %v35138_v18  ;;  %v35180_v18 = vld [vmem:[%s35829_s11 + $0x4460] sm:$0xff]  }
 0x911   : > { %32552 = vmatprep.subr.bf16.mxu1 %v35141_v21  ;;  %v35181_v19 = vld [vmem:[%s35829_s11 + $0x4420] sm:$0xff]  }
 0x912   : > { %v35183_v21 = vld [vmem:[%s35829_s11 + $0x44a0] sm:$0xff]  }
 0x913   : > { %32531 = vmatpush3.bf16.msra.mxu0 %v35140_v20  ;;  %v35182_v20 = vld [vmem:[%s35829_s11 + $0x44e0] sm:$0xff]  }
 0x914   : > { %32532 = vmatprep.subr.bf16.mxu0 %v35143_v23  ;;  %32553 = vmatpush3.bf16.msra.mxu1 %v35142_v22  ;;  %v35184_v22 = vld [vmem:[%s35829_s11 + $0x4468] sm:$0xff]  }
 0x915   : > { %32554 = vmatprep.subr.bf16.mxu1 %v35145_v25 }
 0x917   : > { %32533 = vmatpush3.bf16.msra.mxu0 %v35144_v24  ;;  %v35185_v24 = vld [vmem:[%s35829_s11 + $0x4428] sm:$0xff]  }
 0x918   : > { %32534 = vmatprep.subr.bf16.mxu0 %v35147_v27  ;;  %32555 = vmatpush3.bf16.msra.mxu1 %v35146_v26  ;;  %v35186_v26 = vld [vmem:[%s35829_s11 + $0x44e8] sm:$0xff]  }
 0x919   : > { %32556 = vmatprep.subr.bf16.mxu1 %v35149_v29 }
 0x91b   : > { %32535 = vmatpush3.bf16.msra.mxu0 %v35148_v28 }
 0x91c   : > { %32536 = vmatprep.subr.bf16.mxu0 %v35151_v31  ;;  %32557 = vmatpush3.bf16.msra.mxu1 %v35150_v30  ;;  %v35187_v30 = vld [vmem:[%s35829_s11 + $0x44a8] sm:$0xff]   ;;  %v35188_v31 = vld [vmem:[%s35829_s11 + $0x4470] sm:$0xff]  }
 0x91d   : > { %v32234_v32 = vpop.f32.mrb[240].mxu0  ;;  %32558 = vmatprep.subr.bf16.mxu1 %v35153_v35 }
 0x91e   : > { %v32235_v34 = vpop.f32.mrb[241].mxu0  ;;  %v32256_v38 = vpop.f32.mrb[240].mxu1 }
 0x91f   : > { %v32236_v36 = vadd.f32 %v32235_v34, %v32234_v32  ;;  %v32237_v37 = vpop.f32.mrb[242].mxu0  ;;  %v32257_v43 = vpop.f32.mrb[241].mxu1  ;;  %32537 = vmatpush3.bf16.msra.mxu0 %v35152_v33 }
 0x920   : > { %v32238_v41 = vpop.f32.mrb[243].mxu0  ;;  %v32258_v45 = vadd.f32 %v32257_v43, %v32256_v38  ;;  %v32259_v47 = vpop.f32.mrb[242].mxu1  ;;  %32538 = vmatprep.subr.bf16.mxu0 %v35155_v40  ;;  %32559 = vmatpush3.bf16.msra.mxu1 %v35154_v39  ;;  %v35190_v38 = vld [vmem:[%s35829_s11 + $0x44f0] sm:$0xff]   ;;  %v35192_v43 = vld [vmem:[%s35829_s11 + $0x4478] sm:$0xff]  }
 0x921   : > { %v25953_v44 = vadd.f32 %v32236_v36, %v38360_v57  ;;  %v32260_v49 = vpop.f32.mrb[243].mxu1  ;;  %32560 = vmatprep.subr.bf16.mxu1 %v35157_v48  ;;  %v35162_v57 = vld [vmem:[%s35829_s11 + $0x43b8] sm:$0xff]   ;;  %v35189_v36 = vld [vmem:[%s35829_s11 + $0x4430] sm:$0xff]  }
 0x922   : > { %v35191_v41 = vld [vmem:[%s35829_s11 + $0x44b0] sm:$0xff]   ;;  %v35195_v48 = vld [vmem:[%s35829_s11 + $0x44b8] sm:$0xff]  }
 0x923   : > { %v38399_v50 = vadd.f32 %v32258_v45, %v25953_v44  ;;  %32539 = vmatpush3.bf16.msra.mxu0 %v35156_v46  ;;  %v35193_v44 = vld [vmem:[%s35829_s11 + $0x4438] sm:$0xff]  }
 0x924   : > { %32540 = vmatprep.subr.bf16.mxu0 %v35159_v52  ;;  %32561 = vmatpush3.bf16.msra.mxu1 %v35158_v51  ;;  %v35194_v45 = vld [vmem:[%s35829_s11 + $0x44f8] sm:$0xff]  }
 0x925   : > { %32562 = vmatprep.subr.bf16.mxu1 %v35161_v54  ;;  %v385_v46 = vld [vmem:[%s35822_s13 + $0x220] sm:$0xff] }
 0x926   : > { %v1628_v47 = vrot.slane %v385_v46, %v35880_v42  ;;  %v1621_v49 = vcombine.high %v385_v46, %v385_v46  ;;  %v35232_v46 = vld [vmem:[%s35829_s11 + $0x46c0] sm:$0xff]  }
 0x927   : > { %32541 = vmatpush3.bf16.msra.mxu0 %v35160_v53  ;;  %v35198_v53 = vld [vmem:[%s35829_s11 + $0x4500] sm:$0xff]  }
 0x928   : > { %32570 = vmatprep.subr.bf16.mxu0 %v35163_v59  ;;  %32563 = vmatpush3.bf16.msra.mxu1 %v35162_v57  ;;  %v1636_v51 = vcombine.high %v1628_v47, %v1628_v47  ;;  %v1635_v52 = vrot.slane %v1621_v49, %v35880_v42  ;;  %v2280_v54 = vpack.c.bf16 %v1628_v47, %v1628_v47  ;;  %v35233_v49 = vld [vmem:[%s35829_s11 + $0x4680] sm:$0xff]  }
 0x929   : > { %32592 = vmatprep.subr.bf16.mxu1 %v35166_v0  ;;  %v35204_v0 = vld [vmem:[%s35829_s11 + $0x4588] sm:$0xff]  }
 0x92a   : > { %26511 = vmatmul.mubr.bf16.vlgmr.msra.gmra.mrb[12].mxu0 %v2276_v63  ;;  %v2281_v56 = vpack.c.bf16 %v1636_v51, %v1636_v51  ;;  %v1637_v57 = vcombine.high %v1635_v52, %v1635_v52  ;;  %v2282_v59 = vpack.c.bf16 %v1635_v52, %v1635_v52  ;;  %v35203_v63 = vld [vmem:[%s35829_s11 + $0x45c8] sm:$0xff]  }
 0x92b   : > { %32571 = vmatpush3.bf16.msra.mxu0 %v35165_v62  ;;  %26551 = vmatmul.mubr.bf16.vlgmr.msra.gmra.mrb[12].mxu1 %v2278_v4  ;;  %v35202_v62 = vld [vmem:[%s35829_s11 + $0x4508] sm:$0xff]   ;;  %v35208_v4 = vld [vmem:[%s35829_s11 + $0x4590] sm:$0xff]  }
 0x92c   : > { %32572 = vmatprep.subr.bf16.mxu0 %v35168_v5  ;;  %32593 = vmatpush3.bf16.msra.mxu1 %v35167_v3  ;;  %v2283_v61 = vpack.c.bf16 %v1637_v57, %v1637_v57  ;;  %v35207_v3 = vld [vmem:[%s35829_s11 + $0x45d0] sm:$0xff]   ;;  %v35209_v5 = vld [vmem:[%s35829_s11 + $0x4558] sm:$0xff]   ;;  %v35234_v51 = vld [vmem:[%s35829_s11 + $0x4648] sm:$0xff]  }
 0x92d   : > { %32594 = vmatprep.subr.bf16.mxu1 %v35170_v8  ;;  %26590 = vmatprep.mubr.bf16.mxu0 %v2281_v56  ;;  %v35212_v8 = vld [vmem:[%s35829_s11 + $0x4598] sm:$0xff]   ;;  %v35238_v56 = vld [vmem:[%s35829_s11 + $0x4650] sm:$0xff]  }
 0x92e   : > { %26630 = vmatprep.mubr.bf16.mxu1 %v2283_v61  ;;  %v35239_v57 = vld [vmem:[%s35829_s11 + $0x4610] sm:$0xff]   ;;  %v35243_v61 = vld [vmem:[%s35829_s11 + $0x4618] sm:$0xff]  }
 0x92f   : > { %32573 = vmatpush3.bf16.msra.mxu0 %v35169_v7  ;;  %v35211_v7 = vld [vmem:[%s35829_s11 + $0x45d8] sm:$0xff]  }
 0x930   : > { %32574 = vmatprep.subr.bf16.mxu0 %v35172_v10  ;;  %32595 = vmatpush3.bf16.msra.mxu1 %v35171_v9  ;;  %v35213_v9 = vld [vmem:[%s35829_s11 + $0x4560] sm:$0xff]  }
 0x931   : > { %32596 = vmatprep.subr.bf16.mxu1 %v35174_v12  ;;  %v35214_v10 = vld [vmem:[%s35829_s11 + $0x4520] sm:$0xff]  }
 0x932   : > { %v35216_v12 = vld [vmem:[%s35829_s11 + $0x45a0] sm:$0xff]  }
 0x933   : > { %32575 = vmatpush3.bf16.msra.mxu0 %v35173_v11  ;;  %v35215_v11 = vld [vmem:[%s35829_s11 + $0x45e0] sm:$0xff]  }
 0x934   : > { %32576 = vmatprep.subr.bf16.mxu0 %v35176_v14  ;;  %32597 = vmatpush3.bf16.msra.mxu1 %v35175_v13  ;;  %v35217_v13 = vld [vmem:[%s35829_s11 + $0x4568] sm:$0xff]  }
 0x935   : > { %32598 = vmatprep.subr.bf16.mxu1 %v35178_v16 }
 0x937   : > { %32577 = vmatpush3.bf16.msra.mxu0 %v35177_v15  ;;  %v35218_v15 = vld [vmem:[%s35829_s11 + $0x4528] sm:$0xff]  }
 0x938   : > { %32578 = vmatprep.subr.bf16.mxu0 %v35180_v18  ;;  %32599 = vmatpush3.bf16.msra.mxu1 %v35179_v17  ;;  %v35219_v17 = vld [vmem:[%s35829_s11 + $0x45e8] sm:$0xff]  }
 0x939   : > { %32600 = vmatprep.subr.bf16.mxu1 %v35182_v20 }
 0x93b   : > { %32579 = vmatpush3.bf16.msra.mxu0 %v35181_v19 }
 0x93c   : > { %32580 = vmatprep.subr.bf16.mxu0 %v35184_v22  ;;  %32601 = vmatpush3.bf16.msra.mxu1 %v35183_v21 }
 0x93d   : > { %v32278_v23 = vpop.f32.mrb[244].mxu0  ;;  %32602 = vmatprep.subr.bf16.mxu1 %v35186_v26 }
 0x93e   : > { %v32279_v25 = vpop.f32.mrb[245].mxu0  ;;  %v32300_v29 = vpop.f32.mrb[244].mxu1 }
 0x93f   : > { %v32280_v27 = vadd.f32 %v32279_v25, %v32278_v23  ;;  %v32281_v28 = vpop.f32.mrb[246].mxu0  ;;  %v32301_v33 = vpop.f32.mrb[245].mxu1  ;;  %32581 = vmatpush3.bf16.msra.mxu0 %v35185_v24  ;;  %v35220_v23 = vld [vmem:[%s35829_s11 + $0x45a8] sm:$0xff]   ;;  %v35221_v24 = vld [vmem:[%s35829_s11 + $0x4570] sm:$0xff]  }
 0x940   : > { %v32282_v32 = vpop.f32.mrb[247].mxu0  ;;  %v32302_v35 = vadd.f32 %v32301_v33, %v32300_v29  ;;  %v32303_v37 = vpop.f32.mrb[246].mxu1  ;;  %32582 = vmatprep.subr.bf16.mxu0 %v35188_v31  ;;  %32603 = vmatpush3.bf16.msra.mxu1 %v35187_v30  ;;  %v35223_v30 = vld [vmem:[%s35829_s11 + $0x45f0] sm:$0xff]   ;;  %v35225_v33 = vld [vmem:[%s35829_s11 + $0x4578] sm:$0xff]  }
 0x941   : > { %v26033_v34 = vadd.f32 %v32280_v27, %v38399_v50  ;;  %v32304_v39 = vpop.f32.mrb[247].mxu1  ;;  %32604 = vmatprep.subr.bf16.mxu1 %v35190_v38  ;;  %v35196_v50 = vld [vmem:[%s35829_s11 + $0x4540] sm:$0xff]   ;;  %v35222_v27 = vld [vmem:[%s35829_s11 + $0x4530] sm:$0xff]   ;;  %v35228_v38 = vld [vmem:[%s35829_s11 + $0x45b8] sm:$0xff]  }
 0x942   : > { %v35224_v32 = vld [vmem:[%s35829_s11 + $0x45b0] sm:$0xff]  }
 0x943   : > { %v38437_v40 = vadd.f32 %v32302_v35, %v26033_v34  ;;  %32583 = vmatpush3.bf16.msra.mxu0 %v35189_v36  ;;  %v35226_v34 = vld [vmem:[%s35829_s11 + $0x4538] sm:$0xff]  }
 0x944   : > { %32584 = vmatprep.subr.bf16.mxu0 %v35192_v43  ;;  %32605 = vmatpush3.bf16.msra.mxu1 %v35191_v41  ;;  %v35227_v35 = vld [vmem:[%s35829_s11 + $0x45f8] sm:$0xff]  }
 0x945   : > { %32606 = vmatprep.subr.bf16.mxu1 %v35194_v45  ;;  %v386_v36 = vld [vmem:[%s35822_s13 + $0x228] sm:$0xff] }
 0x946   : > { %v1645_v37 = vrot.slane %v386_v36, %v35880_v42  ;;  %v1638_v39 = vcombine.high %v386_v36, %v386_v36  ;;  %v35265_v36 = vld [vmem:[%s35829_s11 + $0x47c0] sm:$0xff]  }
 0x947   : > { %32585 = vmatpush3.bf16.msra.mxu0 %v35193_v44  ;;  %v35231_v44 = vld [vmem:[%s35829_s11 + $0x4600] sm:$0xff]  }
 0x948   : > { %32614 = vmatprep.subr.bf16.mxu0 %v35196_v50  ;;  %32607 = vmatpush3.bf16.msra.mxu1 %v35195_v48  ;;  %v1653_v41 = vcombine.high %v1645_v37, %v1645_v37  ;;  %v1652_v43 = vrot.slane %v1638_v39, %v35880_v42  ;;  %v2284_v45 = vpack.c.bf16 %v1645_v37, %v1645_v37  ;;  %v35266_v39 = vld [vmem:[%s35829_s11 + $0x4780] sm:$0xff]  }
 0x949   : > { %32636 = vmatprep.subr.bf16.mxu1 %v35199_v55  ;;  %v35237_v55 = vld [vmem:[%s35829_s11 + $0x4688] sm:$0xff]  }
 0x94a   : > { %26591 = vmatmul.mubr.bf16.vlgmr.msra.gmra.mrb[16].mxu0 %v2280_v54  ;;  %v2285_v47 = vpack.c.bf16 %v1653_v41, %v1653_v41  ;;  %v1654_v48 = vcombine.high %v1652_v43, %v1652_v43  ;;  %v2286_v50 = vpack.c.bf16 %v1652_v43, %v1652_v43  ;;  %v35236_v54 = vld [vmem:[%s35829_s11 + $0x46c8] sm:$0xff]  }
 0x94b   : > { %32615 = vmatpush3.bf16.msra.mxu0 %v35198_v53  ;;  %26631 = vmatmul.mubr.bf16.vlgmr.msra.gmra.mrb[16].mxu1 %v2282_v59  ;;  %v35235_v53 = vld [vmem:[%s35829_s11 + $0x4608] sm:$0xff]   ;;  %v35241_v59 = vld [vmem:[%s35829_s11 + $0x4690] sm:$0xff]  }
 0x94c   : > { %32616 = vmatprep.subr.bf16.mxu0 %v35201_v60  ;;  %32637 = vmatpush3.bf16.msra.mxu1 %v35200_v58  ;;  %v2287_v52 = vpack.c.bf16 %v1654_v48, %v1654_v48  ;;  %v35240_v58 = vld [vmem:[%s35829_s11 + $0x46d0] sm:$0xff]   ;;  %v35242_v60 = vld [vmem:[%s35829_s11 + $0x4658] sm:$0xff]   ;;  %v35267_v41 = vld [vmem:[%s35829_s11 + $0x4748] sm:$0xff]  }
 0x94d   : > { %32638 = vmatprep.subr.bf16.mxu1 %v35203_v63  ;;  %26670 = vmatprep.mubr.bf16.mxu0 %v2285_v47  ;;  %v35245_v63 = vld [vmem:[%s35829_s11 + $0x4698] sm:$0xff]   ;;  %v35271_v47 = vld [vmem:[%s35829_s11 + $0x4750] sm:$0xff]  }
 0x94e   : > { %26710 = vmatprep.mubr.bf16.mxu1 %v2287_v52  ;;  %v35272_v48 = vld [vmem:[%s35829_s11 + $0x4710] sm:$0xff]   ;;  %v35276_v52 = vld [vmem:[%s35829_s11 + $0x4718] sm:$0xff]  }
 0x94f   : > { %32617 = vmatpush3.bf16.msra.mxu0 %v35202_v62  ;;  %v35244_v62 = vld [vmem:[%s35829_s11 + $0x46d8] sm:$0xff]  }
 0x950   : > { %32618 = vmatprep.subr.bf16.mxu0 %v35205_v1  ;;  %32639 = vmatpush3.bf16.msra.mxu1 %v35204_v0  ;;  %v35246_v0 = vld [vmem:[%s35829_s11 + $0x4660] sm:$0xff]  }
 0x951   : > { %32640 = vmatprep.subr.bf16.mxu1 %v35207_v3  ;;  %v35247_v1 = vld [vmem:[%s35829_s11 + $0x4620] sm:$0xff]  }
 0x952   : > { %v35249_v3 = vld [vmem:[%s35829_s11 + $0x46a0] sm:$0xff]  }
 0x953   : > { %32619 = vmatpush3.bf16.msra.mxu0 %v35206_v2  ;;  %v35248_v2 = vld [vmem:[%s35829_s11 + $0x46e0] sm:$0xff]  }
 0x954   : > { %32620 = vmatprep.subr.bf16.mxu0 %v35209_v5  ;;  %32641 = vmatpush3.bf16.msra.mxu1 %v35208_v4  ;;  %v35250_v4 = vld [vmem:[%s35829_s11 + $0x4668] sm:$0xff]  }
 0x955   : > { %32642 = vmatprep.subr.bf16.mxu1 %v35211_v7 }
 0x957   : > { %32621 = vmatpush3.bf16.msra.mxu0 %v35210_v6  ;;  %v35251_v6 = vld [vmem:[%s35829_s11 + $0x4628] sm:$0xff]  }
 0x958   : > { %32622 = vmatprep.subr.bf16.mxu0 %v35213_v9  ;;  %32643 = vmatpush3.bf16.msra.mxu1 %v35212_v8  ;;  %v35252_v8 = vld [vmem:[%s35829_s11 + $0x46e8] sm:$0xff]  }
 0x959   : > { %32644 = vmatprep.subr.bf16.mxu1 %v35215_v11 }
 0x95b   : > { %32623 = vmatpush3.bf16.msra.mxu0 %v35214_v10 }
 0x95c   : > { %32624 = vmatprep.subr.bf16.mxu0 %v35217_v13  ;;  %32645 = vmatpush3.bf16.msra.mxu1 %v35216_v12  ;;  %v35253_v12 = vld [vmem:[%s35829_s11 + $0x46a8] sm:$0xff]   ;;  %v35254_v13 = vld [vmem:[%s35829_s11 + $0x4670] sm:$0xff]  }
 0x95d   : > { %v32322_v14 = vpop.f32.mrb[248].mxu0  ;;  %32646 = vmatprep.subr.bf16.mxu1 %v35219_v17 }
 0x95e   : > { %v32323_v16 = vpop.f32.mrb[249].mxu0  ;;  %v32344_v20 = vpop.f32.mrb[248].mxu1 }
 0x95f   : > { %v32324_v18 = vadd.f32 %v32323_v16, %v32322_v14  ;;  %v32325_v19 = vpop.f32.mrb[250].mxu0  ;;  %v32345_v22 = vpop.f32.mrb[249].mxu1  ;;  %32625 = vmatpush3.bf16.msra.mxu0 %v35218_v15 }
 0x960   : > { %v32326_v21 = vpop.f32.mrb[251].mxu0  ;;  %v32346_v26 = vadd.f32 %v32345_v22, %v32344_v20  ;;  %v32347_v28 = vpop.f32.mrb[250].mxu1  ;;  %32626 = vmatprep.subr.bf16.mxu0 %v35221_v24  ;;  %32647 = vmatpush3.bf16.msra.mxu1 %v35220_v23  ;;  %v35256_v20 = vld [vmem:[%s35829_s11 + $0x46f0] sm:$0xff]   ;;  %v35258_v24 = vld [vmem:[%s35829_s11 + $0x4678] sm:$0xff]  }
 0x961   : > { %v26113_v25 = vadd.f32 %v32324_v18, %v38437_v40  ;;  %v32348_v31 = vpop.f32.mrb[251].mxu1  ;;  %32648 = vmatprep.subr.bf16.mxu1 %v35223_v30  ;;  %v35229_v40 = vld [vmem:[%s35829_s11 + $0x4640] sm:$0xff]   ;;  %v35255_v18 = vld [vmem:[%s35829_s11 + $0x4630] sm:$0xff]  }
 0x962   : > { %v35257_v23 = vld [vmem:[%s35829_s11 + $0x46b0] sm:$0xff]   ;;  %v35262_v31 = vld [vmem:[%s35829_s11 + $0x4740] sm:$0xff]  }
 0x963   : > { %v38474_v29 = vadd.f32 %v32346_v26, %v26113_v25  ;;  %32627 = vmatpush3.bf16.msra.mxu0 %v35222_v27  ;;  %v35259_v25 = vld [vmem:[%s35829_s11 + $0x4638] sm:$0xff]  }
 0x964   : > { %32628 = vmatprep.subr.bf16.mxu0 %v35225_v33  ;;  %32649 = vmatpush3.bf16.msra.mxu1 %v35224_v32  ;;  %v35260_v26 = vld [vmem:[%s35829_s11 + $0x46f8] sm:$0xff]  }
 0x965   : > { %32650 = vmatprep.subr.bf16.mxu1 %v35227_v35  ;;  %v387_v27 = vld [vmem:[%s35822_s13 + $0x230] sm:$0xff] }
 0x966   : > { %v1662_v28 = vrot.slane %v387_v27, %v35880_v42  ;;  %v1655_v30 = vcombine.high %v387_v27, %v387_v27  ;;  %v35298_v27 = vld [vmem:[%s35829_s11 + $0x48c0] sm:$0xff]  }
 0x967   : > { %32629 = vmatpush3.bf16.msra.mxu0 %v35226_v34  ;;  %v35264_v34 = vld [vmem:[%s35829_s11 + $0x4700] sm:$0xff]  }
 0x968   : > { %32658 = vmatprep.subr.bf16.mxu0 %v35229_v40  ;;  %32651 = vmatpush3.bf16.msra.mxu1 %v35228_v38  ;;  %v1670_v32 = vcombine.high %v1662_v28, %v1662_v28  ;;  %v1669_v33 = vrot.slane %v1655_v30, %v35880_v42  ;;  %v2288_v35 = vpack.c.bf16 %v1662_v28, %v1662_v28  ;;  %v35299_v30 = vld [vmem:[%s35829_s11 + $0x4880] sm:$0xff]  }
 0x969   : > { %32680 = vmatprep.subr.bf16.mxu1 %v35232_v46  ;;  %v35270_v46 = vld [vmem:[%s35829_s11 + $0x4788] sm:$0xff]  }
 0x96a   : > { %26671 = vmatmul.mubr.bf16.vlgmr.msra.gmra.mrb[20].mxu0 %v2284_v45  ;;  %v2289_v37 = vpack.c.bf16 %v1670_v32, %v1670_v32  ;;  %v1671_v38 = vcombine.high %v1669_v33, %v1669_v33  ;;  %v2290_v40 = vpack.c.bf16 %v1669_v33, %v1669_v33  ;;  %v35269_v45 = vld [vmem:[%s35829_s11 + $0x47c8] sm:$0xff]  }
 0x96b   : > { %32659 = vmatpush3.bf16.msra.mxu0 %v35231_v44  ;;  %26711 = vmatmul.mubr.bf16.vlgmr.msra.gmra.mrb[20].mxu1 %v2286_v50  ;;  %v35268_v44 = vld [vmem:[%s35829_s11 + $0x4708] sm:$0xff]   ;;  %v35274_v50 = vld [vmem:[%s35829_s11 + $0x4790] sm:$0xff]  }
 0x96c   : > { %32660 = vmatprep.subr.bf16.mxu0 %v35234_v51  ;;  %32681 = vmatpush3.bf16.msra.mxu1 %v35233_v49  ;;  %v2291_v43 = vpack.c.bf16 %v1671_v38, %v1671_v38  ;;  %v35273_v49 = vld [vmem:[%s35829_s11 + $0x47d0] sm:$0xff]   ;;  %v35275_v51 = vld [vmem:[%s35829_s11 + $0x4758] sm:$0xff]   ;;  %v35300_v32 = vld [vmem:[%s35829_s11 + $0x4848] sm:$0xff]  }
 0x96d   : > { %32682 = vmatprep.subr.bf16.mxu1 %v35236_v54  ;;  %26750 = vmatprep.mubr.bf16.mxu0 %v2289_v37  ;;  %v35278_v54 = vld [vmem:[%s35829_s11 + $0x4798] sm:$0xff]   ;;  %v35304_v37 = vld [vmem:[%s35829_s11 + $0x4850] sm:$0xff]  }
 0x96e   : > { %26790 = vmatprep.mubr.bf16.mxu1 %v2291_v43  ;;  %v35305_v38 = vld [vmem:[%s35829_s11 + $0x4810] sm:$0xff]   ;;  %v35309_v43 = vld [vmem:[%s35829_s11 + $0x4818] sm:$0xff]  }
 0x96f   : > { %32661 = vmatpush3.bf16.msra.mxu0 %v35235_v53  ;;  %v35277_v53 = vld [vmem:[%s35829_s11 + $0x47d8] sm:$0xff]  }
 0x970   : > { %32662 = vmatprep.subr.bf16.mxu0 %v35238_v56  ;;  %32683 = vmatpush3.bf16.msra.mxu1 %v35237_v55  ;;  %v35279_v55 = vld [vmem:[%s35829_s11 + $0x4760] sm:$0xff]  }
 0x971   : > { %32684 = vmatprep.subr.bf16.mxu1 %v35240_v58  ;;  %v35280_v56 = vld [vmem:[%s35829_s11 + $0x4720] sm:$0xff]  }
 0x972   : > { %v35282_v58 = vld [vmem:[%s35829_s11 + $0x47a0] sm:$0xff]  }
 0x973   : > { %32663 = vmatpush3.bf16.msra.mxu0 %v35239_v57  ;;  %v35281_v57 = vld [vmem:[%s35829_s11 + $0x47e0] sm:$0xff]  }
 0x974   : > { %32664 = vmatprep.subr.bf16.mxu0 %v35242_v60  ;;  %32685 = vmatpush3.bf16.msra.mxu1 %v35241_v59  ;;  %v35283_v59 = vld [vmem:[%s35829_s11 + $0x4768] sm:$0xff]  }
 0x975   : > { %32686 = vmatprep.subr.bf16.mxu1 %v35244_v62 }
 0x977   : > { %32665 = vmatpush3.bf16.msra.mxu0 %v35243_v61  ;;  %v35284_v61 = vld [vmem:[%s35829_s11 + $0x4728] sm:$0xff]  }
 0x978   : > { %32666 = vmatprep.subr.bf16.mxu0 %v35246_v0  ;;  %32687 = vmatpush3.bf16.msra.mxu1 %v35245_v63  ;;  %v35285_v63 = vld [vmem:[%s35829_s11 + $0x47e8] sm:$0xff]  }
 0x979   : > { %32688 = vmatprep.subr.bf16.mxu1 %v35248_v2 }
 0x97b   : > { %32667 = vmatpush3.bf16.msra.mxu0 %v35247_v1 }
 0x97c   : > { %32668 = vmatprep.subr.bf16.mxu0 %v35250_v4  ;;  %32689 = vmatpush3.bf16.msra.mxu1 %v35249_v3  ;;  %v35286_v3 = vld [vmem:[%s35829_s11 + $0x47a8] sm:$0xff]   ;;  %v35287_v4 = vld [vmem:[%s35829_s11 + $0x4770] sm:$0xff]  }
 0x97d   : > { %v32366_v5 = vpop.f32.mrb[252].mxu0  ;;  %32690 = vmatprep.subr.bf16.mxu1 %v35252_v8 }
 0x97e   : > { %v32367_v7 = vpop.f32.mrb[253].mxu0  ;;  %v32388_v11 = vpop.f32.mrb[252].mxu1 }
 0x97f   : > { %v32368_v9 = vadd.f32 %v32367_v7, %v32366_v5  ;;  %v32369_v10 = vpop.f32.mrb[254].mxu0  ;;  %v32389_v15 = vpop.f32.mrb[253].mxu1  ;;  %32669 = vmatpush3.bf16.msra.mxu0 %v35251_v6 }
 0x980   : > { %v32370_v14 = vpop.f32.mrb[255].mxu0  ;;  %v32390_v17 = vadd.f32 %v32389_v15, %v32388_v11  ;;  %v32391_v19 = vpop.f32.mrb[254].mxu1  ;;  %32670 = vmatprep.subr.bf16.mxu0 %v35254_v13  ;;  %32691 = vmatpush3.bf16.msra.mxu1 %v35253_v12  ;;  %v35289_v11 = vld [vmem:[%s35829_s11 + $0x47f0] sm:$0xff]   ;;  %v35291_v15 = vld [vmem:[%s35829_s11 + $0x4778] sm:$0xff]  }
 0x981   : > { %v26193_v16 = vadd.f32 %v32368_v9, %v38474_v29  ;;  %v32392_v21 = vpop.f32.mrb[255].mxu1  ;;  %32692 = vmatprep.subr.bf16.mxu1 %v35256_v20  ;;  %v35261_v29 = vld [vmem:[%s35829_s11 + $0x46b8] sm:$0xff]   ;;  %v35288_v9 = vld [vmem:[%s35829_s11 + $0x4730] sm:$0xff]  }
 0x982   : > { %v35290_v14 = vld [vmem:[%s35829_s11 + $0x47b0] sm:$0xff]   ;;  %v35294_v20 = vld [vmem:[%s35829_s11 + $0x47b8] sm:$0xff]  }
 0x983   : > { %v38513_v22 = vadd.f32 %v32390_v17, %v26193_v16  ;;  %32671 = vmatpush3.bf16.msra.mxu0 %v35255_v18  ;;  %v35292_v16 = vld [vmem:[%s35829_s11 + $0x4738] sm:$0xff]   ;;  %v388_v18 = vld [vmem:[%s35822_s13 + $0x238] sm:$0xff] }
 0x984   : > { %32672 = vmatprep.subr.bf16.mxu0 %v35258_v24  ;;  %32693 = vmatpush3.bf16.msra.mxu1 %v35257_v23  ;;  %v35293_v17 = vld [vmem:[%s35829_s11 + $0x47f8] sm:$0xff]   ;;  %v1679_v19 = vrot.slane %v388_v18, %v35880_v42  ;;  %v1672_v21 = vcombine.high %v388_v18, %v388_v18 }
 0x985   : > { %32694 = vmatprep.subr.bf16.mxu1 %v35260_v26 }
 0x986   : > { %v1687_v23 = vcombine.high %v1679_v19, %v1679_v19  ;;  %v1686_v24 = vrot.slane %v1672_v21, %v35880_v42  ;;  %v2292_v26 = vpack.c.bf16 %v1679_v19, %v1679_v19  ;;  %v35330_v19 = vld [vmem:[%s35829_s11 + $0x4900] sm:$0xff]   ;;  %v35331_v21 = vld [vmem:[%s35829_s11 + $0x4948] sm:$0xff]  }
 0x987   : > { %32673 = vmatpush3.bf16.msra.mxu0 %v35259_v25  ;;  %v35297_v25 = vld [vmem:[%s35829_s11 + $0x4800] sm:$0xff]  }
 0x988   : > { %32702 = vmatprep.subr.bf16.mxu0 %v35262_v31  ;;  %32695 = vmatpush3.bf16.msra.mxu1 %v35261_v29  ;;  %v2293_v28 = vpack.c.bf16 %v1687_v23, %v1687_v23  ;;  %v1688_v29 = vcombine.high %v1686_v24, %v1686_v24  ;;  %v2294_v31 = vpack.c.bf16 %v1686_v24, %v1686_v24  ;;  %v35333_v23 = vld [vmem:[%s35829_s11 + $0x4950] sm:$0xff]  }
 0x989   : > { %32724 = vmatprep.subr.bf16.mxu1 %v35265_v36  ;;  %v35303_v36 = vld [vmem:[%s35829_s11 + $0x4888] sm:$0xff]   ;;  %v35334_v24 = vld [vmem:[%s35829_s11 + $0x4910] sm:$0xff]  }
 0x98a   : > { %26751 = vmatmul.mubr.bf16.vlgmr.msra.gmra.mrb[24].mxu0 %v2288_v35  ;;  %v2295_v33 = vpack.c.bf16 %v1688_v29, %v1688_v29  ;;  %v35302_v35 = vld [vmem:[%s35829_s11 + $0x48c8] sm:$0xff]  }
 0x98b   : > { %32703 = vmatpush3.bf16.msra.mxu0 %v35264_v34  ;;  %26791 = vmatmul.mubr.bf16.vlgmr.msra.gmra.mrb[24].mxu1 %v2290_v40  ;;  %v35301_v34 = vld [vmem:[%s35829_s11 + $0x4808] sm:$0xff]   ;;  %v35307_v40 = vld [vmem:[%s35829_s11 + $0x4890] sm:$0xff]  }
 0x98c   : > { %32704 = vmatprep.subr.bf16.mxu0 %v35267_v41  ;;  %32725 = vmatpush3.bf16.msra.mxu1 %v35266_v39  ;;  %v35306_v39 = vld [vmem:[%s35829_s11 + $0x48d0] sm:$0xff]   ;;  %v35308_v41 = vld [vmem:[%s35829_s11 + $0x4858] sm:$0xff]  }
 0x98d   : > { %32726 = vmatprep.subr.bf16.mxu1 %v35269_v45  ;;  %26830 = vmatprep.mubr.bf16.mxu0 %v2293_v28  ;;  %v35311_v45 = vld [vmem:[%s35829_s11 + $0x4898] sm:$0xff]  }
 0x98e   : > { %26870 = vmatprep.mubr.bf16.mxu1 %v2295_v33  ;;  %v27216_v28 = vld.sshfl [vmem:[%s35822_s13 + $0x248] sm:$0x33 pattern:$0x76325410] }
 0x98f   : > { %32705 = vmatpush3.bf16.msra.mxu0 %v35268_v44  ;;  %v35310_v44 = vld [vmem:[%s35829_s11 + $0x48d8] sm:$0xff]   ;;  %v1713_v29 = vcombine.high %v27216_v28, %v27216_v28 }
 0x990   : > { %32706 = vmatprep.subr.bf16.mxu0 %v35271_v47  ;;  %32727 = vmatpush3.bf16.msra.mxu1 %v35270_v46  ;;  %v35312_v46 = vld [vmem:[%s35829_s11 + $0x4860] sm:$0xff]  }
 0x991   : > { %32728 = vmatprep.subr.bf16.mxu1 %v35273_v49  ;;  %v35313_v47 = vld [vmem:[%s35829_s11 + $0x4820] sm:$0xff]  }
 0x992   : > { %v35315_v49 = vld [vmem:[%s35829_s11 + $0x48a0] sm:$0xff]  }
 0x993   : > { %32707 = vmatpush3.bf16.msra.mxu0 %v35272_v48  ;;  %v35314_v48 = vld [vmem:[%s35829_s11 + $0x48e0] sm:$0xff]  }
 0x994   : > { %32708 = vmatprep.subr.bf16.mxu0 %v35275_v51  ;;  %32729 = vmatpush3.bf16.msra.mxu1 %v35274_v50  ;;  %v35316_v50 = vld [vmem:[%s35829_s11 + $0x4868] sm:$0xff]  }
 0x995   : > { %32730 = vmatprep.subr.bf16.mxu1 %v35277_v53 }
 0x997   : > { %32709 = vmatpush3.bf16.msra.mxu0 %v35276_v52  ;;  %v35317_v52 = vld [vmem:[%s35829_s11 + $0x4828] sm:$0xff]  }
 0x998   : > { %32710 = vmatprep.subr.bf16.mxu0 %v35279_v55  ;;  %32731 = vmatpush3.bf16.msra.mxu1 %v35278_v54  ;;  %v35318_v54 = vld [vmem:[%s35829_s11 + $0x48e8] sm:$0xff]  }
 0x999   : > { %32732 = vmatprep.subr.bf16.mxu1 %v35281_v57 }
 0x99b   : > { %32711 = vmatpush3.bf16.msra.mxu0 %v35280_v56 }
 0x99c   : > { %32712 = vmatprep.subr.bf16.mxu0 %v35283_v59  ;;  %32733 = vmatpush3.bf16.msra.mxu1 %v35282_v58 }
 0x99d   : > { %v32410_v60 = vpop.f32.mrb[0].mxu0  ;;  %32734 = vmatprep.subr.bf16.mxu1 %v35285_v63 }
 0x99e   : > { %v32411_v62 = vpop.f32.mrb[1].mxu0  ;;  %v32432_v2 = vpop.f32.mrb[0].mxu1 }
 0x99f   : > { %v32412_v0 = vadd.f32 %v32411_v62, %v32410_v60  ;;  %v32413_v1 = vpop.f32.mrb[2].mxu0  ;;  %v32433_v6 = vpop.f32.mrb[1].mxu1  ;;  %32713 = vmatpush3.bf16.msra.mxu0 %v35284_v61  ;;  %v35319_v60 = vld [vmem:[%s35829_s11 + $0x48a8] sm:$0xff]   ;;  %v35320_v61 = vld [vmem:[%s35829_s11 + $0x4870] sm:$0xff]  }
 0x9a0   : > { %v32414_v5 = vpop.f32.mrb[3].mxu0  ;;  %v32434_v8 = vadd.f32 %v32433_v6, %v32432_v2  ;;  %v32435_v10 = vpop.f32.mrb[2].mxu1  ;;  %32714 = vmatprep.subr.bf16.mxu0 %v35287_v4  ;;  %32735 = vmatpush3.bf16.msra.mxu1 %v35286_v3  ;;  %v35322_v3 = vld [vmem:[%s35829_s11 + $0x48f0] sm:$0xff]   ;;  %v35324_v6 = vld [vmem:[%s35829_s11 + $0x4878] sm:$0xff]  }
 0x9a1   : > { %v26273_v7 = vadd.f32 %v32412_v0, %v38513_v22  ;;  %v32436_v12 = vpop.f32.mrb[3].mxu1  ;;  %32736 = vmatprep.subr.bf16.mxu1 %v35289_v11  ;;  %v35295_v22 = vld [vmem:[%s35829_s11 + $0x4840] sm:$0xff]   ;;  %v35321_v0 = vld [vmem:[%s35829_s11 + $0x4830] sm:$0xff]   ;;  %v35327_v11 = vld [vmem:[%s35829_s11 + $0x48b8] sm:$0xff]  }
 0x9a2   : > { %v35323_v5 = vld [vmem:[%s35829_s11 + $0x48b0] sm:$0xff]  }
 0x9a3   : > { %v38551_v13 = vadd.f32 %v32434_v8, %v26273_v7  ;;  %32715 = vmatpush3.bf16.msra.mxu0 %v35288_v9  ;;  %v35325_v7 = vld [vmem:[%s35829_s11 + $0x4838] sm:$0xff]  }
 0x9a4   : > { %32716 = vmatprep.subr.bf16.mxu0 %v35291_v15  ;;  %32737 = vmatpush3.bf16.msra.mxu1 %v35290_v14  ;;  %v35326_v8 = vld [vmem:[%s35829_s11 + $0x48f8] sm:$0xff]  }
 0x9a5   : > { %32738 = vmatprep.subr.bf16.mxu1 %v35293_v17  ;;  %v389_v9 = vld [vmem:[%s35822_s13 + $0x240] sm:$0xff] }
 0x9a6   : > { %v1696_v10 = vrot.slane %v389_v9, %v35880_v42  ;;  %v1689_v12 = vcombine.high %v389_v9, %v389_v9 }
 0x9a7   : > { %32717 = vmatpush3.bf16.msra.mxu0 %v35292_v16 }
 0x9a8   : > { %32746 = vmatprep.subr.bf16.mxu0 %v35295_v22  ;;  %32739 = vmatpush3.bf16.msra.mxu1 %v35294_v20  ;;  %v1704_v14 = vcombine.high %v1696_v10, %v1696_v10  ;;  %v1703_v15 = vrot.slane %v1689_v12, %v35880_v42  ;;  %v2296_v16 = vpack.c.bf16 %v1696_v10, %v1696_v10  ;;  %v35332_v42 = vld [vmem:[%s35829_s11 + $0x4908] sm:$0xff]  }
 0x9a9   : > { %32768 = vmatprep.subr.bf16.mxu1 %v35298_v27  ;;  %v35337_v27 = vld [vmem:[%s35829_s11 + $0x4960] sm:$0xff]  }
 0x9aa   : > { %26831 = vmatmul.mubr.bf16.vlgmr.msra.gmra.mrb[28].mxu0 %v2292_v26  ;;  %v2297_v17 = vpack.c.bf16 %v1704_v14, %v1704_v14  ;;  %v1705_v18 = vcombine.high %v1703_v15, %v1703_v15  ;;  %v2298_v20 = vpack.c.bf16 %v1703_v15, %v1703_v15  ;;  %v35336_v26 = vld [vmem:[%s35829_s11 + $0x4918] sm:$0xff]  }
 0x9ab   : > { %32747 = vmatpush3.bf16.msra.mxu0 %v35297_v25  ;;  %26871 = vmatmul.mubr.bf16.vlgmr.msra.gmra.mrb[28].mxu1 %v2294_v31  ;;  %v35335_v25 = vld [vmem:[%s35829_s11 + $0x4958] sm:$0xff]   ;;  %v2301_v31 = vpack.c.bf16 %v1713_v29, %v1713_v29 }
 0x9ac   : > { %32748 = vmatprep.subr.bf16.mxu0 %v35300_v32  ;;  %32769 = vmatpush3.bf16.msra.mxu1 %v35299_v30  ;;  %v2299_v22 = vpack.c.bf16 %v1705_v18, %v1705_v18  ;;  %v35338_v30 = vld [vmem:[%s35829_s11 + $0x4920] sm:$0xff]   ;;  %v35339_v32 = vld [vmem:[%s35829_s11 + $0x4968] sm:$0xff]  }
 0x9ad   : > { %32770 = vmatprep.subr.bf16.mxu1 %v35302_v35  ;;  %26910 = vmatprep.mubr.bf16.mxu0 %v2297_v17 }
 0x9ae   : > { %26950 = vmatprep.mubr.bf16.mxu1 %v2299_v22 }
 0x9af   : > { %32749 = vmatpush3.bf16.msra.mxu0 %v35301_v34 }
 0x9b0   : > { %32750 = vmatprep.subr.bf16.mxu0 %v35304_v37  ;;  %32771 = vmatpush3.bf16.msra.mxu1 %v35303_v36 }
 0x9b1   : > { %32772 = vmatprep.subr.bf16.mxu1 %v35306_v39 }
 0x9b3   : > { %32751 = vmatpush3.bf16.msra.mxu0 %v35305_v38  ;;  %v35340_v38 = vld [vmem:[%s35829_s11 + $0x4928] sm:$0xff]  }
 0x9b4   : > { %32752 = vmatprep.subr.bf16.mxu0 %v35308_v41  ;;  %32773 = vmatpush3.bf16.msra.mxu1 %v35307_v40  ;;  %v35341_v41 = vld [vmem:[%s35829_s11 + $0x4970] sm:$0xff]  }
 0x9b5   : > { %32774 = vmatprep.subr.bf16.mxu1 %v35310_v44 }
 0x9b7   : > { %32753 = vmatpush3.bf16.msra.mxu0 %v35309_v43 }
 0x9b8   : > { %32754 = vmatprep.subr.bf16.mxu0 %v35312_v46  ;;  %32775 = vmatpush3.bf16.msra.mxu1 %v35311_v45 }
 0x9b9   : > { %32776 = vmatprep.subr.bf16.mxu1 %v35314_v48  ;;  %v35342_v48 = vld [vmem:[%s35829_s11 + $0x4930] sm:$0xff]  }
 0x9bb   : > { %32755 = vmatpush3.bf16.msra.mxu0 %v35313_v47 }
 0x9bc   : > { %32756 = vmatprep.subr.bf16.mxu0 %v35316_v50  ;;  %32777 = vmatpush3.bf16.msra.mxu1 %v35315_v49  ;;  %v35343_v49 = vld [vmem:[%s35829_s11 + $0x4978] sm:$0xff]  }
 0x9bd   : > { %v32454_v51 = vpop.f32.mrb[4].mxu0  ;;  %32778 = vmatprep.subr.bf16.mxu1 %v35318_v54  ;;  %v35344_v50 = vld [vmem:[%s35829_s11 + $0x4938] sm:$0xff]  }
 0x9be   : > { %v32455_v53 = vpop.f32.mrb[5].mxu0  ;;  %v32476_v57 = vpop.f32.mrb[4].mxu1 }
 0x9bf   : > { %v32456_v55 = vadd.f32 %v32455_v53, %v32454_v51  ;;  %v32457_v56 = vpop.f32.mrb[6].mxu0  ;;  %v32477_v59 = vpop.f32.mrb[5].mxu1  ;;  %32757 = vmatpush3.bf16.msra.mxu0 %v35317_v52  ;;  %v2300_v51 = vpack.c.bf16 %v27216_v28, %v27216_v28 }
 0x9c0   : > { %v32458_v58 = vpop.f32.mrb[7].mxu0  ;;  %v32478_v63 = vadd.f32 %v32477_v59, %v32476_v57  ;;  %v32479_v1 = vpop.f32.mrb[6].mxu1  ;;  %32758 = vmatprep.subr.bf16.mxu0 %v35320_v61  ;;  %32779 = vmatpush3.bf16.msra.mxu1 %v35319_v60 }
 0x9c1   : > { %v26353_v62 = vadd.f32 %v32456_v55, %v38551_v13  ;;  %v32480_v4 = vpop.f32.mrb[7].mxu1  ;;  %32780 = vmatprep.subr.bf16.mxu1 %v35322_v3  ;;  %v35328_v13 = vld [vmem:[%s35829_s11 + $0x4940] sm:$0xff]  }
 0x9c3   : > { %v38588_v2 = vadd.f32 %v32478_v63, %v26353_v62  ;;  %32759 = vmatpush3.bf16.msra.mxu0 %v35321_v0 }
 0x9c4   : > { %32760 = vmatprep.subr.bf16.mxu0 %v35324_v6  ;;  %32781 = vmatpush3.bf16.msra.mxu1 %v35323_v5 }
 0x9c5   : > { %32782 = vmatprep.subr.bf16.mxu1 %v35326_v8 }
 0x9c7   : > { %32761 = vmatpush3.bf16.msra.mxu0 %v35325_v7 }
 0x9c8   : > { %32790 = vmatprep.subr.bf16.mxu0 %v35328_v13  ;;  %32783 = vmatpush3.bf16.msra.mxu1 %v35327_v11 }
 0x9ca   : > { %26911 = vmatmul.mubr.bf16.vlgmr.msra.gmra.mrb[32].mxu0 %v2296_v16 }
 0x9cb   : > { %32791 = vmatpush3.bf16.msra.mxu0 %v35330_v19  ;;  %26951 = vmatmul.mubr.bf16.vlgmr.msra.gmra.mrb[32].mxu1 %v2298_v20 }
 0x9cc   : > { %32792 = vmatprep.subr.bf16.mxu0 %v35331_v21  ;;  %26990 = vmatprep.mubr.bf16.mxu0 %v2301_v31 }
 0x9cf   : > { %32793 = vmatpush3.bf16.msra.mxu0 %v35332_v42 }
 0x9d0   : > { %32794 = vmatprep.subr.bf16.mxu0 %v35333_v23 }
 0x9d3   : > { %32795 = vmatpush3.bf16.msra.mxu0 %v35334_v24 }
 0x9d4   : > { %32796 = vmatprep.subr.bf16.mxu0 %v35335_v25 }
 0x9d7   : > { %32797 = vmatpush3.bf16.msra.mxu0 %v35336_v26 }
 0x9d8   : > { %32798 = vmatprep.subr.bf16.mxu0 %v35337_v27 }
 0x9db   : > { %32799 = vmatpush3.bf16.msra.mxu0 %v35338_v30 }
 0x9dc   : > { %32800 = vmatprep.subr.bf16.mxu0 %v35339_v32 }
 0x9dd   : > { %v32498_v33 = vpop.f32.mrb[8].mxu0 }
 0x9de   : > { %v32499_v34 = vpop.f32.mrb[9].mxu0  ;;  %v32520_v37 = vpop.f32.mrb[8].mxu1 }
 0x9df   : > { %v32500_v35 = vadd.f32 %v32499_v34, %v32498_v33  ;;  %v32501_v36 = vpop.f32.mrb[10].mxu0  ;;  %v32521_v40 = vpop.f32.mrb[9].mxu1  ;;  %32801 = vmatpush3.bf16.msra.mxu0 %v35340_v38 }
 0x9e0   : > { %v32502_v39 = vpop.f32.mrb[11].mxu0  ;;  %v32522_v44 = vadd.f32 %v32521_v40, %v32520_v37  ;;  %v32523_v45 = vpop.f32.mrb[10].mxu1  ;;  %32802 = vmatprep.subr.bf16.mxu0 %v35341_v41 }
 0x9e1   : > { %v26433_v43 = vadd.f32 %v32500_v35, %v38588_v2  ;;  %v32524_v46 = vpop.f32.mrb[11].mxu1 }
 0x9e3   : > { %v26473_v47 = vadd.f32 %v32522_v44, %v26433_v43  ;;  %32803 = vmatpush3.bf16.msra.mxu0 %v35342_v48 }
 0x9e4   : > { %32804 = vmatprep.subr.bf16.mxu0 %v35343_v49 }
 0x9e7   : > { %32805 = vmatpush3.bf16.msra.mxu0 %v35344_v50 }
 0x9ea   : > { %26991 = vmatmul.mubr.bf16.vlgmr.msra.gmra.mrb[36].mxu0 %v2300_v51 }
 0x9fd   : > { %v32542_v52 = vpop.f32.mrb[12].mxu0 }
 0x9fe   : > { %v32543_v53 = vpop.f32.mrb[13].mxu0  ;;  %v32564_v56 = vpop.f32.mrb[12].mxu1 }
 0x9ff   : > { %v32544_v54 = vadd.f32 %v32543_v53, %v32542_v52  ;;  %v32545_v55 = vpop.f32.mrb[14].mxu0  ;;  %v32565_v58 = vpop.f32.mrb[13].mxu1 }
 0xa00   : > { %v32546_v57 = vpop.f32.mrb[15].mxu0  ;;  %v32566_v60 = vadd.f32 %v32565_v58, %v32564_v56  ;;  %v32567_v61 = vpop.f32.mrb[14].mxu1 }
 0xa01   : > { %v26513_v59 = vadd.f32 %v32544_v54, %v26473_v47  ;;  %v32568_v62 = vpop.f32.mrb[15].mxu1 }
 0xa03   : > { %v26553_v63 = vadd.f32 %v32566_v60, %v26513_v59 }
 0xa1d   : > { %v32586_v0 = vpop.f32.mrb[16].mxu0 }
 0xa1e   : > { %v32587_v1 = vpop.f32.mrb[17].mxu0  ;;  %v32608_v4 = vpop.f32.mrb[16].mxu1 }
 0xa1f   : > { %v32588_v2 = vadd.f32 %v32587_v1, %v32586_v0  ;;  %v32589_v3 = vpop.f32.mrb[18].mxu0  ;;  %v32609_v6 = vpop.f32.mrb[17].mxu1  ;;  %v316_v0 = vld [vmem:[#allocation2] sm:$0x3] }
 0xa20   : > { %v32590_v5 = vpop.f32.mrb[19].mxu0  ;;  %v32610_v8 = vadd.f32 %v32609_v6, %v32608_v4  ;;  %v32611_v9 = vpop.f32.mrb[18].mxu1  ;;  %v27014_v4 = vld [vmem:[#allocation9] sm:$0xff] (!%p29569_p12)  ;;  %v35578_v6 = vmov (!%p29569_p12), 0.0|0.0  }
 0xa21   : > { %v26593_v7 = vadd.f32 %v32588_v2, %v26553_v63  ;;  %v32612_v10 = vpop.f32.mrb[19].mxu1  ;;  %v27015_v5 = vld [vmem:[#allocation9 + $0x8] sm:$0x3] (!%p29569_p12)  ;;  %32822 = vmatprep.subr.bf16.mxu0 (!%p29569_p12), %v35578_v6 }
 0xa22   : > { %v29570_v10 = vld [vmem:[#allocation8] ss:$0 sm:$0xff] (!%p29569_p12) }
 0xa23   : > { %v26633_v11 = vadd.f32 %v32610_v8, %v26593_v7  ;;  %v32823_v7 = vpack.c.bf16 (!%p29569_p12), %v27015_v5, %v27014_v4  ;;  %v35580_v8 = vmov (!%p29569_p12), 0.0  }
 0xa24   : > { %32819 = vmatprep.mubr.msk.f32.mxu0 (!%p29569_p12), %vm35579_vm0, %v35580_v8 }
 0xa25   : > { %32824 = vmatpush3.bf16.xpose.msra.mxu0 (!%p29569_p12), %v32823_v7 }
 0xa3d   : > { %v32630_v12 = vpop.f32.mrb[20].mxu0 }
 0xa3e   : > { %v32631_v13 = vpop.f32.mrb[21].mxu0  ;;  %v32652_v16 = vpop.f32.mrb[20].mxu1 }
 0xa3f   : > { %v32632_v14 = vadd.f32 %v32631_v13, %v32630_v12  ;;  %v32633_v15 = vpop.f32.mrb[22].mxu0  ;;  %v32653_v18 = vpop.f32.mrb[21].mxu1  ;;  %v29571_v13 = vld [vmem:[#allocation11] ss:$0 sm:$0xff] (!%p29569_p12) }
 0xa40   : > { %v32634_v17 = vpop.f32.mrb[23].mxu0  ;;  %v32654_v20 = vadd.f32 %v32653_v18, %v32652_v16  ;;  %v32655_v21 = vpop.f32.mrb[22].mxu1 }
 0xa41   : > { %v26673_v19 = vadd.f32 %v32632_v14, %v26633_v11  ;;  %v32656_v22 = vpop.f32.mrb[23].mxu1 }
 0xa43   : > { %v26713_v42 = vadd.f32 %v32654_v20, %v26673_v19 }
 0xa5d   : > { %v32674_v23 = vpop.f32.mrb[24].mxu0 }
 0xa5e   : > { %v32675_v24 = vpop.f32.mrb[25].mxu0  ;;  %v32696_v27 = vpop.f32.mrb[24].mxu1 }
 0xa5f   : > { %v32676_v25 = vadd.f32 %v32675_v24, %v32674_v23  ;;  %v32677_v26 = vpop.f32.mrb[26].mxu0  ;;  %v32697_v29 = vpop.f32.mrb[25].mxu1 }
 0xa60   : > { %v32678_v28 = vpop.f32.mrb[27].mxu0  ;;  %v32698_v31 = vadd.f32 %v32697_v29, %v32696_v27  ;;  %v32699_v32 = vpop.f32.mrb[26].mxu1 }
 0xa61   : > { %v26753_v30 = vadd.f32 %v32676_v25, %v26713_v42  ;;  %v32700_v33 = vpop.f32.mrb[27].mxu1 }
 0xa63   : > { %v26793_v34 = vadd.f32 %v32698_v31, %v26753_v30 }
 0xa7d   : > { %v32718_v35 = vpop.f32.mrb[28].mxu0 }
 0xa7e   : > { %v32719_v36 = vpop.f32.mrb[29].mxu0  ;;  %v32740_v39 = vpop.f32.mrb[28].mxu1 }
 0xa7f   : > { %v32720_v37 = vadd.f32 %v32719_v36, %v32718_v35  ;;  %v32721_v38 = vpop.f32.mrb[30].mxu0  ;;  %v32741_v41 = vpop.f32.mrb[29].mxu1 }
 0xa80   : > { %v32722_v40 = vpop.f32.mrb[31].mxu0  ;;  %v32742_v44 = vadd.f32 %v32741_v41, %v32740_v39  ;;  %v32743_v45 = vpop.f32.mrb[30].mxu1 }
 0xa81   : > { %v26833_v43 = vadd.f32 %v32720_v37, %v26793_v34  ;;  %v32744_v46 = vpop.f32.mrb[31].mxu1 }
 0xa83   : > { %v26873_v47 = vadd.f32 %v32742_v44, %v26833_v43 }
 0xa9d   : > { %v32762_v48 = vpop.f32.mrb[32].mxu0 }
 0xa9e   : > { %v32763_v49 = vpop.f32.mrb[33].mxu0  ;;  %v32784_v52 = vpop.f32.mrb[32].mxu1 }
 0xa9f   : > { %v32764_v50 = vadd.f32 %v32763_v49, %v32762_v48  ;;  %v32765_v51 = vpop.f32.mrb[34].mxu0  ;;  %v32785_v54 = vpop.f32.mrb[33].mxu1 }
 0xaa0   : > { %v32766_v53 = vpop.f32.mrb[35].mxu0  ;;  %v32786_v56 = vadd.f32 %v32785_v54, %v32784_v52  ;;  %v32787_v57 = vpop.f32.mrb[34].mxu1 }
 0xaa1   : > { %v26913_v55 = vadd.f32 %v32764_v50, %v26873_v47  ;;  %v32788_v58 = vpop.f32.mrb[35].mxu1 }
 0xaa3   : > { %v26953_v59 = vadd.f32 %v32786_v56, %v26913_v55 }
 0xabd   : > { %v32806_v60 = vpop.f32.mrb[36].mxu0 }
 0xabe   : > { %v32807_v61 = vpop.f32.mrb[37].mxu0 }
 0xabf   : > { %v32808_v62 = vadd.f32 %v32807_v61, %v32806_v60  ;;  %v32809_v63 = vpop.f32.mrb[38].mxu0  ;;  %27003 = sbr.rel (%p29569_p12) target bundleno = 2984 (0xba8), region = 68 }
 0xac0   : > { %v32810_v1 = vpop.f32.mrb[39].mxu0 }
 0xac1   : > { %v26993_v2 = vadd.f32 %v32808_v62, %v26953_v59 }
 0xac3   : > { %v26998_v3 = vadd.f32 %v26993_v2, %v316_v0 }
 0xac5   : > { %26999 = vst [vmem:[#allocation2] sm:$0x3] %v26998_v3 }
 0xacc   : > { %v27004_v9 = vld [vmem:[#allocation2] sm:$0x3] }
 0xacd   : > { %v27012_v11 = vadd.f32 %v29570_v10, %v27004_v9 }
 0xacf   : > { %v27013_v12 = vmax.f32 %v27012_v11, 0.0 }
 0xad1   : > { %32820 = vmatmul.mubr.f32.vlgmr.msra.gmra.mrb[0].mxu0 %v27013_v12 }
 0xba4   : > { %v27089_v14 = vpop.f32.mrb[0].mxu0 }
 0xba5   : > { %v27090_v15 = vadd.f32 %v29571_v13, %v27089_v14  ;;  %v32821_v16 = vpop.f32.mrb[1].mxu0 }
 0xba7   : > { %27094 = vst.msk [vmem:[#allocation12] sm:$0x3] %vm27093_vm1, %v27090_v15 }
 0xba8 PF: > { %p32873_p0 = scmp.eq.s32.totalorder %s35631_s22, 3  ;;  %s35581_s23 = smov [#allocation12]  }
 0xba9   : > { %s27102_s24 = sshll.u32 %s35581_s23, 4  ;;  %s27103_s24 = int_to_ptr.vmem [resolvable:$true] %s27102_s24 }
 0xbaa   : > { %s35489_s14 = scalar_lea.vmem %s27103_s24, 32  ;;  %p35496_p10 = scmp.lt.s32.totalorder %s27103_s24, %s27103_s24 }
 0xbab   : > { %p35490_p2 = scmp.ne.s32.totalorder %s27103_s24, %s35489_s14  ;;  %p35497_p9 = scmp.lt.s32.totalorder %s35489_s14, %s35489_s14 }
 0xbad   : > { %p35491_p13 = pnand %p35490_p2, %p32873_p0  ;;  %p35498_p6 = por %p35497_p9, %p35496_p10 }
 0xbaf   : > { %p35492_p3 = pneg %p35491_p13 }
 0xbb1   : > { %p35499_p7 = pnand %p35498_p6, %p35492_p3 }
 0xbb3   : > { %35502 = shalt.err (!%p35499_p7)
}
 0xbb4   : > { %s35503_s30 = scalar_lea.hbm %s38659_s5, 32 }
 0xbb5   : > { %p35504_p8 = scmp.ne.s32.totalorder %s38659_s5, %s35503_s30  ;;  %p35509_p4 = scmp.lt.u32.totalorder %s35503_s30, %s38659_s5 }
 0xbb7   : > { %p35505_p11 = pnand %p35504_p8, %p32873_p0 }
 0xbb9   : > { %p35506_p1 = pneg %p35505_p11 }
 0xbbb   : > { %p35511_p5 = pnand %p35509_p4, %p35506_p1 }
 0xbbd   : > { %35514 = shalt.err (!%p35511_p5)
}
 0xbbe   : > { %32846 = dma.vmem_to_hbm [thread:$0]  (%p32873_p0), %s27103_s24, 32, %s38659_s5, [#allocation5]  }
 0xbbf   : > { %35548 = dma.done.wait (%p32873_p0), [#allocation5], 32  }
 0xbc0   : > { %35550 = vsyncadd (%p32873_p0), [#allocation5], 4294967264 }
 0xbc1 PF: > { %p20_p12 = scmp.ge.s32.totalorder %s35727_s12, 6   ;;  %s38675_s18 = smov %s35557_s19 }
 0xbc2   : > { %s38676_s19 = smov %s35561_s20  ;;  %s38677_s20 = smov %s35737_s29 }
 0xbc3   : > { %s38678_s21 = smov %s35727_s12  ;;  %22 = sbr.rel (!%p20_p12) target bundleno = 7 (0x7), region = 110 }
 0xbca   :  { %27115 = vsyncpa [#allocation4], 1 }
 0xbcb   :  { %27117 = vsyncpa [#allocation4 + $0x1], 1 }
 0xbcc   :  { %27118 = vsyncpa [#allocation7], 1 }
 0xbcd   :  { %27120 = vsyncpa [#allocation7 + $0x1], 1 }
 0xbce   :  { %27121 = vsyncpa [#allocation10], 1 }
 0xbcf   :  { %27122 = vsyncpa [#allocation5], 1 }
 0xbd0   :  { %27124 = vsyncpa [#allocation5 + $0x1], 1 }

</bundles_post_ra>
